<compile_context>
chip_gen: v7x
topology: tpu7x:2x2x1
jax: 0.10.0
libtpu: 0.0.40
codegen_flags: <defaults>
</compile_context>

<pallas_src>
import functools

import jax
import jax.numpy as jnp
from jax import lax
from jax.experimental import pallas as pl
from jax.experimental.pallas import tpu as pltpu

_BN_EPS = 1e-5
_VMEM_LIMIT = 32 * 1024 * 1024     # < v7x's 64 MiB physical VMEM


# ------------------------------- utilities ---------------------------------

def _round_up(x, m):
    return ((x + m - 1) // m) * m


def _pick_tn(C, cap=2048):
    """Largest output-column tile: full C if it fits, else the biggest
    128-multiple divisor of C that is <= cap (lane-dense on all chips)."""
    if C <= cap:
        return C
    for d in range(cap - cap % 128, 127, -128):
        if C % d == 0:
            return d
    return C                      # fallback: one full-width tile


# ------------------------------ Pallas kernels ------------------------------

def _mm_stats_kernel(a_ref, b_ref, o_ref, st_ref):
    """Single-K-block bf16 matmul (f32 accumulation).  Epilogue stores the
    output tile and its per-column sum / sumsq (fused BN statistics) with two
    row stores -- no scratch accumulator, no concatenate."""
    acc = jnp.dot(a_ref[...], b_ref[...], preferred_element_type=jnp.float32)
    o_ref[...] = acc.astype(o_ref.dtype)
    st_ref[0:1, :] = jnp.sum(acc, axis=0, keepdims=True)
    st_ref[1:2, :] = jnp.sum(acc * acc, axis=0, keepdims=True)


def _mm_tanh_kernel(a_ref, b_ref, o_ref):
    """Single-K-block bf16 matmul with tanh fused into the store (final layer)."""
    acc = jnp.dot(a_ref[...], b_ref[...], preferred_element_type=jnp.float32)
    o_ref[...] = jnp.tanh(acc).astype(o_ref.dtype)


def _bn_relu_kernel(y_ref, st_ref, g_ref, b_ref, o_ref, *, inv_count):
    """Fold the (sum, sumsq) batch statistics into scale/shift in-kernel and
    apply the affine + ReLU.  All vector math in f32 (v5e-safe)."""
    mean = st_ref[0:1, :] * inv_count
    var = jnp.maximum(st_ref[1:2, :] * inv_count - mean * mean, 0.0)
    scale = g_ref[...] * lax.rsqrt(var + _BN_EPS)
    shift = b_ref[...] - mean * scale
    y = y_ref[...].astype(jnp.float32)
    o_ref[...] = jnp.maximum(y * scale + shift, 0.0).astype(o_ref.dtype)


# ------------------------------ Pallas wrappers -----------------------------

def fused_matmul(a, b, *, epilogue, out_dtype=jnp.bfloat16):
    """Batched (over leading P) matmul on the MXU, K as a single block.

    a: (P, M, K), b: (P, K, C); operands cast to bf16, f32 accumulation.
      epilogue='stats' -> (out (P, Mp, C), stats (2, C) = [col_sum; col_sumsq])
      epilogue='tanh'  -> out (P, Mp, C) with tanh applied in-kernel.
    Rows [M:Mp] of `out` come from zero padding (zero contribution to stats);
    the caller slices them off.
    """
    P, M, K = a.shape
    C = b.shape[2]
    a = a.astype(jnp.bfloat16)
    b = b.astype(jnp.bfloat16)

    # K: pad the reduction dim to a lane-aligned multiple of 128 (exact).
    Kp = _round_up(K, 128)
    if Kp != K:
        a = jnp.pad(a, ((0, 0), (0, 0), (0, Kp - K)))
        b = jnp.pad(b, ((0, 0), (0, Kp - K), (0, 0)))

    # M: pad rows to an exact tile multiple (robust for any batch size).
    tm = min(_round_up(M, 8), 512)
    Mp = _round_up(M, tm)
    if Mp != M:
        a = jnp.pad(a, ((0, 0), (0, Mp - M), (0, 0)))

    tn = _pick_tn(C)
    mt, nt = Mp // tm, C // tn
    grid = (P, mt, nt)

    in_specs = [pl.BlockSpec((None, tm, Kp), lambda p, i, j: (p, i, 0)),
                pl.BlockSpec((None, Kp, tn), lambda p, i, j: (p, 0, j))]
    y_spec = pl.BlockSpec((None, tm, tn), lambda p, i, j: (p, i, j))
    cparams = pltpu.CompilerParams(
        dimension_semantics=("parallel", "parallel", "parallel"),
        vmem_limit_bytes=_VMEM_LIMIT)

    if epilogue == "stats":
        y, st = pl.pallas_call(
            _mm_stats_kernel,
            out_shape=(jax.ShapeDtypeStruct((P, Mp, C), out_dtype),
                       jax.ShapeDtypeStruct((P, mt, 2, C), jnp.float32)),
            grid=grid,
            in_specs=in_specs,
            out_specs=(y_spec,
                       pl.BlockSpec((None, None, 2, tn),
                                    lambda p, i, j: (p, i, 0, j))),
            compiler_params=cparams,
        )(a, b)
        return y, st.sum(axis=(0, 1))        # tiny (P*mt, 2, C) -> (2, C) reduce

    assert epilogue == "tanh"
    return pl.pallas_call(
        _mm_tanh_kernel,
        out_shape=jax.ShapeDtypeStruct((P, Mp, C), out_dtype),
        grid=grid,
        in_specs=in_specs,
        out_specs=y_spec,
        compiler_params=cparams,
    )(a, b)


def bn_relu(y, st, gamma, beta, *, count):
    """y: (R, C) pre-activation; st: (2, C) = [sum; sumsq]; batch-norm (train
    mode, biased variance) + ReLU, row-tiled, fold done in-kernel."""
    R, C = y.shape
    tm = min(_round_up(R, 8), 1024)
    Rp = _round_up(R, tm)
    if Rp != R:
        y = jnp.pad(y, ((0, Rp - R), (0, 0)))
    kernel = functools.partial(_bn_relu_kernel, inv_count=1.0 / float(count))
    out = pl.pallas_call(
        kernel,
        out_shape=jax.ShapeDtypeStruct((Rp, C), jnp.bfloat16),
        grid=(Rp // tm,),
        in_specs=[pl.BlockSpec((tm, C), lambda i: (i, 0)),
                  pl.BlockSpec((2, C), lambda i: (0, 0)),
                  pl.BlockSpec((1, C), lambda i: (0, 0)),
                  pl.BlockSpec((1, C), lambda i: (0, 0))],
        out_specs=pl.BlockSpec((tm, C), lambda i: (i, 0)),
        compiler_params=pltpu.CompilerParams(
            dimension_semantics=("parallel",),
            vmem_limit_bytes=_VMEM_LIMIT),
    )(y, st.astype(jnp.float32),
      gamma.reshape(1, C).astype(jnp.float32),
      beta.reshape(1, C).astype(jnp.float32))
    return out[:R]


# --------------------- ConvTranspose2d (k=4, s=2, p=1) glue ------------------

def _subpixel_patches(x, w_pt):
    """Sub-pixel decomposition of ConvTranspose2d(kernel=4, stride=2, pad=1).

    x: (N, H, W, Cin) channels-last (bf16).  w_pt: PyTorch weight (Cin,Cout,4,4).
    Output parity (py,px) equals A[2*py+px] @ B[2*py+px] with
    A: (4, N*H*W, 4*Cin) shifted-window patches and B: (4, 4*Cin, Cout)
    2x2 sub-kernels -- no zero-inserted rows are ever built.
    """
    N, H, W, Cin = x.shape
    Cout = w_pt.shape[1]
    xpad = jnp.pad(x, ((0, 0), (1, 1), (1, 1), (0, 0)))
    # spatially flipped kernel, laid out (kh, kw, ci, co)
    w_flip = jnp.transpose(w_pt[:, :, ::-1, ::-1], (2, 3, 0, 1))
    pats, wgts = [], []
    for py in (0, 1):
        for px in (0, 1):
            taps = [xpad[:, py + a:py + a + H, px + b:px + b + W, :]
                    for a in (0, 1) for b in (0, 1)]
            pats.append(jnp.concatenate(taps, axis=-1).reshape(N * H * W, 4 * Cin))
            wgts.append(w_flip[py::2, px::2].reshape(4 * Cin, Cout))
    A = jnp.stack(pats, axis=0).astype(jnp.bfloat16)
    B = jnp.stack(wgts, axis=0).astype(jnp.bfloat16)
    return A, B


def _subpixel_patches_T(x, w_pt):
    """Transposed (channel-major) form of _subpixel_patches for the final layer:
    A_T: (4, 4*Cin, N*H*W), B_T: (4, Cout, 4*Cin) so the long spatial dim is
    the lane dimension of the matmul output."""
    N, H, W, Cin = x.shape
    Cout = w_pt.shape[1]
    xcf = jnp.transpose(x, (3, 0, 1, 2))                      # (Cin, N, H, W)
    xpad = jnp.pad(xcf, ((0, 0), (0, 0), (1, 1), (1, 1)))
    w_flip = jnp.transpose(w_pt[:, :, ::-1, ::-1], (2, 3, 0, 1))
    pats, wgts = [], []
    for py in (0, 1):
        for px in (0, 1):
            taps = [xpad[:, :, py + a:py + a + H, px + b:px + b + W]
                    .reshape(Cin, N * H * W) for a in (0, 1) for b in (0, 1)]
            pats.append(jnp.concatenate(taps, axis=0))        # (4*Cin, M)
            wgts.append(w_flip[py::2, px::2].reshape(4 * Cin, Cout).T)
    A_T = jnp.stack(pats, axis=0).astype(jnp.bfloat16)
    B_T = jnp.stack(wgts, axis=0).astype(jnp.bfloat16)
    return A_T, B_T


def _pixel_unshuffle(y, N, H, W, C):
    """y: (4, N*H*W, C) with parity index p = 2*py+px  ->  (N, 2H, 2W, C)."""
    o = y.reshape(2, 2, N, H, W, C)
    o = jnp.transpose(o, (2, 3, 0, 4, 1, 5))
    return o.reshape(N, 2 * H, 2 * W, C)


# --------------------------------- Generator G -------------------------------

_CONV_SHAPES = [(100, 512, 4, 4), (512, 256, 4, 4), (256, 128, 4, 4),
                (128, 64, 4, 4), (64, 3, 4, 4)]
_BN_CHANNELS = [512, 256, 128, 64]


def init_params(key):
    params = {}
    keys = jax.random.split(key, len(_CONV_SHAPES))
    for i, (shape, k) in enumerate(zip(_CONV_SHAPES, keys)):
        params[f"w{i}"] = (0.02 * jax.random.normal(k, shape)).astype(jnp.float32)
    for i, c in enumerate(_BN_CHANNELS):
        params[f"gamma{i}"] = jnp.ones((c,), jnp.float32)
        params[f"beta{i}"] = jnp.zeros((c,), jnp.float32)
    return params


def generator_forward(z, params):
    """z: (N, 100, 1, 1) NCHW -> (N, 3, 64, 64) NCHW (same semantics as G)."""
    N = z.shape[0]

    # ---- layer 0: ConvTranspose2d(100,512,4,1,0) on a 1x1 input is a plain
    #      matmul (each input pixel stamps the 4x4 kernel); BN stats fused,
    #      single wide output tile (tn=2048, kt=1) -> 4 grid steps total.
    w0 = params["w0"]                                          # (100, 512, 4, 4)
    b0 = jnp.transpose(w0, (0, 2, 3, 1)).reshape(1, 100, 16 * 512)  # (kh,kw,co)
    y0, st0 = fused_matmul(z.reshape(N, 100)[None], b0, epilogue="stats")
    C0 = 512
    st0 = st0.reshape(2, 16, C0).sum(axis=1)                   # fold (kh,kw) groups
    Mp0 = y0.shape[1]
    y0 = bn_relu(y0.reshape(Mp0 * 16, C0), st0,
                 params["gamma0"], params["beta0"], count=N * 16)
    x = y0.reshape(Mp0, 4, 4, C0)[:N]                          # (N,4,4,512) NHWC bf16

    # ---- layers 1..3: ConvTranspose2d(k=4,s=2,p=1) + BN + ReLU.
    #      Layer 3's Cout=64 is zero-padded to 128 so matmul + BN stores stay
    #      lane-dense; the padded (exactly-zero) channels are sliced off.
    for li in range(1, 4):
        Nn, H, W, _ = x.shape
        w = params[f"w{li}"]
        Cout = w.shape[1]
        A, B = _subpixel_patches(x, w)
        gamma, beta = params[f"gamma{li}"], params[f"beta{li}"]
        Cp = Cout
        if Cout % 128 != 0:
            Cp = _round_up(Cout, 128)
            B = jnp.pad(B, ((0, 0), (0, 0), (0, Cp - Cout)))
            gamma = jnp.pad(gamma, (0, Cp - Cout))
            beta = jnp.pad(beta, (0, Cp - Cout))
        M = Nn * H * W
        y, st = fused_matmul(A, B, epilogue="stats")           # (4, Mp, Cp) bf16
        Mp = y.shape[1]
        y = bn_relu(y.reshape(4 * Mp, Cp), st, gamma, beta, count=4 * M)
        y = y.reshape(4, Mp, Cp)[:, :M, :Cout]
        x = _pixel_unshuffle(y, Nn, H, W, Cout)

    # ---- layer 4: ConvTranspose2d(64,3,4,2,1) + Tanh, computed transposed:
    #      (Cout x 4*Cin) @ (4*Cin x M) so stores are lane-dense over the
    #      spatial dim; Cout only padded 3 -> 8 sublanes inside fused_matmul.
    Nn, H, W, _ = x.shape
    A_T, B_T = _subpixel_patches_T(x, params["w4"])            # (4,256,M), (4,3,256)
    y = fused_matmul(B_T, A_T, epilogue="tanh", out_dtype=jnp.float32)
    y = y[:, :3, :].reshape(2, 2, 3, Nn, H, W)                 # (py, px, co, n, h, w)
    out = jnp.transpose(y, (3, 2, 4, 0, 5, 1)).reshape(Nn, 3, 2 * H, 2 * W)
    return out                                                 # NCHW f32


# ------------------------------------ main -----------------------------------

if __name__ == "__main__":
    key = jax.random.PRNGKey(0)
    kp, kz = jax.random.split(key)
    params = init_params(kp)

    z = jax.random.normal(kz, (2, 100, 1, 1), dtype=jnp.float32)

    out = jax.jit(generator_forward)(z, params)
    out = jax.block_until_ready(out)

    assert out.shape == (2, 3, 64, 64), out.shape
    assert out.dtype == jnp.float32, out.dtype
    assert bool(jnp.all(jnp.isfinite(out)))
    assert bool(jnp.all(jnp.abs(out) <= 1.0 + 1e-6))   # tanh range

    print("KERNEL_OK")
</pallas_src>

<mosaic_0001>
module attributes {stable_mosaic.version = 11 : i64} {
  func.func @_mm_stats_kernel(%arg0: i32, %arg1: i32, %arg2: i32, %arg3: memref<1x8x128xbf16, #tpu.memory_space<vmem>>, %arg4: memref<1x128x2048xbf16, #tpu.memory_space<vmem>>, %arg5: memref<1x8x2048xbf16, #tpu.memory_space<vmem>>, %arg6: memref<1x1x2x2048xf32, #tpu.memory_space<vmem>>) attributes {dimension_semantics = [#tpu.dimension_semantics<parallel>, #tpu.dimension_semantics<parallel>, #tpu.dimension_semantics<parallel>], iteration_bounds = array<i64: 1, 1, 4>, scalar_prefetch = 0 : i64, scratch_operands = 0 : i64, tpu.core_type = #tpu.core_type<tc>, window_params = [{transform_indices = @transform_0, window_bounds = array<i64: 1, 8, 128>}, {transform_indices = @transform_1, window_bounds = array<i64: 1, 128, 2048>}, {transform_indices = @transform_2, window_bounds = array<i64: 1, 8, 2048>}, {transform_indices = @transform_3, window_bounds = array<i64: 1, 1, 2, 2048>}]} {
    %c0 = arith.constant 0 : index
    %c0_0 = arith.constant 0 : index
    %c0_1 = arith.constant 0 : index
    %0 = vector.load %arg3[%c0, %c0_0, %c0_1] : memref<1x8x128xbf16, #tpu.memory_space<vmem>>, vector<1x8x128xbf16>
    %1 = vector.shape_cast %0 : vector<1x8x128xbf16> to vector<8x128xbf16>
    %c0_2 = arith.constant 0 : index
    %c0_3 = arith.constant 0 : index
    %c0_4 = arith.constant 0 : index
    %2 = vector.load %arg4[%c0_2, %c0_3, %c0_4] : memref<1x128x2048xbf16, #tpu.memory_space<vmem>>, vector<1x128x2048xbf16>
    %3 = vector.shape_cast %2 : vector<1x128x2048xbf16> to vector<128x2048xbf16>
    %cst = arith.constant dense<0.000000e+00> : vector<8x2048xf32>
    %4 = tpu.matmul %1, %3, %cst {dimension_numbers = #tpu.dot_dimension_numbers<[1], [0], [0], [1], [0, 0, 1, 1], [], []>} : vector<8x128xbf16>, vector<128x2048xbf16>, vector<8x2048xf32> -> vector<8x2048xf32>
    %5 = arith.truncf %4 : vector<8x2048xf32> to vector<8x2048xbf16>
    %c0_5 = arith.constant 0 : index
    %c0_6 = arith.constant 0 : index
    %c0_7 = arith.constant 0 : index
    %6 = vector.load %arg5[%c0_5, %c0_6, %c0_7] : memref<1x8x2048xbf16, #tpu.memory_space<vmem>>, vector<1x8x2048xbf16>
    %7 = vector.shape_cast %6 : vector<1x8x2048xbf16> to vector<8x2048xbf16>
    %8 = vector.shape_cast %5 : vector<8x2048xbf16> to vector<1x8x2048xbf16>
    tpu.vector_store %arg5[%c0_5, %c0_6, %c0_7], %8 {strides = array<i32>} : memref<1x8x2048xbf16, #tpu.memory_space<vmem>>, vector<1x8x2048xbf16>,
    %cst_8 = arith.constant dense<0.000000e+00> : vector<2048xf32>
    %9 = vector.multi_reduction <add>, %4, %cst_8 [0] : vector<8x2048xf32> to vector<2048xf32>
    %10 = vector.shape_cast %9 : vector<2048xf32> to vector<1x2048xf32>
    %c0_9 = arith.constant 0 : index
    %c0_10 = arith.constant 0 : index
    %c0_11 = arith.constant 0 : index
    %c0_12 = arith.constant 0 : index
    %11 = vector.load %arg6[%c0_9, %c0_10, %c0_11, %c0_12] : memref<1x1x2x2048xf32, #tpu.memory_space<vmem>>, vector<1x1x1x2048xf32>
    %12 = vector.shape_cast %11 : vector<1x1x1x2048xf32> to vector<1x2048xf32>
    %13 = vector.shape_cast %10 : vector<1x2048xf32> to vector<1x1x1x2048xf32>
    tpu.vector_store %arg6[%c0_9, %c0_10, %c0_11, %c0_12], %13 {strides = array<i32>} : memref<1x1x2x2048xf32, #tpu.memory_space<vmem>>, vector<1x1x1x2048xf32>,
    %14 = arith.mulf %4, %4 : vector<8x2048xf32>
    %cst_13 = arith.constant dense<0.000000e+00> : vector<2048xf32>
    %15 = vector.multi_reduction <add>, %14, %cst_13 [0] : vector<8x2048xf32> to vector<2048xf32>
    %16 = vector.shape_cast %15 : vector<2048xf32> to vector<1x2048xf32>
    %c0_14 = arith.constant 0 : index
    %c0_15 = arith.constant 0 : index
    %c1 = arith.constant 1 : index
    %c0_16 = arith.constant 0 : index
    %17 = vector.load %arg6[%c0_14, %c0_15, %c1, %c0_16] : memref<1x1x2x2048xf32, #tpu.memory_space<vmem>>, vector<1x1x1x2048xf32>
    %18 = vector.shape_cast %17 : vector<1x1x1x2048xf32> to vector<1x2048xf32>
    %19 = vector.shape_cast %16 : vector<1x2048xf32> to vector<1x1x1x2048xf32>
    tpu.vector_store %arg6[%c0_14, %c0_15, %c1, %c0_16], %19 {strides = array<i32>} : memref<1x1x2x2048xf32, #tpu.memory_space<vmem>>, vector<1x1x1x2048xf32>,
    return
  }
  func.func @transform_0(%arg0: i32, %arg1: i32, %arg2: i32) -> (i32, i32, i32) {
    %c0_i32 = arith.constant 0 : i32
    %c0_i32_0 = arith.constant 0 : i32
    return %arg0, %arg1, %c0_i32 : i32, i32, i32
  }
  func.func @transform_1(%arg0: i32, %arg1: i32, %arg2: i32) -> (i32, i32, i32) {
    %c0_i32 = arith.constant 0 : i32
    %c0_i32_0 = arith.constant 0 : i32
    return %arg0, %c0_i32, %arg2 : i32, i32, i32
  }
  func.func @transform_2(%arg0: i32, %arg1: i32, %arg2: i32) -> (i32, i32, i32) {
    %c0_i32 = arith.constant 0 : i32
    return %arg0, %arg1, %arg2 : i32, i32, i32
  }
  func.func @transform_3(%arg0: i32, %arg1: i32, %arg2: i32) -> (i32, i32, i32, i32) {
    %c0_i32 = arith.constant 0 : i32
    %c0_i32_0 = arith.constant 0 : i32
    return %arg0, %arg1, %c0_i32, %arg2 : i32, i32, i32, i32
  }
}

module attributes {stable_mosaic.version = 11 : i64} {
  func.func @_bn_relu_kernel(%arg0: i32, %arg1: memref<128x512xbf16, #tpu.memory_space<vmem>>, %arg2: memref<2x512xf32, #tpu.memory_space<vmem>>, %arg3: memref<1x512xf32, #tpu.memory_space<vmem>>, %arg4: memref<1x512xf32, #tpu.memory_space<vmem>>, %arg5: memref<128x512xbf16, #tpu.memory_space<vmem>>) attributes {dimension_semantics = [#tpu.dimension_semantics<parallel>], iteration_bounds = array<i64: 1>, scalar_prefetch = 0 : i64, scratch_operands = 0 : i64, tpu.core_type = #tpu.core_type<tc>, window_params = [{transform_indices = @transform_0, window_bounds = array<i64: 128, 512>}, {pipeline_mode = #tpu.pipeline_mode<synchronous>, transform_indices = @transform_1, window_bounds = array<i64: 2, 512>}, {pipeline_mode = #tpu.pipeline_mode<synchronous>, transform_indices = @transform_2, window_bounds = array<i64: 1, 512>}, {pipeline_mode = #tpu.pipeline_mode<synchronous>, transform_indices = @transform_3, window_bounds = array<i64: 1, 512>}, {transform_indices = @transform_4, window_bounds = array<i64: 128, 512>}]} {
    %c0 = arith.constant 0 : index
    %c0_0 = arith.constant 0 : index
    %0 = vector.load %arg2[%c0, %c0_0] : memref<2x512xf32, #tpu.memory_space<vmem>>, vector<1x512xf32>
    %cst = arith.constant 3.125000e-02 : f32
    %1 = vector.broadcast %cst : f32 to vector<1x512xf32>
    %2 = arith.mulf %0, %1 : vector<1x512xf32>
    %c1 = arith.constant 1 : index
    %c0_1 = arith.constant 0 : index
    %3 = vector.load %arg2[%c1, %c0_1] : memref<2x512xf32, #tpu.memory_space<vmem>>, vector<1x512xf32>
    %cst_2 = arith.constant 3.125000e-02 : f32
    %4 = vector.broadcast %cst_2 : f32 to vector<1x512xf32>
    %5 = arith.mulf %3, %4 : vector<1x512xf32>
    %6 = arith.mulf %2, %2 : vector<1x512xf32>
    %7 = arith.subf %5, %6 : vector<1x512xf32>
    %cst_3 = arith.constant 0.000000e+00 : f32
    %8 = vector.broadcast %cst_3 : f32 to vector<1x512xf32>
    %9 = arith.maximumf %7, %8 : vector<1x512xf32>
    %c0_4 = arith.constant 0 : index
    %c0_5 = arith.constant 0 : index
    %10 = vector.load %arg3[%c0_4, %c0_5] : memref<1x512xf32, #tpu.memory_space<vmem>>, vector<1x512xf32>
    %cst_6 = arith.constant 9.99999974E-6 : f32
    %11 = vector.broadcast %cst_6 : f32 to vector<1x512xf32>
    %12 = arith.addf %9, %11 : vector<1x512xf32>
    %13 = math.rsqrt %12 : vector<1x512xf32>
    %14 = arith.mulf %10, %13 : vector<1x512xf32>
    %c0_7 = arith.constant 0 : index
    %c0_8 = arith.constant 0 : index
    %15 = vector.load %arg4[%c0_7, %c0_8] : memref<1x512xf32, #tpu.memory_space<vmem>>, vector<1x512xf32>
    %16 = arith.mulf %2, %14 : vector<1x512xf32>
    %17 = arith.subf %15, %16 : vector<1x512xf32>
    %c0_9 = arith.constant 0 : index
    %c0_10 = arith.constant 0 : index
    %18 = vector.load %arg1[%c0_9, %c0_10] : memref<128x512xbf16, #tpu.memory_space<vmem>>, vector<128x512xbf16>
    %19 = arith.extf %18 : vector<128x512xbf16> to vector<128x512xf32>
    %20 = vector.broadcast %14 : vector<1x512xf32> to vector<128x512xf32>
    %21 = arith.mulf %19, %20 : vector<128x512xf32>
    %22 = vector.broadcast %17 : vector<1x512xf32> to vector<128x512xf32>
    %23 = arith.addf %21, %22 : vector<128x512xf32>
    %cst_11 = arith.constant 0.000000e+00 : f32
    %24 = vector.broadcast %cst_11 : f32 to vector<128x512xf32>
    %25 = arith.maximumf %23, %24 : vector<128x512xf32>
    %26 = arith.truncf %25 : vector<128x512xf32> to vector<128x512xbf16>
    %c0_12 = arith.constant 0 : index
    %c0_13 = arith.constant 0 : index
    %27 = vector.load %arg5[%c0_12, %c0_13] : memref<128x512xbf16, #tpu.memory_space<vmem>>, vector<128x512xbf16>
    tpu.vector_store %arg5[%c0_12, %c0_13], %26 {strides = array<i32>} : memref<128x512xbf16, #tpu.memory_space<vmem>>, vector<128x512xbf16>,
    return
  }
  func.func @transform_0(%arg0: i32) -> (i32, i32) {
    %c0_i32 = arith.constant 0 : i32
    %c0_i32_0 = arith.constant 0 : i32
    return %arg0, %c0_i32 : i32, i32
  }
  func.func @transform_1(%arg0: i32) -> (i32, i32) {
    %c0_i32 = arith.constant 0 : i32
    %c0_i32_0 = arith.constant 0 : i32
    %c0_i32_1 = arith.constant 0 : i32
    return %c0_i32, %c0_i32_0 : i32, i32
  }
  func.func @transform_2(%arg0: i32) -> (i32, i32) {
    %c0_i32 = arith.constant 0 : i32
    %c0_i32_0 = arith.constant 0 : i32
    %c0_i32_1 = arith.constant 0 : i32
    return %c0_i32, %c0_i32_0 : i32, i32
  }
  func.func @transform_3(%arg0: i32) -> (i32, i32) {
    %c0_i32 = arith.constant 0 : i32
    %c0_i32_0 = arith.constant 0 : i32
    %c0_i32_1 = arith.constant 0 : i32
    return %c0_i32, %c0_i32_0 : i32, i32
  }
  func.func @transform_4(%arg0: i32) -> (i32, i32) {
    %c0_i32 = arith.constant 0 : i32
    %c0_i32_0 = arith.constant 0 : i32
    return %arg0, %c0_i32 : i32, i32
  }
}

module attributes {stable_mosaic.version = 11 : i64} {
  func.func @_mm_stats_kernel(%arg0: i32, %arg1: i32, %arg2: i32, %arg3: memref<1x32x2048xbf16, #tpu.memory_space<vmem>>, %arg4: memref<1x2048x256xbf16, #tpu.memory_space<vmem>>, %arg5: memref<1x32x256xbf16, #tpu.memory_space<vmem>>, %arg6: memref<1x1x2x256xf32, #tpu.memory_space<vmem>>) attributes {dimension_semantics = [#tpu.dimension_semantics<parallel>, #tpu.dimension_semantics<parallel>, #tpu.dimension_semantics<parallel>], iteration_bounds = array<i64: 4, 1, 1>, scalar_prefetch = 0 : i64, scratch_operands = 0 : i64, tpu.core_type = #tpu.core_type<tc>, window_params = [{transform_indices = @transform_0, window_bounds = array<i64: 1, 32, 2048>}, {transform_indices = @transform_1, window_bounds = array<i64: 1, 2048, 256>}, {transform_indices = @transform_2, window_bounds = array<i64: 1, 32, 256>}, {transform_indices = @transform_3, window_bounds = array<i64: 1, 1, 2, 256>}]} {
    %c0 = arith.constant 0 : index
    %c0_0 = arith.constant 0 : index
    %c0_1 = arith.constant 0 : index
    %0 = vector.load %arg3[%c0, %c0_0, %c0_1] : memref<1x32x2048xbf16, #tpu.memory_space<vmem>>, vector<1x32x2048xbf16>
    %1 = vector.shape_cast %0 : vector<1x32x2048xbf16> to vector<32x2048xbf16>
    %c0_2 = arith.constant 0 : index
    %c0_3 = arith.constant 0 : index
    %c0_4 = arith.constant 0 : index
    %2 = vector.load %arg4[%c0_2, %c0_3, %c0_4] : memref<1x2048x256xbf16, #tpu.memory_space<vmem>>, vector<1x2048x256xbf16>
    %3 = vector.shape_cast %2 : vector<1x2048x256xbf16> to vector<2048x256xbf16>
    %cst = arith.constant dense<0.000000e+00> : vector<32x256xf32>
    %4 = tpu.matmul %1, %3, %cst {dimension_numbers = #tpu.dot_dimension_numbers<[1], [0], [0], [1], [0, 0, 1, 1], [], []>} : vector<32x2048xbf16>, vector<2048x256xbf16>, vector<32x256xf32> -> vector<32x256xf32>
    %5 = arith.truncf %4 : vector<32x256xf32> to vector<32x256xbf16>
    %c0_5 = arith.constant 0 : index
    %c0_6 = arith.constant 0 : index
    %c0_7 = arith.constant 0 : index
    %6 = vector.load %arg5[%c0_5, %c0_6, %c0_7] : memref<1x32x256xbf16, #tpu.memory_space<vmem>>, vector<1x32x256xbf16>
    %7 = vector.shape_cast %6 : vector<1x32x256xbf16> to vector<32x256xbf16>
    %8 = vector.shape_cast %5 : vector<32x256xbf16> to vector<1x32x256xbf16>
    tpu.vector_store %arg5[%c0_5, %c0_6, %c0_7], %8 {strides = array<i32>} : memref<1x32x256xbf16, #tpu.memory_space<vmem>>, vector<1x32x256xbf16>,
    %cst_8 = arith.constant dense<0.000000e+00> : vector<256xf32>
    %9 = vector.multi_reduction <add>, %4, %cst_8 [0] : vector<32x256xf32> to vector<256xf32>
    %10 = vector.shape_cast %9 : vector<256xf32> to vector<1x256xf32>
    %c0_9 = arith.constant 0 : index
    %c0_10 = arith.constant 0 : index
    %c0_11 = arith.constant 0 : index
    %c0_12 = arith.constant 0 : index
    %11 = vector.load %arg6[%c0_9, %c0_10, %c0_11, %c0_12] : memref<1x1x2x256xf32, #tpu.memory_space<vmem>>, vector<1x1x1x256xf32>
    %12 = vector.shape_cast %11 : vector<1x1x1x256xf32> to vector<1x256xf32>
    %13 = vector.shape_cast %10 : vector<1x256xf32> to vector<1x1x1x256xf32>
    tpu.vector_store %arg6[%c0_9, %c0_10, %c0_11, %c0_12], %13 {strides = array<i32>} : memref<1x1x2x256xf32, #tpu.memory_space<vmem>>, vector<1x1x1x256xf32>,
    %14 = arith.mulf %4, %4 : vector<32x256xf32>
    %cst_13 = arith.constant dense<0.000000e+00> : vector<256xf32>
    %15 = vector.multi_reduction <add>, %14, %cst_13 [0] : vector<32x256xf32> to vector<256xf32>
    %16 = vector.shape_cast %15 : vector<256xf32> to vector<1x256xf32>
    %c0_14 = arith.constant 0 : index
    %c0_15 = arith.constant 0 : index
    %c1 = arith.constant 1 : index
    %c0_16 = arith.constant 0 : index
    %17 = vector.load %arg6[%c0_14, %c0_15, %c1, %c0_16] : memref<1x1x2x256xf32, #tpu.memory_space<vmem>>, vector<1x1x1x256xf32>
    %18 = vector.shape_cast %17 : vector<1x1x1x256xf32> to vector<1x256xf32>
    %19 = vector.shape_cast %16 : vector<1x256xf32> to vector<1x1x1x256xf32>
    tpu.vector_store %arg6[%c0_14, %c0_15, %c1, %c0_16], %19 {strides = array<i32>} : memref<1x1x2x256xf32, #tpu.memory_space<vmem>>, vector<1x1x1x256xf32>,
    return
  }
  func.func @transform_0(%arg0: i32, %arg1: i32, %arg2: i32) -> (i32, i32, i32) {
    %c0_i32 = arith.constant 0 : i32
    %c0_i32_0 = arith.constant 0 : i32
    return %arg0, %arg1, %c0_i32 : i32, i32, i32
  }
  func.func @transform_1(%arg0: i32, %arg1: i32, %arg2: i32) -> (i32, i32, i32) {
    %c0_i32 = arith.constant 0 : i32
    %c0_i32_0 = arith.constant 0 : i32
    return %arg0, %c0_i32, %arg2 : i32, i32, i32
  }
  func.func @transform_2(%arg0: i32, %arg1: i32, %arg2: i32) -> (i32, i32, i32) {
    %c0_i32 = arith.constant 0 : i32
    return %arg0, %arg1, %arg2 : i32, i32, i32
  }
  func.func @transform_3(%arg0: i32, %arg1: i32, %arg2: i32) -> (i32, i32, i32, i32) {
    %c0_i32 = arith.constant 0 : i32
    %c0_i32_0 = arith.constant 0 : i32
    return %arg0, %arg1, %c0_i32, %arg2 : i32, i32, i32, i32
  }
}

module attributes {stable_mosaic.version = 11 : i64} {
  func.func @_bn_relu_kernel(%arg0: i32, %arg1: memref<128x256xbf16, #tpu.memory_space<vmem>>, %arg2: memref<2x256xf32, #tpu.memory_space<vmem>>, %arg3: memref<1x256xf32, #tpu.memory_space<vmem>>, %arg4: memref<1x256xf32, #tpu.memory_space<vmem>>, %arg5: memref<128x256xbf16, #tpu.memory_space<vmem>>) attributes {dimension_semantics = [#tpu.dimension_semantics<parallel>], iteration_bounds = array<i64: 1>, scalar_prefetch = 0 : i64, scratch_operands = 0 : i64, tpu.core_type = #tpu.core_type<tc>, window_params = [{transform_indices = @transform_0, window_bounds = array<i64: 128, 256>}, {pipeline_mode = #tpu.pipeline_mode<synchronous>, transform_indices = @transform_1, window_bounds = array<i64: 2, 256>}, {pipeline_mode = #tpu.pipeline_mode<synchronous>, transform_indices = @transform_2, window_bounds = array<i64: 1, 256>}, {pipeline_mode = #tpu.pipeline_mode<synchronous>, transform_indices = @transform_3, window_bounds = array<i64: 1, 256>}, {transform_indices = @transform_4, window_bounds = array<i64: 128, 256>}]} {
    %c0 = arith.constant 0 : index
    %c0_0 = arith.constant 0 : index
    %0 = vector.load %arg2[%c0, %c0_0] : memref<2x256xf32, #tpu.memory_space<vmem>>, vector<1x256xf32>
    %cst = arith.constant 7.812500e-03 : f32
    %1 = vector.broadcast %cst : f32 to vector<1x256xf32>
    %2 = arith.mulf %0, %1 : vector<1x256xf32>
    %c1 = arith.constant 1 : index
    %c0_1 = arith.constant 0 : index
    %3 = vector.load %arg2[%c1, %c0_1] : memref<2x256xf32, #tpu.memory_space<vmem>>, vector<1x256xf32>
    %cst_2 = arith.constant 7.812500e-03 : f32
    %4 = vector.broadcast %cst_2 : f32 to vector<1x256xf32>
    %5 = arith.mulf %3, %4 : vector<1x256xf32>
    %6 = arith.mulf %2, %2 : vector<1x256xf32>
    %7 = arith.subf %5, %6 : vector<1x256xf32>
    %cst_3 = arith.constant 0.000000e+00 : f32
    %8 = vector.broadcast %cst_3 : f32 to vector<1x256xf32>
    %9 = arith.maximumf %7, %8 : vector<1x256xf32>
    %c0_4 = arith.constant 0 : index
    %c0_5 = arith.constant 0 : index
    %10 = vector.load %arg3[%c0_4, %c0_5] : memref<1x256xf32, #tpu.memory_space<vmem>>, vector<1x256xf32>
    %cst_6 = arith.constant 9.99999974E-6 : f32
    %11 = vector.broadcast %cst_6 : f32 to vector<1x256xf32>
    %12 = arith.addf %9, %11 : vector<1x256xf32>
    %13 = math.rsqrt %12 : vector<1x256xf32>
    %14 = arith.mulf %10, %13 : vector<1x256xf32>
    %c0_7 = arith.constant 0 : index
    %c0_8 = arith.constant 0 : index
    %15 = vector.load %arg4[%c0_7, %c0_8] : memref<1x256xf32, #tpu.memory_space<vmem>>, vector<1x256xf32>
    %16 = arith.mulf %2, %14 : vector<1x256xf32>
    %17 = arith.subf %15, %16 : vector<1x256xf32>
    %c0_9 = arith.constant 0 : index
    %c0_10 = arith.constant 0 : index
    %18 = vector.load %arg1[%c0_9, %c0_10] : memref<128x256xbf16, #tpu.memory_space<vmem>>, vector<128x256xbf16>
    %19 = arith.extf %18 : vector<128x256xbf16> to vector<128x256xf32>
    %20 = vector.broadcast %14 : vector<1x256xf32> to vector<128x256xf32>
    %21 = arith.mulf %19, %20 : vector<128x256xf32>
    %22 = vector.broadcast %17 : vector<1x256xf32> to vector<128x256xf32>
    %23 = arith.addf %21, %22 : vector<128x256xf32>
    %cst_11 = arith.constant 0.000000e+00 : f32
    %24 = vector.broadcast %cst_11 : f32 to vector<128x256xf32>
    %25 = arith.maximumf %23, %24 : vector<128x256xf32>
    %26 = arith.truncf %25 : vector<128x256xf32> to vector<128x256xbf16>
    %c0_12 = arith.constant 0 : index
    %c0_13 = arith.constant 0 : index
    %27 = vector.load %arg5[%c0_12, %c0_13] : memref<128x256xbf16, #tpu.memory_space<vmem>>, vector<128x256xbf16>
    tpu.vector_store %arg5[%c0_12, %c0_13], %26 {strides = array<i32>} : memref<128x256xbf16, #tpu.memory_space<vmem>>, vector<128x256xbf16>,
    return
  }
  func.func @transform_0(%arg0: i32) -> (i32, i32) {
    %c0_i32 = arith.constant 0 : i32
    %c0_i32_0 = arith.constant 0 : i32
    return %arg0, %c0_i32 : i32, i32
  }
  func.func @transform_1(%arg0: i32) -> (i32, i32) {
    %c0_i32 = arith.constant 0 : i32
    %c0_i32_0 = arith.constant 0 : i32
    %c0_i32_1 = arith.constant 0 : i32
    return %c0_i32, %c0_i32_0 : i32, i32
  }
  func.func @transform_2(%arg0: i32) -> (i32, i32) {
    %c0_i32 = arith.constant 0 : i32
    %c0_i32_0 = arith.constant 0 : i32
    %c0_i32_1 = arith.constant 0 : i32
    return %c0_i32, %c0_i32_0 : i32, i32
  }
  func.func @transform_3(%arg0: i32) -> (i32, i32) {
    %c0_i32 = arith.constant 0 : i32
    %c0_i32_0 = arith.constant 0 : i32
    %c0_i32_1 = arith.constant 0 : i32
    return %c0_i32, %c0_i32_0 : i32, i32
  }
  func.func @transform_4(%arg0: i32) -> (i32, i32) {
    %c0_i32 = arith.constant 0 : i32
    %c0_i32_0 = arith.constant 0 : i32
    return %arg0, %c0_i32 : i32, i32
  }
}

module attributes {stable_mosaic.version = 11 : i64} {
  func.func @_mm_stats_kernel(%arg0: i32, %arg1: i32, %arg2: i32, %arg3: memref<1x128x1024xbf16, #tpu.memory_space<vmem>>, %arg4: memref<1x1024x128xbf16, #tpu.memory_space<vmem>>, %arg5: memref<1x128x128xbf16, #tpu.memory_space<vmem>>, %arg6: memref<1x1x2x128xf32, #tpu.memory_space<vmem>>) attributes {dimension_semantics = [#tpu.dimension_semantics<parallel>, #tpu.dimension_semantics<parallel>, #tpu.dimension_semantics<parallel>], iteration_bounds = array<i64: 4, 1, 1>, scalar_prefetch = 0 : i64, scratch_operands = 0 : i64, tpu.core_type = #tpu.core_type<tc>, window_params = [{transform_indices = @transform_0, window_bounds = array<i64: 1, 128, 1024>}, {transform_indices = @transform_1, window_bounds = array<i64: 1, 1024, 128>}, {transform_indices = @transform_2, window_bounds = array<i64: 1, 128, 128>}, {transform_indices = @transform_3, window_bounds = array<i64: 1, 1, 2, 128>}]} {
    %c0 = arith.constant 0 : index
    %c0_0 = arith.constant 0 : index
    %c0_1 = arith.constant 0 : index
    %0 = vector.load %arg3[%c0, %c0_0, %c0_1] : memref<1x128x1024xbf16, #tpu.memory_space<vmem>>, vector<1x128x1024xbf16>
    %1 = vector.shape_cast %0 : vector<1x128x1024xbf16> to vector<128x1024xbf16>
    %c0_2 = arith.constant 0 : index
    %c0_3 = arith.constant 0 : index
    %c0_4 = arith.constant 0 : index
    %2 = vector.load %arg4[%c0_2, %c0_3, %c0_4] : memref<1x1024x128xbf16, #tpu.memory_space<vmem>>, vector<1x1024x128xbf16>
    %3 = vector.shape_cast %2 : vector<1x1024x128xbf16> to vector<1024x128xbf16>
    %cst = arith.constant dense<0.000000e+00> : vector<128x128xf32>
    %4 = tpu.matmul %1, %3, %cst {dimension_numbers = #tpu.dot_dimension_numbers<[1], [0], [0], [1], [0, 0, 1, 1], [], []>} : vector<128x1024xbf16>, vector<1024x128xbf16>, vector<128x128xf32> -> vector<128x128xf32>
    %5 = arith.truncf %4 : vector<128x128xf32> to vector<128x128xbf16>
    %c0_5 = arith.constant 0 : index
    %c0_6 = arith.constant 0 : index
    %c0_7 = arith.constant 0 : index
    %6 = vector.load %arg5[%c0_5, %c0_6, %c0_7] : memref<1x128x128xbf16, #tpu.memory_space<vmem>>, vector<1x128x128xbf16>
    %7 = vector.shape_cast %6 : vector<1x128x128xbf16> to vector<128x128xbf16>
    %8 = vector.shape_cast %5 : vector<128x128xbf16> to vector<1x128x128xbf16>
    tpu.vector_store %arg5[%c0_5, %c0_6, %c0_7], %8 {strides = array<i32>} : memref<1x128x128xbf16, #tpu.memory_space<vmem>>, vector<1x128x128xbf16>,
    %cst_8 = arith.constant dense<0.000000e+00> : vector<128xf32>
    %9 = vector.multi_reduction <add>, %4, %cst_8 [0] : vector<128x128xf32> to vector<128xf32>
    %10 = vector.shape_cast %9 : vector<128xf32> to vector<1x128xf32>
    %c0_9 = arith.constant 0 : index
    %c0_10 = arith.constant 0 : index
    %c0_11 = arith.constant 0 : index
    %c0_12 = arith.constant 0 : index
    %11 = vector.load %arg6[%c0_9, %c0_10, %c0_11, %c0_12] : memref<1x1x2x128xf32, #tpu.memory_space<vmem>>, vector<1x1x1x128xf32>
    %12 = vector.shape_cast %11 : vector<1x1x1x128xf32> to vector<1x128xf32>
    %13 = vector.shape_cast %10 : vector<1x128xf32> to vector<1x1x1x128xf32>
    tpu.vector_store %arg6[%c0_9, %c0_10, %c0_11, %c0_12], %13 {strides = array<i32>} : memref<1x1x2x128xf32, #tpu.memory_space<vmem>>, vector<1x1x1x128xf32>,
    %14 = arith.mulf %4, %4 : vector<128x128xf32>
    %cst_13 = arith.constant dense<0.000000e+00> : vector<128xf32>
    %15 = vector.multi_reduction <add>, %14, %cst_13 [0] : vector<128x128xf32> to vector<128xf32>
    %16 = vector.shape_cast %15 : vector<128xf32> to vector<1x128xf32>
    %c0_14 = arith.constant 0 : index
    %c0_15 = arith.constant 0 : index
    %c1 = arith.constant 1 : index
    %c0_16 = arith.constant 0 : index
    %17 = vector.load %arg6[%c0_14, %c0_15, %c1, %c0_16] : memref<1x1x2x128xf32, #tpu.memory_space<vmem>>, vector<1x1x1x128xf32>
    %18 = vector.shape_cast %17 : vector<1x1x1x128xf32> to vector<1x128xf32>
    %19 = vector.shape_cast %16 : vector<1x128xf32> to vector<1x1x1x128xf32>
    tpu.vector_store %arg6[%c0_14, %c0_15, %c1, %c0_16], %19 {strides = array<i32>} : memref<1x1x2x128xf32, #tpu.memory_space<vmem>>, vector<1x1x1x128xf32>,
    return
  }
  func.func @transform_0(%arg0: i32, %arg1: i32, %arg2: i32) -> (i32, i32, i32) {
    %c0_i32 = arith.constant 0 : i32
    %c0_i32_0 = arith.constant 0 : i32
    return %arg0, %arg1, %c0_i32 : i32, i32, i32
  }
  func.func @transform_1(%arg0: i32, %arg1: i32, %arg2: i32) -> (i32, i32, i32) {
    %c0_i32 = arith.constant 0 : i32
    %c0_i32_0 = arith.constant 0 : i32
    return %arg0, %c0_i32, %arg2 : i32, i32, i32
  }
  func.func @transform_2(%arg0: i32, %arg1: i32, %arg2: i32) -> (i32, i32, i32) {
    %c0_i32 = arith.constant 0 : i32
    return %arg0, %arg1, %arg2 : i32, i32, i32
  }
  func.func @transform_3(%arg0: i32, %arg1: i32, %arg2: i32) -> (i32, i32, i32, i32) {
    %c0_i32 = arith.constant 0 : i32
    %c0_i32_0 = arith.constant 0 : i32
    return %arg0, %arg1, %c0_i32, %arg2 : i32, i32, i32, i32
  }
}

module attributes {stable_mosaic.version = 11 : i64} {
  func.func @_bn_relu_kernel(%arg0: i32, %arg1: memref<512x128xbf16, #tpu.memory_space<vmem>>, %arg2: memref<2x128xf32, #tpu.memory_space<vmem>>, %arg3: memref<1x128xf32, #tpu.memory_space<vmem>>, %arg4: memref<1x128xf32, #tpu.memory_space<vmem>>, %arg5: memref<512x128xbf16, #tpu.memory_space<vmem>>) attributes {dimension_semantics = [#tpu.dimension_semantics<parallel>], iteration_bounds = array<i64: 1>, scalar_prefetch = 0 : i64, scratch_operands = 0 : i64, tpu.core_type = #tpu.core_type<tc>, window_params = [{transform_indices = @transform_0, window_bounds = array<i64: 512, 128>}, {pipeline_mode = #tpu.pipeline_mode<synchronous>, transform_indices = @transform_1, window_bounds = array<i64: 2, 128>}, {pipeline_mode = #tpu.pipeline_mode<synchronous>, transform_indices = @transform_2, window_bounds = array<i64: 1, 128>}, {pipeline_mode = #tpu.pipeline_mode<synchronous>, transform_indices = @transform_3, window_bounds = array<i64: 1, 128>}, {transform_indices = @transform_4, window_bounds = array<i64: 512, 128>}]} {
    %c0 = arith.constant 0 : index
    %c0_0 = arith.constant 0 : index
    %0 = vector.load %arg2[%c0, %c0_0] : memref<2x128xf32, #tpu.memory_space<vmem>>, vector<1x128xf32>
    %cst = arith.constant 0.001953125 : f32
    %1 = vector.broadcast %cst : f32 to vector<1x128xf32>
    %2 = arith.mulf %0, %1 : vector<1x128xf32>
    %c1 = arith.constant 1 : index
    %c0_1 = arith.constant 0 : index
    %3 = vector.load %arg2[%c1, %c0_1] : memref<2x128xf32, #tpu.memory_space<vmem>>, vector<1x128xf32>
    %cst_2 = arith.constant 0.001953125 : f32
    %4 = vector.broadcast %cst_2 : f32 to vector<1x128xf32>
    %5 = arith.mulf %3, %4 : vector<1x128xf32>
    %6 = arith.mulf %2, %2 : vector<1x128xf32>
    %7 = arith.subf %5, %6 : vector<1x128xf32>
    %cst_3 = arith.constant 0.000000e+00 : f32
    %8 = vector.broadcast %cst_3 : f32 to vector<1x128xf32>
    %9 = arith.maximumf %7, %8 : vector<1x128xf32>
    %c0_4 = arith.constant 0 : index
    %c0_5 = arith.constant 0 : index
    %10 = vector.load %arg3[%c0_4, %c0_5] : memref<1x128xf32, #tpu.memory_space<vmem>>, vector<1x128xf32>
    %cst_6 = arith.constant 9.99999974E-6 : f32
    %11 = vector.broadcast %cst_6 : f32 to vector<1x128xf32>
    %12 = arith.addf %9, %11 : vector<1x128xf32>
    %13 = math.rsqrt %12 : vector<1x128xf32>
    %14 = arith.mulf %10, %13 : vector<1x128xf32>
    %c0_7 = arith.constant 0 : index
    %c0_8 = arith.constant 0 : index
    %15 = vector.load %arg4[%c0_7, %c0_8] : memref<1x128xf32, #tpu.memory_space<vmem>>, vector<1x128xf32>
    %16 = arith.mulf %2, %14 : vector<1x128xf32>
    %17 = arith.subf %15, %16 : vector<1x128xf32>
    %c0_9 = arith.constant 0 : index
    %c0_10 = arith.constant 0 : index
    %18 = vector.load %arg1[%c0_9, %c0_10] : memref<512x128xbf16, #tpu.memory_space<vmem>>, vector<512x128xbf16>
    %19 = arith.extf %18 : vector<512x128xbf16> to vector<512x128xf32>
    %20 = vector.broadcast %14 : vector<1x128xf32> to vector<512x128xf32>
    %21 = arith.mulf %19, %20 : vector<512x128xf32>
    %22 = vector.broadcast %17 : vector<1x128xf32> to vector<512x128xf32>
    %23 = arith.addf %21, %22 : vector<512x128xf32>
    %cst_11 = arith.constant 0.000000e+00 : f32
    %24 = vector.broadcast %cst_11 : f32 to vector<512x128xf32>
    %25 = arith.maximumf %23, %24 : vector<512x128xf32>
    %26 = arith.truncf %25 : vector<512x128xf32> to vector<512x128xbf16>
    %c0_12 = arith.constant 0 : index
    %c0_13 = arith.constant 0 : index
    %27 = vector.load %arg5[%c0_12, %c0_13] : memref<512x128xbf16, #tpu.memory_space<vmem>>, vector<512x128xbf16>
    tpu.vector_store %arg5[%c0_12, %c0_13], %26 {strides = array<i32>} : memref<512x128xbf16, #tpu.memory_space<vmem>>, vector<512x128xbf16>,
    return
  }
  func.func @transform_0(%arg0: i32) -> (i32, i32) {
    %c0_i32 = arith.constant 0 : i32
    %c0_i32_0 = arith.constant 0 : i32
    return %arg0, %c0_i32 : i32, i32
  }
  func.func @transform_1(%arg0: i32) -> (i32, i32) {
    %c0_i32 = arith.constant 0 : i32
    %c0_i32_0 = arith.constant 0 : i32
    %c0_i32_1 = arith.constant 0 : i32
    return %c0_i32, %c0_i32_0 : i32, i32
  }
  func.func @transform_2(%arg0: i32) -> (i32, i32) {
    %c0_i32 = arith.constant 0 : i32
    %c0_i32_0 = arith.constant 0 : i32
    %c0_i32_1 = arith.constant 0 : i32
    return %c0_i32, %c0_i32_0 : i32, i32
  }
  func.func @transform_3(%arg0: i32) -> (i32, i32) {
    %c0_i32 = arith.constant 0 : i32
    %c0_i32_0 = arith.constant 0 : i32
    %c0_i32_1 = arith.constant 0 : i32
    return %c0_i32, %c0_i32_0 : i32, i32
  }
  func.func @transform_4(%arg0: i32) -> (i32, i32) {
    %c0_i32 = arith.constant 0 : i32
    %c0_i32_0 = arith.constant 0 : i32
    return %arg0, %c0_i32 : i32, i32
  }
}

module attributes {stable_mosaic.version = 11 : i64} {
  func.func @_mm_stats_kernel(%arg0: i32, %arg1: i32, %arg2: i32, %arg3: memref<1x512x512xbf16, #tpu.memory_space<vmem>>, %arg4: memref<1x512x128xbf16, #tpu.memory_space<vmem>>, %arg5: memref<1x512x128xbf16, #tpu.memory_space<vmem>>, %arg6: memref<1x1x2x128xf32, #tpu.memory_space<vmem>>) attributes {dimension_semantics = [#tpu.dimension_semantics<parallel>, #tpu.dimension_semantics<parallel>, #tpu.dimension_semantics<parallel>], iteration_bounds = array<i64: 4, 1, 1>, scalar_prefetch = 0 : i64, scratch_operands = 0 : i64, tpu.core_type = #tpu.core_type<tc>, window_params = [{transform_indices = @transform_0, window_bounds = array<i64: 1, 512, 512>}, {transform_indices = @transform_1, window_bounds = array<i64: 1, 512, 128>}, {transform_indices = @transform_2, window_bounds = array<i64: 1, 512, 128>}, {transform_indices = @transform_3, window_bounds = array<i64: 1, 1, 2, 128>}]} {
    %c0 = arith.constant 0 : index
    %c0_0 = arith.constant 0 : index
    %c0_1 = arith.constant 0 : index
    %0 = vector.load %arg3[%c0, %c0_0, %c0_1] : memref<1x512x512xbf16, #tpu.memory_space<vmem>>, vector<1x512x512xbf16>
    %1 = vector.shape_cast %0 : vector<1x512x512xbf16> to vector<512x512xbf16>
    %c0_2 = arith.constant 0 : index
    %c0_3 = arith.constant 0 : index
    %c0_4 = arith.constant 0 : index
    %2 = vector.load %arg4[%c0_2, %c0_3, %c0_4] : memref<1x512x128xbf16, #tpu.memory_space<vmem>>, vector<1x512x128xbf16>
    %3 = vector.shape_cast %2 : vector<1x512x128xbf16> to vector<512x128xbf16>
    %cst = arith.constant dense<0.000000e+00> : vector<512x128xf32>
    %4 = tpu.matmul %1, %3, %cst {dimension_numbers = #tpu.dot_dimension_numbers<[1], [0], [0], [1], [0, 0, 1, 1], [], []>} : vector<512x512xbf16>, vector<512x128xbf16>, vector<512x128xf32> -> vector<512x128xf32>
    %5 = arith.truncf %4 : vector<512x128xf32> to vector<512x128xbf16>
    %c0_5 = arith.constant 0 : index
    %c0_6 = arith.constant 0 : index
    %c0_7 = arith.constant 0 : index
    %6 = vector.load %arg5[%c0_5, %c0_6, %c0_7] : memref<1x512x128xbf16, #tpu.memory_space<vmem>>, vector<1x512x128xbf16>
    %7 = vector.shape_cast %6 : vector<1x512x128xbf16> to vector<512x128xbf16>
    %8 = vector.shape_cast %5 : vector<512x128xbf16> to vector<1x512x128xbf16>
    tpu.vector_store %arg5[%c0_5, %c0_6, %c0_7], %8 {strides = array<i32>} : memref<1x512x128xbf16, #tpu.memory_space<vmem>>, vector<1x512x128xbf16>,
    %cst_8 = arith.constant dense<0.000000e+00> : vector<128xf32>
    %9 = vector.multi_reduction <add>, %4, %cst_8 [0] : vector<512x128xf32> to vector<128xf32>
    %10 = vector.shape_cast %9 : vector<128xf32> to vector<1x128xf32>
    %c0_9 = arith.constant 0 : index
    %c0_10 = arith.constant 0 : index
    %c0_11 = arith.constant 0 : index
    %c0_12 = arith.constant 0 : index
    %11 = vector.load %arg6[%c0_9, %c0_10, %c0_11, %c0_12] : memref<1x1x2x128xf32, #tpu.memory_space<vmem>>, vector<1x1x1x128xf32>
    %12 = vector.shape_cast %11 : vector<1x1x1x128xf32> to vector<1x128xf32>
    %13 = vector.shape_cast %10 : vector<1x128xf32> to vector<1x1x1x128xf32>
    tpu.vector_store %arg6[%c0_9, %c0_10, %c0_11, %c0_12], %13 {strides = array<i32>} : memref<1x1x2x128xf32, #tpu.memory_space<vmem>>, vector<1x1x1x128xf32>,
    %14 = arith.mulf %4, %4 : vector<512x128xf32>
    %cst_13 = arith.constant dense<0.000000e+00> : vector<128xf32>
    %15 = vector.multi_reduction <add>, %14, %cst_13 [0] : vector<512x128xf32> to vector<128xf32>
    %16 = vector.shape_cast %15 : vector<128xf32> to vector<1x128xf32>
    %c0_14 = arith.constant 0 : index
    %c0_15 = arith.constant 0 : index
    %c1 = arith.constant 1 : index
    %c0_16 = arith.constant 0 : index
    %17 = vector.load %arg6[%c0_14, %c0_15, %c1, %c0_16] : memref<1x1x2x128xf32, #tpu.memory_space<vmem>>, vector<1x1x1x128xf32>
    %18 = vector.shape_cast %17 : vector<1x1x1x128xf32> to vector<1x128xf32>
    %19 = vector.shape_cast %16 : vector<1x128xf32> to vector<1x1x1x128xf32>
    tpu.vector_store %arg6[%c0_14, %c0_15, %c1, %c0_16], %19 {strides = array<i32>} : memref<1x1x2x128xf32, #tpu.memory_space<vmem>>, vector<1x1x1x128xf32>,
    return
  }
  func.func @transform_0(%arg0: i32, %arg1: i32, %arg2: i32) -> (i32, i32, i32) {
    %c0_i32 = arith.constant 0 : i32
    %c0_i32_0 = arith.constant 0 : i32
    return %arg0, %arg1, %c0_i32 : i32, i32, i32
  }
  func.func @transform_1(%arg0: i32, %arg1: i32, %arg2: i32) -> (i32, i32, i32) {
    %c0_i32 = arith.constant 0 : i32
    %c0_i32_0 = arith.constant 0 : i32
    return %arg0, %c0_i32, %arg2 : i32, i32, i32
  }
  func.func @transform_2(%arg0: i32, %arg1: i32, %arg2: i32) -> (i32, i32, i32) {
    %c0_i32 = arith.constant 0 : i32
    return %arg0, %arg1, %arg2 : i32, i32, i32
  }
  func.func @transform_3(%arg0: i32, %arg1: i32, %arg2: i32) -> (i32, i32, i32, i32) {
    %c0_i32 = arith.constant 0 : i32
    %c0_i32_0 = arith.constant 0 : i32
    return %arg0, %arg1, %c0_i32, %arg2 : i32, i32, i32, i32
  }
}

module attributes {stable_mosaic.version = 11 : i64} {
  func.func @_bn_relu_kernel(%arg0: i32, %arg1: memref<1024x128xbf16, #tpu.memory_space<vmem>>, %arg2: memref<2x128xf32, #tpu.memory_space<vmem>>, %arg3: memref<1x128xf32, #tpu.memory_space<vmem>>, %arg4: memref<1x128xf32, #tpu.memory_space<vmem>>, %arg5: memref<1024x128xbf16, #tpu.memory_space<vmem>>) attributes {dimension_semantics = [#tpu.dimension_semantics<parallel>], iteration_bounds = array<i64: 2>, scalar_prefetch = 0 : i64, scratch_operands = 0 : i64, tpu.core_type = #tpu.core_type<tc>, window_params = [{transform_indices = @transform_0, window_bounds = array<i64: 1024, 128>}, {pipeline_mode = #tpu.pipeline_mode<synchronous>, transform_indices = @transform_1, window_bounds = array<i64: 2, 128>}, {pipeline_mode = #tpu.pipeline_mode<synchronous>, transform_indices = @transform_2, window_bounds = array<i64: 1, 128>}, {pipeline_mode = #tpu.pipeline_mode<synchronous>, transform_indices = @transform_3, window_bounds = array<i64: 1, 128>}, {transform_indices = @transform_4, window_bounds = array<i64: 1024, 128>}]} {
    %c0 = arith.constant 0 : index
    %c0_0 = arith.constant 0 : index
    %0 = vector.load %arg2[%c0, %c0_0] : memref<2x128xf32, #tpu.memory_space<vmem>>, vector<1x128xf32>
    %cst = arith.constant 4.8828125E-4 : f32
    %1 = vector.broadcast %cst : f32 to vector<1x128xf32>
    %2 = arith.mulf %0, %1 : vector<1x128xf32>
    %c1 = arith.constant 1 : index
    %c0_1 = arith.constant 0 : index
    %3 = vector.load %arg2[%c1, %c0_1] : memref<2x128xf32, #tpu.memory_space<vmem>>, vector<1x128xf32>
    %cst_2 = arith.constant 4.8828125E-4 : f32
    %4 = vector.broadcast %cst_2 : f32 to vector<1x128xf32>
    %5 = arith.mulf %3, %4 : vector<1x128xf32>
    %6 = arith.mulf %2, %2 : vector<1x128xf32>
    %7 = arith.subf %5, %6 : vector<1x128xf32>
    %cst_3 = arith.constant 0.000000e+00 : f32
    %8 = vector.broadcast %cst_3 : f32 to vector<1x128xf32>
    %9 = arith.maximumf %7, %8 : vector<1x128xf32>
    %c0_4 = arith.constant 0 : index
    %c0_5 = arith.constant 0 : index
    %10 = vector.load %arg3[%c0_4, %c0_5] : memref<1x128xf32, #tpu.memory_space<vmem>>, vector<1x128xf32>
    %cst_6 = arith.constant 9.99999974E-6 : f32
    %11 = vector.broadcast %cst_6 : f32 to vector<1x128xf32>
    %12 = arith.addf %9, %11 : vector<1x128xf32>
    %13 = math.rsqrt %12 : vector<1x128xf32>
    %14 = arith.mulf %10, %13 : vector<1x128xf32>
    %c0_7 = arith.constant 0 : index
    %c0_8 = arith.constant 0 : index
    %15 = vector.load %arg4[%c0_7, %c0_8] : memref<1x128xf32, #tpu.memory_space<vmem>>, vector<1x128xf32>
    %16 = arith.mulf %2, %14 : vector<1x128xf32>
    %17 = arith.subf %15, %16 : vector<1x128xf32>
    %c0_9 = arith.constant 0 : index
    %c0_10 = arith.constant 0 : index
    %18 = vector.load %arg1[%c0_9, %c0_10] : memref<1024x128xbf16, #tpu.memory_space<vmem>>, vector<1024x128xbf16>
    %19 = arith.extf %18 : vector<1024x128xbf16> to vector<1024x128xf32>
    %20 = vector.broadcast %14 : vector<1x128xf32> to vector<1024x128xf32>
    %21 = arith.mulf %19, %20 : vector<1024x128xf32>
    %22 = vector.broadcast %17 : vector<1x128xf32> to vector<1024x128xf32>
    %23 = arith.addf %21, %22 : vector<1024x128xf32>
    %cst_11 = arith.constant 0.000000e+00 : f32
    %24 = vector.broadcast %cst_11 : f32 to vector<1024x128xf32>
    %25 = arith.maximumf %23, %24 : vector<1024x128xf32>
    %26 = arith.truncf %25 : vector<1024x128xf32> to vector<1024x128xbf16>
    %c0_12 = arith.constant 0 : index
    %c0_13 = arith.constant 0 : index
    %27 = vector.load %arg5[%c0_12, %c0_13] : memref<1024x128xbf16, #tpu.memory_space<vmem>>, vector<1024x128xbf16>
    tpu.vector_store %arg5[%c0_12, %c0_13], %26 {strides = array<i32>} : memref<1024x128xbf16, #tpu.memory_space<vmem>>, vector<1024x128xbf16>,
    return
  }
  func.func @transform_0(%arg0: i32) -> (i32, i32) {
    %c0_i32 = arith.constant 0 : i32
    %c0_i32_0 = arith.constant 0 : i32
    return %arg0, %c0_i32 : i32, i32
  }
  func.func @transform_1(%arg0: i32) -> (i32, i32) {
    %c0_i32 = arith.constant 0 : i32
    %c0_i32_0 = arith.constant 0 : i32
    %c0_i32_1 = arith.constant 0 : i32
    return %c0_i32, %c0_i32_0 : i32, i32
  }
  func.func @transform_2(%arg0: i32) -> (i32, i32) {
    %c0_i32 = arith.constant 0 : i32
    %c0_i32_0 = arith.constant 0 : i32
    %c0_i32_1 = arith.constant 0 : i32
    return %c0_i32, %c0_i32_0 : i32, i32
  }
  func.func @transform_3(%arg0: i32) -> (i32, i32) {
    %c0_i32 = arith.constant 0 : i32
    %c0_i32_0 = arith.constant 0 : i32
    %c0_i32_1 = arith.constant 0 : i32
    return %c0_i32, %c0_i32_0 : i32, i32
  }
  func.func @transform_4(%arg0: i32) -> (i32, i32) {
    %c0_i32 = arith.constant 0 : i32
    %c0_i32_0 = arith.constant 0 : i32
    return %arg0, %c0_i32 : i32, i32
  }
}

module attributes {stable_mosaic.version = 11 : i64} {
  func.func @_mm_tanh_kernel(%arg0: i32, %arg1: i32, %arg2: i32, %arg3: memref<1x8x256xbf16, #tpu.memory_space<vmem>>, %arg4: memref<1x256x2048xbf16, #tpu.memory_space<vmem>>, %arg5: memref<1x8x2048xf32, #tpu.memory_space<vmem>>) attributes {dimension_semantics = [#tpu.dimension_semantics<parallel>, #tpu.dimension_semantics<parallel>, #tpu.dimension_semantics<parallel>], iteration_bounds = array<i64: 4, 1, 1>, scalar_prefetch = 0 : i64, scratch_operands = 0 : i64, tpu.core_type = #tpu.core_type<tc>, window_params = [{transform_indices = @transform_0, window_bounds = array<i64: 1, 8, 256>}, {transform_indices = @transform_1, window_bounds = array<i64: 1, 256, 2048>}, {transform_indices = @transform_2, window_bounds = array<i64: 1, 8, 2048>}]} {
    %c0 = arith.constant 0 : index
    %c0_0 = arith.constant 0 : index
    %c0_1 = arith.constant 0 : index
    %0 = vector.load %arg3[%c0, %c0_0, %c0_1] : memref<1x8x256xbf16, #tpu.memory_space<vmem>>, vector<1x8x256xbf16>
    %1 = vector.shape_cast %0 : vector<1x8x256xbf16> to vector<8x256xbf16>
    %c0_2 = arith.constant 0 : index
    %c0_3 = arith.constant 0 : index
    %c0_4 = arith.constant 0 : index
    %2 = vector.load %arg4[%c0_2, %c0_3, %c0_4] : memref<1x256x2048xbf16, #tpu.memory_space<vmem>>, vector<1x256x2048xbf16>
    %3 = vector.shape_cast %2 : vector<1x256x2048xbf16> to vector<256x2048xbf16>
    %cst = arith.constant dense<0.000000e+00> : vector<8x2048xf32>
    %4 = tpu.matmul %1, %3, %cst {dimension_numbers = #tpu.dot_dimension_numbers<[1], [0], [0], [1], [0, 0, 1, 1], [], []>} : vector<8x256xbf16>, vector<256x2048xbf16>, vector<8x2048xf32> -> vector<8x2048xf32>
    %5 = math.tanh %4 : vector<8x2048xf32>
    %c0_5 = arith.constant 0 : index
    %c0_6 = arith.constant 0 : index
    %c0_7 = arith.constant 0 : index
    %6 = vector.load %arg5[%c0_5, %c0_6, %c0_7] : memref<1x8x2048xf32, #tpu.memory_space<vmem>>, vector<1x8x2048xf32>
    %7 = vector.shape_cast %6 : vector<1x8x2048xf32> to vector<8x2048xf32>
    %8 = vector.shape_cast %5 : vector<8x2048xf32> to vector<1x8x2048xf32>
    tpu.vector_store %arg5[%c0_5, %c0_6, %c0_7], %8 {strides = array<i32>} : memref<1x8x2048xf32, #tpu.memory_space<vmem>>, vector<1x8x2048xf32>,
    return
  }
  func.func @transform_0(%arg0: i32, %arg1: i32, %arg2: i32) -> (i32, i32, i32) {
    %c0_i32 = arith.constant 0 : i32
    %c0_i32_0 = arith.constant 0 : i32
    return %arg0, %arg1, %c0_i32 : i32, i32, i32
  }
  func.func @transform_1(%arg0: i32, %arg1: i32, %arg2: i32) -> (i32, i32, i32) {
    %c0_i32 = arith.constant 0 : i32
    %c0_i32_0 = arith.constant 0 : i32
    return %arg0, %c0_i32, %arg2 : i32, i32, i32
  }
  func.func @transform_2(%arg0: i32, %arg1: i32, %arg2: i32) -> (i32, i32, i32) {
    %c0_i32 = arith.constant 0 : i32
    return %arg0, %arg1, %arg2 : i32, i32, i32
  }
}

</mosaic_0001>

<bundles_post_ra>
// kernel: generator_forward.9
= control target key start
LH: loop header
LB: loop body
LE: loop exit
PB: predicated region body
PF: predicated region fallthrough
CT: control target
= control target key end

     0   :  { %s2630_s12 = smov 0   ;;  %s2632_s13 = smov 0   ;;  %s3191_s0 = inlined_call_operand.vmem [shape: bf16[1,8,128], index: 0, kind: input, shape index: {}]   ;;  %s3192_s1 = inlined_call_operand.vmem [shape: bf16[1,128,8192], index: 1, kind: input, shape index: {}]   ;;  %s3193_s2 = inlined_call_operand.vmem [shape: bf16[1,8,8192], index: 2, kind: output, shape index: {0}]   ;;  %s3194_s3 = inlined_call_operand.vmem [shape: f32[1,1,2,8192], index: 3, kind: output, shape index: {1}]  }
   0x1   :  { %s2634_s14 = smov 0   ;;  %s2636_s15 = smov 0  }
   0x2   :  { %s2638_s16 = smov 0  }
   0x3 LB: > { %s26_s17 = sadd.s32 1, %s2602_s15  ;;  %p77_p1 = scmp.ne.s32.totalorder %s2594_s13, %s2590_s12  ;;  %s2606_s16 = sphi %s2638_s16, %s14_s16   ;;  %s2602_s15 = sphi %s2636_s15, %s3198_s15   ;;  %s2598_s14 = sphi %s2634_s14, %s3197_s14   ;;  %s2594_s13 = sphi %s2632_s13, %s3196_s13   ;;  %s2590_s12 = sphi %s2630_s12, %s3195_s12  }
   0x4   : > { %p27_p0 = scmp.ge.s32.totalorder %s26_s17, 4  ;;  %p78_p2 = scmp.eq.s32.totalorder %s2606_s16, 0 }
   0x5   : > { %s70_s19 = sadd.s32 1, %s2594_s13  ;;  %p2366_p5 = scmp.ge.s32.totalorder %s2606_s16, 4 }
   0x6   : > { %s3200_s17 = smov (%p27_p0, %s26_s17), 0  ;;  %p79_p3 = por %p78_p2, %p77_p1 }
   0x7   : > { %s66_s18 = ssub.s32 %s2602_s15, %s3200_s17  ;;  %173 = sbr.rel (%p2366_p5) target bundleno = 82 (0x52), region = 20 }
   0x8   : > { %p68_p4 = scmp.eq.s32.totalorder %s66_s18, 0 }
   0xa   : > { %s2665_s20 = scalar_select %p68_p4, %s2594_s13, %s70_s19  }
   0xe   : > { %176 = sbr.rel (!%p79_p3) target bundleno = 82 (0x52), region = 24  ;;  %s178_s21 = sand.u32 (%p79_p3), 1, %s2594_s13  }
   0xf   : > { %s2517_s22 = sshll.u32 (%p79_p3), %s2602_s15, 6  ;;  %s2367_s23 = sshll.u32 (%p79_p3), %s178_s21, 10 }
  0x10   : > { %s2673_s26 = scalar_lea.vmem (%p79_p3), %s3192_s1, %s2517_s22  ;;  %s2678_s27 = scalar_lea.vmem (%p79_p3), [#allocation2], %s2367_s23 }
  0x11   : > { %v198_v0 = vld [vmem:[%s2673_s26] sm:$0xff] (%p79_p3)  ;;  %v200_v1 = vld [vmem:[%s2673_s26 + $0x8] sm:$0xff] (%p79_p3)  ;;  %v202_v2 = vld [vmem:[%s2673_s26 + $0x10] sm:$0xff] (%p79_p3) }
  0x12   : > { %199 = vst [vmem:[%s2678_s27] sm:$0xff] (%p79_p3), %v198_v0  ;;  %201 = vst [vmem:[%s2678_s27 + $0x8] sm:$0xff] (%p79_p3), %v200_v1  ;;  %v204_v3 = vld [vmem:[%s2673_s26 + $0x18] sm:$0xff] (%p79_p3)  ;;  %v206_v4 = vld [vmem:[%s2673_s26 + $0x20] sm:$0xff] (%p79_p3) }
  0x13   : > { %203 = vst [vmem:[%s2678_s27 + $0x10] sm:$0xff] (%p79_p3), %v202_v2  ;;  %v208_v5 = vld [vmem:[%s2673_s26 + $0x28] sm:$0xff] (%p79_p3)  ;;  %205 = vst [vmem:[%s2678_s27 + $0x18] sm:$0xff] (%p79_p3), %v204_v3  ;;  %v210_v6 = vld [vmem:[%s2673_s26 + $0x30] sm:$0xff] (%p79_p3) }
  0x14   : > { %207 = vst [vmem:[%s2678_s27 + $0x20] sm:$0xff] (%p79_p3), %v206_v4  ;;  %209 = vst [vmem:[%s2678_s27 + $0x28] sm:$0xff] (%p79_p3), %v208_v5  ;;  %v212_v7 = vld [vmem:[%s2673_s26 + $0x38] sm:$0xff] (%p79_p3)  ;;  %v214_v8 = vld [vmem:[%s2673_s26 + $0x100] sm:$0xff] (%p79_p3) }
  0x15   : > { %211 = vst [vmem:[%s2678_s27 + $0x30] sm:$0xff] %v210_v6  ;;  %213 = vst [vmem:[%s2678_s27 + $0x38] sm:$0xff] %v212_v7  ;;  %v216_v9 = vld [vmem:[%s2673_s26 + $0x108] sm:$0xff]  ;;  %v218_v10 = vld [vmem:[%s2673_s26 + $0x110] sm:$0xff] }
  0x16   : > { %215 = vst [vmem:[%s2678_s27 + $0x40] sm:$0xff] %v214_v8  ;;  %v220_v11 = vld [vmem:[%s2673_s26 + $0x118] sm:$0xff]  ;;  %217 = vst [vmem:[%s2678_s27 + $0x48] sm:$0xff] %v216_v9  ;;  %v222_v12 = vld [vmem:[%s2673_s26 + $0x120] sm:$0xff] }
  0x17   : > { %219 = vst [vmem:[%s2678_s27 + $0x50] sm:$0xff] %v218_v10  ;;  %221 = vst [vmem:[%s2678_s27 + $0x58] sm:$0xff] %v220_v11  ;;  %v224_v13 = vld [vmem:[%s2673_s26 + $0x128] sm:$0xff]  ;;  %v226_v14 = vld [vmem:[%s2673_s26 + $0x130] sm:$0xff] }
  0x18   : > { %223 = vst [vmem:[%s2678_s27 + $0x60] sm:$0xff] %v222_v12  ;;  %225 = vst [vmem:[%s2678_s27 + $0x68] sm:$0xff] %v224_v13  ;;  %v228_v15 = vld [vmem:[%s2673_s26 + $0x138] sm:$0xff]  ;;  %v230_v16 = vld [vmem:[%s2673_s26 + $0x200] sm:$0xff] }
  0x19   : > { %227 = vst [vmem:[%s2678_s27 + $0x70] sm:$0xff] %v226_v14  ;;  %v232_v17 = vld [vmem:[%s2673_s26 + $0x208] sm:$0xff]  ;;  %229 = vst [vmem:[%s2678_s27 + $0x78] sm:$0xff] %v228_v15  ;;  %v234_v18 = vld [vmem:[%s2673_s26 + $0x210] sm:$0xff] }
  0x1a   : > { %231 = vst [vmem:[%s2678_s27 + $0x80] sm:$0xff] %v230_v16  ;;  %233 = vst [vmem:[%s2678_s27 + $0x88] sm:$0xff] %v232_v17  ;;  %v236_v19 = vld [vmem:[%s2673_s26 + $0x218] sm:$0xff]  ;;  %v238_v20 = vld [vmem:[%s2673_s26 + $0x220] sm:$0xff] }
  0x1b   : > { %235 = vst [vmem:[%s2678_s27 + $0x90] sm:$0xff] %v234_v18  ;;  %237 = vst [vmem:[%s2678_s27 + $0x98] sm:$0xff] %v236_v19  ;;  %v240_v21 = vld [vmem:[%s2673_s26 + $0x228] sm:$0xff]  ;;  %v242_v22 = vld [vmem:[%s2673_s26 + $0x230] sm:$0xff] }
  0x1c   : > { %239 = vst [vmem:[%s2678_s27 + $0xa0] sm:$0xff] %v238_v20  ;;  %v244_v23 = vld [vmem:[%s2673_s26 + $0x238] sm:$0xff]  ;;  %241 = vst [vmem:[%s2678_s27 + $0xa8] sm:$0xff] %v240_v21  ;;  %v246_v24 = vld [vmem:[%s2673_s26 + $0x300] sm:$0xff] }
  0x1d   : > { %243 = vst [vmem:[%s2678_s27 + $0xb0] sm:$0xff] %v242_v22  ;;  %245 = vst [vmem:[%s2678_s27 + $0xb8] sm:$0xff] %v244_v23  ;;  %v248_v25 = vld [vmem:[%s2673_s26 + $0x308] sm:$0xff]  ;;  %v250_v26 = vld [vmem:[%s2673_s26 + $0x310] sm:$0xff] }
  0x1e   : > { %247 = vst [vmem:[%s2678_s27 + $0xc0] sm:$0xff] %v246_v24  ;;  %249 = vst [vmem:[%s2678_s27 + $0xc8] sm:$0xff] %v248_v25  ;;  %v252_v27 = vld [vmem:[%s2673_s26 + $0x318] sm:$0xff]  ;;  %v254_v28 = vld [vmem:[%s2673_s26 + $0x320] sm:$0xff] }
  0x1f   : > { %251 = vst [vmem:[%s2678_s27 + $0xd0] sm:$0xff] %v250_v26  ;;  %v256_v29 = vld [vmem:[%s2673_s26 + $0x328] sm:$0xff]  ;;  %253 = vst [vmem:[%s2678_s27 + $0xd8] sm:$0xff] %v252_v27  ;;  %v258_v30 = vld [vmem:[%s2673_s26 + $0x330] sm:$0xff] }
  0x20   : > { %255 = vst [vmem:[%s2678_s27 + $0xe0] sm:$0xff] %v254_v28  ;;  %257 = vst [vmem:[%s2678_s27 + $0xe8] sm:$0xff] %v256_v29  ;;  %v260_v31 = vld [vmem:[%s2673_s26 + $0x338] sm:$0xff]  ;;  %v262_v32 = vld [vmem:[%s2673_s26 + $0x400] sm:$0xff] }
  0x21   : > { %259 = vst [vmem:[%s2678_s27 + $0xf0] sm:$0xff] %v258_v30  ;;  %261 = vst [vmem:[%s2678_s27 + $0xf8] sm:$0xff] %v260_v31  ;;  %v264_v33 = vld [vmem:[%s2673_s26 + $0x408] sm:$0xff]  ;;  %v266_v34 = vld [vmem:[%s2673_s26 + $0x410] sm:$0xff] }
  0x22   : > { %263 = vst [vmem:[%s2678_s27 + $0x100] sm:$0xff] %v262_v32  ;;  %v268_v35 = vld [vmem:[%s2673_s26 + $0x418] sm:$0xff]  ;;  %265 = vst [vmem:[%s2678_s27 + $0x108] sm:$0xff] %v264_v33  ;;  %v270_v36 = vld [vmem:[%s2673_s26 + $0x420] sm:$0xff] }
  0x23   : > { %267 = vst [vmem:[%s2678_s27 + $0x110] sm:$0xff] %v266_v34  ;;  %269 = vst [vmem:[%s2678_s27 + $0x118] sm:$0xff] %v268_v35  ;;  %v272_v37 = vld [vmem:[%s2673_s26 + $0x428] sm:$0xff]  ;;  %v274_v38 = vld [vmem:[%s2673_s26 + $0x430] sm:$0xff] }
  0x24   : > { %271 = vst [vmem:[%s2678_s27 + $0x120] sm:$0xff] %v270_v36  ;;  %273 = vst [vmem:[%s2678_s27 + $0x128] sm:$0xff] %v272_v37  ;;  %v276_v39 = vld [vmem:[%s2673_s26 + $0x438] sm:$0xff]  ;;  %v278_v40 = vld [vmem:[%s2673_s26 + $0x500] sm:$0xff] }
  0x25   : > { %275 = vst [vmem:[%s2678_s27 + $0x130] sm:$0xff] %v274_v38  ;;  %v280_v41 = vld [vmem:[%s2673_s26 + $0x508] sm:$0xff]  ;;  %277 = vst [vmem:[%s2678_s27 + $0x138] sm:$0xff] %v276_v39  ;;  %v282_v42 = vld [vmem:[%s2673_s26 + $0x510] sm:$0xff] }
  0x26   : > { %279 = vst [vmem:[%s2678_s27 + $0x140] sm:$0xff] %v278_v40  ;;  %281 = vst [vmem:[%s2678_s27 + $0x148] sm:$0xff] %v280_v41  ;;  %v284_v43 = vld [vmem:[%s2673_s26 + $0x518] sm:$0xff]  ;;  %v286_v44 = vld [vmem:[%s2673_s26 + $0x520] sm:$0xff] }
  0x27   : > { %283 = vst [vmem:[%s2678_s27 + $0x150] sm:$0xff] %v282_v42  ;;  %285 = vst [vmem:[%s2678_s27 + $0x158] sm:$0xff] %v284_v43  ;;  %v288_v45 = vld [vmem:[%s2673_s26 + $0x528] sm:$0xff]  ;;  %v290_v46 = vld [vmem:[%s2673_s26 + $0x530] sm:$0xff] }
  0x28   : > { %287 = vst [vmem:[%s2678_s27 + $0x160] sm:$0xff] %v286_v44  ;;  %v292_v47 = vld [vmem:[%s2673_s26 + $0x538] sm:$0xff]  ;;  %289 = vst [vmem:[%s2678_s27 + $0x168] sm:$0xff] %v288_v45  ;;  %v294_v48 = vld [vmem:[%s2673_s26 + $0x600] sm:$0xff] }
  0x29   : > { %291 = vst [vmem:[%s2678_s27 + $0x170] sm:$0xff] %v290_v46  ;;  %293 = vst [vmem:[%s2678_s27 + $0x178] sm:$0xff] %v292_v47  ;;  %v296_v49 = vld [vmem:[%s2673_s26 + $0x608] sm:$0xff]  ;;  %v298_v50 = vld [vmem:[%s2673_s26 + $0x610] sm:$0xff] }
  0x2a   : > { %295 = vst [vmem:[%s2678_s27 + $0x180] sm:$0xff] %v294_v48  ;;  %297 = vst [vmem:[%s2678_s27 + $0x188] sm:$0xff] %v296_v49  ;;  %v300_v51 = vld [vmem:[%s2673_s26 + $0x618] sm:$0xff]  ;;  %v302_v52 = vld [vmem:[%s2673_s26 + $0x620] sm:$0xff] }
  0x2b   : > { %299 = vst [vmem:[%s2678_s27 + $0x190] sm:$0xff] %v298_v50  ;;  %v304_v53 = vld [vmem:[%s2673_s26 + $0x628] sm:$0xff]  ;;  %301 = vst [vmem:[%s2678_s27 + $0x198] sm:$0xff] %v300_v51  ;;  %v306_v54 = vld [vmem:[%s2673_s26 + $0x630] sm:$0xff] }
  0x2c   : > { %303 = vst [vmem:[%s2678_s27 + $0x1a0] sm:$0xff] %v302_v52  ;;  %305 = vst [vmem:[%s2678_s27 + $0x1a8] sm:$0xff] %v304_v53  ;;  %v308_v55 = vld [vmem:[%s2673_s26 + $0x638] sm:$0xff]  ;;  %v310_v56 = vld [vmem:[%s2673_s26 + $0x700] sm:$0xff] }
  0x2d   : > { %307 = vst [vmem:[%s2678_s27 + $0x1b0] sm:$0xff] %v306_v54  ;;  %309 = vst [vmem:[%s2678_s27 + $0x1b8] sm:$0xff] %v308_v55  ;;  %v312_v57 = vld [vmem:[%s2673_s26 + $0x708] sm:$0xff]  ;;  %v314_v58 = vld [vmem:[%s2673_s26 + $0x710] sm:$0xff] }
  0x2e   : > { %311 = vst [vmem:[%s2678_s27 + $0x1c0] sm:$0xff] %v310_v56  ;;  %v316_v59 = vld [vmem:[%s2673_s26 + $0x718] sm:$0xff]  ;;  %313 = vst [vmem:[%s2678_s27 + $0x1c8] sm:$0xff] %v312_v57  ;;  %v318_v60 = vld [vmem:[%s2673_s26 + $0x720] sm:$0xff] }
  0x2f   : > { %315 = vst [vmem:[%s2678_s27 + $0x1d0] sm:$0xff] %v314_v58  ;;  %317 = vst [vmem:[%s2678_s27 + $0x1d8] sm:$0xff] %v316_v59  ;;  %v320_v61 = vld [vmem:[%s2673_s26 + $0x728] sm:$0xff]  ;;  %v322_v62 = vld [vmem:[%s2673_s26 + $0x730] sm:$0xff] }
  0x30   : > { %319 = vst [vmem:[%s2678_s27 + $0x1e0] sm:$0xff] %v318_v60  ;;  %321 = vst [vmem:[%s2678_s27 + $0x1e8] sm:$0xff] %v320_v61  ;;  %v324_v63 = vld [vmem:[%s2673_s26 + $0x738] sm:$0xff]  ;;  %v326_v0 = vld [vmem:[%s2673_s26 + $0x800] sm:$0xff] }
  0x31   : > { %323 = vst [vmem:[%s2678_s27 + $0x1f0] sm:$0xff] %v322_v62  ;;  %v328_v1 = vld [vmem:[%s2673_s26 + $0x808] sm:$0xff]  ;;  %325 = vst [vmem:[%s2678_s27 + $0x1f8] sm:$0xff] %v324_v63  ;;  %v330_v2 = vld [vmem:[%s2673_s26 + $0x810] sm:$0xff] }
  0x32   : > { %327 = vst [vmem:[%s2678_s27 + $0x200] sm:$0xff] %v326_v0  ;;  %329 = vst [vmem:[%s2678_s27 + $0x208] sm:$0xff] %v328_v1  ;;  %v332_v3 = vld [vmem:[%s2673_s26 + $0x818] sm:$0xff]  ;;  %v334_v4 = vld [vmem:[%s2673_s26 + $0x820] sm:$0xff] }
  0x33   : > { %331 = vst [vmem:[%s2678_s27 + $0x210] sm:$0xff] %v330_v2  ;;  %333 = vst [vmem:[%s2678_s27 + $0x218] sm:$0xff] %v332_v3  ;;  %v336_v5 = vld [vmem:[%s2673_s26 + $0x828] sm:$0xff]  ;;  %v338_v6 = vld [vmem:[%s2673_s26 + $0x830] sm:$0xff] }
  0x34   : > { %335 = vst [vmem:[%s2678_s27 + $0x220] sm:$0xff] %v334_v4  ;;  %v340_v7 = vld [vmem:[%s2673_s26 + $0x838] sm:$0xff]  ;;  %337 = vst [vmem:[%s2678_s27 + $0x228] sm:$0xff] %v336_v5  ;;  %v342_v8 = vld [vmem:[%s2673_s26 + $0x900] sm:$0xff] }
  0x35   : > { %339 = vst [vmem:[%s2678_s27 + $0x230] sm:$0xff] %v338_v6  ;;  %341 = vst [vmem:[%s2678_s27 + $0x238] sm:$0xff] %v340_v7  ;;  %v344_v9 = vld [vmem:[%s2673_s26 + $0x908] sm:$0xff]  ;;  %v346_v10 = vld [vmem:[%s2673_s26 + $0x910] sm:$0xff] }
  0x36   : > { %343 = vst [vmem:[%s2678_s27 + $0x240] sm:$0xff] %v342_v8  ;;  %345 = vst [vmem:[%s2678_s27 + $0x248] sm:$0xff] %v344_v9  ;;  %v348_v11 = vld [vmem:[%s2673_s26 + $0x918] sm:$0xff]  ;;  %v350_v12 = vld [vmem:[%s2673_s26 + $0x920] sm:$0xff] }
  0x37   : > { %347 = vst [vmem:[%s2678_s27 + $0x250] sm:$0xff] %v346_v10  ;;  %v352_v13 = vld [vmem:[%s2673_s26 + $0x928] sm:$0xff]  ;;  %349 = vst [vmem:[%s2678_s27 + $0x258] sm:$0xff] %v348_v11  ;;  %v354_v14 = vld [vmem:[%s2673_s26 + $0x930] sm:$0xff] }
  0x38   : > { %351 = vst [vmem:[%s2678_s27 + $0x260] sm:$0xff] %v350_v12  ;;  %353 = vst [vmem:[%s2678_s27 + $0x268] sm:$0xff] %v352_v13  ;;  %v356_v15 = vld [vmem:[%s2673_s26 + $0x938] sm:$0xff]  ;;  %v358_v16 = vld [vmem:[%s2673_s26 + $0xa00] sm:$0xff] }
  0x39   : > { %355 = vst [vmem:[%s2678_s27 + $0x270] sm:$0xff] %v354_v14  ;;  %357 = vst [vmem:[%s2678_s27 + $0x278] sm:$0xff] %v356_v15  ;;  %v360_v17 = vld [vmem:[%s2673_s26 + $0xa08] sm:$0xff]  ;;  %v362_v18 = vld [vmem:[%s2673_s26 + $0xa10] sm:$0xff] }
  0x3a   : > { %359 = vst [vmem:[%s2678_s27 + $0x280] sm:$0xff] %v358_v16  ;;  %v364_v19 = vld [vmem:[%s2673_s26 + $0xa18] sm:$0xff]  ;;  %361 = vst [vmem:[%s2678_s27 + $0x288] sm:$0xff] %v360_v17  ;;  %v366_v20 = vld [vmem:[%s2673_s26 + $0xa20] sm:$0xff] }
  0x3b   : > { %363 = vst [vmem:[%s2678_s27 + $0x290] sm:$0xff] %v362_v18  ;;  %365 = vst [vmem:[%s2678_s27 + $0x298] sm:$0xff] %v364_v19  ;;  %v368_v21 = vld [vmem:[%s2673_s26 + $0xa28] sm:$0xff]  ;;  %v370_v22 = vld [vmem:[%s2673_s26 + $0xa30] sm:$0xff] }
  0x3c   : > { %367 = vst [vmem:[%s2678_s27 + $0x2a0] sm:$0xff] %v366_v20  ;;  %369 = vst [vmem:[%s2678_s27 + $0x2a8] sm:$0xff] %v368_v21  ;;  %v372_v23 = vld [vmem:[%s2673_s26 + $0xa38] sm:$0xff]  ;;  %v374_v24 = vld [vmem:[%s2673_s26 + $0xb00] sm:$0xff] }
  0x3d   : > { %371 = vst [vmem:[%s2678_s27 + $0x2b0] sm:$0xff] %v370_v22  ;;  %v376_v25 = vld [vmem:[%s2673_s26 + $0xb08] sm:$0xff]  ;;  %373 = vst [vmem:[%s2678_s27 + $0x2b8] sm:$0xff] %v372_v23  ;;  %v378_v26 = vld [vmem:[%s2673_s26 + $0xb10] sm:$0xff] }
  0x3e   : > { %375 = vst [vmem:[%s2678_s27 + $0x2c0] sm:$0xff] %v374_v24  ;;  %377 = vst [vmem:[%s2678_s27 + $0x2c8] sm:$0xff] %v376_v25  ;;  %v380_v27 = vld [vmem:[%s2673_s26 + $0xb18] sm:$0xff]  ;;  %v382_v28 = vld [vmem:[%s2673_s26 + $0xb20] sm:$0xff] }
  0x3f   : > { %379 = vst [vmem:[%s2678_s27 + $0x2d0] sm:$0xff] %v378_v26  ;;  %381 = vst [vmem:[%s2678_s27 + $0x2d8] sm:$0xff] %v380_v27  ;;  %v384_v29 = vld [vmem:[%s2673_s26 + $0xb28] sm:$0xff]  ;;  %v386_v30 = vld [vmem:[%s2673_s26 + $0xb30] sm:$0xff] }
  0x40   : > { %383 = vst [vmem:[%s2678_s27 + $0x2e0] sm:$0xff] %v382_v28  ;;  %v388_v31 = vld [vmem:[%s2673_s26 + $0xb38] sm:$0xff]  ;;  %385 = vst [vmem:[%s2678_s27 + $0x2e8] sm:$0xff] %v384_v29  ;;  %v390_v32 = vld [vmem:[%s2673_s26 + $0xc00] sm:$0xff] }
  0x41   : > { %387 = vst [vmem:[%s2678_s27 + $0x2f0] sm:$0xff] %v386_v30  ;;  %389 = vst [vmem:[%s2678_s27 + $0x2f8] sm:$0xff] %v388_v31  ;;  %v392_v33 = vld [vmem:[%s2673_s26 + $0xc08] sm:$0xff]  ;;  %v394_v34 = vld [vmem:[%s2673_s26 + $0xc10] sm:$0xff] }
  0x42   : > { %391 = vst [vmem:[%s2678_s27 + $0x300] sm:$0xff] %v390_v32  ;;  %393 = vst [vmem:[%s2678_s27 + $0x308] sm:$0xff] %v392_v33  ;;  %v396_v35 = vld [vmem:[%s2673_s26 + $0xc18] sm:$0xff]  ;;  %v398_v36 = vld [vmem:[%s2673_s26 + $0xc20] sm:$0xff] }
  0x43   : > { %395 = vst [vmem:[%s2678_s27 + $0x310] sm:$0xff] %v394_v34  ;;  %v400_v37 = vld [vmem:[%s2673_s26 + $0xc28] sm:$0xff]  ;;  %397 = vst [vmem:[%s2678_s27 + $0x318] sm:$0xff] %v396_v35  ;;  %v402_v38 = vld [vmem:[%s2673_s26 + $0xc30] sm:$0xff] }
  0x44   : > { %399 = vst [vmem:[%s2678_s27 + $0x320] sm:$0xff] %v398_v36  ;;  %401 = vst [vmem:[%s2678_s27 + $0x328] sm:$0xff] %v400_v37  ;;  %v404_v39 = vld [vmem:[%s2673_s26 + $0xc38] sm:$0xff]  ;;  %v406_v40 = vld [vmem:[%s2673_s26 + $0xd00] sm:$0xff] }
  0x45   : > { %403 = vst [vmem:[%s2678_s27 + $0x330] sm:$0xff] %v402_v38  ;;  %405 = vst [vmem:[%s2678_s27 + $0x338] sm:$0xff] %v404_v39  ;;  %v408_v41 = vld [vmem:[%s2673_s26 + $0xd08] sm:$0xff]  ;;  %v410_v42 = vld [vmem:[%s2673_s26 + $0xd10] sm:$0xff] }
  0x46   : > { %407 = vst [vmem:[%s2678_s27 + $0x340] sm:$0xff] %v406_v40  ;;  %v412_v43 = vld [vmem:[%s2673_s26 + $0xd18] sm:$0xff]  ;;  %409 = vst [vmem:[%s2678_s27 + $0x348] sm:$0xff] %v408_v41  ;;  %v414_v44 = vld [vmem:[%s2673_s26 + $0xd20] sm:$0xff] }
  0x47   : > { %411 = vst [vmem:[%s2678_s27 + $0x350] sm:$0xff] %v410_v42  ;;  %413 = vst [vmem:[%s2678_s27 + $0x358] sm:$0xff] %v412_v43  ;;  %v416_v45 = vld [vmem:[%s2673_s26 + $0xd28] sm:$0xff]  ;;  %v418_v46 = vld [vmem:[%s2673_s26 + $0xd30] sm:$0xff] }
  0x48   : > { %415 = vst [vmem:[%s2678_s27 + $0x360] sm:$0xff] %v414_v44  ;;  %417 = vst [vmem:[%s2678_s27 + $0x368] sm:$0xff] %v416_v45  ;;  %v420_v47 = vld [vmem:[%s2673_s26 + $0xd38] sm:$0xff]  ;;  %v422_v48 = vld [vmem:[%s2673_s26 + $0xe00] sm:$0xff] }
  0x49   : > { %419 = vst [vmem:[%s2678_s27 + $0x370] sm:$0xff] %v418_v46  ;;  %v424_v49 = vld [vmem:[%s2673_s26 + $0xe08] sm:$0xff]  ;;  %421 = vst [vmem:[%s2678_s27 + $0x378] sm:$0xff] %v420_v47  ;;  %v426_v50 = vld [vmem:[%s2673_s26 + $0xe10] sm:$0xff] }
  0x4a   : > { %423 = vst [vmem:[%s2678_s27 + $0x380] sm:$0xff] %v422_v48  ;;  %425 = vst [vmem:[%s2678_s27 + $0x388] sm:$0xff] %v424_v49  ;;  %v428_v51 = vld [vmem:[%s2673_s26 + $0xe18] sm:$0xff]  ;;  %v430_v52 = vld [vmem:[%s2673_s26 + $0xe20] sm:$0xff] }
  0x4b   : > { %427 = vst [vmem:[%s2678_s27 + $0x390] sm:$0xff] %v426_v50  ;;  %429 = vst [vmem:[%s2678_s27 + $0x398] sm:$0xff] %v428_v51  ;;  %v432_v53 = vld [vmem:[%s2673_s26 + $0xe28] sm:$0xff]  ;;  %v434_v54 = vld [vmem:[%s2673_s26 + $0xe30] sm:$0xff] }
  0x4c   : > { %431 = vst [vmem:[%s2678_s27 + $0x3a0] sm:$0xff] %v430_v52  ;;  %v436_v55 = vld [vmem:[%s2673_s26 + $0xe38] sm:$0xff]  ;;  %433 = vst [vmem:[%s2678_s27 + $0x3a8] sm:$0xff] %v432_v53  ;;  %v438_v56 = vld [vmem:[%s2673_s26 + $0xf00] sm:$0xff] }
  0x4d   : > { %435 = vst [vmem:[%s2678_s27 + $0x3b0] sm:$0xff] %v434_v54  ;;  %437 = vst [vmem:[%s2678_s27 + $0x3b8] sm:$0xff] %v436_v55  ;;  %v440_v57 = vld [vmem:[%s2673_s26 + $0xf08] sm:$0xff]  ;;  %v442_v58 = vld [vmem:[%s2673_s26 + $0xf10] sm:$0xff] }
  0x4e   : > { %439 = vst [vmem:[%s2678_s27 + $0x3c0] sm:$0xff] %v438_v56  ;;  %441 = vst [vmem:[%s2678_s27 + $0x3c8] sm:$0xff] %v440_v57  ;;  %v444_v59 = vld [vmem:[%s2673_s26 + $0xf18] sm:$0xff]  ;;  %v446_v60 = vld [vmem:[%s2673_s26 + $0xf20] sm:$0xff] }
  0x4f   : > { %443 = vst [vmem:[%s2678_s27 + $0x3d0] sm:$0xff] %v442_v58  ;;  %v448_v61 = vld [vmem:[%s2673_s26 + $0xf28] sm:$0xff]  ;;  %445 = vst [vmem:[%s2678_s27 + $0x3d8] sm:$0xff] %v444_v59  ;;  %v450_v62 = vld [vmem:[%s2673_s26 + $0xf30] sm:$0xff] }
  0x50   : > { %447 = vst [vmem:[%s2678_s27 + $0x3e0] sm:$0xff] %v446_v60  ;;  %449 = vst [vmem:[%s2678_s27 + $0x3e8] sm:$0xff] %v448_v61  ;;  %v452_v63 = vld [vmem:[%s2673_s26 + $0xf38] sm:$0xff] }
  0x51   : > { %451 = vst [vmem:[%s2678_s27 + $0x3f0] sm:$0xff] %v450_v62  ;;  %453 = vst [vmem:[%s2678_s27 + $0x3f8] sm:$0xff] %v452_v63 }
  0x52 PF: > { %p2370_p6 = scmp.ge.s32.totalorder %s2606_s16, 1  ;;  %p458_p7 = scmp.lt.s32.totalorder %s2606_s16, 5 }
  0x54   : > { %p459_p8 = pnand %p2370_p6, %p458_p7 }
  0x55   : > { %s465_s28 = sand.u32 (!%p459_p8), 1, %s2590_s12   ;;  %v2608_v0 = vmov (!%p459_p8), 0   ;;  %s2372_s6 = sshll.u32 (!%p459_p8), %s2598_s14, 4 }
  0x56   : > { %462 = sbr.rel (%p459_p8) target bundleno = 460 (0x1cc), region = 47  ;;  %s2371_s29 = sshll.u32 (!%p459_p8), %s465_s28, 10  ;;  %1354 = vmatprep.mubr.bf16.mxu0 (!%p459_p8), %v2608_v0  ;;  %1395 = vmatprep.mubr.bf16.mxu1 (!%p459_p8), %v2608_v0 }
  0x57   : > { %s2938_s30 = scalar_lea.vmem (!%p459_p8), [#allocation2], %s2371_s29  ;;  %p529_p9 = scmp.lt.s32.totalorder (!%p459_p8), %s2372_s6, 63 }
  0x58   : > { %v554_v1 = vld [vmem:[%s2938_s30] sm:$0xff] (!%p459_p8)  ;;  %v555_v3 = vld [vmem:[%s2938_s30 + $0x8] sm:$0xff] (!%p459_p8)  ;;  %v556_v63 = vld [vmem:[%s2938_s30 + $0x10] sm:$0xff] (!%p459_p8) }
  0x59   : > { %v562_v2 = vld [vmem:[%s2938_s30 + $0x40] sm:$0xff] (!%p459_p8)  ;;  %v563_v5 = vld [vmem:[%s2938_s30 + $0x48] sm:$0xff] (!%p459_p8) }
  0x5a   : > { %v2377_v4 = vcombine.high (!%p459_p8), %v554_v1, %v562_v2  ;;  %v2376_v6 = vcombine.low (!%p459_p8), %v554_v1, %v562_v2  ;;  %v570_v7 = vld [vmem:[%s2938_s30 + $0x80] sm:$0xff] (!%p459_p8)  ;;  %v2379_v9 = vcombine.high (!%p459_p8), %v555_v3, %v563_v5  ;;  %v2378_v10 = vcombine.low (!%p459_p8), %v555_v3, %v563_v5  ;;  %v571_v12 = vld [vmem:[%s2938_s30 + $0x88] sm:$0xff] (!%p459_p8)  ;;  %v564_v1 = vld [vmem:[%s2938_s30 + $0x50] sm:$0xff] (!%p459_p8) }
  0x5b   : > { %v578_v8 = vld [vmem:[%s2938_s30 + $0xc0] sm:$0xff] (!%p459_p8)  ;;  %v579_v13 = vld [vmem:[%s2938_s30 + $0xc8] sm:$0xff] (!%p459_p8)  ;;  %v557_v2 = vld [vmem:[%s2938_s30 + $0x18] sm:$0xff] (!%p459_p8) }
  0x5c   : > { %v2393_v11 = vcombine.high (!%p459_p8), %v570_v7, %v578_v8  ;;  %v586_v14 = vld [vmem:[%s2938_s30 + $0x100] sm:$0xff] (!%p459_p8)  ;;  %1322 = vmatprep.subr.bf16.mxu0 (!%p459_p8), %v2377_v4  ;;  %v2395_v15 = vcombine.high (!%p459_p8), %v571_v12, %v579_v13  ;;  %v587_v17 = vld [vmem:[%s2938_s30 + $0x108] sm:$0xff] (!%p459_p8)  ;;  %1363 = vmatprep.subr.bf16.mxu1 (!%p459_p8), %v2379_v9  ;;  %v2392_v19 = vcombine.low (!%p459_p8), %v570_v7, %v578_v8  ;;  %v565_v3 = vld [vmem:[%s2938_s30 + $0x58] sm:$0xff] (!%p459_p8) }
  0x5d   : > { %v594_v16 = vld [vmem:[%s2938_s30 + $0x140] sm:$0xff]  ;;  %v595_v18 = vld [vmem:[%s2938_s30 + $0x148] sm:$0xff]  ;;  %1323 = vmatpush1.bf16.msra.mxu0 %v2376_v6  ;;  %1364 = vmatpush1.bf16.msra.mxu1 %v2378_v10  ;;  %v2394_v20 = vcombine.low %v571_v12, %v579_v13  ;;  %v2381_v6 = vcombine.high %v556_v63, %v564_v1  ;;  %v2383_v7 = vcombine.high %v557_v2, %v565_v3  ;;  %v572_v8 = vld [vmem:[%s2938_s30 + $0x90] sm:$0xff]  ;;  %s3202_s6 = smov (!%p529_p9, %s2372_s6), 63 }
  0x5e   : > { %1324 = vmatprep.subr.bf16.mxu0 %v2393_v11  ;;  %v2409_v21 = vcombine.high %v586_v14, %v594_v16  ;;  %1365 = vmatprep.subr.bf16.mxu1 %v2395_v15  ;;  %v2411_v22 = vcombine.high %v587_v17, %v595_v18  ;;  %v602_v23 = vld [vmem:[%s2938_s30 + $0x180] sm:$0xff]  ;;  %v603_v25 = vld [vmem:[%s2938_s30 + $0x188] sm:$0xff]  ;;  %v2408_v27 = vcombine.low %v586_v14, %v594_v16  ;;  %v580_v9 = vld [vmem:[%s2938_s30 + $0xd0] sm:$0xff]  ;;  %s2373_s7 = sshll.u32 %s3202_s6, 2  ;;  %s2375_s11 = sshll.u32 %s3202_s6, 1 }
  0x5f   : > { %v610_v24 = vld [vmem:[%s2938_s30 + $0x1c0] sm:$0xff]  ;;  %v611_v26 = vld [vmem:[%s2938_s30 + $0x1c8] sm:$0xff]  ;;  %v2410_v28 = vcombine.low %v587_v17, %v595_v18  ;;  %v573_v10 = vld [vmem:[%s2938_s30 + $0x98] sm:$0xff]  ;;  %v2380_v13 = vcombine.low %v556_v63, %v564_v1  ;;  %v2382_v14 = vcombine.low %v557_v2, %v565_v3  ;;  %v2397_v15 = vcombine.high %v572_v8, %v580_v9  ;;  %s3094_s10 = scalar_lea.vmem %s3193_s2, %s2373_s7  ;;  %s3131_s18 = scalar_lea.vmem %s3194_s3, %s2375_s11 }
  0x60   : > { %v2425_v29 = vcombine.high %v602_v23, %v610_v24  ;;  %v2427_v30 = vcombine.high %v603_v25, %v611_v26  ;;  %v618_v31 = vld [vmem:[%s2938_s30 + $0x200] sm:$0xff]  ;;  %v619_v33 = vld [vmem:[%s2938_s30 + $0x208] sm:$0xff]  ;;  %v2424_v35 = vcombine.low %v602_v23, %v610_v24  ;;  %v2426_v36 = vcombine.low %v603_v25, %v611_v26  ;;  %v581_v11 = vld [vmem:[%s2938_s30 + $0xd8] sm:$0xff] }
  0x61   : > { %1325 = vmatpush1.bf16.msra.mxu0 %v2392_v19  ;;  %1366 = vmatpush1.bf16.msra.mxu1 %v2394_v20  ;;  %v626_v32 = vld [vmem:[%s2938_s30 + $0x240] sm:$0xff]  ;;  %v627_v34 = vld [vmem:[%s2938_s30 + $0x248] sm:$0xff]  ;;  %v2399_v16 = vcombine.high %v573_v10, %v581_v11  ;;  %v588_v17 = vld [vmem:[%s2938_s30 + $0x110] sm:$0xff] }
  0x62   : > { %1326 = vmatprep.subr.bf16.mxu0 %v2409_v21  ;;  %1367 = vmatprep.subr.bf16.mxu1 %v2411_v22  ;;  %v2441_v37 = vcombine.high %v618_v31, %v626_v32  ;;  %v2443_v38 = vcombine.high %v619_v33, %v627_v34  ;;  %v634_v39 = vld [vmem:[%s2938_s30 + $0x280] sm:$0xff]  ;;  %v635_v41 = vld [vmem:[%s2938_s30 + $0x288] sm:$0xff]  ;;  %v2440_v43 = vcombine.low %v618_v31, %v626_v32  ;;  %v596_v18 = vld [vmem:[%s2938_s30 + $0x150] sm:$0xff] }
  0x63   : > { %v642_v40 = vld [vmem:[%s2938_s30 + $0x2c0] sm:$0xff]  ;;  %v643_v42 = vld [vmem:[%s2938_s30 + $0x2c8] sm:$0xff]  ;;  %v2442_v44 = vcombine.low %v619_v33, %v627_v34  ;;  %v589_v19 = vld [vmem:[%s2938_s30 + $0x118] sm:$0xff]  ;;  %v2396_v21 = vcombine.low %v572_v8, %v580_v9  ;;  %v2398_v22 = vcombine.low %v573_v10, %v581_v11  ;;  %v2413_v23 = vcombine.high %v588_v17, %v596_v18 }
  0x64   : > { %v2457_v45 = vcombine.high %v634_v39, %v642_v40  ;;  %v2459_v46 = vcombine.high %v635_v41, %v643_v42  ;;  %v650_v47 = vld [vmem:[%s2938_s30 + $0x300] sm:$0xff]  ;;  %v651_v49 = vld [vmem:[%s2938_s30 + $0x308] sm:$0xff]  ;;  %v2456_v51 = vcombine.low %v634_v39, %v642_v40  ;;  %v2458_v52 = vcombine.low %v635_v41, %v643_v42  ;;  %v597_v20 = vld [vmem:[%s2938_s30 + $0x158] sm:$0xff] }
  0x65   : > { %1327 = vmatpush1.bf16.msra.mxu0 %v2408_v27  ;;  %1368 = vmatpush1.bf16.msra.mxu1 %v2410_v28  ;;  %v658_v48 = vld [vmem:[%s2938_s30 + $0x340] sm:$0xff]  ;;  %v659_v50 = vld [vmem:[%s2938_s30 + $0x348] sm:$0xff]  ;;  %v2415_v24 = vcombine.high %v589_v19, %v597_v20  ;;  %v604_v25 = vld [vmem:[%s2938_s30 + $0x190] sm:$0xff] }
  0x66   : > { %1328 = vmatprep.subr.bf16.mxu0 %v2425_v29  ;;  %1369 = vmatprep.subr.bf16.mxu1 %v2427_v30  ;;  %v2473_v53 = vcombine.high %v650_v47, %v658_v48  ;;  %v2475_v54 = vcombine.high %v651_v49, %v659_v50  ;;  %v666_v55 = vld [vmem:[%s2938_s30 + $0x380] sm:$0xff]  ;;  %v667_v57 = vld [vmem:[%s2938_s30 + $0x388] sm:$0xff]  ;;  %v2472_v59 = vcombine.low %v650_v47, %v658_v48  ;;  %v612_v26 = vld [vmem:[%s2938_s30 + $0x1d0] sm:$0xff] }
  0x67   : > { %v674_v56 = vld [vmem:[%s2938_s30 + $0x3c0] sm:$0xff]  ;;  %v675_v58 = vld [vmem:[%s2938_s30 + $0x3c8] sm:$0xff]  ;;  %v2474_v60 = vcombine.low %v651_v49, %v659_v50  ;;  %v605_v27 = vld [vmem:[%s2938_s30 + $0x198] sm:$0xff]  ;;  %v2412_v29 = vcombine.low %v588_v17, %v596_v18  ;;  %v2414_v30 = vcombine.low %v589_v19, %v597_v20  ;;  %v2429_v31 = vcombine.high %v604_v25, %v612_v26 }
  0x68   : > { %v2489_v61 = vcombine.high %v666_v55, %v674_v56  ;;  %v2491_v62 = vcombine.high %v667_v57, %v675_v58  ;;  %v2488_v4 = vcombine.low %v666_v55, %v674_v56  ;;  %v2490_v5 = vcombine.low %v667_v57, %v675_v58  ;;  %v2983_v12 = vld [vmem:[%s3191_s0] sm:$0xf]  ;;  %v613_v28 = vld [vmem:[%s2938_s30 + $0x1d8] sm:$0xff]  ;;  %v620_v33 = vld [vmem:[%s2938_s30 + $0x210] sm:$0xff] }
  0x69   : > { %1329 = vmatpush1.bf16.msra.mxu0 %v2424_v35  ;;  %1370 = vmatpush1.bf16.msra.mxu1 %v2426_v36  ;;  %v2431_v32 = vcombine.high %v605_v27, %v613_v28  ;;  %v628_v34 = vld [vmem:[%s2938_s30 + $0x250] sm:$0xff]  ;;  %v621_v35 = vld [vmem:[%s2938_s30 + $0x218] sm:$0xff]  ;;  %v558_v2 = vld [vmem:[%s2938_s30 + $0x20] sm:$0xff] }
  0x6a   : > { %1330 = vmatprep.subr.bf16.mxu0 %v2441_v37  ;;  %1371 = vmatprep.subr.bf16.mxu1 %v2443_v38  ;;  %v629_v36 = vld [vmem:[%s2938_s30 + $0x258] sm:$0xff]  ;;  %v2428_v37 = vcombine.low %v604_v25, %v612_v26  ;;  %v2430_v38 = vcombine.low %v605_v27, %v613_v28  ;;  %v2445_v39 = vcombine.high %v620_v33, %v628_v34  ;;  %v636_v41 = vld [vmem:[%s2938_s30 + $0x290] sm:$0xff]  ;;  %v566_v3 = vld [vmem:[%s2938_s30 + $0x60] sm:$0xff] }
  0x6b   : > { %v2447_v40 = vcombine.high %v621_v35, %v629_v36  ;;  %v644_v42 = vld [vmem:[%s2938_s30 + $0x2d0] sm:$0xff]  ;;  %v2385_v8 = vcombine.high %v558_v2, %v566_v3  ;;  %v574_v10 = vld [vmem:[%s2938_s30 + $0xa0] sm:$0xff] }
  0x6c   : > { %v2461_v47 = vcombine.high %v636_v41, %v644_v42  ;;  %v652_v49 = vld [vmem:[%s2938_s30 + $0x310] sm:$0xff]  ;;  %v582_v11 = vld [vmem:[%s2938_s30 + $0xe0] sm:$0xff] }
  0x6d   : > { %1331 = vmatpush1.bf16.msra.mxu0 %v2440_v43  ;;  %1372 = vmatpush1.bf16.msra.mxu1 %v2442_v44  ;;  %v637_v43 = vld [vmem:[%s2938_s30 + $0x298] sm:$0xff]  ;;  %v660_v50 = vld [vmem:[%s2938_s30 + $0x350] sm:$0xff]  ;;  %v2401_v17 = vcombine.high %v574_v10, %v582_v11  ;;  %v590_v19 = vld [vmem:[%s2938_s30 + $0x120] sm:$0xff] }
  0x6e   : > { %1332 = vmatprep.subr.bf16.mxu0 %v2457_v45  ;;  %1373 = vmatprep.subr.bf16.mxu1 %v2459_v46  ;;  %v645_v44 = vld [vmem:[%s2938_s30 + $0x2d8] sm:$0xff]  ;;  %v2444_v45 = vcombine.low %v620_v33, %v628_v34  ;;  %v2446_v46 = vcombine.low %v621_v35, %v629_v36  ;;  %v2477_v55 = vcombine.high %v652_v49, %v660_v50  ;;  %v668_v57 = vld [vmem:[%s2938_s30 + $0x390] sm:$0xff]  ;;  %v598_v20 = vld [vmem:[%s2938_s30 + $0x160] sm:$0xff] }
  0x6f   : > { %v2463_v48 = vcombine.high %v637_v43, %v645_v44  ;;  %v676_v58 = vld [vmem:[%s2938_s30 + $0x3d0] sm:$0xff]  ;;  %v2417_v25 = vcombine.high %v590_v19, %v598_v20  ;;  %v606_v27 = vld [vmem:[%s2938_s30 + $0x1a0] sm:$0xff] }
  0x70   : > { %v2493_v63 = vcombine.high %v668_v57, %v676_v58  ;;  %v614_v28 = vld [vmem:[%s2938_s30 + $0x1e0] sm:$0xff] }
  0x71   : > { %1333 = vmatpush1.bf16.msra.mxu0 %v2456_v51  ;;  %1374 = vmatpush1.bf16.msra.mxu1 %v2458_v52  ;;  %v653_v51 = vld [vmem:[%s2938_s30 + $0x318] sm:$0xff]  ;;  %v2433_v33 = vcombine.high %v606_v27, %v614_v28  ;;  %v622_v35 = vld [vmem:[%s2938_s30 + $0x220] sm:$0xff] }
  0x72   : > { %1334 = vmatprep.subr.bf16.mxu0 %v2473_v53  ;;  %1375 = vmatprep.subr.bf16.mxu1 %v2475_v54  ;;  %v661_v52 = vld [vmem:[%s2938_s30 + $0x358] sm:$0xff]  ;;  %v2460_v53 = vcombine.low %v636_v41, %v644_v42  ;;  %v2462_v54 = vcombine.low %v637_v43, %v645_v44  ;;  %v630_v36 = vld [vmem:[%s2938_s30 + $0x260] sm:$0xff] }
  0x73   : > { %v2479_v56 = vcombine.high %v653_v51, %v661_v52  ;;  %v2449_v41 = vcombine.high %v622_v35, %v630_v36  ;;  %v638_v43 = vld [vmem:[%s2938_s30 + $0x2a0] sm:$0xff] }
  0x74   : > { %v646_v44 = vld [vmem:[%s2938_s30 + $0x2e0] sm:$0xff] }
  0x75   : > { %1335 = vmatpush1.bf16.msra.mxu0 %v2472_v59  ;;  %1376 = vmatpush1.bf16.msra.mxu1 %v2474_v60  ;;  %v669_v59 = vld [vmem:[%s2938_s30 + $0x398] sm:$0xff] }
  0x76   : > { %1336 = vmatprep.subr.bf16.mxu0 %v2489_v61  ;;  %1377 = vmatprep.subr.bf16.mxu1 %v2491_v62  ;;  %v677_v60 = vld [vmem:[%s2938_s30 + $0x3d8] sm:$0xff]  ;;  %v2476_v61 = vcombine.low %v652_v49, %v660_v50  ;;  %v2478_v62 = vcombine.low %v653_v51, %v661_v52  ;;  %v2465_v49 = vcombine.high %v638_v43, %v646_v44  ;;  %v654_v51 = vld [vmem:[%s2938_s30 + $0x320] sm:$0xff] }
  0x77   : > { %v2495_v1 = vcombine.high %v669_v59, %v677_v60  ;;  %v662_v52 = vld [vmem:[%s2938_s30 + $0x360] sm:$0xff] }
  0x79   : > { %1337 = vmatpush1.bf16.msra.mxu0 %v2488_v4  ;;  %1378 = vmatpush1.bf16.msra.mxu1 %v2490_v5  ;;  %v559_v4 = vld [vmem:[%s2938_s30 + $0x28] sm:$0xff] }
  0x7a   : > { %1404 = vmatprep.subr.bf16.mxu0 %v2381_v6  ;;  %1445 = vmatprep.subr.bf16.mxu1 %v2383_v7  ;;  %v567_v5 = vld [vmem:[%s2938_s30 + $0x68] sm:$0xff]  ;;  %v2492_v6 = vcombine.low %v668_v57, %v676_v58  ;;  %v2494_v7 = vcombine.low %v669_v59, %v677_v60  ;;  %v2481_v57 = vcombine.high %v654_v51, %v662_v52  ;;  %v670_v59 = vld [vmem:[%s2938_s30 + $0x3a0] sm:$0xff] }
  0x7b   : > { %v2387_v9 = vcombine.high %v559_v4, %v567_v5  ;;  %v678_v60 = vld [vmem:[%s2938_s30 + $0x3e0] sm:$0xff] }
  0x7c   : > { %1355 = vmatmul.mubr.bf16.vlgmr.msra.gmra.mrb[0].mxu0 %v2983_v12  ;;  %1396 = vmatmul.mubr.bf16.vlgmr.msra.gmra.mrb[0].mxu1 %v2983_v12 }
  0x7d   : > { %1405 = vmatpush1.bf16.msra.mxu0 %v2380_v13  ;;  %1446 = vmatpush1.bf16.msra.mxu1 %v2382_v14  ;;  %v575_v13 = vld [vmem:[%s2938_s30 + $0xa8] sm:$0xff] }
  0x7e   : > { %1406 = vmatprep.subr.bf16.mxu0 %v2397_v15  ;;  %1447 = vmatprep.subr.bf16.mxu1 %v2399_v16  ;;  %v583_v14 = vld [vmem:[%s2938_s30 + $0xe8] sm:$0xff]  ;;  %v2384_v15 = vcombine.low %v558_v2, %v566_v3  ;;  %v2386_v16 = vcombine.low %v559_v4, %v567_v5  ;;  %v2497_v2 = vcombine.high %v670_v59, %v678_v60  ;;  %v560_v4 = vld [vmem:[%s2938_s30 + $0x30] sm:$0xff] }
  0x7f   : > { %1436 = vmatprep.mubr.bf16.mxu0 %v2608_v0  ;;  %1477 = vmatprep.mubr.bf16.mxu1 %v2608_v0  ;;  %v2403_v18 = vcombine.high %v575_v13, %v583_v14  ;;  %v568_v5 = vld [vmem:[%s2938_s30 + $0x70] sm:$0xff] }
  0x81   : > { %1407 = vmatpush1.bf16.msra.mxu0 %v2396_v21  ;;  %1448 = vmatpush1.bf16.msra.mxu1 %v2398_v22  ;;  %v591_v21 = vld [vmem:[%s2938_s30 + $0x128] sm:$0xff] }
  0x82   : > { %1408 = vmatprep.subr.bf16.mxu0 %v2413_v23  ;;  %1449 = vmatprep.subr.bf16.mxu1 %v2415_v24  ;;  %v599_v22 = vld [vmem:[%s2938_s30 + $0x168] sm:$0xff]  ;;  %v2400_v23 = vcombine.low %v574_v10, %v582_v11  ;;  %v2402_v24 = vcombine.low %v575_v13, %v583_v14  ;;  %v2389_v10 = vcombine.high %v560_v4, %v568_v5  ;;  %v576_v13 = vld [vmem:[%s2938_s30 + $0xb0] sm:$0xff] }
  0x83   : > { %v2419_v26 = vcombine.high %v591_v21, %v599_v22  ;;  %v584_v14 = vld [vmem:[%s2938_s30 + $0xf0] sm:$0xff] }
  0x85   : > { %1409 = vmatpush1.bf16.msra.mxu0 %v2412_v29  ;;  %1450 = vmatpush1.bf16.msra.mxu1 %v2414_v30  ;;  %v607_v29 = vld [vmem:[%s2938_s30 + $0x1a8] sm:$0xff] }
  0x86   : > { %1410 = vmatprep.subr.bf16.mxu0 %v2429_v31  ;;  %1451 = vmatprep.subr.bf16.mxu1 %v2431_v32  ;;  %v615_v30 = vld [vmem:[%s2938_s30 + $0x1e8] sm:$0xff]  ;;  %v2416_v31 = vcombine.low %v590_v19, %v598_v20  ;;  %v2418_v32 = vcombine.low %v591_v21, %v599_v22  ;;  %v2405_v19 = vcombine.high %v576_v13, %v584_v14  ;;  %v592_v21 = vld [vmem:[%s2938_s30 + $0x130] sm:$0xff] }
  0x87   : > { %v2435_v34 = vcombine.high %v607_v29, %v615_v30  ;;  %v600_v22 = vld [vmem:[%s2938_s30 + $0x170] sm:$0xff] }
  0x89   : > { %1411 = vmatpush1.bf16.msra.mxu0 %v2428_v37  ;;  %1452 = vmatpush1.bf16.msra.mxu1 %v2430_v38  ;;  %v623_v37 = vld [vmem:[%s2938_s30 + $0x228] sm:$0xff] }
  0x8a   : > { %1412 = vmatprep.subr.bf16.mxu0 %v2445_v39  ;;  %1453 = vmatprep.subr.bf16.mxu1 %v2447_v40  ;;  %v631_v38 = vld [vmem:[%s2938_s30 + $0x268] sm:$0xff]  ;;  %v2432_v39 = vcombine.low %v606_v27, %v614_v28  ;;  %v2434_v40 = vcombine.low %v607_v29, %v615_v30  ;;  %v2421_v27 = vcombine.high %v592_v21, %v600_v22  ;;  %v608_v29 = vld [vmem:[%s2938_s30 + $0x1b0] sm:$0xff] }
  0x8b   : > { %v2451_v42 = vcombine.high %v623_v37, %v631_v38  ;;  %v616_v30 = vld [vmem:[%s2938_s30 + $0x1f0] sm:$0xff] }
  0x8d   : > { %1413 = vmatpush1.bf16.msra.mxu0 %v2444_v45  ;;  %1454 = vmatpush1.bf16.msra.mxu1 %v2446_v46  ;;  %v639_v45 = vld [vmem:[%s2938_s30 + $0x2a8] sm:$0xff] }
  0x8e   : > { %1414 = vmatprep.subr.bf16.mxu0 %v2461_v47  ;;  %1455 = vmatprep.subr.bf16.mxu1 %v2463_v48  ;;  %v647_v46 = vld [vmem:[%s2938_s30 + $0x2e8] sm:$0xff]  ;;  %v2448_v47 = vcombine.low %v622_v35, %v630_v36  ;;  %v2450_v48 = vcombine.low %v623_v37, %v631_v38  ;;  %v2437_v35 = vcombine.high %v608_v29, %v616_v30  ;;  %v624_v37 = vld [vmem:[%s2938_s30 + $0x230] sm:$0xff] }
  0x8f   : > { %v2467_v50 = vcombine.high %v639_v45, %v647_v46  ;;  %v632_v38 = vld [vmem:[%s2938_s30 + $0x270] sm:$0xff] }
  0x91   : > { %1415 = vmatpush1.bf16.msra.mxu0 %v2460_v53  ;;  %1456 = vmatpush1.bf16.msra.mxu1 %v2462_v54  ;;  %v655_v53 = vld [vmem:[%s2938_s30 + $0x328] sm:$0xff] }
  0x92   : > { %1416 = vmatprep.subr.bf16.mxu0 %v2477_v55  ;;  %1457 = vmatprep.subr.bf16.mxu1 %v2479_v56  ;;  %v663_v54 = vld [vmem:[%s2938_s30 + $0x368] sm:$0xff]  ;;  %v2464_v55 = vcombine.low %v638_v43, %v646_v44  ;;  %v2466_v56 = vcombine.low %v639_v45, %v647_v46  ;;  %v640_v44 = vld [vmem:[%s2938_s30 + $0x2b0] sm:$0xff]  ;;  %v641_v46 = vld [vmem:[%s2938_s30 + $0x2b8] sm:$0xff] }
  0x93   : > { %v2483_v58 = vcombine.high %v655_v53, %v663_v54  ;;  %v648_v45 = vld [vmem:[%s2938_s30 + $0x2f0] sm:$0xff] }
  0x95   : > { %1417 = vmatpush1.bf16.msra.mxu0 %v2476_v61  ;;  %1458 = vmatpush1.bf16.msra.mxu1 %v2478_v62  ;;  %v671_v61 = vld [vmem:[%s2938_s30 + $0x3a8] sm:$0xff] }
  0x96   : > { %1418 = vmatprep.subr.bf16.mxu0 %v2493_v63  ;;  %1459 = vmatprep.subr.bf16.mxu1 %v2495_v1  ;;  %v679_v62 = vld [vmem:[%s2938_s30 + $0x3e8] sm:$0xff]  ;;  %v2480_v63 = vcombine.low %v654_v51, %v662_v52  ;;  %v2482_v1 = vcombine.low %v655_v53, %v663_v54  ;;  %v656_v52 = vld [vmem:[%s2938_s30 + $0x330] sm:$0xff]  ;;  %v657_v54 = vld [vmem:[%s2938_s30 + $0x338] sm:$0xff] }
  0x97   : > { %v2499_v3 = vcombine.high %v671_v61, %v679_v62  ;;  %v664_v53 = vld [vmem:[%s2938_s30 + $0x370] sm:$0xff] }
  0x99   : > { %1419 = vmatpush1.bf16.msra.mxu0 %v2492_v6  ;;  %1460 = vmatpush1.bf16.msra.mxu1 %v2494_v7  ;;  %v561_v6 = vld [vmem:[%s2938_s30 + $0x38] sm:$0xff] }
  0x9a   : > { %1486 = vmatprep.subr.bf16.mxu0 %v2385_v8  ;;  %1527 = vmatprep.subr.bf16.mxu1 %v2387_v9  ;;  %v569_v7 = vld [vmem:[%s2938_s30 + $0x78] sm:$0xff]  ;;  %v2496_v8 = vcombine.low %v670_v59, %v678_v60  ;;  %v2498_v9 = vcombine.low %v671_v61, %v679_v62  ;;  %v672_v60 = vld [vmem:[%s2938_s30 + $0x3b0] sm:$0xff] }
  0x9b   : > { %v2391_v11 = vcombine.high %v561_v6, %v569_v7  ;;  %v680_v61 = vld [vmem:[%s2938_s30 + $0x3f0] sm:$0xff]  ;;  %v673_v62 = vld [vmem:[%s2938_s30 + $0x3b8] sm:$0xff] }
  0x9c   : > { %1437 = vmatmul.mubr.bf16.vlgmr.msra.gmra.mrb[4].mxu0 %v2983_v12  ;;  %1478 = vmatmul.mubr.bf16.vlgmr.msra.gmra.mrb[4].mxu1 %v2983_v12 }
  0x9d   : > { %1487 = vmatpush1.bf16.msra.mxu0 %v2384_v15  ;;  %1528 = vmatpush1.bf16.msra.mxu1 %v2386_v16  ;;  %v577_v15 = vld [vmem:[%s2938_s30 + $0xb8] sm:$0xff] }
  0x9e   : > { %1488 = vmatprep.subr.bf16.mxu0 %v2401_v17  ;;  %1529 = vmatprep.subr.bf16.mxu1 %v2403_v18  ;;  %v585_v16 = vld [vmem:[%s2938_s30 + $0xf8] sm:$0xff]  ;;  %v2388_v17 = vcombine.low %v560_v4, %v568_v5  ;;  %v2390_v18 = vcombine.low %v561_v6, %v569_v7  ;;  %v2500_v5 = vcombine.low %v672_v60, %v680_v61  ;;  %v2609_v7 = vmov 1966171168  }
  0x9f   : > { %1518 = vmatprep.mubr.bf16.mxu0 %v2608_v0  ;;  %1559 = vmatprep.mubr.bf16.mxu1 %v2608_v0  ;;  %v2407_v20 = vcombine.high %v577_v15, %v585_v16 }
  0xa1   : > { %1489 = vmatpush1.bf16.msra.mxu0 %v2400_v23  ;;  %1530 = vmatpush1.bf16.msra.mxu1 %v2402_v24  ;;  %v593_v23 = vld [vmem:[%s2938_s30 + $0x138] sm:$0xff] }
  0xa2   : > { %1490 = vmatprep.subr.bf16.mxu0 %v2417_v25  ;;  %1531 = vmatprep.subr.bf16.mxu1 %v2419_v26  ;;  %v601_v24 = vld [vmem:[%s2938_s30 + $0x178] sm:$0xff]  ;;  %v2404_v25 = vcombine.low %v576_v13, %v584_v14  ;;  %v2406_v26 = vcombine.low %v577_v15, %v585_v16 }
  0xa3   : > { %v2423_v28 = vcombine.high %v593_v23, %v601_v24 }
  0xa5   : > { %1491 = vmatpush1.bf16.msra.mxu0 %v2416_v31  ;;  %1532 = vmatpush1.bf16.msra.mxu1 %v2418_v32  ;;  %v609_v31 = vld [vmem:[%s2938_s30 + $0x1b8] sm:$0xff] }
  0xa6   : > { %1492 = vmatprep.subr.bf16.mxu0 %v2433_v33  ;;  %1533 = vmatprep.subr.bf16.mxu1 %v2435_v34  ;;  %v617_v32 = vld [vmem:[%s2938_s30 + $0x1f8] sm:$0xff]  ;;  %v2420_v33 = vcombine.low %v592_v21, %v600_v22  ;;  %v2422_v34 = vcombine.low %v593_v23, %v601_v24 }
  0xa7   : > { %v2439_v36 = vcombine.high %v609_v31, %v617_v32 }
  0xa9   : > { %1493 = vmatpush1.bf16.msra.mxu0 %v2432_v39  ;;  %1534 = vmatpush1.bf16.msra.mxu1 %v2434_v40  ;;  %v625_v39 = vld [vmem:[%s2938_s30 + $0x238] sm:$0xff] }
  0xaa   : > { %1494 = vmatprep.subr.bf16.mxu0 %v2449_v41  ;;  %1535 = vmatprep.subr.bf16.mxu1 %v2451_v42  ;;  %v633_v40 = vld [vmem:[%s2938_s30 + $0x278] sm:$0xff]  ;;  %v2436_v41 = vcombine.low %v608_v29, %v616_v30  ;;  %v2453_v42 = vcombine.high %v624_v37, %v632_v38 }
  0xab   : > { %v2455_v43 = vcombine.high %v625_v39, %v633_v40 }
  0xad   : > { %1495 = vmatpush1.bf16.msra.mxu0 %v2448_v47  ;;  %1536 = vmatpush1.bf16.msra.mxu1 %v2450_v48  ;;  %v649_v47 = vld [vmem:[%s2938_s30 + $0x2f8] sm:$0xff]  ;;  %v2452_v48 = vcombine.low %v624_v37, %v632_v38 }
  0xae   : > { %1496 = vmatprep.subr.bf16.mxu0 %v2465_v49  ;;  %1537 = vmatprep.subr.bf16.mxu1 %v2467_v50  ;;  %v2454_v49 = vcombine.low %v625_v39, %v633_v40  ;;  %v2469_v50 = vcombine.high %v640_v44, %v648_v45  ;;  %v2471_v51 = vcombine.high %v641_v46, %v649_v47 }
  0xb1   : > { %1497 = vmatpush1.bf16.msra.mxu0 %v2464_v55  ;;  %1538 = vmatpush1.bf16.msra.mxu1 %v2466_v56  ;;  %v665_v55 = vld [vmem:[%s2938_s30 + $0x378] sm:$0xff]  ;;  %v2468_v56 = vcombine.low %v640_v44, %v648_v45 }
  0xb2   : > { %1498 = vmatprep.subr.bf16.mxu0 %v2481_v57  ;;  %1539 = vmatprep.subr.bf16.mxu1 %v2483_v58  ;;  %v2470_v57 = vcombine.low %v641_v46, %v649_v47  ;;  %v2485_v58 = vcombine.high %v656_v52, %v664_v53  ;;  %v2487_v59 = vcombine.high %v657_v54, %v665_v55 }
  0xb5   : > { %1499 = vmatpush1.bf16.msra.mxu0 %v2480_v63  ;;  %1540 = vmatpush1.bf16.msra.mxu1 %v2482_v1  ;;  %v681_v63 = vld [vmem:[%s2938_s30 + $0x3f8] sm:$0xff]  ;;  %v2484_v1 = vcombine.low %v656_v52, %v664_v53 }
  0xb6   : > { %1500 = vmatprep.subr.bf16.mxu0 %v2497_v2  ;;  %1541 = vmatprep.subr.bf16.mxu1 %v2499_v3  ;;  %v2486_v2 = vcombine.low %v657_v54, %v665_v55  ;;  %v2501_v3 = vcombine.high %v672_v60, %v680_v61  ;;  %v2503_v4 = vcombine.high %v673_v62, %v681_v63 }
  0xb7   : > { %v2502_v6 = vcombine.low %v673_v62, %v681_v63 }
  0xb9   : > { %1501 = vmatpush1.bf16.msra.mxu0 %v2496_v8  ;;  %1542 = vmatpush1.bf16.msra.mxu1 %v2498_v9  ;;  %v1839_v8 = vunpack.c.l.s4 %v2609_v7  ;;  %v1841_v9 = vlaneseq }
  0xba   : > { %1568 = vmatprep.subr.bf16.mxu0 %v2389_v10  ;;  %1609 = vmatprep.subr.bf16.mxu1 %v2391_v11 }
  0xbb   : > { %v1840_v10 = vunpack.c.0.s8 %v1839_v8  ;;  %v1842_v11 = vshrl.u32 %v1841_v9, 7 }
  0xbc   : > { %1519 = vmatmul.mubr.bf16.vlgmr.msra.gmra.mrb[8].mxu0 %v2983_v12  ;;  %1560 = vmatmul.mubr.bf16.vlgmr.msra.gmra.mrb[8].mxu1 %v2983_v12 }
  0xbd   : > { %1569 = vmatpush1.bf16.msra.mxu0 %v2388_v17  ;;  %1610 = vmatpush1.bf16.msra.mxu1 %v2390_v18  ;;  %v3096_v17 = vsub.s32 %v1840_v10, %v1842_v11 }
  0xbe   : > { %1570 = vmatprep.subr.bf16.mxu0 %v2405_v19  ;;  %1611 = vmatprep.subr.bf16.mxu1 %v2407_v20 }
  0xbf   : > { %1600 = vmatprep.mubr.bf16.mxu0 %v2608_v0  ;;  %1641 = vmatprep.mubr.bf16.mxu1 %v2608_v0  ;;  %v2438_v0 = vcombine.low %v609_v31, %v617_v32 }
  0xc1   : > { %1571 = vmatpush1.bf16.msra.mxu0 %v2404_v25  ;;  %1612 = vmatpush1.bf16.msra.mxu1 %v2406_v26 }
  0xc2   : > { %1572 = vmatprep.subr.bf16.mxu0 %v2421_v27  ;;  %1613 = vmatprep.subr.bf16.mxu1 %v2423_v28 }
  0xc5   : > { %1573 = vmatpush1.bf16.msra.mxu0 %v2420_v33  ;;  %1614 = vmatpush1.bf16.msra.mxu1 %v2422_v34 }
  0xc6   : > { %1574 = vmatprep.subr.bf16.mxu0 %v2437_v35  ;;  %1615 = vmatprep.subr.bf16.mxu1 %v2439_v36 }
  0xc9   : > { %1575 = vmatpush1.bf16.msra.mxu0 %v2436_v41  ;;  %1616 = vmatpush1.bf16.msra.mxu1 %v2438_v0 }
  0xca   : > { %1576 = vmatprep.subr.bf16.mxu0 %v2453_v42  ;;  %1617 = vmatprep.subr.bf16.mxu1 %v2455_v43 }
  0xcd   : > { %1577 = vmatpush1.bf16.msra.mxu0 %v2452_v48  ;;  %1618 = vmatpush1.bf16.msra.mxu1 %v2454_v49 }
  0xce   : > { %1578 = vmatprep.subr.bf16.mxu0 %v2469_v50  ;;  %1619 = vmatprep.subr.bf16.mxu1 %v2471_v51 }
  0xd1   : > { %1579 = vmatpush1.bf16.msra.mxu0 %v2468_v56  ;;  %1620 = vmatpush1.bf16.msra.mxu1 %v2470_v57 }
  0xd2   : > { %1580 = vmatprep.subr.bf16.mxu0 %v2485_v58  ;;  %1621 = vmatprep.subr.bf16.mxu1 %v2487_v59 }
  0xd5   : > { %1581 = vmatpush1.bf16.msra.mxu0 %v2484_v1  ;;  %1622 = vmatpush1.bf16.msra.mxu1 %v2486_v2 }
  0xd6   : > { %1582 = vmatprep.subr.bf16.mxu0 %v2501_v3  ;;  %1623 = vmatprep.subr.bf16.mxu1 %v2503_v4 }
  0xd9   : > { %1583 = vmatpush1.bf16.msra.mxu0 %v2500_v5  ;;  %1624 = vmatpush1.bf16.msra.mxu1 %v2502_v6 }
  0xdc   : > { %1601 = vmatmul.mubr.bf16.vlgmr.msra.gmra.mrb[12].mxu0 %v2983_v12  ;;  %1642 = vmatmul.mubr.bf16.vlgmr.msra.gmra.mrb[12].mxu1 %v2983_v12 }
 0x14f   : > { %v1356_v13 = vpop.f32.mrb[0].mxu0  ;;  %v1397_v16 = vpop.f32.mrb[0].mxu1 }
 0x150   : > { %v1722_v14 = vrot.slane %v1356_v13, 4  ;;  %v1937_v15 = vmul.f32 %v1356_v13, %v1356_v13  ;;  %v1358_v12 = vpop.f32.mrb[1].mxu0  ;;  %v1734_v18 = vrot.slane %v1397_v16, 4  ;;  %v1939_v19 = vmul.f32 %v1397_v16, %v1397_v16  ;;  %v1399_v22 = vpop.f32.mrb[1].mxu1 }
 0x151   : > { %v2518_v20 = vpack.c.bf16 %v1358_v12, %v1356_v13  ;;  %v1728_v21 = vrot.slane %v1358_v12, 4  ;;  %v1360_v23 = vpop.f32.mrb[2].mxu0  ;;  %v1938_v26 = vmul.f32 %v1358_v12, %v1358_v12  ;;  %v2519_v27 = vpack.c.bf16 %v1399_v22, %v1397_v16  ;;  %v1401_v28 = vpop.f32.mrb[2].mxu1 }
 0x152   : > { %v1723_v24 = vadd.f32 %v1722_v14, %v1356_v13  ;;  %v1953_v25 = vrot.slane %v1937_v15, 4  ;;  %v1361_v29 = vpop.f32.mrb[3].mxu0  ;;  %v1735_v30 = vadd.f32 %v1734_v18, %v1397_v16  ;;  %v1965_v31 = vrot.slane %v1939_v19, 4  ;;  %v1402_v34 = vpop.f32.mrb[3].mxu1 }
 0x153   : > { %1714 = vst [vmem:[%s3094_s10] sm:$0xff] %v2518_v20  ;;  %v1729_v32 = vadd.f32 %v1728_v21, %v1358_v12  ;;  %v1740_v33 = vrot.slane %v1399_v22, 4  ;;  %v1959_v37 = vrot.slane %v1938_v26, 4  ;;  %1715 = vst [vmem:[%s3094_s10 + $0x8] sm:$0xff] %v2519_v27  ;;  %v1940_v38 = vmul.f32 %v1399_v22, %v1399_v22 }
 0x154   : > { %v1724_v35 = vrot.slane %v1723_v24, 2  ;;  %v1954_v36 = vadd.f32 %v1953_v25, %v1937_v15  ;;  %v1736_v39 = vrot.slane %v1735_v30, 2  ;;  %v1966_v40 = vadd.f32 %v1965_v31, %v1939_v19 }
 0x155   : > { %v1730_v41 = vrot.slane %v1729_v32, 2  ;;  %v1741_v0 = vadd.f32 %v1740_v33, %v1399_v22  ;;  %v1960_v44 = vadd.f32 %v1959_v37, %v1938_v26  ;;  %v1971_v45 = vrot.slane %v1940_v38, 4 }
 0x156   : > { %v1725_v42 = vadd.f32 %v1724_v35, %v1723_v24  ;;  %v1955_v43 = vrot.slane %v1954_v36, 2  ;;  %v1737_v46 = vadd.f32 %v1736_v39, %v1735_v30  ;;  %v1967_v47 = vrot.slane %v1966_v40, 2 }
 0x157   : > { %v1731_v48 = vadd.f32 %v1730_v41, %v1729_v32  ;;  %v1742_v49 = vrot.slane %v1741_v0, 2  ;;  %v1961_v52 = vrot.slane %v1960_v44, 2  ;;  %v1972_v53 = vadd.f32 %v1971_v45, %v1940_v38 }
 0x158   : > { %v1726_v50 = vrot.slane %v1725_v42, 1  ;;  %v1956_v51 = vadd.f32 %v1955_v43, %v1954_v36  ;;  %v1738_v54 = vrot.slane %v1737_v46, 1  ;;  %v1968_v55 = vadd.f32 %v1967_v47, %v1966_v40 }
 0x159   : > { %v1732_v56 = vrot.slane %v1731_v48, 1  ;;  %v1743_v57 = vadd.f32 %v1742_v49, %v1741_v0  ;;  %v1962_v60 = vadd.f32 %v1961_v52, %v1960_v44  ;;  %v1973_v61 = vrot.slane %v1972_v53, 2 }
 0x15a   : > { %v1727_v58 = vadd.f32 %v1726_v50, %v1725_v42  ;;  %v1957_v59 = vrot.slane %v1956_v51, 1  ;;  %v1739_v62 = vadd.f32 %v1738_v54, %v1737_v46  ;;  %v1969_v63 = vrot.slane %v1968_v55, 1 }
 0x15b   : > { %v1733_v1 = vadd.f32 %v1732_v56, %v1731_v48  ;;  %v1744_v2 = vrot.slane %v1743_v57, 1  ;;  %v1963_v4 = vrot.slane %v1962_v60, 1  ;;  %v1974_v5 = vadd.f32 %v1973_v61, %v1972_v53 }
 0x15c   : > { %v1958_v3 = vadd.f32 %v1957_v59, %v1956_v51  ;;  %v1970_v8 = vadd.f32 %v1969_v63, %v1968_v55 }
 0x15d   : > { %v1834_v6 = vcombine.low %v1727_v58, %v1733_v1  ;;  %v1745_v7 = vadd.f32 %v1744_v2, %v1743_v57  ;;  %v1964_v9 = vadd.f32 %v1963_v4, %v1962_v60  ;;  %v1975_v10 = vrot.slane %v1974_v5, 1 }
 0x15f   : > { %v3101_v11 = vrot.slane %v1834_v6, %v3096_v17  ;;  %v1835_v13 = vcombine.low %v1739_v62, %v1745_v7  ;;  %v2065_v14 = vcombine.low %v1958_v3, %v1964_v9  ;;  %v1976_v15 = vadd.f32 %v1975_v10, %v1974_v5 }
 0x161   : > { %v3104_v16 = vrot.slane %v1835_v13, %v3096_v17  ;;  %v3107_v12 = vrot.slane %v2065_v14, %v3096_v17  ;;  %v2066_v18 = vcombine.low %v1970_v8, %v1976_v15 }
 0x163   : > { %v1866_v19 = vcombine.low %v3101_v11, %v3104_v16  ;;  %v3112_v20 = vrot.slane %v2066_v18, %v3096_v17 }
 0x165   : > { %v2097_v21 = vcombine.low %v3107_v12, %v3112_v20 }
 0x16f   : > { %v1438_v22 = vpop.f32.mrb[4].mxu0  ;;  %v1479_v25 = vpop.f32.mrb[4].mxu1 }
 0x170   : > { %v1746_v23 = vrot.slane %v1438_v22, 4  ;;  %v1941_v24 = vmul.f32 %v1438_v22, %v1438_v22  ;;  %v1440_v26 = vpop.f32.mrb[5].mxu0  ;;  %v1758_v27 = vrot.slane %v1479_v25, 4  ;;  %v1943_v28 = vmul.f32 %v1479_v25, %v1479_v25  ;;  %v1481_v31 = vpop.f32.mrb[5].mxu1 }
 0x171   : > { %v2520_v29 = vpack.c.bf16 %v1440_v26, %v1438_v22  ;;  %v1752_v30 = vrot.slane %v1440_v26, 4  ;;  %v1442_v32 = vpop.f32.mrb[6].mxu0  ;;  %v1942_v35 = vmul.f32 %v1440_v26, %v1440_v26  ;;  %v2521_v36 = vpack.c.bf16 %v1481_v31, %v1479_v25  ;;  %v1483_v37 = vpop.f32.mrb[6].mxu1 }
 0x172   : > { %v1747_v33 = vadd.f32 %v1746_v23, %v1438_v22  ;;  %v1977_v34 = vrot.slane %v1941_v24, 4  ;;  %v1443_v38 = vpop.f32.mrb[7].mxu0  ;;  %v1759_v39 = vadd.f32 %v1758_v27, %v1479_v25  ;;  %v1989_v40 = vrot.slane %v1943_v28, 4  ;;  %v1484_v42 = vpop.f32.mrb[7].mxu1 }
 0x173   : > { %1716 = vst [vmem:[%s3094_s10 + $0x10] sm:$0xff] %v2520_v29  ;;  %v1753_v41 = vadd.f32 %v1752_v30, %v1440_v26  ;;  %v1764_v0 = vrot.slane %v1481_v31, 4  ;;  %v1983_v45 = vrot.slane %v1942_v35, 4  ;;  %1717 = vst [vmem:[%s3094_s10 + $0x18] sm:$0xff] %v2521_v36  ;;  %v1944_v46 = vmul.f32 %v1481_v31, %v1481_v31 }
 0x174   : > { %v1748_v43 = vrot.slane %v1747_v33, 2  ;;  %v1978_v44 = vadd.f32 %v1977_v34, %v1941_v24  ;;  %v1760_v47 = vrot.slane %v1759_v39, 2  ;;  %v1990_v48 = vadd.f32 %v1989_v40, %v1943_v28 }
 0x175   : > { %v1754_v49 = vrot.slane %v1753_v41, 2  ;;  %v1765_v50 = vadd.f32 %v1764_v0, %v1481_v31  ;;  %v1984_v53 = vadd.f32 %v1983_v45, %v1942_v35  ;;  %v1995_v54 = vrot.slane %v1944_v46, 4 }
 0x176   : > { %v1749_v51 = vadd.f32 %v1748_v43, %v1747_v33  ;;  %v1979_v52 = vrot.slane %v1978_v44, 2  ;;  %v1761_v55 = vadd.f32 %v1760_v47, %v1759_v39  ;;  %v1991_v56 = vrot.slane %v1990_v48, 2 }
 0x177   : > { %v1755_v57 = vadd.f32 %v1754_v49, %v1753_v41  ;;  %v1766_v58 = vrot.slane %v1765_v50, 2  ;;  %v1985_v61 = vrot.slane %v1984_v53, 2  ;;  %v1996_v62 = vadd.f32 %v1995_v54, %v1944_v46 }
 0x178   : > { %v1750_v59 = vrot.slane %v1749_v51, 1  ;;  %v1980_v60 = vadd.f32 %v1979_v52, %v1978_v44  ;;  %v1762_v63 = vrot.slane %v1761_v55, 1  ;;  %v1992_v1 = vadd.f32 %v1991_v56, %v1990_v48 }
 0x179   : > { %v1756_v2 = vrot.slane %v1755_v57, 1  ;;  %v1767_v3 = vadd.f32 %v1766_v58, %v1765_v50  ;;  %v1986_v6 = vadd.f32 %v1985_v61, %v1984_v53  ;;  %v1997_v7 = vrot.slane %v1996_v62, 2 }
 0x17a   : > { %v1751_v4 = vadd.f32 %v1750_v59, %v1749_v51  ;;  %v1981_v5 = vrot.slane %v1980_v60, 1  ;;  %v1763_v8 = vadd.f32 %v1762_v63, %v1761_v55  ;;  %v1993_v9 = vrot.slane %v1992_v1, 1 }
 0x17b   : > { %v1757_v10 = vadd.f32 %v1756_v2, %v1755_v57  ;;  %v1768_v13 = vrot.slane %v1767_v3, 1  ;;  %v1987_v15 = vrot.slane %v1986_v6, 1  ;;  %v1998_v18 = vadd.f32 %v1997_v7, %v1996_v62 }
 0x17c   : > { %v1982_v14 = vadd.f32 %v1981_v5, %v1980_v60  ;;  %v1994_v24 = vadd.f32 %v1993_v9, %v1992_v1  ;;  %v1874_v36 = vrot.slane %v1866_v19, %v3096_v17  ;;  %v2105_v40 = vrot.slane %v2097_v21, %v3096_v17 }
 0x17d   : > { %v1836_v22 = vcombine.low %v1751_v4, %v1757_v10  ;;  %v1769_v23 = vadd.f32 %v1768_v13, %v1767_v3  ;;  %v1988_v25 = vadd.f32 %v1987_v15, %v1986_v6  ;;  %v1999_v26 = vrot.slane %v1998_v18, 1 }
 0x17f   : > { %v1858_v27 = vrot.slane %v1836_v22, %v3096_v17  ;;  %v1837_v28 = vcombine.low %v1763_v8, %v1769_v23  ;;  %v2067_v29 = vcombine.low %v1982_v14, %v1988_v25  ;;  %v2000_v30 = vadd.f32 %v1999_v26, %v1998_v18 }
 0x181   : > { %v1865_v31 = vrot.slane %v1837_v28, %v3096_v17  ;;  %v2089_v32 = vrot.slane %v2067_v29, %v3096_v17  ;;  %v2068_v33 = vcombine.low %v1994_v24, %v2000_v30 }
 0x183   : > { %v1867_v34 = vcombine.low %v1858_v27, %v1865_v31  ;;  %v2096_v35 = vrot.slane %v2068_v33, %v3096_v17 }
 0x185   : > { %v1881_v37 = vrot.slane %v1867_v34, %v3096_v17  ;;  %v2098_v38 = vcombine.low %v2089_v32, %v2096_v35 }
 0x187   : > { %v1882_v39 = vcombine.low %v1874_v36, %v1881_v37  ;;  %v2112_v41 = vrot.slane %v2098_v38, %v3096_v17 }
 0x189   : > { %1934 = vst [vmem:[%s3131_s18] ss:$2 sm:$0xff] %v1882_v39  ;;  %v2113_v11 = vcombine.low %v2105_v40, %v2112_v41 }
 0x18b   : > { %2513 = vst [vmem:[%s3131_s18 + $0x1] ss:$2 sm:$0xff] %v2113_v11 }
 0x18f   : > { %v1520_v16 = vpop.f32.mrb[8].mxu0  ;;  %v1561_v42 = vpop.f32.mrb[8].mxu1 }
 0x190   : > { %v1770_v19 = vrot.slane %v1520_v16, 4  ;;  %v1945_v0 = vmul.f32 %v1520_v16, %v1520_v16  ;;  %v1522_v43 = vpop.f32.mrb[9].mxu0  ;;  %v1782_v44 = vrot.slane %v1561_v42, 4  ;;  %v1947_v45 = vmul.f32 %v1561_v42, %v1561_v42  ;;  %v1563_v48 = vpop.f32.mrb[9].mxu1 }
 0x191   : > { %v2522_v46 = vpack.c.bf16 %v1522_v43, %v1520_v16  ;;  %v1776_v47 = vrot.slane %v1522_v43, 4  ;;  %v1524_v49 = vpop.f32.mrb[10].mxu0  ;;  %v1946_v21 = vmul.f32 %v1522_v43, %v1522_v43  ;;  %v2523_v50 = vpack.c.bf16 %v1563_v48, %v1561_v42  ;;  %v1565_v51 = vpop.f32.mrb[10].mxu1 }
 0x192   : > { %v1771_v12 = vadd.f32 %v1770_v19, %v1520_v16  ;;  %v2001_v20 = vrot.slane %v1945_v0, 4  ;;  %v1525_v52 = vpop.f32.mrb[11].mxu0  ;;  %v1783_v53 = vadd.f32 %v1782_v44, %v1561_v42  ;;  %v2013_v54 = vrot.slane %v1947_v45, 4  ;;  %v1566_v57 = vpop.f32.mrb[11].mxu1 }
 0x193   : > { %1718 = vst [vmem:[%s3094_s10 + $0x20] sm:$0xff] %v2522_v46  ;;  %v1777_v55 = vadd.f32 %v1776_v47, %v1522_v43  ;;  %v1788_v56 = vrot.slane %v1563_v48, 4  ;;  %v2007_v60 = vrot.slane %v1946_v21, 4  ;;  %1719 = vst [vmem:[%s3094_s10 + $0x28] sm:$0xff] %v2523_v50  ;;  %v1948_v61 = vmul.f32 %v1563_v48, %v1563_v48 }
 0x194   : > { %v1772_v58 = vrot.slane %v1771_v12, 2  ;;  %v2002_v59 = vadd.f32 %v2001_v20, %v1945_v0  ;;  %v1784_v62 = vrot.slane %v1783_v53, 2  ;;  %v2014_v63 = vadd.f32 %v2013_v54, %v1947_v45 }
 0x195   : > { %v1778_v1 = vrot.slane %v1777_v55, 2  ;;  %v1789_v2 = vadd.f32 %v1788_v56, %v1563_v48  ;;  %v2008_v5 = vadd.f32 %v2007_v60, %v1946_v21  ;;  %v2019_v6 = vrot.slane %v1948_v61, 4 }
 0x196   : > { %v1773_v3 = vadd.f32 %v1772_v58, %v1771_v12  ;;  %v2003_v4 = vrot.slane %v2002_v59, 2  ;;  %v1785_v7 = vadd.f32 %v1784_v62, %v1783_v53  ;;  %v2015_v8 = vrot.slane %v2014_v63, 2 }
 0x197   : > { %v1779_v9 = vadd.f32 %v1778_v1, %v1777_v55  ;;  %v1790_v10 = vrot.slane %v1789_v2, 2  ;;  %v2009_v15 = vrot.slane %v2008_v5, 2  ;;  %v2020_v18 = vadd.f32 %v2019_v6, %v1948_v61 }
 0x198   : > { %v1774_v13 = vrot.slane %v1773_v3, 1  ;;  %v2004_v14 = vadd.f32 %v2003_v4, %v2002_v59  ;;  %v1786_v22 = vrot.slane %v1785_v7, 1  ;;  %v2016_v23 = vadd.f32 %v2015_v8, %v2014_v63 }
 0x199   : > { %v1780_v24 = vrot.slane %v1779_v9, 1  ;;  %v1791_v25 = vadd.f32 %v1790_v10, %v1789_v2  ;;  %v2010_v28 = vadd.f32 %v2009_v15, %v2008_v5  ;;  %v2021_v29 = vrot.slane %v2020_v18, 2 }
 0x19a   : > { %v1775_v26 = vadd.f32 %v1774_v13, %v1773_v3  ;;  %v2005_v27 = vrot.slane %v2004_v14, 1  ;;  %v1787_v30 = vadd.f32 %v1786_v22, %v1785_v7  ;;  %v2017_v31 = vrot.slane %v2016_v23, 1 }
 0x19b   : > { %v1781_v32 = vadd.f32 %v1780_v24, %v1779_v9  ;;  %v1792_v33 = vrot.slane %v1791_v25, 1  ;;  %v2011_v35 = vrot.slane %v2010_v28, 1  ;;  %v2022_v36 = vadd.f32 %v2021_v29, %v2020_v18 }
 0x19c   : > { %v2006_v34 = vadd.f32 %v2005_v27, %v2004_v14  ;;  %v2018_v39 = vadd.f32 %v2017_v31, %v2016_v23 }
 0x19d   : > { %v1883_v37 = vcombine.low %v1775_v26, %v1781_v32  ;;  %v1793_v38 = vadd.f32 %v1792_v33, %v1791_v25  ;;  %v2012_v40 = vadd.f32 %v2011_v35, %v2010_v28  ;;  %v2023_v41 = vrot.slane %v2022_v36, 1 }
 0x19f   : > { %v3143_v11 = vrot.slane %v1883_v37, %v3096_v17  ;;  %v1884_v16 = vcombine.low %v1787_v30, %v1793_v38  ;;  %v2114_v19 = vcombine.low %v2006_v34, %v2012_v40  ;;  %v2024_v0 = vadd.f32 %v2023_v41, %v2022_v36 }
 0x1a1   : > { %v3146_v42 = vrot.slane %v1884_v16, %v3096_v17  ;;  %v3149_v43 = vrot.slane %v2114_v19, %v3096_v17  ;;  %v2115_v44 = vcombine.low %v2018_v39, %v2024_v0 }
 0x1a3   : > { %v1915_v45 = vcombine.low %v3143_v11, %v3146_v42  ;;  %v3154_v46 = vrot.slane %v2115_v44, %v3096_v17 }
 0x1a5   : > { %v2146_v47 = vcombine.low %v3149_v43, %v3154_v46 }
 0x1af   : > { %v1602_v48 = vpop.f32.mrb[12].mxu0  ;;  %v1643_v20 = vpop.f32.mrb[12].mxu1 }
 0x1b0   : > { %v1794_v49 = vrot.slane %v1602_v48, 4  ;;  %v1949_v12 = vmul.f32 %v1602_v48, %v1602_v48  ;;  %v1604_v21 = vpop.f32.mrb[13].mxu0  ;;  %v1806_v50 = vrot.slane %v1643_v20, 4  ;;  %v1951_v51 = vmul.f32 %v1643_v20, %v1643_v20  ;;  %v1645_v54 = vpop.f32.mrb[13].mxu1 }
 0x1b1   : > { %v2524_v52 = vpack.c.bf16 %v1604_v21, %v1602_v48  ;;  %v1800_v53 = vrot.slane %v1604_v21, 4  ;;  %v1606_v55 = vpop.f32.mrb[14].mxu0  ;;  %v1950_v58 = vmul.f32 %v1604_v21, %v1604_v21  ;;  %v2525_v59 = vpack.c.bf16 %v1645_v54, %v1643_v20  ;;  %v1647_v60 = vpop.f32.mrb[14].mxu1 }
 0x1b2   : > { %v1795_v56 = vadd.f32 %v1794_v49, %v1602_v48  ;;  %v2025_v57 = vrot.slane %v1949_v12, 4  ;;  %v1607_v61 = vpop.f32.mrb[15].mxu0  ;;  %v1807_v62 = vadd.f32 %v1806_v50, %v1643_v20  ;;  %v2037_v63 = vrot.slane %v1951_v51, 4  ;;  %v1648_v3 = vpop.f32.mrb[15].mxu1 }
 0x1b3   : > { %1720 = vst [vmem:[%s3094_s10 + $0x30] sm:$0xff] %v2524_v52  ;;  %v1801_v1 = vadd.f32 %v1800_v53, %v1604_v21  ;;  %v1812_v2 = vrot.slane %v1645_v54, 4  ;;  %v2031_v6 = vrot.slane %v1950_v58, 4  ;;  %1721 = vst [vmem:[%s3094_s10 + $0x38] sm:$0xff] %v2525_v59  ;;  %v1952_v7 = vmul.f32 %v1645_v54, %v1645_v54 }
 0x1b4   : > { %v1796_v4 = vrot.slane %v1795_v56, 2  ;;  %v2026_v5 = vadd.f32 %v2025_v57, %v1949_v12  ;;  %v1808_v8 = vrot.slane %v1807_v62, 2  ;;  %v2038_v9 = vadd.f32 %v2037_v63, %v1951_v51 }
 0x1b5   : > { %v1802_v10 = vrot.slane %v1801_v1, 2  ;;  %v1813_v13 = vadd.f32 %v1812_v2, %v1645_v54  ;;  %v2032_v18 = vadd.f32 %v2031_v6, %v1950_v58  ;;  %v2043_v22 = vrot.slane %v1952_v7, 4 }
 0x1b6   : > { %v1797_v14 = vadd.f32 %v1796_v4, %v1795_v56  ;;  %v2027_v15 = vrot.slane %v2026_v5, 2  ;;  %v1809_v23 = vadd.f32 %v1808_v8, %v1807_v62  ;;  %v2039_v24 = vrot.slane %v2038_v9, 2 }
 0x1b7   : > { %v1803_v25 = vadd.f32 %v1802_v10, %v1801_v1  ;;  %v1814_v26 = vrot.slane %v1813_v13, 2  ;;  %v2033_v29 = vrot.slane %v2032_v18, 2  ;;  %v2044_v30 = vadd.f32 %v2043_v22, %v1952_v7 }
 0x1b8   : > { %v1798_v27 = vrot.slane %v1797_v14, 1  ;;  %v2028_v28 = vadd.f32 %v2027_v15, %v2026_v5  ;;  %v1810_v31 = vrot.slane %v1809_v23, 1  ;;  %v2040_v32 = vadd.f32 %v2039_v24, %v2038_v9 }
 0x1b9   : > { %v1804_v33 = vrot.slane %v1803_v25, 1  ;;  %v1815_v34 = vadd.f32 %v1814_v26, %v1813_v13  ;;  %v2034_v37 = vadd.f32 %v2033_v29, %v2032_v18  ;;  %v2045_v38 = vrot.slane %v2044_v30, 2 }
 0x1ba   : > { %v1799_v35 = vadd.f32 %v1798_v27, %v1797_v14  ;;  %v2029_v36 = vrot.slane %v2028_v28, 1  ;;  %v1811_v39 = vadd.f32 %v1810_v31, %v1809_v23  ;;  %v2041_v40 = vrot.slane %v2040_v32, 1 }
 0x1bb   : > { %v1805_v41 = vadd.f32 %v1804_v33, %v1803_v25  ;;  %v1816_v16 = vrot.slane %v1815_v34, 1  ;;  %v2035_v0 = vrot.slane %v2034_v37, 1  ;;  %v2046_v44 = vadd.f32 %v2045_v38, %v2044_v30 }
 0x1bc   : > { %v2030_v19 = vadd.f32 %v2029_v36, %v2028_v28  ;;  %v2042_v12 = vadd.f32 %v2041_v40, %v2040_v32  ;;  %v1923_v59 = vrot.slane %v1915_v45, %v3096_v17  ;;  %v2154_v63 = vrot.slane %v2146_v47, %v3096_v17 }
 0x1bd   : > { %v1885_v48 = vcombine.low %v1799_v35, %v1805_v41  ;;  %v1817_v49 = vadd.f32 %v1816_v16, %v1815_v34  ;;  %v2036_v20 = vadd.f32 %v2035_v0, %v2034_v37  ;;  %v2047_v21 = vrot.slane %v2046_v44, 1 }
 0x1bf   : > { %v1907_v50 = vrot.slane %v1885_v48, %v3096_v17  ;;  %v1886_v51 = vcombine.low %v1811_v39, %v1817_v49  ;;  %v2116_v52 = vcombine.low %v2030_v19, %v2036_v20  ;;  %v2048_v53 = vadd.f32 %v2047_v21, %v2046_v44 }
 0x1c1   : > { %v1914_v54 = vrot.slane %v1886_v51, %v3096_v17  ;;  %v2138_v55 = vrot.slane %v2116_v52, %v3096_v17  ;;  %v2117_v56 = vcombine.low %v2042_v12, %v2048_v53 }
 0x1c3   : > { %v1916_v57 = vcombine.low %v1907_v50, %v1914_v54  ;;  %v2145_v58 = vrot.slane %v2117_v56, %v3096_v17 }
 0x1c5   : > { %v1930_v60 = vrot.slane %v1916_v57, %v3096_v17  ;;  %v2147_v61 = vcombine.low %v2138_v55, %v2145_v58 }
 0x1c7   : > { %v1931_v62 = vcombine.low %v1923_v59, %v1930_v60  ;;  %v2161_v1 = vrot.slane %v2147_v61, %v3096_v17 }
 0x1c9   : > { %2512 = vst [vmem:[%s3131_s18 + $0x10] ss:$2 sm:$0xff] %v1931_v62  ;;  %v2162_v2 = vcombine.low %v2154_v63, %v2161_v1 }
 0x1cb   : > { %2514 = vst [vmem:[%s3131_s18 + $0x11] ss:$2 sm:$0xff] %v2162_v2 }
 0x1cc PF: > { %s14_s16 = sadd.s32 1, %s2606_s16   ;;  %s3195_s12 = smov %s2594_s13 }
 0x1cd   : > { %p11_p10 = scmp.ge.s32.totalorder %s14_s16, 6   ;;  %s3196_s13 = smov %s2665_s20 }
 0x1ce   : > { %s3197_s14 = smov %s2602_s15  ;;  %s3198_s15 = smov %s3200_s17 }
 0x1cf   :  { %13 = sbr.rel (!%p11_p10) target bundleno = 3 (0x3), region = 104 }

// kernel: generator_forward.10
= control target key start
LH: loop header
LB: loop body
LE: loop exit
PB: predicated region body
PF: predicated region fallthrough
CT: control target
= control target key end

     0   :  { %v129_v0 = vlaneseq  ;;  %s1313_s1 = inlined_call_operand.vmem [shape: f32[2,512], index: 1, kind: input, shape index: {}]   ;;  %s1314_s0 = inlined_call_operand.vmem [shape: bf16[128,512], index: 0, kind: input, shape index: {}]   ;;  %s1315_s2 = inlined_call_operand.vmem [shape: f32[1,512], index: 2, kind: input, shape index: {}]   ;;  %s1316_s3 = inlined_call_operand.vmem [shape: f32[1,512], index: 3, kind: input, shape index: {}]   ;;  %s1317_s4 = inlined_call_operand.vmem [shape: bf16[128,512], index: 4, kind: output, shape index: {}]  }
   0x1   :  { %v17_v1 = vld [vmem:[%s1313_s1] ss:$2 sm:$0xf]  ;;  %v590_v2 = vld [vmem:[%s1313_s1 + $0x1] ss:$2 sm:$0xf] }
   0x2   :  { %v688_v3 = vmul.f32 0.03125, %v17_v1  ;;  %v21_v4 = vmul.f32 0.03125, %v590_v2  ;;  %v695_v6 = vld [vmem:[%s1314_s0] sm:$0xff]  ;;  %v697_v7 = vshrl.u32 %v129_v0, 7  ;;  %v702_v8 = vld [vmem:[%s1314_s0 + $0x8] sm:$0xff]  ;;  %v708_v11 = vld [vmem:[%s1314_s0 + $0x10] sm:$0xff] }
   0x3   :  { %v64_v10 = vunpack.c.l.bf16 %v695_v6  ;;  %v713_v12 = vld [vmem:[%s1314_s0 + $0x18] sm:$0xff]  ;;  %v65_v14 = vunpack.c.h.bf16 %v695_v6  ;;  %v66_v16 = vunpack.c.l.bf16 %v702_v8  ;;  %v721_v17 = vld [vmem:[%s1314_s0 + $0x20] sm:$0xff]  ;;  %v726_v18 = vld [vmem:[%s1314_s0 + $0x28] sm:$0xff]  ;;  %v67_v20 = vunpack.c.h.bf16 %v702_v8 }
   0x4   :  { %v22_v5 = vmul.f32 %v688_v3, %v688_v3  ;;  %v131_v15 = vsub.s32 0, %v697_v7  ;;  %v135_v19 = vsub.s32 1, %v697_v7  ;;  %v139_v21 = vsub.s32 2, %v697_v7  ;;  %v735_v23 = vld [vmem:[%s1314_s0 + $0x30] sm:$0xff]  ;;  %v743_v28 = vld [vmem:[%s1314_s0 + $0x38] sm:$0xff]  ;;  %v748_v29 = vld [vmem:[%s1314_s0 + $0x40] sm:$0xff] }
   0x5   :  { %v143_v22 = vsub.s32 3, %v697_v7  ;;  %v68_v25 = vunpack.c.l.bf16 %v708_v11  ;;  %v69_v26 = vunpack.c.h.bf16 %v708_v11  ;;  %v70_v27 = vunpack.c.l.bf16 %v713_v12  ;;  %v757_v34 = vld [vmem:[%s1314_s0 + $0x48] sm:$0xff]  ;;  %v762_v35 = vld [vmem:[%s1314_s0 + $0x50] sm:$0xff]  ;;  %v770_v39 = vld [vmem:[%s1314_s0 + $0x58] sm:$0xff] }
   0x6   :  { %v23_v9 = vsub.f32 %v21_v4, %v22_v5  ;;  %v71_v30 = vunpack.c.h.bf16 %v713_v12  ;;  %v72_v31 = vunpack.c.l.bf16 %v721_v17  ;;  %v73_v32 = vunpack.c.h.bf16 %v721_v17  ;;  %v775_v40 = vld [vmem:[%s1314_s0 + $0x60] sm:$0xff]  ;;  %v784_v45 = vld [vmem:[%s1314_s0 + $0x68] sm:$0xff]  ;;  %v789_v46 = vld [vmem:[%s1314_s0 + $0x70] sm:$0xff] }
   0x7   :  { %v74_v33 = vunpack.c.l.bf16 %v726_v18  ;;  %v75_v36 = vunpack.c.h.bf16 %v726_v18  ;;  %v76_v37 = vunpack.c.l.bf16 %v735_v23  ;;  %v798_v51 = vld [vmem:[%s1314_s0 + $0x78] sm:$0xff]  ;;  %v803_v52 = vld [vmem:[%s1314_s0 + $0x80] sm:$0xff]  ;;  %v812_v57 = vld [vmem:[%s1314_s0 + $0x88] sm:$0xff]  ;;  %v1318_v18 = vunpack.c.h.bf16 %v735_v23 }
   0x8   :  { %v24_v13 = vmax.f32 %v23_v9, 0.0  ;;  %v817_v58 = vld [vmem:[%s1314_s0 + $0x90] sm:$0xff]  ;;  %v826_v63 = vld [vmem:[%s1314_s0 + $0x98] sm:$0xff]  ;;  %v831_v0 = vld [vmem:[%s1314_s0 + $0xa0] sm:$0xff] }
   0x9   :  { %v840_v9 = vld [vmem:[%s1314_s0 + $0xa8] sm:$0xff]  ;;  %v854_v5 = vld [vmem:[%s1314_s0 + $0xb8] sm:$0xff]  ;;  %v859_v62 = vld [vmem:[%s1314_s0 + $0xc0] sm:$0xff] }
   0xa   :  { %v26_v24 = vadd.f32 1e-05, %v24_v13  ;;  %v845_v13 = vld [vmem:[%s1314_s0 + $0xb0] sm:$0xff]  ;;  %v868_v4 = vld [vmem:[%s1314_s0 + $0xc8] sm:$0xff]  ;;  %v25_v61 = vld [vmem:[%s1315_s2] sm:$0xf] }
   0xb   :  { %v873_v60 = vld [vmem:[%s1314_s0 + $0xd0] sm:$0xff]  ;;  %v885_v56 = vld [vmem:[%s1314_s0 + $0xd8] sm:$0xff]  ;;  %v890_v55 = vld [vmem:[%s1314_s0 + $0xe0] sm:$0xff] }
   0xc   :  { %655 = vrsqrt.f32 %v26_v24  ;;  %v899_v59 = vld [vmem:[%s1314_s0 + $0xe8] sm:$0xff]  ;;  %v904_v53 = vld [vmem:[%s1314_s0 + $0xf0] sm:$0xff]  ;;  %v916_v43 = vld [vmem:[%s1314_s0 + $0xf8] sm:$0xff] }
   0xd   :  { %v29_v54 = vld [vmem:[%s1316_s3] sm:$0xf] }
  0x16   :  { %v656_v50 = vpop.eup %655 }
  0x17   :  { %v28_v2 = vmul.f32 %v656_v50, %v25_v61 }
  0x19   :  { %v30_v47 = vmul.f32 %v28_v2, %v688_v3  ;;  %v928_v44 = vrot.slane %v28_v2, %v131_v15  ;;  %v932_v48 = vrot.slane %v28_v2, %v135_v19  ;;  %v936_v49 = vrot.slane %v28_v2, %v139_v21 }
  0x1a   :  { %v940_v1 = vrot.slane %v28_v2, %v143_v22 }
  0x1b   :  { %v31_v24 = vsub.f32 %v29_v54, %v30_v47  ;;  %v149_v42 = vmul.f32 %v928_v44, %v64_v10  ;;  %v150_v41 = vmul.f32 %v932_v48, %v65_v14  ;;  %v151_v2 = vmul.f32 %v936_v49, %v66_v16 }
  0x1c   :  { %v152_v61 = vmul.f32 %v940_v1, %v67_v20  ;;  %v153_v47 = vmul.f32 %v928_v44, %v68_v25  ;;  %v154_v10 = vmul.f32 %v932_v48, %v69_v26  ;;  %v155_v6 = vmul.f32 %v936_v49, %v70_v27 }
  0x1d   :  { %v968_v14 = vrot.slane %v31_v24, %v131_v15  ;;  %v972_v8 = vrot.slane %v31_v24, %v135_v19  ;;  %v976_v16 = vrot.slane %v31_v24, %v139_v21  ;;  %v980_v11 = vrot.slane %v31_v24, %v143_v22 }
  0x1e   :  { %v156_v20 = vmul.f32 %v940_v1, %v71_v30  ;;  %v157_v15 = vmul.f32 %v928_v44, %v72_v31  ;;  %v158_v19 = vmul.f32 %v932_v48, %v73_v32  ;;  %v159_v21 = vmul.f32 %v936_v49, %v74_v33 }
  0x1f   :  { %v234_v7 = vadd.f32 %v968_v14, %v149_v42  ;;  %v235_v22 = vadd.f32 %v972_v8, %v150_v41  ;;  %v236_v12 = vadd.f32 %v976_v16, %v151_v2  ;;  %v237_v25 = vadd.f32 %v980_v11, %v152_v61 }
  0x20   :  { %v238_v26 = vadd.f32 %v968_v14, %v153_v47  ;;  %v239_v27 = vadd.f32 %v972_v8, %v154_v10  ;;  %v240_v17 = vadd.f32 %v976_v16, %v155_v6  ;;  %v241_v30 = vadd.f32 %v980_v11, %v156_v20 }
  0x21   :  { %v298_v31 = vmax.f32 %v234_v7, 0.0  ;;  %v299_v32 = vmax.f32 %v235_v22, 0.0  ;;  %v300_v54 = vmax.f32 %v236_v12, 0.0  ;;  %v301_v33 = vmax.f32 %v237_v25, 0.0 }
  0x22   :  { %v302_v24 = vmax.f32 %v238_v26, 0.0  ;;  %v303_v42 = vmax.f32 %v239_v27, 0.0  ;;  %v304_v50 = vmax.f32 %v240_v17, 0.0  ;;  %v305_v41 = vmax.f32 %v241_v30, 0.0 }
  0x23   :  { %v623_v3 = vpack.c.bf16 %v299_v32, %v298_v31  ;;  %v624_v2 = vpack.c.bf16 %v301_v33, %v300_v54  ;;  %v242_v61 = vadd.f32 %v968_v14, %v157_v15  ;;  %v243_v47 = vadd.f32 %v972_v8, %v158_v19 }
  0x24   :  { %v625_v38 = vpack.c.bf16 %v303_v42, %v302_v24  ;;  %v626_v10 = vpack.c.bf16 %v305_v41, %v304_v50  ;;  %v160_v6 = vmul.f32 %v940_v1, %v75_v36  ;;  %v244_v20 = vadd.f32 %v976_v16, %v159_v21 }
  0x25   :  { %554 = vst [vmem:[%s1317_s4] sm:$0xff] %v623_v3  ;;  %555 = vst [vmem:[%s1317_s4 + $0x8] sm:$0xff] %v624_v2  ;;  %v306_v7 = vmax.f32 %v242_v61, 0.0  ;;  %v307_v15 = vmax.f32 %v243_v47, 0.0  ;;  %v161_v50 = vmul.f32 %v928_v44, %v76_v37  ;;  %v162_v36 = vmul.f32 %v932_v48, %v1318_v18 }
  0x26   :  { %556 = vst [vmem:[%s1317_s4 + $0x10] sm:$0xff] %v625_v38  ;;  %557 = vst [vmem:[%s1317_s4 + $0x18] sm:$0xff] %v626_v10  ;;  %v245_v3 = vadd.f32 %v980_v11, %v160_v6  ;;  %v308_v19 = vmax.f32 %v244_v20, 0.0  ;;  %v1319_v21 = vunpack.c.l.bf16 %v743_v28  ;;  %v1320_v37 = vunpack.c.h.bf16 %v743_v28 }
  0x27   :  { %v627_v12 = vpack.c.bf16 %v307_v15, %v306_v7  ;;  %v246_v25 = vadd.f32 %v968_v14, %v161_v50  ;;  %v247_v38 = vadd.f32 %v972_v8, %v162_v36  ;;  %v1321_v26 = vunpack.c.l.bf16 %v748_v29 }
  0x28   :  { %v163_v22 = vmul.f32 %v936_v49, %v1319_v21  ;;  %v164_v23 = vmul.f32 %v940_v1, %v1320_v37  ;;  %v309_v17 = vmax.f32 %v245_v3, 0.0  ;;  %v1322_v32 = vunpack.c.h.bf16 %v748_v29 }
  0x29   :  { %v165_v27 = vmul.f32 %v928_v44, %v1321_v26  ;;  %558 = vst [vmem:[%s1317_s4 + $0x20] sm:$0xff] %v627_v12  ;;  %v310_v54 = vmax.f32 %v246_v25, 0.0  ;;  %v311_v33 = vmax.f32 %v247_v38, 0.0  ;;  %v1323_v42 = vunpack.c.l.bf16 %v757_v34 }
  0x2a   :  { %v248_v30 = vadd.f32 %v976_v16, %v163_v22  ;;  %v249_v31 = vadd.f32 %v980_v11, %v164_v23  ;;  %v166_v28 = vmul.f32 %v932_v48, %v1322_v32  ;;  %v628_v2 = vpack.c.bf16 %v309_v17, %v308_v19 }
  0x2b   :  { %v250_v24 = vadd.f32 %v968_v14, %v165_v27  ;;  %v167_v41 = vmul.f32 %v936_v49, %v1323_v42  ;;  %v629_v29 = vpack.c.bf16 %v311_v33, %v310_v54  ;;  %v1324_v20 = vunpack.c.h.bf16 %v757_v34 }
  0x2c   :  { %v312_v61 = vmax.f32 %v248_v30, 0.0  ;;  %v313_v47 = vmax.f32 %v249_v31, 0.0  ;;  %v251_v10 = vadd.f32 %v972_v8, %v166_v28  ;;  %559 = vst [vmem:[%s1317_s4 + $0x28] sm:$0xff] %v628_v2  ;;  %v1325_v36 = vunpack.c.l.bf16 %v762_v35 }
  0x2d   :  { %v314_v6 = vmax.f32 %v250_v24, 0.0  ;;  %v168_v7 = vmul.f32 %v940_v1, %v1324_v20  ;;  %v252_v15 = vadd.f32 %v976_v16, %v167_v41  ;;  %v1326_v19 = vunpack.c.h.bf16 %v762_v35  ;;  %560 = vst [vmem:[%s1317_s4 + $0x30] sm:$0xff] %v629_v29 }
  0x2e   :  { %v630_v50 = vpack.c.bf16 %v313_v47, %v312_v61  ;;  %v315_v18 = vmax.f32 %v251_v10, 0.0  ;;  %v169_v3 = vmul.f32 %v928_v44, %v1325_v36  ;;  %v1327_v37 = vunpack.c.l.bf16 %v770_v39 }
  0x2f   :  { %v170_v21 = vmul.f32 %v932_v48, %v1326_v19  ;;  %v253_v34 = vadd.f32 %v980_v11, %v168_v7  ;;  %v316_v22 = vmax.f32 %v252_v15, 0.0  ;;  %v1328_v12 = vunpack.c.h.bf16 %v770_v39 }
  0x30   :  { %v171_v23 = vmul.f32 %v936_v49, %v1327_v37  ;;  %561 = vst [vmem:[%s1317_s4 + $0x38] sm:$0xff] %v630_v50  ;;  %v631_v35 = vpack.c.bf16 %v315_v18, %v314_v6  ;;  %v254_v38 = vadd.f32 %v968_v14, %v169_v3  ;;  %v1329_v27 = vunpack.c.l.bf16 %v775_v40 }
  0x31   :  { %v172_v25 = vmul.f32 %v940_v1, %v1328_v12  ;;  %v255_v26 = vadd.f32 %v972_v8, %v170_v21  ;;  %v317_v30 = vmax.f32 %v253_v34, 0.0  ;;  %v1330_v32 = vunpack.c.h.bf16 %v775_v40 }
  0x32   :  { %v173_v17 = vmul.f32 %v928_v44, %v1329_v27  ;;  %v256_v31 = vadd.f32 %v976_v16, %v171_v23  ;;  %562 = vst [vmem:[%s1317_s4 + $0x40] sm:$0xff] %v631_v35  ;;  %v318_v54 = vmax.f32 %v254_v38, 0.0  ;;  %v1331_v42 = vunpack.c.l.bf16 %v784_v45 }
  0x33   :  { %v257_v39 = vadd.f32 %v980_v11, %v172_v25  ;;  %v174_v28 = vmul.f32 %v932_v48, %v1330_v32  ;;  %v319_v33 = vmax.f32 %v255_v26, 0.0  ;;  %v632_v2 = vpack.c.bf16 %v317_v30, %v316_v22 }
  0x34   :  { %v258_v24 = vadd.f32 %v968_v14, %v173_v17  ;;  %v175_v41 = vmul.f32 %v936_v49, %v1331_v42  ;;  %v320_v61 = vmax.f32 %v256_v31, 0.0  ;;  %v1332_v6 = vunpack.c.h.bf16 %v784_v45 }
  0x35   :  { %v321_v47 = vmax.f32 %v257_v39, 0.0  ;;  %v259_v10 = vadd.f32 %v972_v8, %v174_v28  ;;  %v633_v40 = vpack.c.bf16 %v319_v33, %v318_v54  ;;  %563 = vst [vmem:[%s1317_s4 + $0x48] sm:$0xff] %v632_v2  ;;  %v1333_v18 = vunpack.c.l.bf16 %v789_v46 }
  0x36   :  { %v322_v29 = vmax.f32 %v258_v24, 0.0  ;;  %v176_v20 = vmul.f32 %v940_v1, %v1332_v6  ;;  %v260_v7 = vadd.f32 %v976_v16, %v175_v41  ;;  %v1334_v3 = vunpack.c.h.bf16 %v789_v46 }
  0x37   :  { %v634_v15 = vpack.c.bf16 %v321_v47, %v320_v61  ;;  %v323_v50 = vmax.f32 %v259_v10, 0.0  ;;  %v177_v36 = vmul.f32 %v928_v44, %v1333_v18  ;;  %564 = vst [vmem:[%s1317_s4 + $0x50] sm:$0xff] %v633_v40  ;;  %v1335_v34 = vunpack.c.l.bf16 %v798_v51 }
  0x38   :  { %v178_v19 = vmul.f32 %v932_v48, %v1334_v3  ;;  %v261_v45 = vadd.f32 %v980_v11, %v176_v20  ;;  %v324_v21 = vmax.f32 %v260_v7, 0.0  ;;  %v1336_v37 = vunpack.c.h.bf16 %v798_v51 }
  0x39   :  { %v179_v22 = vmul.f32 %v936_v49, %v1335_v34  ;;  %565 = vst [vmem:[%s1317_s4 + $0x58] sm:$0xff] %v634_v15  ;;  %v635_v46 = vpack.c.bf16 %v323_v50, %v322_v29  ;;  %v262_v12 = vadd.f32 %v968_v14, %v177_v36  ;;  %v1337_v35 = vunpack.c.l.bf16 %v803_v52 }
  0x3a   :  { %v180_v23 = vmul.f32 %v940_v1, %v1336_v37  ;;  %v263_v25 = vadd.f32 %v972_v8, %v178_v19  ;;  %v325_v26 = vmax.f32 %v261_v45, 0.0  ;;  %v1338_v17 = vunpack.c.h.bf16 %v803_v52 }
  0x3b   :  { %v181_v38 = vmul.f32 %v928_v44, %v1337_v35  ;;  %v264_v27 = vadd.f32 %v976_v16, %v179_v22  ;;  %566 = vst [vmem:[%s1317_s4 + $0x60] sm:$0xff] %v635_v46  ;;  %v326_v31 = vmax.f32 %v262_v12, 0.0  ;;  %v1339_v28 = vunpack.c.l.bf16 %v812_v57 }
  0x3c   :  { %v265_v51 = vadd.f32 %v980_v11, %v180_v23  ;;  %v182_v30 = vmul.f32 %v932_v48, %v1338_v17  ;;  %v327_v39 = vmax.f32 %v263_v25, 0.0  ;;  %v636_v33 = vpack.c.bf16 %v325_v26, %v324_v21 }
  0x3d   :  { %v266_v32 = vadd.f32 %v968_v14, %v181_v38  ;;  %v183_v54 = vmul.f32 %v936_v49, %v1339_v28  ;;  %v328_v24 = vmax.f32 %v264_v27, 0.0  ;;  %v1340_v61 = vunpack.c.h.bf16 %v812_v57 }
  0x3e   :  { %v329_v42 = vmax.f32 %v265_v51, 0.0  ;;  %v267_v41 = vadd.f32 %v972_v8, %v182_v30  ;;  %v637_v52 = vpack.c.bf16 %v327_v39, %v326_v31  ;;  %567 = vst [vmem:[%s1317_s4 + $0x68] sm:$0xff] %v636_v33  ;;  %v1341_v6 = vunpack.c.l.bf16 %v817_v58 }
  0x3f   :  { %v330_v2 = vmax.f32 %v266_v32, 0.0  ;;  %v184_v47 = vmul.f32 %v940_v1, %v1340_v61  ;;  %v268_v10 = vadd.f32 %v976_v16, %v183_v54  ;;  %v1342_v7 = vunpack.c.h.bf16 %v817_v58 }
  0x40   :  { %v638_v40 = vpack.c.bf16 %v329_v42, %v328_v24  ;;  %v331_v29 = vmax.f32 %v267_v41, 0.0  ;;  %v185_v20 = vmul.f32 %v928_v44, %v1341_v6  ;;  %568 = vst [vmem:[%s1317_s4 + $0x70] sm:$0xff] %v637_v52  ;;  %v1343_v18 = vunpack.c.l.bf16 %v826_v63 }
  0x41   :  { %v186_v15 = vmul.f32 %v932_v48, %v1342_v7  ;;  %v269_v57 = vadd.f32 %v980_v11, %v184_v47  ;;  %v332_v50 = vmax.f32 %v268_v10, 0.0  ;;  %v1344_v3 = vunpack.c.h.bf16 %v826_v63 }
  0x42   :  { %v187_v36 = vmul.f32 %v936_v49, %v1343_v18  ;;  %569 = vst [vmem:[%s1317_s4 + $0x78] sm:$0xff] %v638_v40  ;;  %v639_v58 = vpack.c.bf16 %v331_v29, %v330_v2  ;;  %v270_v45 = vadd.f32 %v968_v14, %v185_v20  ;;  %v1345_v34 = vunpack.c.l.bf16 %v831_v0 }
  0x43   :  { %v188_v19 = vmul.f32 %v940_v1, %v1344_v3  ;;  %v271_v21 = vadd.f32 %v972_v8, %v186_v15  ;;  %v333_v37 = vmax.f32 %v269_v57, 0.0  ;;  %v1346_v46 = vunpack.c.h.bf16 %v831_v0 }
  0x44   :  { %v189_v22 = vmul.f32 %v928_v44, %v1345_v34  ;;  %v272_v23 = vadd.f32 %v976_v16, %v187_v36  ;;  %570 = vst [vmem:[%s1317_s4 + $0x80] sm:$0xff] %v639_v58  ;;  %v334_v25 = vmax.f32 %v270_v45, 0.0  ;;  %v1347_v26 = vunpack.c.l.bf16 %v840_v9 }
  0x45   :  { %v273_v63 = vadd.f32 %v980_v11, %v188_v19  ;;  %v190_v12 = vmul.f32 %v932_v48, %v1346_v46  ;;  %v335_v35 = vmax.f32 %v271_v21, 0.0  ;;  %v640_v51 = vpack.c.bf16 %v333_v37, %v332_v50 }
  0x46   :  { %v274_v38 = vadd.f32 %v968_v14, %v189_v22  ;;  %v191_v27 = vmul.f32 %v936_v49, %v1347_v26  ;;  %v336_v17 = vmax.f32 %v272_v23, 0.0  ;;  %v1348_v32 = vunpack.c.h.bf16 %v840_v9 }
  0x47   :  { %v337_v30 = vmax.f32 %v273_v63, 0.0  ;;  %v275_v31 = vadd.f32 %v972_v8, %v190_v12  ;;  %v641_v0 = vpack.c.bf16 %v335_v35, %v334_v25  ;;  %571 = vst [vmem:[%s1317_s4 + $0x88] sm:$0xff] %v640_v51  ;;  %v1349_v42 = vunpack.c.l.bf16 %v845_v13 }
  0x48   :  { %v338_v39 = vmax.f32 %v274_v38, 0.0  ;;  %v192_v28 = vmul.f32 %v940_v1, %v1348_v32  ;;  %v276_v54 = vadd.f32 %v976_v16, %v191_v27  ;;  %v1350_v52 = vunpack.c.h.bf16 %v845_v13 }
  0x49   :  { %v642_v33 = vpack.c.bf16 %v337_v30, %v336_v17  ;;  %v339_v24 = vmax.f32 %v275_v31, 0.0  ;;  %v193_v41 = vmul.f32 %v928_v44, %v1349_v42  ;;  %572 = vst [vmem:[%s1317_s4 + $0x90] sm:$0xff] %v641_v0  ;;  %v1351_v47 = vunpack.c.l.bf16 %v854_v5 }
  0x4a   :  { %v194_v2 = vmul.f32 %v932_v48, %v1350_v52  ;;  %v277_v9 = vadd.f32 %v980_v11, %v192_v28  ;;  %v340_v61 = vmax.f32 %v276_v54, 0.0  ;;  %v1352_v40 = vunpack.c.h.bf16 %v854_v5 }
  0x4b   :  { %v195_v10 = vmul.f32 %v936_v49, %v1351_v47  ;;  %573 = vst [vmem:[%s1317_s4 + $0x98] sm:$0xff] %v642_v33  ;;  %v643_v13 = vpack.c.bf16 %v339_v24, %v338_v39  ;;  %v278_v6 = vadd.f32 %v968_v14, %v193_v41  ;;  %v1353_v7 = vunpack.c.l.bf16 %v859_v62 }
  0x4c   :  { %v196_v29 = vmul.f32 %v940_v1, %v1352_v40  ;;  %v279_v20 = vadd.f32 %v972_v8, %v194_v2  ;;  %v341_v57 = vmax.f32 %v277_v9, 0.0  ;;  %v1354_v18 = vunpack.c.h.bf16 %v859_v62 }
  0x4d   :  { %v197_v15 = vmul.f32 %v928_v44, %v1353_v7  ;;  %v280_v50 = vadd.f32 %v976_v16, %v195_v10  ;;  %574 = vst [vmem:[%s1317_s4 + $0xa0] sm:$0xff] %v643_v13  ;;  %v342_v3 = vmax.f32 %v278_v6, 0.0  ;;  %v1355_v45 = vunpack.c.l.bf16 %v868_v4 }
  0x4e   :  { %v281_v5 = vadd.f32 %v980_v11, %v196_v29  ;;  %v198_v36 = vmul.f32 %v932_v48, %v1354_v18  ;;  %v343_v19 = vmax.f32 %v279_v20, 0.0  ;;  %v644_v34 = vpack.c.bf16 %v341_v57, %v340_v61 }
  0x4f   :  { %v282_v58 = vadd.f32 %v968_v14, %v197_v15  ;;  %v199_v21 = vmul.f32 %v936_v49, %v1355_v45  ;;  %v344_v22 = vmax.f32 %v280_v50, 0.0  ;;  %v1356_v46 = vunpack.c.h.bf16 %v868_v4 }
  0x50   :  { %v345_v37 = vmax.f32 %v281_v5, 0.0  ;;  %v283_v23 = vadd.f32 %v972_v8, %v198_v36  ;;  %v645_v62 = vpack.c.bf16 %v343_v19, %v342_v3  ;;  %575 = vst [vmem:[%s1317_s4 + $0xa8] sm:$0xff] %v644_v34  ;;  %v1357_v26 = vunpack.c.l.bf16 %v873_v60 }
  0x51   :  { %v346_v63 = vmax.f32 %v282_v58, 0.0  ;;  %v200_v12 = vmul.f32 %v940_v1, %v1356_v46  ;;  %v284_v25 = vadd.f32 %v976_v16, %v199_v21  ;;  %v1358_v51 = vunpack.c.h.bf16 %v873_v60 }
  0x52   :  { %v646_v35 = vpack.c.bf16 %v345_v37, %v344_v22  ;;  %v347_v38 = vmax.f32 %v283_v23, 0.0  ;;  %v201_v27 = vmul.f32 %v928_v44, %v1357_v26  ;;  %576 = vst [vmem:[%s1317_s4 + $0xb0] sm:$0xff] %v645_v62  ;;  %v1359_v31 = vunpack.c.l.bf16 %v885_v56 }
  0x53   :  { %v202_v17 = vmul.f32 %v932_v48, %v1358_v51  ;;  %v285_v4 = vadd.f32 %v980_v11, %v200_v12  ;;  %v348_v30 = vmax.f32 %v284_v25, 0.0  ;;  %v1360_v39 = vunpack.c.h.bf16 %v885_v56 }
  0x54   :  { %v203_v0 = vmul.f32 %v936_v49, %v1359_v31  ;;  %577 = vst [vmem:[%s1317_s4 + $0xb8] sm:$0xff] %v646_v35  ;;  %v647_v60 = vpack.c.bf16 %v347_v38, %v346_v63  ;;  %v286_v28 = vadd.f32 %v968_v14, %v201_v27  ;;  %v1361_v33 = vunpack.c.l.bf16 %v890_v55 }
  0x55   :  { %v204_v32 = vmul.f32 %v940_v1, %v1360_v39  ;;  %v287_v54 = vadd.f32 %v972_v8, %v202_v17  ;;  %v349_v42 = vmax.f32 %v285_v4, 0.0  ;;  %v1362_v52 = vunpack.c.h.bf16 %v890_v55 }
  0x56   :  { %v205_v24 = vmul.f32 %v928_v44, %v1361_v33  ;;  %v288_v41 = vadd.f32 %v976_v16, %v203_v0  ;;  %578 = vst [vmem:[%s1317_s4 + $0xc0] sm:$0xff] %v647_v60  ;;  %v350_v9 = vmax.f32 %v286_v28, 0.0  ;;  %v1363_v10 = vunpack.c.l.bf16 %v899_v59 }
  0x57   :  { %v289_v56 = vadd.f32 %v980_v11, %v204_v32  ;;  %v206_v2 = vmul.f32 %v932_v48, %v1362_v52  ;;  %v351_v61 = vmax.f32 %v287_v54, 0.0  ;;  %v648_v29 = vpack.c.bf16 %v349_v42, %v348_v30 }
  0x58   :  { %v290_v47 = vadd.f32 %v968_v14, %v205_v24  ;;  %v207_v40 = vmul.f32 %v936_v49, %v1363_v10  ;;  %v352_v13 = vmax.f32 %v288_v41, 0.0  ;;  %v1364_v15 = vunpack.c.h.bf16 %v899_v59 }
  0x59   :  { %v353_v6 = vmax.f32 %v289_v56, 0.0  ;;  %v291_v20 = vadd.f32 %v972_v8, %v206_v2  ;;  %v649_v55 = vpack.c.bf16 %v351_v61, %v350_v9  ;;  %579 = vst [vmem:[%s1317_s4 + $0xc8] sm:$0xff] %v648_v29  ;;  %v1365_v36 = vunpack.c.l.bf16 %v904_v53 }
  0x5a   :  { %v354_v7 = vmax.f32 %v290_v47, 0.0  ;;  %v208_v57 = vmul.f32 %v940_v1, %v1364_v15  ;;  %v292_v50 = vadd.f32 %v976_v16, %v207_v40  ;;  %v1366_v19 = vunpack.c.h.bf16 %v904_v53 }
  0x5b   :  { %v650_v5 = vpack.c.bf16 %v353_v6, %v352_v13  ;;  %v355_v18 = vmax.f32 %v291_v20, 0.0  ;;  %v209_v3 = vmul.f32 %v928_v44, %v1365_v36  ;;  %580 = vst [vmem:[%s1317_s4 + $0xd0] sm:$0xff] %v649_v55  ;;  %v1367_v21 = vunpack.c.l.bf16 %v916_v43 }
  0x5c   :  { %v210_v58 = vmul.f32 %v932_v48, %v1366_v19  ;;  %v293_v59 = vadd.f32 %v980_v11, %v208_v57  ;;  %v356_v45 = vmax.f32 %v292_v50, 0.0  ;;  %v1368_v22 = vunpack.c.h.bf16 %v916_v43 }
  0x5d   :  { %v211_v34 = vmul.f32 %v936_v49, %v1367_v21  ;;  %581 = vst [vmem:[%s1317_s4 + $0xd8] sm:$0xff] %v650_v5  ;;  %v651_v44 = vpack.c.bf16 %v355_v18, %v354_v7  ;;  %v294_v48 = vadd.f32 %v968_v14, %v209_v3 }
  0x5e   :  { %v212_v37 = vmul.f32 %v940_v1, %v1368_v22  ;;  %v295_v53 = vadd.f32 %v972_v8, %v210_v58  ;;  %v357_v23 = vmax.f32 %v293_v59, 0.0 }
  0x5f   :  { %v296_v62 = vadd.f32 %v976_v16, %v211_v34  ;;  %582 = vst [vmem:[%s1317_s4 + $0xe0] sm:$0xff] %v651_v44  ;;  %v358_v43 = vmax.f32 %v294_v48, 0.0 }
  0x60   :  { %v297_v63 = vadd.f32 %v980_v11, %v212_v37  ;;  %v359_v49 = vmax.f32 %v295_v53, 0.0  ;;  %v652_v1 = vpack.c.bf16 %v357_v23, %v356_v45 }
  0x61   :  { %v360_v46 = vmax.f32 %v296_v62, 0.0 }
  0x62   :  { %v361_v12 = vmax.f32 %v297_v63, 0.0  ;;  %v653_v25 = vpack.c.bf16 %v359_v49, %v358_v43  ;;  %583 = vst [vmem:[%s1317_s4 + $0xe8] sm:$0xff] %v652_v1 }
  0x64   :  { %v654_v14 = vpack.c.bf16 %v361_v12, %v360_v46  ;;  %584 = vst [vmem:[%s1317_s4 + $0xf0] sm:$0xff] %v653_v25 }
  0x66   :  { %585 = vst [vmem:[%s1317_s4 + $0xf8] sm:$0xff] %v654_v14 }

// kernel: generator_forward.12
= control target key start
LH: loop header
LB: loop body
LE: loop exit
PB: predicated region body
PF: predicated region fallthrough
CT: control target
= control target key end

     0   :  { %v81_v8 = vlaneseq  ;;  %s660_s1 = inlined_call_operand.vmem [shape: f32[2,256], index: 1, kind: input, shape index: {}]   ;;  %s661_s0 = inlined_call_operand.vmem [shape: bf16[128,256], index: 0, kind: input, shape index: {}]   ;;  %s662_s2 = inlined_call_operand.vmem [shape: f32[1,256], index: 2, kind: input, shape index: {}]   ;;  %s663_s3 = inlined_call_operand.vmem [shape: f32[1,256], index: 3, kind: input, shape index: {}]   ;;  %s664_s4 = inlined_call_operand.vmem [shape: bf16[128,256], index: 4, kind: output, shape index: {}]  }
   0x1   :  { %v17_v0 = vld [vmem:[%s660_s1] ss:$2 sm:$0x3]  ;;  %v314_v1 = vld [vmem:[%s660_s1 + $0x1] ss:$2 sm:$0x3] }
   0x2   :  { %v18_v2 = vmul.f32 0.0078125, %v17_v0  ;;  %v21_v3 = vmul.f32 0.0078125, %v314_v1  ;;  %v383_v9 = vld [vmem:[%s661_s0] sm:$0xff]  ;;  %v385_v10 = vshrl.u32 %v81_v8, 7  ;;  %v390_v11 = vld [vmem:[%s661_s0 + $0x8] sm:$0xff]  ;;  %v395_v12 = vld [vmem:[%s661_s0 + $0x10] sm:$0xff] }
   0x3   :  { %v400_v13 = vld [vmem:[%s661_s0 + $0x18] sm:$0xff]  ;;  %v48_v14 = vunpack.c.l.bf16 %v383_v9  ;;  %v49_v15 = vunpack.c.h.bf16 %v383_v9  ;;  %v407_v16 = vld [vmem:[%s661_s0 + $0x20] sm:$0xff]  ;;  %v412_v17 = vld [vmem:[%s661_s0 + $0x28] sm:$0xff]  ;;  %v50_v20 = vunpack.c.l.bf16 %v390_v11  ;;  %v51_v21 = vunpack.c.h.bf16 %v390_v11 }
   0x4   :  { %v22_v4 = vmul.f32 %v18_v2, %v18_v2  ;;  %v83_v18 = vsub.s32 0, %v385_v10  ;;  %v87_v19 = vsub.s32 1, %v385_v10  ;;  %v421_v22 = vld [vmem:[%s661_s0 + $0x30] sm:$0xff]  ;;  %v426_v23 = vld [vmem:[%s661_s0 + $0x38] sm:$0xff]  ;;  %v52_v24 = vunpack.c.l.bf16 %v395_v12  ;;  %v435_v28 = vld [vmem:[%s661_s0 + $0x40] sm:$0xff] }
   0x5   :  { %v53_v25 = vunpack.c.h.bf16 %v395_v12  ;;  %v54_v26 = vunpack.c.l.bf16 %v400_v13  ;;  %v55_v27 = vunpack.c.h.bf16 %v400_v13  ;;  %v440_v29 = vld [vmem:[%s661_s0 + $0x48] sm:$0xff]  ;;  %v25_v30 = vld [vmem:[%s662_s2] sm:$0x3]  ;;  %v56_v31 = vunpack.c.l.bf16 %v407_v16  ;;  %v452_v35 = vld [vmem:[%s661_s0 + $0x50] sm:$0xff] }
   0x6   :  { %v23_v5 = vsub.f32 %v21_v3, %v22_v4  ;;  %v57_v32 = vunpack.c.h.bf16 %v407_v16  ;;  %v58_v33 = vunpack.c.l.bf16 %v412_v17  ;;  %v59_v34 = vunpack.c.h.bf16 %v412_v17  ;;  %v457_v36 = vld [vmem:[%s661_s0 + $0x58] sm:$0xff]  ;;  %v466_v41 = vld [vmem:[%s661_s0 + $0x60] sm:$0xff]  ;;  %v471_v42 = vld [vmem:[%s661_s0 + $0x68] sm:$0xff] }
   0x7   :  { %v60_v37 = vunpack.c.l.bf16 %v421_v22  ;;  %v61_v38 = vunpack.c.h.bf16 %v421_v22  ;;  %v62_v39 = vunpack.c.l.bf16 %v426_v23  ;;  %v63_v40 = vunpack.c.h.bf16 %v426_v23  ;;  %v483_v52 = vld [vmem:[%s661_s0 + $0x70] sm:$0xff]  ;;  %v488_v53 = vld [vmem:[%s661_s0 + $0x78] sm:$0xff]  ;;  %v29_v54 = vld [vmem:[%s663_s3] sm:$0x3] }
   0x8   :  { %v24_v6 = vmax.f32 %v23_v5, 0.0  ;;  %v64_v44 = vunpack.c.l.bf16 %v435_v28  ;;  %v65_v45 = vunpack.c.h.bf16 %v435_v28  ;;  %v66_v46 = vunpack.c.l.bf16 %v440_v29 }
   0x9   :  { %v67_v47 = vunpack.c.h.bf16 %v440_v29  ;;  %v68_v49 = vunpack.c.l.bf16 %v452_v35  ;;  %v69_v50 = vunpack.c.h.bf16 %v452_v35  ;;  %v70_v51 = vunpack.c.l.bf16 %v457_v36 }
   0xa   :  { %v26_v7 = vadd.f32 1e-05, %v24_v6  ;;  %v71_v55 = vunpack.c.h.bf16 %v457_v36  ;;  %v72_v56 = vunpack.c.l.bf16 %v466_v41  ;;  %v73_v57 = vunpack.c.h.bf16 %v466_v41 }
   0xb   :  { %v74_v58 = vunpack.c.l.bf16 %v471_v42  ;;  %v75_v62 = vunpack.c.h.bf16 %v471_v42  ;;  %v76_v63 = vunpack.c.l.bf16 %v483_v52  ;;  %v77_v0 = vunpack.c.h.bf16 %v483_v52 }
   0xc   :  { %347 = vrsqrt.f32 %v26_v7  ;;  %v78_v1 = vunpack.c.l.bf16 %v488_v53  ;;  %v79_v3 = vunpack.c.h.bf16 %v488_v53 }
  0x16   :  { %v348_v43 = vpop.eup %347 }
  0x17   :  { %v28_v48 = vmul.f32 %v348_v43, %v25_v30 }
  0x19   :  { %v30_v59 = vmul.f32 %v28_v48, %v18_v2  ;;  %v497_v60 = vrot.slane %v28_v48, %v83_v18  ;;  %v499_v61 = vrot.slane %v28_v48, %v87_v19 }
  0x1b   :  { %v31_v4 = vsub.f32 %v29_v54, %v30_v59  ;;  %v91_v5 = vmul.f32 %v497_v60, %v48_v14  ;;  %v92_v6 = vmul.f32 %v499_v61, %v49_v15  ;;  %v93_v2 = vmul.f32 %v497_v60, %v50_v20 }
  0x1c   :  { %v94_v7 = vmul.f32 %v499_v61, %v51_v21  ;;  %v95_v8 = vmul.f32 %v497_v60, %v52_v24  ;;  %v96_v9 = vmul.f32 %v499_v61, %v53_v25  ;;  %v97_v10 = vmul.f32 %v497_v60, %v54_v26 }
  0x1d   :  { %v513_v11 = vrot.slane %v31_v4, %v83_v18  ;;  %v515_v12 = vrot.slane %v31_v4, %v87_v19  ;;  %v98_v13 = vmul.f32 %v499_v61, %v55_v27  ;;  %v99_v14 = vmul.f32 %v497_v60, %v56_v31 }
  0x1e   :  { %v100_v15 = vmul.f32 %v499_v61, %v57_v32  ;;  %v101_v16 = vmul.f32 %v497_v60, %v58_v33  ;;  %v102_v17 = vmul.f32 %v499_v61, %v59_v34  ;;  %v103_v20 = vmul.f32 %v497_v60, %v60_v37 }
  0x1f   :  { %v134_v21 = vadd.f32 %v513_v11, %v91_v5  ;;  %v135_v24 = vadd.f32 %v515_v12, %v92_v6  ;;  %v136_v18 = vadd.f32 %v513_v11, %v93_v2  ;;  %v137_v19 = vadd.f32 %v515_v12, %v94_v7 }
  0x20   :  { %v138_v25 = vadd.f32 %v513_v11, %v95_v8  ;;  %v139_v26 = vadd.f32 %v515_v12, %v96_v9  ;;  %v140_v27 = vadd.f32 %v513_v11, %v97_v10  ;;  %v141_v30 = vadd.f32 %v515_v12, %v98_v13 }
  0x21   :  { %v166_v31 = vmax.f32 %v134_v21, 0.0  ;;  %v167_v32 = vmax.f32 %v135_v24, 0.0  ;;  %v168_v33 = vmax.f32 %v136_v18, 0.0  ;;  %v169_v34 = vmax.f32 %v137_v19, 0.0 }
  0x22   :  { %v170_v37 = vmax.f32 %v138_v25, 0.0  ;;  %v171_v43 = vmax.f32 %v139_v26, 0.0  ;;  %v172_v48 = vmax.f32 %v140_v27, 0.0  ;;  %v173_v54 = vmax.f32 %v141_v30, 0.0 }
  0x23   :  { %v331_v59 = vpack.c.bf16 %v167_v32, %v166_v31  ;;  %v332_v4 = vpack.c.bf16 %v169_v34, %v168_v33  ;;  %v142_v5 = vadd.f32 %v513_v11, %v99_v14  ;;  %v143_v6 = vadd.f32 %v515_v12, %v100_v15 }
  0x24   :  { %v333_v2 = vpack.c.bf16 %v171_v43, %v170_v37  ;;  %v334_v7 = vpack.c.bf16 %v173_v54, %v172_v48  ;;  %v144_v8 = vadd.f32 %v513_v11, %v101_v16  ;;  %v145_v9 = vadd.f32 %v515_v12, %v102_v17 }
  0x25   :  { %294 = vst [vmem:[%s664_s4] sm:$0xff] %v331_v59  ;;  %295 = vst [vmem:[%s664_s4 + $0x8] sm:$0xff] %v332_v4  ;;  %v174_v10 = vmax.f32 %v142_v5, 0.0  ;;  %v175_v13 = vmax.f32 %v143_v6, 0.0  ;;  %v104_v14 = vmul.f32 %v499_v61, %v61_v38  ;;  %v146_v15 = vadd.f32 %v513_v11, %v103_v20 }
  0x26   :  { %296 = vst [vmem:[%s664_s4 + $0x10] sm:$0xff] %v333_v2  ;;  %297 = vst [vmem:[%s664_s4 + $0x18] sm:$0xff] %v334_v7  ;;  %v176_v16 = vmax.f32 %v144_v8, 0.0  ;;  %v177_v17 = vmax.f32 %v145_v9, 0.0  ;;  %v105_v21 = vmul.f32 %v497_v60, %v62_v39  ;;  %v106_v22 = vmul.f32 %v499_v61, %v63_v40 }
  0x27   :  { %v335_v38 = vpack.c.bf16 %v175_v13, %v174_v10  ;;  %v147_v20 = vadd.f32 %v515_v12, %v104_v14  ;;  %v178_v24 = vmax.f32 %v146_v15, 0.0  ;;  %v107_v18 = vmul.f32 %v497_v60, %v64_v44 }
  0x28   :  { %v336_v19 = vpack.c.bf16 %v177_v17, %v176_v16  ;;  %v148_v25 = vadd.f32 %v513_v11, %v105_v21  ;;  %v149_v26 = vadd.f32 %v515_v12, %v106_v22  ;;  %v108_v39 = vmul.f32 %v499_v61, %v65_v45 }
  0x29   :  { %298 = vst [vmem:[%s664_s4 + $0x20] sm:$0xff] %v335_v38  ;;  %v179_v23 = vmax.f32 %v147_v20, 0.0  ;;  %v150_v40 = vadd.f32 %v513_v11, %v107_v18  ;;  %v109_v44 = vmul.f32 %v497_v60, %v66_v46  ;;  %v110_v27 = vmul.f32 %v499_v61, %v67_v47 }
  0x2a   :  { %299 = vst [vmem:[%s664_s4 + $0x28] sm:$0xff] %v336_v19  ;;  %v180_v28 = vmax.f32 %v148_v25, 0.0  ;;  %v181_v45 = vmax.f32 %v149_v26, 0.0  ;;  %v151_v30 = vadd.f32 %v515_v12, %v108_v39  ;;  %v111_v31 = vmul.f32 %v497_v60, %v68_v49 }
  0x2b   :  { %v337_v32 = vpack.c.bf16 %v179_v23, %v178_v24  ;;  %v182_v33 = vmax.f32 %v150_v40, 0.0  ;;  %v152_v46 = vadd.f32 %v513_v11, %v109_v44  ;;  %v153_v29 = vadd.f32 %v515_v12, %v110_v27 }
  0x2c   :  { %v338_v34 = vpack.c.bf16 %v181_v45, %v180_v28  ;;  %v183_v47 = vmax.f32 %v151_v30, 0.0  ;;  %v112_v37 = vmul.f32 %v499_v61, %v69_v50  ;;  %v154_v43 = vadd.f32 %v513_v11, %v111_v31 }
  0x2d   :  { %300 = vst [vmem:[%s664_s4 + $0x30] sm:$0xff] %v337_v32  ;;  %v184_v48 = vmax.f32 %v152_v46, 0.0  ;;  %v185_v49 = vmax.f32 %v153_v29, 0.0  ;;  %v113_v54 = vmul.f32 %v497_v60, %v70_v51  ;;  %v114_v59 = vmul.f32 %v499_v61, %v71_v55 }
  0x2e   :  { %301 = vst [vmem:[%s664_s4 + $0x38] sm:$0xff] %v338_v34  ;;  %v339_v35 = vpack.c.bf16 %v183_v47, %v182_v33  ;;  %v155_v50 = vadd.f32 %v515_v12, %v112_v37  ;;  %v186_v4 = vmax.f32 %v154_v43, 0.0  ;;  %v115_v5 = vmul.f32 %v497_v60, %v72_v56 }
  0x2f   :  { %v340_v6 = vpack.c.bf16 %v185_v49, %v184_v48  ;;  %v156_v2 = vadd.f32 %v513_v11, %v113_v54  ;;  %v157_v51 = vadd.f32 %v515_v12, %v114_v59  ;;  %v116_v36 = vmul.f32 %v499_v61, %v73_v57 }
  0x30   :  { %302 = vst [vmem:[%s664_s4 + $0x40] sm:$0xff] %v339_v35  ;;  %v187_v55 = vmax.f32 %v155_v50, 0.0  ;;  %v158_v7 = vadd.f32 %v513_v11, %v115_v5  ;;  %v117_v56 = vmul.f32 %v497_v60, %v74_v58  ;;  %v118_v8 = vmul.f32 %v499_v61, %v75_v62 }
  0x31   :  { %303 = vst [vmem:[%s664_s4 + $0x48] sm:$0xff] %v340_v6  ;;  %v188_v41 = vmax.f32 %v156_v2, 0.0  ;;  %v189_v57 = vmax.f32 %v157_v51, 0.0  ;;  %v159_v9 = vadd.f32 %v515_v12, %v116_v36  ;;  %v119_v10 = vmul.f32 %v497_v60, %v76_v63 }
  0x32   :  { %v341_v13 = vpack.c.bf16 %v187_v55, %v186_v4  ;;  %v190_v14 = vmax.f32 %v158_v7, 0.0  ;;  %v160_v58 = vadd.f32 %v513_v11, %v117_v56  ;;  %v161_v42 = vadd.f32 %v515_v12, %v118_v8 }
  0x33   :  { %v342_v15 = vpack.c.bf16 %v189_v57, %v188_v41  ;;  %v191_v62 = vmax.f32 %v159_v9, 0.0  ;;  %v120_v16 = vmul.f32 %v499_v61, %v77_v0  ;;  %v162_v17 = vadd.f32 %v513_v11, %v119_v10 }
  0x34   :  { %304 = vst [vmem:[%s664_s4 + $0x50] sm:$0xff] %v341_v13  ;;  %v192_v21 = vmax.f32 %v160_v58, 0.0  ;;  %v193_v63 = vmax.f32 %v161_v42, 0.0  ;;  %v121_v22 = vmul.f32 %v497_v60, %v78_v1  ;;  %v122_v38 = vmul.f32 %v499_v61, %v79_v3 }
  0x35   :  { %305 = vst [vmem:[%s664_s4 + $0x58] sm:$0xff] %v342_v15  ;;  %v343_v52 = vpack.c.bf16 %v191_v62, %v190_v14  ;;  %v163_v0 = vadd.f32 %v515_v12, %v120_v16  ;;  %v194_v20 = vmax.f32 %v162_v17, 0.0 }
  0x36   :  { %v344_v24 = vpack.c.bf16 %v193_v63, %v192_v21  ;;  %v164_v18 = vadd.f32 %v513_v11, %v121_v22  ;;  %v165_v19 = vadd.f32 %v515_v12, %v122_v38 }
  0x37   :  { %306 = vst [vmem:[%s664_s4 + $0x60] sm:$0xff] %v343_v52  ;;  %v195_v53 = vmax.f32 %v163_v0, 0.0 }
  0x38   :  { %307 = vst [vmem:[%s664_s4 + $0x68] sm:$0xff] %v344_v24  ;;  %v196_v60 = vmax.f32 %v164_v18, 0.0  ;;  %v197_v61 = vmax.f32 %v165_v19, 0.0 }
  0x39   :  { %v345_v1 = vpack.c.bf16 %v195_v53, %v194_v20 }
  0x3a   :  { %v346_v3 = vpack.c.bf16 %v197_v61, %v196_v60 }
  0x3b   :  { %308 = vst [vmem:[%s664_s4 + $0x70] sm:$0xff] %v345_v1 }
  0x3c   :  { %309 = vst [vmem:[%s664_s4 + $0x78] sm:$0xff] %v346_v3 }

// kernel: generator_forward.11
= control target key start
LH: loop header
LB: loop body
LE: loop exit
PB: predicated region body
PF: predicated region fallthrough
CT: control target
= control target key end

     0   :  { %s3592_s12 = smov 0   ;;  %s3594_s13 = smov 0   ;;  %s3983_s0 = inlined_call_operand.vmem [shape: bf16[4,32,2048], index: 0, kind: input, shape index: {}]   ;;  %s3984_s1 = inlined_call_operand.vmem [shape: bf16[4,2048,256], index: 1, kind: input, shape index: {}]   ;;  %s3985_s2 = inlined_call_operand.vmem [shape: bf16[4,32,256], index: 2, kind: output, shape index: {0}]   ;;  %s3986_s3 = inlined_call_operand.vmem [shape: f32[4,1,2,256], index: 3, kind: output, shape index: {1}]  }
   0x1   :  { %s3596_s14 = smov 0  }
   0x2 LB: > { %s33_s15 = sadd.s32 1, %s3565_s13  ;;  %p2770_p0 = scmp.ge.s32.totalorder %s3569_s14, 1  ;;  %s3569_s14 = sphi %s3596_s14, %s14_s14   ;;  %s3565_s13 = sphi %s3594_s13, %s3988_s13   ;;  %s3561_s12 = sphi %s3592_s12, %s3987_s12  }
   0x3   : > { %p35_p1 = scmp.ge.s32.totalorder %s33_s15, 4  ;;  %p192_p2 = scmp.lt.s32.totalorder %s3569_s14, 5 }
   0x5   : > { %s3990_s15 = smov (%p35_p1, %s33_s15), 0  ;;  %p193_p3 = pnand %p2770_p0, %p192_p2 }
   0x6   : > { %p253_p4 = scmp.lt.s32.totalorder (!%p193_p3), %s3561_s12, 3 }
   0x7   : > { %196 = sbr.rel (%p193_p3) target bundleno = 523 (0x20b), region = 28 }
   0xe   : > { %s3992_s12 = smov (!%p253_p4, %s3561_s12), 3 }
   0xf   : > { %s3075_s16 = sshll.u32 %s3992_s12, 11  ;;  %s3074_s20 = sshll.u32 %s3992_s12, 8 }
  0x10   : > { %s3616_s19 = scalar_lea.vmem %s3984_s1, %s3075_s16  ;;  %s3666_s23 = scalar_lea.vmem %s3983_s0, %s3074_s20 }
  0x11   : > { %v3163_v0 = vld [vmem:[%s3616_s19 + $0x4] ss:$8 sps:$4 sm:$0xff]   ;;  %v3167_v2 = vld [vmem:[%s3616_s19] ss:$8 sps:$4 sm:$0xff]   ;;  %v3169_v4 = vld [vmem:[%s3616_s19 + $0x14] ss:$8 sps:$4 sm:$0xff]  }
  0x12   : > { %v3165_v1 = vld [vmem:[%s3616_s19 + $0x404] ss:$8 sps:$4 sm:$0xff]   ;;  %2031 = vmatprep.subr.bf16.mxu1 %v3163_v0  ;;  %v3168_v3 = vld [vmem:[%s3616_s19 + $0x400] ss:$8 sps:$4 sm:$0xff]   ;;  %v3171_v5 = vld [vmem:[%s3616_s19 + $0x414] ss:$8 sps:$4 sm:$0xff]  }
  0x13   : > { %2243 = vmatprep.subr.bf16.mxu0 %v3165_v1  ;;  %2032 = vmatpush1.bf16.msra.mxu1 %v3167_v2  ;;  %v3173_v6 = vld [vmem:[%s3616_s19 + $0x10] ss:$8 sps:$4 sm:$0xff]   ;;  %v3175_v8 = vld [vmem:[%s3616_s19 + $0x24] ss:$8 sps:$4 sm:$0xff]   ;;  %v3179_v10 = vld [vmem:[%s3616_s19 + $0x20] ss:$8 sps:$4 sm:$0xff]  }
  0x14   : > { %2244 = vmatpush1.bf16.msra.mxu0 %v3168_v3  ;;  %2033 = vmatprep.subr.bf16.mxu1 %v3169_v4  ;;  %v3174_v7 = vld [vmem:[%s3616_s19 + $0x410] ss:$8 sps:$4 sm:$0xff]   ;;  %v3177_v9 = vld [vmem:[%s3616_s19 + $0x424] ss:$8 sps:$4 sm:$0xff]   ;;  %v3180_v11 = vld [vmem:[%s3616_s19 + $0x420] ss:$8 sps:$4 sm:$0xff]  }
  0x15   : > { %2245 = vmatprep.subr.bf16.mxu0 %v3171_v5  ;;  %v3181_v12 = vld [vmem:[%s3616_s19 + $0x34] ss:$8 sps:$4 sm:$0xff]   ;;  %v3185_v14 = vld [vmem:[%s3616_s19 + $0x30] ss:$8 sps:$4 sm:$0xff]   ;;  %v3187_v16 = vld [vmem:[%s3616_s19 + $0x44] ss:$8 sps:$4 sm:$0xff]  }
  0x16   : > { %v3183_v13 = vld [vmem:[%s3616_s19 + $0x434] ss:$8 sps:$4 sm:$0xff]   ;;  %v3186_v15 = vld [vmem:[%s3616_s19 + $0x430] ss:$8 sps:$4 sm:$0xff]   ;;  %v3189_v17 = vld [vmem:[%s3616_s19 + $0x444] ss:$8 sps:$4 sm:$0xff]  }
  0x17   : > { %2034 = vmatpush1.bf16.msra.mxu1 %v3173_v6  ;;  %v3191_v18 = vld [vmem:[%s3616_s19 + $0x40] ss:$8 sps:$4 sm:$0xff]   ;;  %v3193_v20 = vld [vmem:[%s3616_s19 + $0x54] ss:$8 sps:$4 sm:$0xff]   ;;  %v3197_v22 = vld [vmem:[%s3616_s19 + $0x50] ss:$8 sps:$4 sm:$0xff]  }
  0x18   : > { %2246 = vmatpush1.bf16.msra.mxu0 %v3174_v7  ;;  %2035 = vmatprep.subr.bf16.mxu1 %v3175_v8  ;;  %v3192_v19 = vld [vmem:[%s3616_s19 + $0x440] ss:$8 sps:$4 sm:$0xff]   ;;  %v3195_v21 = vld [vmem:[%s3616_s19 + $0x454] ss:$8 sps:$4 sm:$0xff]   ;;  %v3198_v23 = vld [vmem:[%s3616_s19 + $0x450] ss:$8 sps:$4 sm:$0xff]  }
  0x19   : > { %2247 = vmatprep.subr.bf16.mxu0 %v3177_v9  ;;  %v3199_v24 = vld [vmem:[%s3616_s19 + $0x64] ss:$8 sps:$4 sm:$0xff]   ;;  %v3203_v26 = vld [vmem:[%s3616_s19 + $0x60] ss:$8 sps:$4 sm:$0xff]   ;;  %v3205_v28 = vld [vmem:[%s3616_s19 + $0x74] ss:$8 sps:$4 sm:$0xff]  }
  0x1a   : > { %v3201_v25 = vld [vmem:[%s3616_s19 + $0x464] ss:$8 sps:$4 sm:$0xff]   ;;  %v3204_v27 = vld [vmem:[%s3616_s19 + $0x460] ss:$8 sps:$4 sm:$0xff]   ;;  %v3207_v29 = vld [vmem:[%s3616_s19 + $0x474] ss:$8 sps:$4 sm:$0xff]  }
  0x1b   : > { %2036 = vmatpush1.bf16.msra.mxu1 %v3179_v10  ;;  %v3209_v30 = vld [vmem:[%s3616_s19 + $0x70] ss:$8 sps:$4 sm:$0xff]   ;;  %v3211_v32 = vld [vmem:[%s3616_s19 + $0x84] ss:$8 sps:$4 sm:$0xff]   ;;  %v3215_v34 = vld [vmem:[%s3616_s19 + $0x80] ss:$8 sps:$4 sm:$0xff]  }
  0x1c   : > { %2248 = vmatpush1.bf16.msra.mxu0 %v3180_v11  ;;  %2037 = vmatprep.subr.bf16.mxu1 %v3181_v12  ;;  %v3210_v31 = vld [vmem:[%s3616_s19 + $0x470] ss:$8 sps:$4 sm:$0xff]   ;;  %v3213_v33 = vld [vmem:[%s3616_s19 + $0x484] ss:$8 sps:$4 sm:$0xff]   ;;  %v3216_v35 = vld [vmem:[%s3616_s19 + $0x480] ss:$8 sps:$4 sm:$0xff]  }
  0x1d   : > { %2249 = vmatprep.subr.bf16.mxu0 %v3183_v13  ;;  %v3217_v36 = vld [vmem:[%s3616_s19 + $0x94] ss:$8 sps:$4 sm:$0xff]   ;;  %v3221_v38 = vld [vmem:[%s3616_s19 + $0x90] ss:$8 sps:$4 sm:$0xff]   ;;  %v3223_v40 = vld [vmem:[%s3616_s19 + $0xa4] ss:$8 sps:$4 sm:$0xff]  }
  0x1e   : > { %v3219_v37 = vld [vmem:[%s3616_s19 + $0x494] ss:$8 sps:$4 sm:$0xff]   ;;  %v3222_v39 = vld [vmem:[%s3616_s19 + $0x490] ss:$8 sps:$4 sm:$0xff]   ;;  %v3225_v41 = vld [vmem:[%s3616_s19 + $0x4a4] ss:$8 sps:$4 sm:$0xff]  }
  0x1f   : > { %2038 = vmatpush1.bf16.msra.mxu1 %v3185_v14  ;;  %v3227_v42 = vld [vmem:[%s3616_s19 + $0xa0] ss:$8 sps:$4 sm:$0xff]   ;;  %v3229_v44 = vld [vmem:[%s3616_s19 + $0xb4] ss:$8 sps:$4 sm:$0xff]   ;;  %v3233_v46 = vld [vmem:[%s3616_s19 + $0xb0] ss:$8 sps:$4 sm:$0xff]  }
  0x20   : > { %2250 = vmatpush1.bf16.msra.mxu0 %v3186_v15  ;;  %2039 = vmatprep.subr.bf16.mxu1 %v3187_v16  ;;  %v3228_v43 = vld [vmem:[%s3616_s19 + $0x4a0] ss:$8 sps:$4 sm:$0xff]   ;;  %v3231_v45 = vld [vmem:[%s3616_s19 + $0x4b4] ss:$8 sps:$4 sm:$0xff]   ;;  %v3234_v47 = vld [vmem:[%s3616_s19 + $0x4b0] ss:$8 sps:$4 sm:$0xff]  }
  0x21   : > { %2251 = vmatprep.subr.bf16.mxu0 %v3189_v17  ;;  %v303_v48 = vld [vmem:[%s3666_s23] sm:$0xff]  ;;  %v3241_v58 = vld [vmem:[%s3616_s19 + $0xd4] ss:$8 sps:$4 sm:$0xff]   ;;  %v3245_v60 = vld [vmem:[%s3616_s19 + $0xd0] ss:$8 sps:$4 sm:$0xff]   ;;  %s3076_s24 = sshll.u32 %s3992_s12, 5 }
  0x22   : > { %v311_v49 = vld [vmem:[%s3666_s23 + $0x40] sm:$0xff]  ;;  %v3243_v59 = vld [vmem:[%s3616_s19 + $0x4d4] ss:$8 sps:$4 sm:$0xff]   ;;  %v3246_v61 = vld [vmem:[%s3616_s19 + $0x4d0] ss:$8 sps:$4 sm:$0xff]   ;;  %s3964_s27 = scalar_lea.vmem %s3985_s2, %s3076_s24  ;;  %s3077_s28 = sshll.u32 %s3992_s12, 2 }
  0x23   : > { %2040 = vmatpush1.bf16.msra.mxu1 %v3191_v18  ;;  %v3235_v50 = vld [vmem:[%s3616_s19 + $0xc4] ss:$8 sps:$4 sm:$0xff]   ;;  %v2780_v52 = vcombine.high %v303_v48, %v311_v49  ;;  %v3239_v56 = vld [vmem:[%s3616_s19 + $0xc0] ss:$8 sps:$4 sm:$0xff]   ;;  %v3253_v2 = vld [vmem:[%s3616_s19 + $0xf4] ss:$8 sps:$4 sm:$0xff]   ;;  %v2779_v8 = vcombine.low %v303_v48, %v311_v49  ;;  %s301_s4 = scalar_lea.vmem %s3986_s3, %s3077_s28 }
  0x24   : > { %2252 = vmatpush1.bf16.msra.mxu0 %v3192_v19  ;;  %2041 = vmatprep.subr.bf16.mxu1 %v3193_v20  ;;  %v3237_v51 = vld [vmem:[%s3616_s19 + $0x4c4] ss:$8 sps:$4 sm:$0xff]   ;;  %v3240_v57 = vld [vmem:[%s3616_s19 + $0x4c0] ss:$8 sps:$4 sm:$0xff]   ;;  %v3255_v3 = vld [vmem:[%s3616_s19 + $0x4f4] ss:$8 sps:$4 sm:$0xff]  }
  0x25   : > { %2253 = vmatprep.subr.bf16.mxu0 %v3195_v21  ;;  %v307_v53 = vld [vmem:[%s3666_s23 + $0x20] sm:$0xff]  ;;  %2063 = vmatprep.mubr.bf16.mxu1 %v2780_v52  ;;  %v3257_v4 = vld [vmem:[%s3616_s19 + $0xf0] ss:$8 sps:$4 sm:$0xff]   ;;  %v3267_v12 = vld [vmem:[%s3616_s19 + $0x114] ss:$8 sps:$4 sm:$0xff]  }
  0x26   : > { %v315_v54 = vld [vmem:[%s3666_s23 + $0x60] sm:$0xff]  ;;  %v3258_v5 = vld [vmem:[%s3616_s19 + $0x4f0] ss:$8 sps:$4 sm:$0xff]   ;;  %v3270_v13 = vld [vmem:[%s3616_s19 + $0x514] ss:$8 sps:$4 sm:$0xff]  }
  0x27   : > { %2042 = vmatpush1.bf16.msra.mxu1 %v3197_v22  ;;  %v2788_v55 = vcombine.high %v307_v53, %v315_v54  ;;  %v3247_v62 = vld [vmem:[%s3616_s19 + $0xe4] ss:$8 sps:$4 sm:$0xff]   ;;  %v3251_v0 = vld [vmem:[%s3616_s19 + $0xe0] ss:$8 sps:$4 sm:$0xff]   ;;  %v2787_v10 = vcombine.low %v307_v53, %v315_v54  ;;  %v3265_v14 = vld [vmem:[%s3616_s19 + $0x110] ss:$8 sps:$4 sm:$0xff]  }
  0x28   : > { %2254 = vmatpush1.bf16.msra.mxu0 %v3198_v23  ;;  %2043 = vmatprep.subr.bf16.mxu1 %v3199_v24  ;;  %v3249_v63 = vld [vmem:[%s3616_s19 + $0x4e4] ss:$8 sps:$4 sm:$0xff]   ;;  %v3252_v1 = vld [vmem:[%s3616_s19 + $0x4e0] ss:$8 sps:$4 sm:$0xff]   ;;  %v3268_v15 = vld [vmem:[%s3616_s19 + $0x510] ss:$8 sps:$4 sm:$0xff]  }
  0x29   : > { %2255 = vmatprep.subr.bf16.mxu0 %v3201_v25  ;;  %2275 = vmatprep.mubr.bf16.mxu0 %v2788_v55  ;;  %v3261_v6 = vld [vmem:[%s3616_s19 + $0x104] ss:$8 sps:$4 sm:$0xff]   ;;  %v3259_v9 = vld [vmem:[%s3616_s19 + $0x100] ss:$8 sps:$4 sm:$0xff]   ;;  %v3279_v20 = vld [vmem:[%s3616_s19 + $0x134] ss:$8 sps:$4 sm:$0xff]  }
  0x2a   : > { %v3264_v7 = vld [vmem:[%s3616_s19 + $0x504] ss:$8 sps:$4 sm:$0xff]   ;;  %v3262_v11 = vld [vmem:[%s3616_s19 + $0x500] ss:$8 sps:$4 sm:$0xff]   ;;  %v3282_v21 = vld [vmem:[%s3616_s19 + $0x534] ss:$8 sps:$4 sm:$0xff]  }
  0x2b   : > { %2044 = vmatpush1.bf16.msra.mxu1 %v3203_v26  ;;  %v3273_v16 = vld [vmem:[%s3616_s19 + $0x124] ss:$8 sps:$4 sm:$0xff]   ;;  %v3271_v18 = vld [vmem:[%s3616_s19 + $0x120] ss:$8 sps:$4 sm:$0xff]   ;;  %v3277_v22 = vld [vmem:[%s3616_s19 + $0x130] ss:$8 sps:$4 sm:$0xff]  }
  0x2c   : > { %2256 = vmatpush1.bf16.msra.mxu0 %v3204_v27  ;;  %2045 = vmatprep.subr.bf16.mxu1 %v3205_v28  ;;  %v3276_v17 = vld [vmem:[%s3616_s19 + $0x524] ss:$8 sps:$4 sm:$0xff]   ;;  %v3274_v19 = vld [vmem:[%s3616_s19 + $0x520] ss:$8 sps:$4 sm:$0xff]   ;;  %v3280_v23 = vld [vmem:[%s3616_s19 + $0x530] ss:$8 sps:$4 sm:$0xff]  }
  0x2d   : > { %2257 = vmatprep.subr.bf16.mxu0 %v3207_v29  ;;  %v3285_v24 = vld [vmem:[%s3616_s19 + $0x144] ss:$8 sps:$4 sm:$0xff]   ;;  %v3283_v26 = vld [vmem:[%s3616_s19 + $0x140] ss:$8 sps:$4 sm:$0xff]   ;;  %v3291_v28 = vld [vmem:[%s3616_s19 + $0x154] ss:$8 sps:$4 sm:$0xff]  }
  0x2e   : > { %v3288_v25 = vld [vmem:[%s3616_s19 + $0x544] ss:$8 sps:$4 sm:$0xff]   ;;  %v3286_v27 = vld [vmem:[%s3616_s19 + $0x540] ss:$8 sps:$4 sm:$0xff]   ;;  %v3294_v29 = vld [vmem:[%s3616_s19 + $0x554] ss:$8 sps:$4 sm:$0xff]  }
  0x2f   : > { %2046 = vmatpush1.bf16.msra.mxu1 %v3209_v30  ;;  %v319_v30 = vld [vmem:[%s3666_s23 + $0x80] sm:$0xff]  ;;  %v3735_v49 = vld [vmem:[%s3666_s23 + $0x28] sm:$0xff]  ;;  %v3304_v52 = vld [vmem:[%s3616_s19 + $0x570] ss:$8 sps:$4 sm:$0xff]  }
  0x30   : > { %2258 = vmatpush1.bf16.msra.mxu0 %v3210_v31  ;;  %2047 = vmatprep.subr.bf16.mxu1 %v3211_v32  ;;  %v327_v31 = vld [vmem:[%s3666_s23 + $0xc0] sm:$0xff]  ;;  %v3289_v32 = vld [vmem:[%s3616_s19 + $0x150] ss:$8 sps:$4 sm:$0xff]  }
  0x31   : > { %2259 = vmatprep.subr.bf16.mxu0 %v3213_v33  ;;  %v2796_v33 = vcombine.high %v319_v30, %v327_v31  ;;  %v3309_v54 = vld [vmem:[%s3616_s19 + $0x184] ss:$8 sps:$4 sm:$0xff]  }
  0x32   : > { %v3312_v55 = vld [vmem:[%s3616_s19 + $0x584] ss:$8 sps:$4 sm:$0xff]  }
  0x33   : > { %2048 = vmatpush1.bf16.msra.mxu1 %v3215_v34  ;;  %v3292_v34 = vld [vmem:[%s3616_s19 + $0x550] ss:$8 sps:$4 sm:$0xff]  }
  0x34   : > { %2260 = vmatpush1.bf16.msra.mxu0 %v3216_v35  ;;  %2049 = vmatprep.subr.bf16.mxu1 %v3217_v36  ;;  %v323_v35 = vld [vmem:[%s3666_s23 + $0xa0] sm:$0xff] }
  0x35   : > { %2261 = vmatprep.subr.bf16.mxu0 %v3219_v37  ;;  %v331_v36 = vld [vmem:[%s3666_s23 + $0xe0] sm:$0xff]  ;;  %v2795_v37 = vcombine.low %v319_v30, %v327_v31  ;;  %v3363_v30 = vld [vmem:[%s3616_s19 + $0x214] ss:$8 sps:$4 sm:$0xff]  }
  0x36   : > { %v3366_v31 = vld [vmem:[%s3616_s19 + $0x614] ss:$8 sps:$4 sm:$0xff]  }
  0x37   : > { %2050 = vmatpush1.bf16.msra.mxu1 %v3221_v38  ;;  %v3297_v38 = vld [vmem:[%s3616_s19 + $0x164] ss:$8 sps:$4 sm:$0xff]  }
  0x38   : > { %2262 = vmatpush1.bf16.msra.mxu0 %v3222_v39  ;;  %2051 = vmatprep.subr.bf16.mxu1 %v3223_v40  ;;  %v2804_v39 = vcombine.high %v323_v35, %v331_v36  ;;  %v2803_v40 = vcombine.low %v323_v35, %v331_v36  ;;  %v3361_v36 = vld [vmem:[%s3616_s19 + $0x210] ss:$8 sps:$4 sm:$0xff]  }
  0x39   : > { %2263 = vmatprep.subr.bf16.mxu0 %v3225_v41  ;;  %v3300_v41 = vld [vmem:[%s3616_s19 + $0x564] ss:$8 sps:$4 sm:$0xff]  }
  0x3b   : > { %2052 = vmatpush1.bf16.msra.mxu1 %v3227_v42  ;;  %v3295_v42 = vld [vmem:[%s3616_s19 + $0x160] ss:$8 sps:$4 sm:$0xff]  }
  0x3c   : > { %2264 = vmatpush1.bf16.msra.mxu0 %v3228_v43  ;;  %2053 = vmatprep.subr.bf16.mxu1 %v3229_v44  ;;  %v3298_v43 = vld [vmem:[%s3616_s19 + $0x560] ss:$8 sps:$4 sm:$0xff]  }
  0x3d   : > { %2265 = vmatprep.subr.bf16.mxu0 %v3231_v45  ;;  %v3725_v44 = vld [vmem:[%s3666_s23 + $0x8] sm:$0xff] }
  0x3e   : > { %v3728_v45 = vld [vmem:[%s3666_s23 + $0x48] sm:$0xff] }
  0x3f   : > { %2054 = vmatpush1.bf16.msra.mxu1 %v3233_v46  ;;  %v3303_v46 = vld [vmem:[%s3616_s19 + $0x174] ss:$8 sps:$4 sm:$0xff]   ;;  %v2782_v48 = vcombine.high %v3725_v44, %v3728_v45 }
  0x40   : > { %2266 = vmatpush1.bf16.msra.mxu0 %v3234_v47  ;;  %2055 = vmatprep.subr.bf16.mxu1 %v3235_v50  ;;  %v3306_v47 = vld [vmem:[%s3616_s19 + $0x574] ss:$8 sps:$4 sm:$0xff]   ;;  %v3738_v50 = vld [vmem:[%s3666_s23 + $0x68] sm:$0xff] }
  0x41   : > { %2267 = vmatprep.subr.bf16.mxu0 %v3237_v51  ;;  %v3301_v51 = vld [vmem:[%s3616_s19 + $0x170] ss:$8 sps:$4 sm:$0xff]   ;;  %v2790_v53 = vcombine.high %v3735_v49, %v3738_v50 }
  0x43   : > { %2056 = vmatpush1.bf16.msra.mxu1 %v3239_v56  ;;  %v3307_v56 = vld [vmem:[%s3616_s19 + $0x180] ss:$8 sps:$4 sm:$0xff]  }
  0x44   : > { %2268 = vmatpush1.bf16.msra.mxu0 %v3240_v57  ;;  %2057 = vmatprep.subr.bf16.mxu1 %v3241_v58  ;;  %v3310_v57 = vld [vmem:[%s3616_s19 + $0x580] ss:$8 sps:$4 sm:$0xff]   ;;  %v3315_v58 = vld [vmem:[%s3616_s19 + $0x194] ss:$8 sps:$4 sm:$0xff]  }
  0x45   : > { %2269 = vmatprep.subr.bf16.mxu0 %v3243_v59  ;;  %v3318_v59 = vld [vmem:[%s3616_s19 + $0x594] ss:$8 sps:$4 sm:$0xff]  }
  0x47   : > { %2058 = vmatpush1.bf16.msra.mxu1 %v3245_v60  ;;  %v3313_v60 = vld [vmem:[%s3616_s19 + $0x190] ss:$8 sps:$4 sm:$0xff]  }
  0x48   : > { %2270 = vmatpush1.bf16.msra.mxu0 %v3246_v61  ;;  %2059 = vmatprep.subr.bf16.mxu1 %v3247_v62  ;;  %v3316_v61 = vld [vmem:[%s3616_s19 + $0x590] ss:$8 sps:$4 sm:$0xff]   ;;  %v3321_v62 = vld [vmem:[%s3616_s19 + $0x1a4] ss:$8 sps:$4 sm:$0xff]  }
  0x49   : > { %2271 = vmatprep.subr.bf16.mxu0 %v3249_v63  ;;  %v3324_v63 = vld [vmem:[%s3616_s19 + $0x5a4] ss:$8 sps:$4 sm:$0xff]  }
  0x4b   : > { %2060 = vmatpush1.bf16.msra.mxu1 %v3251_v0  ;;  %v3319_v0 = vld [vmem:[%s3616_s19 + $0x1a0] ss:$8 sps:$4 sm:$0xff]  }
  0x4c   : > { %2272 = vmatpush1.bf16.msra.mxu0 %v3252_v1  ;;  %2061 = vmatprep.subr.bf16.mxu1 %v3253_v2  ;;  %v3322_v1 = vld [vmem:[%s3616_s19 + $0x5a0] ss:$8 sps:$4 sm:$0xff]   ;;  %v3327_v2 = vld [vmem:[%s3616_s19 + $0x1b4] ss:$8 sps:$4 sm:$0xff]  }
  0x4d   : > { %2273 = vmatprep.subr.bf16.mxu0 %v3255_v3  ;;  %v3330_v3 = vld [vmem:[%s3616_s19 + $0x5b4] ss:$8 sps:$4 sm:$0xff]  }
  0x4f   : > { %2062 = vmatpush1.bf16.msra.mxu1 %v3257_v4  ;;  %v3325_v4 = vld [vmem:[%s3616_s19 + $0x1b0] ss:$8 sps:$4 sm:$0xff]  }
  0x50   : > { %2274 = vmatpush1.bf16.msra.mxu0 %v3258_v5  ;;  %2084 = vmatprep.subr.bf16.mxu1 %v3261_v6  ;;  %v3328_v5 = vld [vmem:[%s3616_s19 + $0x5b0] ss:$8 sps:$4 sm:$0xff]   ;;  %v3333_v6 = vld [vmem:[%s3616_s19 + $0x1c4] ss:$8 sps:$4 sm:$0xff]  }
  0x51   : > { %2296 = vmatprep.subr.bf16.mxu0 %v3264_v7  ;;  %v3336_v7 = vld [vmem:[%s3616_s19 + $0x5c4] ss:$8 sps:$4 sm:$0xff]  }
  0x52   : > { %2064 = vmatmul.mubr.bf16.vlgmr.msra.gmra.mrb[0].mxu1 %v2779_v8  ;;  %v3331_v8 = vld [vmem:[%s3616_s19 + $0x1c0] ss:$8 sps:$4 sm:$0xff]  }
  0x53   : > { %2276 = vmatmul.mubr.bf16.vlgmr.msra.gmra.mrb[0].mxu0 %v2787_v10  ;;  %2085 = vmatpush1.bf16.msra.mxu1 %v3259_v9  ;;  %v3334_v9 = vld [vmem:[%s3616_s19 + $0x5c0] ss:$8 sps:$4 sm:$0xff]   ;;  %v3339_v10 = vld [vmem:[%s3616_s19 + $0x1d4] ss:$8 sps:$4 sm:$0xff]  }
  0x54   : > { %2297 = vmatpush1.bf16.msra.mxu0 %v3262_v11  ;;  %2086 = vmatprep.subr.bf16.mxu1 %v3267_v12  ;;  %v3342_v11 = vld [vmem:[%s3616_s19 + $0x5d4] ss:$8 sps:$4 sm:$0xff]   ;;  %v3337_v12 = vld [vmem:[%s3616_s19 + $0x1d0] ss:$8 sps:$4 sm:$0xff]  }
  0x55   : > { %2298 = vmatprep.subr.bf16.mxu0 %v3270_v13  ;;  %2073 = vmatprep.mubr.bf16.mxu1 %v2796_v33  ;;  %v3340_v13 = vld [vmem:[%s3616_s19 + $0x5d0] ss:$8 sps:$4 sm:$0xff]   ;;  %v332_v33 = vld [vmem:[%s3666_s23 + $0xe8] sm:$0xff] }
  0x56   : > { %2285 = vmatprep.mubr.bf16.mxu0 %v2804_v39  ;;  %v3372_v39 = vld [vmem:[%s3616_s19 + $0x624] ss:$8 sps:$4 sm:$0xff]  }
  0x57   : > { %2087 = vmatpush1.bf16.msra.mxu1 %v3265_v14  ;;  %v3345_v14 = vld [vmem:[%s3616_s19 + $0x1e4] ss:$8 sps:$4 sm:$0xff]  }
  0x58   : > { %2299 = vmatpush1.bf16.msra.mxu0 %v3268_v15  ;;  %2088 = vmatprep.subr.bf16.mxu1 %v3273_v16  ;;  %v3348_v15 = vld [vmem:[%s3616_s19 + $0x5e4] ss:$8 sps:$4 sm:$0xff]   ;;  %v3343_v16 = vld [vmem:[%s3616_s19 + $0x1e0] ss:$8 sps:$4 sm:$0xff]  }
  0x59   : > { %2300 = vmatprep.subr.bf16.mxu0 %v3276_v17  ;;  %v3346_v17 = vld [vmem:[%s3616_s19 + $0x5e0] ss:$8 sps:$4 sm:$0xff]  }
  0x5a   : > { %2074 = vmatmul.mubr.bf16.gmra.mrb[4].mxu1 %v2795_v37  ;;  %v3364_v37 = vld [vmem:[%s3616_s19 + $0x610] ss:$8 sps:$4 sm:$0xff]  }
  0x5b   : > { %2089 = vmatpush1.bf16.msra.mxu1 %v3271_v18  ;;  %2286 = vmatmul.mubr.bf16.gmra.mrb[4].mxu0 %v2803_v40  ;;  %v3351_v18 = vld [vmem:[%s3616_s19 + $0x1f4] ss:$8 sps:$4 sm:$0xff]   ;;  %v3367_v40 = vld [vmem:[%s3616_s19 + $0x220] ss:$8 sps:$4 sm:$0xff]  }
  0x5c   : > { %2301 = vmatpush1.bf16.msra.mxu0 %v3274_v19  ;;  %2090 = vmatprep.subr.bf16.mxu1 %v3279_v20  ;;  %v3354_v19 = vld [vmem:[%s3616_s19 + $0x5f4] ss:$8 sps:$4 sm:$0xff]   ;;  %v3349_v20 = vld [vmem:[%s3616_s19 + $0x1f0] ss:$8 sps:$4 sm:$0xff]  }
  0x5d   : > { %2302 = vmatprep.subr.bf16.mxu0 %v3282_v21  ;;  %2116 = vmatprep.mubr.bf16.mxu1 %v2782_v48  ;;  %v3352_v21 = vld [vmem:[%s3616_s19 + $0x5f0] ss:$8 sps:$4 sm:$0xff]   ;;  %v3375_v48 = vld [vmem:[%s3616_s19 + $0x234] ss:$8 sps:$4 sm:$0xff]  }
  0x5e   : > { %2328 = vmatprep.mubr.bf16.mxu0 %v2790_v53  ;;  %v3376_v53 = vld [vmem:[%s3616_s19 + $0x630] ss:$8 sps:$4 sm:$0xff]  }
  0x5f   : > { %2091 = vmatpush1.bf16.msra.mxu1 %v3277_v22  ;;  %v3357_v22 = vld [vmem:[%s3616_s19 + $0x204] ss:$8 sps:$4 sm:$0xff]  }
  0x60   : > { %2303 = vmatpush1.bf16.msra.mxu0 %v3280_v23  ;;  %2092 = vmatprep.subr.bf16.mxu1 %v3285_v24  ;;  %v3360_v23 = vld [vmem:[%s3616_s19 + $0x604] ss:$8 sps:$4 sm:$0xff]   ;;  %v3355_v24 = vld [vmem:[%s3616_s19 + $0x200] ss:$8 sps:$4 sm:$0xff]  }
  0x61   : > { %2304 = vmatprep.subr.bf16.mxu0 %v3288_v25  ;;  %v3358_v25 = vld [vmem:[%s3616_s19 + $0x600] ss:$8 sps:$4 sm:$0xff]  }
  0x63   : > { %2093 = vmatpush1.bf16.msra.mxu1 %v3283_v26  ;;  %v320_v26 = vld [vmem:[%s3666_s23 + $0x88] sm:$0xff] }
  0x64   : > { %2305 = vmatpush1.bf16.msra.mxu0 %v3286_v27  ;;  %2094 = vmatprep.subr.bf16.mxu1 %v3291_v28  ;;  %v2781_v27 = vcombine.low %v3725_v44, %v3728_v45  ;;  %v2789_v28 = vcombine.low %v3735_v49, %v3738_v50  ;;  %v3800_v45 = vld [vmem:[%s3666_s23 + $0x50] sm:$0xff] }
  0x65   : > { %2306 = vmatprep.subr.bf16.mxu0 %v3294_v29  ;;  %v328_v29 = vld [vmem:[%s3666_s23 + $0xc8] sm:$0xff]  ;;  %v3378_v49 = vld [vmem:[%s3616_s19 + $0x634] ss:$8 sps:$4 sm:$0xff]  }
  0x67   : > { %2095 = vmatpush1.bf16.msra.mxu1 %v3289_v32  ;;  %v324_v32 = vld [vmem:[%s3666_s23 + $0xa8] sm:$0xff] }
  0x68   : > { %2307 = vmatpush1.bf16.msra.mxu0 %v3292_v34  ;;  %2096 = vmatprep.subr.bf16.mxu1 %v3297_v38  ;;  %v2798_v34 = vcombine.high %v320_v26, %v328_v29  ;;  %v2806_v35 = vcombine.high %v324_v32, %v332_v33  ;;  %v3369_v38 = vld [vmem:[%s3616_s19 + $0x224] ss:$8 sps:$4 sm:$0xff]   ;;  %v2805_v44 = vcombine.low %v324_v32, %v332_v33  ;;  %v3439_v32 = vld [vmem:[%s3616_s19 + $0x2e0] ss:$8 sps:$4 sm:$0xff]  }
  0x69   : > { %2308 = vmatprep.subr.bf16.mxu0 %v3300_v41  ;;  %v3370_v41 = vld [vmem:[%s3616_s19 + $0x620] ss:$8 sps:$4 sm:$0xff]  }
  0x6a   : > { %v3442_v33 = vld [vmem:[%s3616_s19 + $0x6e0] ss:$8 sps:$4 sm:$0xff]  }
  0x6b   : > { %2097 = vmatpush1.bf16.msra.mxu1 %v3295_v42  ;;  %v3797_v42 = vld [vmem:[%s3666_s23 + $0x10] sm:$0xff] }
  0x6c   : > { %2309 = vmatpush1.bf16.msra.mxu0 %v3298_v43  ;;  %2098 = vmatprep.subr.bf16.mxu1 %v3303_v46  ;;  %v2797_v43 = vcombine.low %v320_v26, %v328_v29  ;;  %v3803_v46 = vld [vmem:[%s3666_s23 + $0x30] sm:$0xff]  ;;  %v2784_v50 = vcombine.high %v3797_v42, %v3800_v45 }
  0x6d   : > { %2310 = vmatprep.subr.bf16.mxu0 %v3306_v47  ;;  %v3806_v47 = vld [vmem:[%s3666_s23 + $0x70] sm:$0xff] }
  0x6e   : > { %v3435_v26 = vld [vmem:[%s3616_s19 + $0x2d4] ss:$8 sps:$4 sm:$0xff]   ;;  %v3436_v29 = vld [vmem:[%s3616_s19 + $0x6d0] ss:$8 sps:$4 sm:$0xff]  }
  0x6f   : > { %2099 = vmatpush1.bf16.msra.mxu1 %v3301_v51  ;;  %v2792_v51 = vcombine.high %v3803_v46, %v3806_v47 }
  0x70   : > { %2311 = vmatpush1.bf16.msra.mxu0 %v3304_v52  ;;  %2100 = vmatprep.subr.bf16.mxu1 %v3309_v54  ;;  %v3373_v52 = vld [vmem:[%s3616_s19 + $0x230] ss:$8 sps:$4 sm:$0xff]   ;;  %v3381_v54 = vld [vmem:[%s3616_s19 + $0x244] ss:$8 sps:$4 sm:$0xff]  }
  0x71   : > { %2312 = vmatprep.subr.bf16.mxu0 %v3312_v55  ;;  %v3384_v55 = vld [vmem:[%s3616_s19 + $0x644] ss:$8 sps:$4 sm:$0xff]  }
  0x73   : > { %2101 = vmatpush1.bf16.msra.mxu1 %v3307_v56  ;;  %v3379_v56 = vld [vmem:[%s3616_s19 + $0x240] ss:$8 sps:$4 sm:$0xff]  }
  0x74   : > { %2313 = vmatpush1.bf16.msra.mxu0 %v3310_v57  ;;  %2102 = vmatprep.subr.bf16.mxu1 %v3315_v58  ;;  %v3382_v57 = vld [vmem:[%s3616_s19 + $0x640] ss:$8 sps:$4 sm:$0xff]   ;;  %v3387_v58 = vld [vmem:[%s3616_s19 + $0x254] ss:$8 sps:$4 sm:$0xff]  }
  0x75   : > { %2314 = vmatprep.subr.bf16.mxu0 %v3318_v59  ;;  %v3390_v59 = vld [vmem:[%s3616_s19 + $0x654] ss:$8 sps:$4 sm:$0xff]  }
  0x77   : > { %2103 = vmatpush1.bf16.msra.mxu1 %v3313_v60  ;;  %v3385_v60 = vld [vmem:[%s3616_s19 + $0x250] ss:$8 sps:$4 sm:$0xff]  }
  0x78   : > { %2315 = vmatpush1.bf16.msra.mxu0 %v3316_v61  ;;  %2104 = vmatprep.subr.bf16.mxu1 %v3321_v62  ;;  %v3388_v61 = vld [vmem:[%s3616_s19 + $0x650] ss:$8 sps:$4 sm:$0xff]   ;;  %v3393_v62 = vld [vmem:[%s3616_s19 + $0x264] ss:$8 sps:$4 sm:$0xff]  }
  0x79   : > { %2316 = vmatprep.subr.bf16.mxu0 %v3324_v63  ;;  %v3396_v63 = vld [vmem:[%s3616_s19 + $0x664] ss:$8 sps:$4 sm:$0xff]  }
  0x7b   : > { %2105 = vmatpush1.bf16.msra.mxu1 %v3319_v0  ;;  %v3391_v0 = vld [vmem:[%s3616_s19 + $0x260] ss:$8 sps:$4 sm:$0xff]  }
  0x7c   : > { %2317 = vmatpush1.bf16.msra.mxu0 %v3322_v1  ;;  %2106 = vmatprep.subr.bf16.mxu1 %v3327_v2  ;;  %v3394_v1 = vld [vmem:[%s3616_s19 + $0x660] ss:$8 sps:$4 sm:$0xff]   ;;  %v3399_v2 = vld [vmem:[%s3616_s19 + $0x274] ss:$8 sps:$4 sm:$0xff]  }
  0x7d   : > { %2318 = vmatprep.subr.bf16.mxu0 %v3330_v3  ;;  %v3402_v3 = vld [vmem:[%s3616_s19 + $0x674] ss:$8 sps:$4 sm:$0xff]  }
  0x7f   : > { %2107 = vmatpush1.bf16.msra.mxu1 %v3325_v4  ;;  %v3397_v4 = vld [vmem:[%s3616_s19 + $0x270] ss:$8 sps:$4 sm:$0xff]  }
  0x80   : > { %2319 = vmatpush1.bf16.msra.mxu0 %v3328_v5  ;;  %2108 = vmatprep.subr.bf16.mxu1 %v3333_v6  ;;  %v3400_v5 = vld [vmem:[%s3616_s19 + $0x670] ss:$8 sps:$4 sm:$0xff]   ;;  %v3405_v6 = vld [vmem:[%s3616_s19 + $0x284] ss:$8 sps:$4 sm:$0xff]  }
  0x81   : > { %2320 = vmatprep.subr.bf16.mxu0 %v3336_v7  ;;  %v3408_v7 = vld [vmem:[%s3616_s19 + $0x684] ss:$8 sps:$4 sm:$0xff]  }
  0x83   : > { %2109 = vmatpush1.bf16.msra.mxu1 %v3331_v8  ;;  %v3403_v8 = vld [vmem:[%s3616_s19 + $0x280] ss:$8 sps:$4 sm:$0xff]  }
  0x84   : > { %2321 = vmatpush1.bf16.msra.mxu0 %v3334_v9  ;;  %2110 = vmatprep.subr.bf16.mxu1 %v3339_v10  ;;  %v3406_v9 = vld [vmem:[%s3616_s19 + $0x680] ss:$8 sps:$4 sm:$0xff]   ;;  %v3411_v10 = vld [vmem:[%s3616_s19 + $0x294] ss:$8 sps:$4 sm:$0xff]  }
  0x85   : > { %2322 = vmatprep.subr.bf16.mxu0 %v3342_v11  ;;  %v3414_v11 = vld [vmem:[%s3616_s19 + $0x694] ss:$8 sps:$4 sm:$0xff]  }
  0x87   : > { %2111 = vmatpush1.bf16.msra.mxu1 %v3337_v12  ;;  %v3409_v12 = vld [vmem:[%s3616_s19 + $0x290] ss:$8 sps:$4 sm:$0xff]  }
  0x88   : > { %2323 = vmatpush1.bf16.msra.mxu0 %v3340_v13  ;;  %2112 = vmatprep.subr.bf16.mxu1 %v3345_v14  ;;  %v3412_v13 = vld [vmem:[%s3616_s19 + $0x690] ss:$8 sps:$4 sm:$0xff]   ;;  %v3417_v14 = vld [vmem:[%s3616_s19 + $0x2a4] ss:$8 sps:$4 sm:$0xff]  }
  0x89   : > { %2324 = vmatprep.subr.bf16.mxu0 %v3348_v15  ;;  %v3420_v15 = vld [vmem:[%s3616_s19 + $0x6a4] ss:$8 sps:$4 sm:$0xff]  }
  0x8b   : > { %2113 = vmatpush1.bf16.msra.mxu1 %v3343_v16  ;;  %v3415_v16 = vld [vmem:[%s3616_s19 + $0x2a0] ss:$8 sps:$4 sm:$0xff]  }
  0x8c   : > { %2325 = vmatpush1.bf16.msra.mxu0 %v3346_v17  ;;  %2114 = vmatprep.subr.bf16.mxu1 %v3351_v18  ;;  %v3418_v17 = vld [vmem:[%s3616_s19 + $0x6a0] ss:$8 sps:$4 sm:$0xff]   ;;  %v3423_v18 = vld [vmem:[%s3616_s19 + $0x2b4] ss:$8 sps:$4 sm:$0xff]  }
  0x8d   : > { %2326 = vmatprep.subr.bf16.mxu0 %v3354_v19  ;;  %v3426_v19 = vld [vmem:[%s3616_s19 + $0x6b4] ss:$8 sps:$4 sm:$0xff]  }
  0x8f   : > { %2115 = vmatpush1.bf16.msra.mxu1 %v3349_v20  ;;  %v3421_v20 = vld [vmem:[%s3616_s19 + $0x2b0] ss:$8 sps:$4 sm:$0xff]  }
  0x90   : > { %2327 = vmatpush1.bf16.msra.mxu0 %v3352_v21  ;;  %2137 = vmatprep.subr.bf16.mxu1 %v3357_v22  ;;  %v3424_v21 = vld [vmem:[%s3616_s19 + $0x6b0] ss:$8 sps:$4 sm:$0xff]   ;;  %v3429_v22 = vld [vmem:[%s3616_s19 + $0x2c4] ss:$8 sps:$4 sm:$0xff]  }
  0x91   : > { %2349 = vmatprep.subr.bf16.mxu0 %v3360_v23  ;;  %v3432_v23 = vld [vmem:[%s3616_s19 + $0x6c4] ss:$8 sps:$4 sm:$0xff]  }
  0x92   : > { %2117 = vmatmul.mubr.bf16.vlgmr.msra.gmra.mrb[0].mxu1 %v2781_v27  ;;  %v3438_v27 = vld [vmem:[%s3616_s19 + $0x6d4] ss:$8 sps:$4 sm:$0xff]  }
  0x93   : > { %2329 = vmatmul.mubr.bf16.vlgmr.msra.gmra.mrb[0].mxu0 %v2789_v28  ;;  %2138 = vmatpush1.bf16.msra.mxu1 %v3355_v24  ;;  %v3427_v24 = vld [vmem:[%s3616_s19 + $0x2c0] ss:$8 sps:$4 sm:$0xff]   ;;  %v3433_v28 = vld [vmem:[%s3616_s19 + $0x2d0] ss:$8 sps:$4 sm:$0xff]  }
  0x94   : > { %2350 = vmatpush1.bf16.msra.mxu0 %v3358_v25  ;;  %2139 = vmatprep.subr.bf16.mxu1 %v3363_v30  ;;  %v3430_v25 = vld [vmem:[%s3616_s19 + $0x6c0] ss:$8 sps:$4 sm:$0xff]   ;;  %v3441_v30 = vld [vmem:[%s3616_s19 + $0x2e4] ss:$8 sps:$4 sm:$0xff]  }
  0x95   : > { %2351 = vmatprep.subr.bf16.mxu0 %v3366_v31  ;;  %2126 = vmatprep.mubr.bf16.mxu1 %v2798_v34  ;;  %v3444_v31 = vld [vmem:[%s3616_s19 + $0x6e4] ss:$8 sps:$4 sm:$0xff]   ;;  %v3447_v34 = vld [vmem:[%s3616_s19 + $0x2f4] ss:$8 sps:$4 sm:$0xff]  }
  0x96   : > { %2338 = vmatprep.mubr.bf16.mxu0 %v2806_v35  ;;  %v3450_v35 = vld [vmem:[%s3616_s19 + $0x6f4] ss:$8 sps:$4 sm:$0xff]  }
  0x97   : > { %2140 = vmatpush1.bf16.msra.mxu1 %v3361_v36  ;;  %v3445_v36 = vld [vmem:[%s3616_s19 + $0x2f0] ss:$8 sps:$4 sm:$0xff]  }
  0x98   : > { %2352 = vmatpush1.bf16.msra.mxu0 %v3364_v37  ;;  %2141 = vmatprep.subr.bf16.mxu1 %v3369_v38  ;;  %v3448_v37 = vld [vmem:[%s3616_s19 + $0x6f0] ss:$8 sps:$4 sm:$0xff]   ;;  %v3453_v38 = vld [vmem:[%s3616_s19 + $0x304] ss:$8 sps:$4 sm:$0xff]  }
  0x99   : > { %2353 = vmatprep.subr.bf16.mxu0 %v3372_v39  ;;  %v3456_v39 = vld [vmem:[%s3616_s19 + $0x704] ss:$8 sps:$4 sm:$0xff]  }
  0x9a   : > { %2127 = vmatmul.mubr.bf16.gmra.mrb[4].mxu1 %v2797_v43  ;;  %v2791_v43 = vcombine.low %v3803_v46, %v3806_v47  ;;  %v3457_v46 = vld [vmem:[%s3616_s19 + $0x310] ss:$8 sps:$4 sm:$0xff]  }
  0x9b   : > { %2339 = vmatmul.mubr.bf16.gmra.mrb[4].mxu0 %v2805_v44  ;;  %2142 = vmatpush1.bf16.msra.mxu1 %v3367_v40  ;;  %v321_v40 = vld [vmem:[%s3666_s23 + $0x90] sm:$0xff] }
  0x9c   : > { %2354 = vmatpush1.bf16.msra.mxu0 %v3370_v41  ;;  %2143 = vmatprep.subr.bf16.mxu1 %v3375_v48  ;;  %v2783_v41 = vcombine.low %v3797_v42, %v3800_v45  ;;  %v329_v44 = vld [vmem:[%s3666_s23 + $0xd0] sm:$0xff] }
  0x9d   : > { %2355 = vmatprep.subr.bf16.mxu0 %v3378_v49  ;;  %2169 = vmatprep.mubr.bf16.mxu1 %v2784_v50  ;;  %v325_v48 = vld [vmem:[%s3666_s23 + $0xb0] sm:$0xff]  ;;  %v3451_v50 = vld [vmem:[%s3616_s19 + $0x300] ss:$8 sps:$4 sm:$0xff]   ;;  %v2800_v42 = vcombine.high %v321_v40, %v329_v44 }
  0x9e   : > { %2381 = vmatprep.mubr.bf16.mxu0 %v2792_v51  ;;  %v333_v49 = vld [vmem:[%s3666_s23 + $0xf0] sm:$0xff]  ;;  %v3454_v51 = vld [vmem:[%s3616_s19 + $0x700] ss:$8 sps:$4 sm:$0xff]  }
  0x9f   : > { %2144 = vmatpush1.bf16.msra.mxu1 %v3373_v52  ;;  %v3459_v52 = vld [vmem:[%s3616_s19 + $0x314] ss:$8 sps:$4 sm:$0xff]   ;;  %v2808_v45 = vcombine.high %v325_v48, %v333_v49  ;;  %v3460_v47 = vld [vmem:[%s3616_s19 + $0x710] ss:$8 sps:$4 sm:$0xff]  }
  0xa0   : > { %2356 = vmatpush1.bf16.msra.mxu0 %v3376_v53  ;;  %2145 = vmatprep.subr.bf16.mxu1 %v3381_v54  ;;  %v3462_v53 = vld [vmem:[%s3616_s19 + $0x714] ss:$8 sps:$4 sm:$0xff]   ;;  %v3465_v54 = vld [vmem:[%s3616_s19 + $0x324] ss:$8 sps:$4 sm:$0xff]  }
  0xa1   : > { %2357 = vmatprep.subr.bf16.mxu0 %v3384_v55  ;;  %v3468_v55 = vld [vmem:[%s3616_s19 + $0x724] ss:$8 sps:$4 sm:$0xff]  }
  0xa3   : > { %2146 = vmatpush1.bf16.msra.mxu1 %v3379_v56  ;;  %v3883_v56 = vld [vmem:[%s3666_s23 + $0x18] sm:$0xff] }
  0xa4   : > { %2358 = vmatpush1.bf16.msra.mxu0 %v3382_v57  ;;  %2147 = vmatprep.subr.bf16.mxu1 %v3387_v58  ;;  %v2799_v57 = vcombine.low %v321_v40, %v329_v44  ;;  %v2807_v58 = vcombine.low %v325_v48, %v333_v49  ;;  %v3523_v40 = vld [vmem:[%s3616_s19 + $0x3c0] ss:$8 sps:$4 sm:$0xff]   ;;  %v3534_v44 = vld [vmem:[%s3616_s19 + $0x7d4] ss:$8 sps:$4 sm:$0xff]   ;;  %v3529_v48 = vld [vmem:[%s3616_s19 + $0x3d0] ss:$8 sps:$4 sm:$0xff]  }
  0xa5   : > { %2359 = vmatprep.subr.bf16.mxu0 %v3390_v59  ;;  %v3886_v59 = vld [vmem:[%s3666_s23 + $0x58] sm:$0xff] }
  0xa6   : > { %v3532_v49 = vld [vmem:[%s3616_s19 + $0x7d0] ss:$8 sps:$4 sm:$0xff]  }
  0xa7   : > { %2148 = vmatpush1.bf16.msra.mxu1 %v3385_v60  ;;  %v3889_v60 = vld [vmem:[%s3666_s23 + $0x38] sm:$0xff] }
  0xa8   : > { %2360 = vmatpush1.bf16.msra.mxu0 %v3388_v61  ;;  %2149 = vmatprep.subr.bf16.mxu1 %v3393_v62  ;;  %v3892_v61 = vld [vmem:[%s3666_s23 + $0x78] sm:$0xff]  ;;  %v3463_v62 = vld [vmem:[%s3616_s19 + $0x320] ss:$8 sps:$4 sm:$0xff]  }
  0xa9   : > { %2361 = vmatprep.subr.bf16.mxu0 %v3396_v63  ;;  %v3466_v63 = vld [vmem:[%s3616_s19 + $0x720] ss:$8 sps:$4 sm:$0xff]  }
  0xab   : > { %2150 = vmatpush1.bf16.msra.mxu1 %v3391_v0  ;;  %v3471_v0 = vld [vmem:[%s3616_s19 + $0x334] ss:$8 sps:$4 sm:$0xff]  }
  0xac   : > { %2362 = vmatpush1.bf16.msra.mxu0 %v3394_v1  ;;  %2151 = vmatprep.subr.bf16.mxu1 %v3399_v2  ;;  %v3474_v1 = vld [vmem:[%s3616_s19 + $0x734] ss:$8 sps:$4 sm:$0xff]   ;;  %v2786_v2 = vcombine.high %v3883_v56, %v3886_v59 }
  0xad   : > { %2363 = vmatprep.subr.bf16.mxu0 %v3402_v3  ;;  %v2794_v3 = vcombine.high %v3889_v60, %v3892_v61 }
  0xaf   : > { %2152 = vmatpush1.bf16.msra.mxu1 %v3397_v4  ;;  %v3469_v4 = vld [vmem:[%s3616_s19 + $0x330] ss:$8 sps:$4 sm:$0xff]  }
  0xb0   : > { %2364 = vmatpush1.bf16.msra.mxu0 %v3400_v5  ;;  %2153 = vmatprep.subr.bf16.mxu1 %v3405_v6  ;;  %v3472_v5 = vld [vmem:[%s3616_s19 + $0x730] ss:$8 sps:$4 sm:$0xff]   ;;  %v3477_v6 = vld [vmem:[%s3616_s19 + $0x344] ss:$8 sps:$4 sm:$0xff]  }
  0xb1   : > { %2365 = vmatprep.subr.bf16.mxu0 %v3408_v7  ;;  %v3480_v7 = vld [vmem:[%s3616_s19 + $0x744] ss:$8 sps:$4 sm:$0xff]  }
  0xb3   : > { %2154 = vmatpush1.bf16.msra.mxu1 %v3403_v8  ;;  %v3475_v8 = vld [vmem:[%s3616_s19 + $0x340] ss:$8 sps:$4 sm:$0xff]  }
  0xb4   : > { %2366 = vmatpush1.bf16.msra.mxu0 %v3406_v9  ;;  %2155 = vmatprep.subr.bf16.mxu1 %v3411_v10  ;;  %v3478_v9 = vld [vmem:[%s3616_s19 + $0x740] ss:$8 sps:$4 sm:$0xff]   ;;  %v3483_v10 = vld [vmem:[%s3616_s19 + $0x354] ss:$8 sps:$4 sm:$0xff]  }
  0xb5   : > { %2367 = vmatprep.subr.bf16.mxu0 %v3414_v11  ;;  %v3486_v11 = vld [vmem:[%s3616_s19 + $0x754] ss:$8 sps:$4 sm:$0xff]  }
  0xb7   : > { %2156 = vmatpush1.bf16.msra.mxu1 %v3409_v12  ;;  %v3481_v12 = vld [vmem:[%s3616_s19 + $0x350] ss:$8 sps:$4 sm:$0xff]  }
  0xb8   : > { %2368 = vmatpush1.bf16.msra.mxu0 %v3412_v13  ;;  %2157 = vmatprep.subr.bf16.mxu1 %v3417_v14  ;;  %v3484_v13 = vld [vmem:[%s3616_s19 + $0x750] ss:$8 sps:$4 sm:$0xff]   ;;  %v3489_v14 = vld [vmem:[%s3616_s19 + $0x364] ss:$8 sps:$4 sm:$0xff]  }
  0xb9   : > { %2369 = vmatprep.subr.bf16.mxu0 %v3420_v15  ;;  %v3492_v15 = vld [vmem:[%s3616_s19 + $0x764] ss:$8 sps:$4 sm:$0xff]  }
  0xbb   : > { %2158 = vmatpush1.bf16.msra.mxu1 %v3415_v16  ;;  %v3487_v16 = vld [vmem:[%s3616_s19 + $0x360] ss:$8 sps:$4 sm:$0xff]  }
  0xbc   : > { %2370 = vmatpush1.bf16.msra.mxu0 %v3418_v17  ;;  %2159 = vmatprep.subr.bf16.mxu1 %v3423_v18  ;;  %v3490_v17 = vld [vmem:[%s3616_s19 + $0x760] ss:$8 sps:$4 sm:$0xff]   ;;  %v3495_v18 = vld [vmem:[%s3616_s19 + $0x374] ss:$8 sps:$4 sm:$0xff]  }
  0xbd   : > { %2371 = vmatprep.subr.bf16.mxu0 %v3426_v19  ;;  %v3498_v19 = vld [vmem:[%s3616_s19 + $0x774] ss:$8 sps:$4 sm:$0xff]  }
  0xbf   : > { %2160 = vmatpush1.bf16.msra.mxu1 %v3421_v20  ;;  %v3493_v20 = vld [vmem:[%s3616_s19 + $0x370] ss:$8 sps:$4 sm:$0xff]  }
  0xc0   : > { %2372 = vmatpush1.bf16.msra.mxu0 %v3424_v21  ;;  %2161 = vmatprep.subr.bf16.mxu1 %v3429_v22  ;;  %v3496_v21 = vld [vmem:[%s3616_s19 + $0x770] ss:$8 sps:$4 sm:$0xff]   ;;  %v3501_v22 = vld [vmem:[%s3616_s19 + $0x384] ss:$8 sps:$4 sm:$0xff]  }
  0xc1   : > { %2373 = vmatprep.subr.bf16.mxu0 %v3432_v23  ;;  %v3504_v23 = vld [vmem:[%s3616_s19 + $0x784] ss:$8 sps:$4 sm:$0xff]  }
  0xc3   : > { %2162 = vmatpush1.bf16.msra.mxu1 %v3427_v24  ;;  %v3499_v24 = vld [vmem:[%s3616_s19 + $0x380] ss:$8 sps:$4 sm:$0xff]  }
  0xc4   : > { %2374 = vmatpush1.bf16.msra.mxu0 %v3430_v25  ;;  %2163 = vmatprep.subr.bf16.mxu1 %v3435_v26  ;;  %v3502_v25 = vld [vmem:[%s3616_s19 + $0x780] ss:$8 sps:$4 sm:$0xff]   ;;  %v3507_v26 = vld [vmem:[%s3616_s19 + $0x394] ss:$8 sps:$4 sm:$0xff]  }
  0xc5   : > { %2375 = vmatprep.subr.bf16.mxu0 %v3438_v27  ;;  %v3510_v27 = vld [vmem:[%s3616_s19 + $0x794] ss:$8 sps:$4 sm:$0xff]  }
  0xc7   : > { %2164 = vmatpush1.bf16.msra.mxu1 %v3433_v28  ;;  %v3505_v28 = vld [vmem:[%s3616_s19 + $0x390] ss:$8 sps:$4 sm:$0xff]  }
  0xc8   : > { %2376 = vmatpush1.bf16.msra.mxu0 %v3436_v29  ;;  %2165 = vmatprep.subr.bf16.mxu1 %v3441_v30  ;;  %v3508_v29 = vld [vmem:[%s3616_s19 + $0x790] ss:$8 sps:$4 sm:$0xff]   ;;  %v3513_v30 = vld [vmem:[%s3616_s19 + $0x3a4] ss:$8 sps:$4 sm:$0xff]  }
  0xc9   : > { %2377 = vmatprep.subr.bf16.mxu0 %v3444_v31  ;;  %v3516_v31 = vld [vmem:[%s3616_s19 + $0x7a4] ss:$8 sps:$4 sm:$0xff]  }
  0xcb   : > { %2166 = vmatpush1.bf16.msra.mxu1 %v3439_v32  ;;  %v3511_v32 = vld [vmem:[%s3616_s19 + $0x3a0] ss:$8 sps:$4 sm:$0xff]  }
  0xcc   : > { %2378 = vmatpush1.bf16.msra.mxu0 %v3442_v33  ;;  %2167 = vmatprep.subr.bf16.mxu1 %v3447_v34  ;;  %v3514_v33 = vld [vmem:[%s3616_s19 + $0x7a0] ss:$8 sps:$4 sm:$0xff]   ;;  %v3519_v34 = vld [vmem:[%s3616_s19 + $0x3b4] ss:$8 sps:$4 sm:$0xff]  }
  0xcd   : > { %2379 = vmatprep.subr.bf16.mxu0 %v3450_v35  ;;  %v3522_v35 = vld [vmem:[%s3616_s19 + $0x7b4] ss:$8 sps:$4 sm:$0xff]  }
  0xcf   : > { %2168 = vmatpush1.bf16.msra.mxu1 %v3445_v36  ;;  %v3517_v36 = vld [vmem:[%s3616_s19 + $0x3b0] ss:$8 sps:$4 sm:$0xff]  }
  0xd0   : > { %2380 = vmatpush1.bf16.msra.mxu0 %v3448_v37  ;;  %2190 = vmatprep.subr.bf16.mxu1 %v3453_v38  ;;  %v3520_v37 = vld [vmem:[%s3616_s19 + $0x7b0] ss:$8 sps:$4 sm:$0xff]   ;;  %v3525_v38 = vld [vmem:[%s3616_s19 + $0x3c4] ss:$8 sps:$4 sm:$0xff]  }
  0xd1   : > { %2402 = vmatprep.subr.bf16.mxu0 %v3456_v39  ;;  %v3528_v39 = vld [vmem:[%s3616_s19 + $0x7c4] ss:$8 sps:$4 sm:$0xff]  }
  0xd2   : > { %2170 = vmatmul.mubr.bf16.vlgmr.msra.gmra.mrb[0].mxu1 %v2783_v41  ;;  %v3526_v41 = vld [vmem:[%s3616_s19 + $0x7c0] ss:$8 sps:$4 sm:$0xff]  }
  0xd3   : > { %2382 = vmatmul.mubr.bf16.vlgmr.msra.gmra.mrb[0].mxu0 %v2791_v43  ;;  %2191 = vmatpush1.bf16.msra.mxu1 %v3451_v50  ;;  %v3531_v43 = vld [vmem:[%s3616_s19 + $0x3d4] ss:$8 sps:$4 sm:$0xff]   ;;  %v3537_v50 = vld [vmem:[%s3616_s19 + $0x3e4] ss:$8 sps:$4 sm:$0xff]  }
  0xd4   : > { %2403 = vmatpush1.bf16.msra.mxu0 %v3454_v51  ;;  %2192 = vmatprep.subr.bf16.mxu1 %v3459_v52  ;;  %v3540_v51 = vld [vmem:[%s3616_s19 + $0x7e4] ss:$8 sps:$4 sm:$0xff]   ;;  %v3535_v52 = vld [vmem:[%s3616_s19 + $0x3e0] ss:$8 sps:$4 sm:$0xff]  }
  0xd5   : > { %2404 = vmatprep.subr.bf16.mxu0 %v3462_v53  ;;  %2179 = vmatprep.mubr.bf16.mxu1 %v2800_v42  ;;  %v3538_v53 = vld [vmem:[%s3616_s19 + $0x7e0] ss:$8 sps:$4 sm:$0xff]   ;;  %v3543_v42 = vld [vmem:[%s3616_s19 + $0x3f4] ss:$8 sps:$4 sm:$0xff]  }
  0xd6   : > { %2391 = vmatprep.mubr.bf16.mxu0 %v2808_v45  ;;  %v3546_v45 = vld [vmem:[%s3616_s19 + $0x7f4] ss:$8 sps:$4 sm:$0xff]  }
  0xd7   : > { %2193 = vmatpush1.bf16.msra.mxu1 %v3457_v46  ;;  %v3541_v46 = vld [vmem:[%s3616_s19 + $0x3f0] ss:$8 sps:$4 sm:$0xff]  }
  0xd8   : > { %2405 = vmatpush1.bf16.msra.mxu0 %v3460_v47  ;;  %2194 = vmatprep.subr.bf16.mxu1 %v3465_v54  ;;  %v3544_v47 = vld [vmem:[%s3616_s19 + $0x7f0] ss:$8 sps:$4 sm:$0xff]  }
  0xd9   : > { %2406 = vmatprep.subr.bf16.mxu0 %v3468_v55  ;;  %v322_v54 = vld [vmem:[%s3666_s23 + $0x98] sm:$0xff] }
  0xda   : > { %2180 = vmatmul.mubr.bf16.gmra.mrb[4].mxu1 %v2799_v57  ;;  %v330_v55 = vld [vmem:[%s3666_s23 + $0xd8] sm:$0xff] }
  0xdb   : > { %2392 = vmatmul.mubr.bf16.gmra.mrb[4].mxu0 %v2807_v58  ;;  %2195 = vmatpush1.bf16.msra.mxu1 %v3463_v62  ;;  %v326_v57 = vld [vmem:[%s3666_s23 + $0xb8] sm:$0xff]  ;;  %v2785_v62 = vcombine.low %v3883_v56, %v3886_v59 }
  0xdc   : > { %2407 = vmatpush1.bf16.msra.mxu0 %v3466_v63  ;;  %2196 = vmatprep.subr.bf16.mxu1 %v3471_v0  ;;  %v334_v58 = vld [vmem:[%s3666_s23 + $0xf8] sm:$0xff]  ;;  %v2793_v63 = vcombine.low %v3889_v60, %v3892_v61  ;;  %v2802_v0 = vcombine.high %v322_v54, %v330_v55 }
  0xdd   : > { %2408 = vmatprep.subr.bf16.mxu0 %v3474_v1  ;;  %2222 = vmatprep.mubr.bf16.mxu1 %v2786_v2  ;;  %v2810_v1 = vcombine.high %v326_v57, %v334_v58  ;;  %v2801_v2 = vcombine.low %v322_v54, %v330_v55  ;;  %v2507_v55 = vlaneseq }
  0xde   : > { %2434 = vmatprep.mubr.bf16.mxu0 %v2794_v3  ;;  %v2809_v3 = vcombine.low %v326_v57, %v334_v58 }
  0xdf   : > { %2197 = vmatpush1.bf16.msra.mxu1 %v3469_v4  ;;  %vm2521_vm0 = vcmp.lt.s32.totalorder %v2507_v55, 256 }
  0xe0   : > { %2409 = vmatpush1.bf16.msra.mxu0 %v3472_v5  ;;  %2198 = vmatprep.subr.bf16.mxu1 %v3477_v6 }
  0xe1   : > { %2410 = vmatprep.subr.bf16.mxu0 %v3480_v7 }
  0xe3   : > { %2199 = vmatpush1.bf16.msra.mxu1 %v3475_v8 }
  0xe4   : > { %2411 = vmatpush1.bf16.msra.mxu0 %v3478_v9  ;;  %2200 = vmatprep.subr.bf16.mxu1 %v3483_v10 }
  0xe5   : > { %2412 = vmatprep.subr.bf16.mxu0 %v3486_v11 }
  0xe7   : > { %2201 = vmatpush1.bf16.msra.mxu1 %v3481_v12 }
  0xe8   : > { %2413 = vmatpush1.bf16.msra.mxu0 %v3484_v13  ;;  %2202 = vmatprep.subr.bf16.mxu1 %v3489_v14 }
  0xe9   : > { %2414 = vmatprep.subr.bf16.mxu0 %v3492_v15 }
  0xeb   : > { %2203 = vmatpush1.bf16.msra.mxu1 %v3487_v16 }
  0xec   : > { %2415 = vmatpush1.bf16.msra.mxu0 %v3490_v17  ;;  %2204 = vmatprep.subr.bf16.mxu1 %v3495_v18 }
  0xed   : > { %2416 = vmatprep.subr.bf16.mxu0 %v3498_v19 }
  0xef   : > { %2205 = vmatpush1.bf16.msra.mxu1 %v3493_v20 }
  0xf0   : > { %2417 = vmatpush1.bf16.msra.mxu0 %v3496_v21  ;;  %2206 = vmatprep.subr.bf16.mxu1 %v3501_v22 }
  0xf1   : > { %2418 = vmatprep.subr.bf16.mxu0 %v3504_v23 }
  0xf3   : > { %2207 = vmatpush1.bf16.msra.mxu1 %v3499_v24 }
  0xf4   : > { %2419 = vmatpush1.bf16.msra.mxu0 %v3502_v25  ;;  %2208 = vmatprep.subr.bf16.mxu1 %v3507_v26 }
  0xf5   : > { %2420 = vmatprep.subr.bf16.mxu0 %v3510_v27 }
  0xf7   : > { %2209 = vmatpush1.bf16.msra.mxu1 %v3505_v28 }
  0xf8   : > { %2421 = vmatpush1.bf16.msra.mxu0 %v3508_v29  ;;  %2210 = vmatprep.subr.bf16.mxu1 %v3513_v30 }
  0xf9   : > { %2422 = vmatprep.subr.bf16.mxu0 %v3516_v31 }
  0xfb   : > { %2211 = vmatpush1.bf16.msra.mxu1 %v3511_v32 }
  0xfc   : > { %2423 = vmatpush1.bf16.msra.mxu0 %v3514_v33  ;;  %2212 = vmatprep.subr.bf16.mxu1 %v3519_v34 }
  0xfd   : > { %2424 = vmatprep.subr.bf16.mxu0 %v3522_v35 }
  0xff   : > { %2213 = vmatpush1.bf16.msra.mxu1 %v3517_v36 }
 0x100   : > { %2425 = vmatpush1.bf16.msra.mxu0 %v3520_v37  ;;  %2214 = vmatprep.subr.bf16.mxu1 %v3525_v38 }
 0x101   : > { %2426 = vmatprep.subr.bf16.mxu0 %v3528_v39 }
 0x103   : > { %2215 = vmatpush1.bf16.msra.mxu1 %v3523_v40 }
 0x104   : > { %2427 = vmatpush1.bf16.msra.mxu0 %v3526_v41  ;;  %2216 = vmatprep.subr.bf16.mxu1 %v3531_v43 }
 0x105   : > { %2428 = vmatprep.subr.bf16.mxu0 %v3534_v44 }
 0x107   : > { %2217 = vmatpush1.bf16.msra.mxu1 %v3529_v48 }
 0x108   : > { %2429 = vmatpush1.bf16.msra.mxu0 %v3532_v49  ;;  %2218 = vmatprep.subr.bf16.mxu1 %v3537_v50 }
 0x109   : > { %2430 = vmatprep.subr.bf16.mxu0 %v3540_v51 }
 0x10b   : > { %2219 = vmatpush1.bf16.msra.mxu1 %v3535_v52 }
 0x10c   : > { %2431 = vmatpush1.bf16.msra.mxu0 %v3538_v53  ;;  %2220 = vmatprep.subr.bf16.mxu1 %v3543_v42 }
 0x10d   : > { %2432 = vmatprep.subr.bf16.mxu0 %v3546_v45 }
 0x10f   : > { %2221 = vmatpush1.bf16.msra.mxu1 %v3541_v46 }
 0x110   : > { %2433 = vmatpush1.bf16.msra.mxu0 %v3544_v47  ;;  %v3571_v47 = vmov 1966171168  }
 0x111   : > { %v2505_v54 = vunpack.c.l.s4 %v3571_v47 }
 0x112   : > { %2223 = vmatmul.mubr.bf16.vlgmr.msra.gmra.mrb[0].mxu1 %v2785_v62 }
 0x113   : > { %2435 = vmatmul.mubr.bf16.vlgmr.msra.gmra.mrb[0].mxu0 %v2793_v63  ;;  %2232 = vmatprep.mubr.bf16.mxu1 %v2802_v0 }
 0x114   : > { %2444 = vmatprep.mubr.bf16.mxu0 %v2810_v1 }
 0x11a   : > { %2233 = vmatmul.mubr.bf16.gmra.mrb[4].mxu1 %v2801_v2 }
 0x11b   : > { %2445 = vmatmul.mubr.bf16.gmra.mrb[4].mxu0 %v2809_v3 }
 0x1e5   : > { %v2224_v4 = vpop.f32.mrb[0].mxu1 }
 0x1e6   : > { %v2436_v5 = vpop.f32.mrb[0].mxu0  ;;  %v2226_v59 = vpop.f32.mrb[1].mxu1 }
 0x1e7   : > { %v3082_v56 = vadd.f32 %v2436_v5, %v2224_v4  ;;  %v2438_v6 = vpop.f32.mrb[1].mxu0  ;;  %v2228_v60 = vpop.f32.mrb[2].mxu1  ;;  %v2506_v4 = vunpack.c.0.s8 %v2505_v54  ;;  %v2508_v5 = vshrl.u32 %v2507_v55, 7 }
 0x1e8   : > { %v3083_v7 = vadd.f32 %v2438_v6, %v2226_v59  ;;  %v2440_v61 = vpop.f32.mrb[2].mxu0  ;;  %v2230_v9 = vpop.f32.mrb[3].mxu1 }
 0x1e9   : > { %v3084_v8 = vadd.f32 %v2440_v61, %v2228_v60  ;;  %v2442_v10 = vpop.f32.mrb[3].mxu0  ;;  %v2524_v13 = vmul.f32 %v3082_v56, %v3082_v56 }
 0x1ea   : > { %v3078_v11 = vpack.c.bf16 %v3083_v7, %v3082_v56  ;;  %v3085_v12 = vadd.f32 %v2442_v10, %v2230_v9  ;;  %v2525_v16 = vmul.f32 %v3083_v7, %v3083_v7  ;;  %v2509_v10 = vsub.s32 %v2506_v4, %v2508_v5 }
 0x1eb   : > { %v2483_v14 = vadd.f32 %v3084_v8, %v3082_v56  ;;  %v2526_v15 = vmul.f32 %v3084_v8, %v3084_v8 }
 0x1ec   : > { %2479 = vst [vmem:[%s3964_s27] sm:$0xff] %v3078_v11  ;;  %v3079_v17 = vpack.c.bf16 %v3085_v12, %v3084_v8  ;;  %v2492_v18 = vadd.f32 %v3085_v12, %v3083_v7  ;;  %v2527_v19 = vmul.f32 %v3085_v12, %v3085_v12 }
 0x1ed   : > { %v2532_v20 = vadd.f32 %v2526_v15, %v2524_v13  ;;  %v2234_v22 = vpop.f32.mrb[4].mxu1 }
 0x1ee   : > { %2480 = vst [vmem:[%s3964_s27 + $0x8] sm:$0xff] %v3079_v17  ;;  %v2541_v21 = vadd.f32 %v2527_v19, %v2525_v16  ;;  %v2446_v23 = vpop.f32.mrb[4].mxu0  ;;  %v2236_v25 = vpop.f32.mrb[5].mxu1 }
 0x1ef   : > { %v3086_v24 = vadd.f32 %v2446_v23, %v2234_v22  ;;  %v2448_v26 = vpop.f32.mrb[5].mxu0  ;;  %v2238_v28 = vpop.f32.mrb[6].mxu1 }
 0x1f0   : > { %v3087_v27 = vadd.f32 %v2448_v26, %v2236_v25  ;;  %v2450_v29 = vpop.f32.mrb[6].mxu0  ;;  %v2240_v33 = vpop.f32.mrb[7].mxu1 }
 0x1f1   : > { %v2484_v30 = vadd.f32 %v3086_v24, %v2483_v14  ;;  %v2528_v31 = vmul.f32 %v3086_v24, %v3086_v24  ;;  %v3088_v32 = vadd.f32 %v2450_v29, %v2238_v28  ;;  %v2452_v34 = vpop.f32.mrb[7].mxu0 }
 0x1f2   : > { %v3080_v35 = vpack.c.bf16 %v3087_v27, %v3086_v24  ;;  %v2493_v36 = vadd.f32 %v3087_v27, %v2492_v18  ;;  %v2529_v37 = vmul.f32 %v3087_v27, %v3087_v27  ;;  %v3089_v38 = vadd.f32 %v2452_v34, %v2240_v33 }
 0x1f3   : > { %v2533_v39 = vadd.f32 %v2532_v20, %v2528_v31  ;;  %v2485_v40 = vadd.f32 %v3088_v32, %v2484_v30  ;;  %v2530_v41 = vmul.f32 %v3088_v32, %v3088_v32 }
 0x1f4   : > { %2481 = vst [vmem:[%s3964_s27 + $0x10] sm:$0xff] %v3080_v35  ;;  %v2542_v43 = vadd.f32 %v2541_v21, %v2529_v37  ;;  %v3081_v44 = vpack.c.bf16 %v3089_v38, %v3088_v32  ;;  %v2494_v48 = vadd.f32 %v3089_v38, %v2493_v36  ;;  %v2531_v49 = vmul.f32 %v3089_v38, %v3089_v38 }
 0x1f5   : > { %v2486_v50 = vrot.slane %v2485_v40, 4  ;;  %v2534_v51 = vadd.f32 %v2533_v39, %v2530_v41 }
 0x1f6   : > { %2482 = vst [vmem:[%s3964_s27 + $0x18] sm:$0xff] %v3081_v44  ;;  %v2495_v52 = vrot.slane %v2494_v48, 4  ;;  %v2543_v53 = vadd.f32 %v2542_v43, %v2531_v49 }
 0x1f7   : > { %v2487_v42 = vadd.f32 %v2486_v50, %v2485_v40  ;;  %v2535_v45 = vrot.slane %v2534_v51, 4 }
 0x1f8   : > { %v2496_v46 = vadd.f32 %v2495_v52, %v2494_v48  ;;  %v2544_v57 = vrot.slane %v2543_v53, 4 }
 0x1f9   : > { %v2488_v58 = vrot.slane %v2487_v42, 2  ;;  %v2536_v62 = vadd.f32 %v2535_v45, %v2534_v51 }
 0x1fa   : > { %v2497_v63 = vrot.slane %v2496_v46, 2  ;;  %v2545_v0 = vadd.f32 %v2544_v57, %v2543_v53 }
 0x1fb   : > { %v2489_v1 = vadd.f32 %v2488_v58, %v2487_v42  ;;  %v2537_v2 = vrot.slane %v2536_v62, 2 }
 0x1fc   : > { %v2498_v3 = vadd.f32 %v2497_v63, %v2496_v46  ;;  %v2546_v56 = vrot.slane %v2545_v0, 2 }
 0x1fd   : > { %v2490_v59 = vrot.slane %v2489_v1, 1  ;;  %v2538_v6 = vadd.f32 %v2537_v2, %v2536_v62 }
 0x1fe   : > { %v2499_v7 = vrot.slane %v2498_v3, 1  ;;  %v2547_v60 = vadd.f32 %v2546_v56, %v2545_v0 }
 0x1ff   : > { %v2491_v61 = vadd.f32 %v2490_v59, %v2489_v1  ;;  %v2539_v8 = vrot.slane %v2538_v6, 1 }
 0x200   : > { %v2500_v9 = vadd.f32 %v2499_v7, %v2498_v3  ;;  %v2548_v11 = vrot.slane %v2547_v60, 1 }
 0x201   : > { %v2540_v12 = vadd.f32 %v2539_v8, %v2538_v6 }
 0x202   : > { %v2503_v13 = vcombine.low %v2491_v61, %v2500_v9  ;;  %v2549_v14 = vadd.f32 %v2548_v11, %v2547_v60 }
 0x204   : > { %v2510_v15 = vrot.slane %v2503_v13, %v2509_v10  ;;  %v2552_v16 = vcombine.low %v2540_v12, %v2549_v14 }
 0x206   : > { %v2517_v17 = vrot.slane %v2510_v15, %v2509_v10  ;;  %v2559_v18 = vrot.slane %v2552_v16, %v2509_v10 }
 0x208   : > { %2523 = vst.msk [vmem:[%s301_s4] ss:$2 sm:$0x3] %vm2521_vm0, %v2517_v17  ;;  %v2566_v19 = vrot.slane %v2559_v18, %v2509_v10 }
 0x20a   : > { %3071 = vst.msk [vmem:[%s301_s4 + $0x1] ss:$2 sm:$0x3] %vm2521_vm0, %v2566_v19 }
 0x20b PF: > { %s14_s14 = sadd.s32 1, %s3569_s14   ;;  %s3987_s12 = smov %s3565_s13 }
 0x20c   : > { %p11_p5 = scmp.ge.s32.totalorder %s14_s14, 6   ;;  %s3988_s13 = smov %s3990_s15 }
 0x20e   :  { %13 = sbr.rel (!%p11_p5) target bundleno = 2 (0x2), region = 74 }

// kernel: generator_forward.13
= control target key start
LH: loop header
LB: loop body
LE: loop exit
PB: predicated region body
PF: predicated region fallthrough
CT: control target
= control target key end

     0   :  { %s2495_s12 = smov 0   ;;  %s2497_s13 = smov 0   ;;  %s2733_s0 = inlined_call_operand.vmem [shape: bf16[4,128,1024], index: 0, kind: input, shape index: {}]   ;;  %s2734_s1 = inlined_call_operand.vmem [shape: bf16[4,1024,128], index: 1, kind: input, shape index: {}]   ;;  %s2735_s2 = inlined_call_operand.vmem [shape: bf16[4,128,128], index: 2, kind: output, shape index: {0}]   ;;  %s2736_s3 = inlined_call_operand.vmem [shape: f32[4,1,2,128], index: 3, kind: output, shape index: {1}]  }
   0x1   :  { %s2499_s14 = smov 0  }
   0x2 LB: > { %s33_s15 = sadd.s32 1, %s2469_s13  ;;  %p1887_p0 = scmp.ge.s32.totalorder %s2473_s14, 1  ;;  %s2473_s14 = sphi %s2499_s14, %s14_s14   ;;  %s2469_s13 = sphi %s2497_s13, %s2738_s13   ;;  %s2465_s12 = sphi %s2495_s12, %s2737_s12  }
   0x3   : > { %p35_p1 = scmp.ge.s32.totalorder %s33_s15, 4  ;;  %p190_p2 = scmp.lt.s32.totalorder %s2473_s14, 5 }
   0x5   : > { %s2740_s15 = smov (%p35_p1, %s33_s15), 0  ;;  %p191_p3 = pnand %p1887_p0, %p190_p2 }
   0x6   : > { %p245_p4 = scmp.lt.s32.totalorder (!%p191_p3), %s2465_s12, 3 }
   0x7   : > { %194 = sbr.rel (%p191_p3) target bundleno = 409 (0x199), region = 28 }
   0xe   : > { %s2742_s12 = smov (!%p245_p4, %s2465_s12), 3 }
   0xf   : > { %s2041_s16 = sshll.u32 %s2742_s12, 9  ;;  %s2043_s23 = sshll.u32 %s2742_s12, 6 }
  0x10   : > { %s2521_s19 = scalar_lea.vmem %s2734_s1, %s2041_s16  ;;  %s2558_s22 = scalar_lea.vmem %s2733_s0, %s2041_s16 }
  0x11   : > { %v2387_v0 = vld [vmem:[%s2521_s19 + $0x40] sm:$0xff]   ;;  %v2391_v4 = vld [vmem:[%s2521_s19 + $0x48] sm:$0xff]   ;;  %v2395_v8 = vld [vmem:[%s2521_s19 + $0x50] sm:$0xff]   ;;  %s2696_s26 = scalar_lea.vmem %s2735_s2, %s2043_s23  ;;  %s1894_s27 = sshll.u32 %s2742_s12, 1 }
  0x12   : > { %v2388_v1 = vld [vmem:[%s2521_s19 + $0xc0] sm:$0xff]   ;;  %2107 = vmatprep.subr.bf16.mxu0 %v2387_v0  ;;  %v2392_v5 = vld [vmem:[%s2521_s19 + $0xc8] sm:$0xff]   ;;  %v2396_v9 = vld [vmem:[%s2521_s19 + $0xd0] sm:$0xff]   ;;  %s285_s30 = scalar_lea.vmem %s2736_s3, %s1894_s27 }
  0x13   : > { %v2389_v2 = vld [vmem:[%s2521_s19] sm:$0xff]   ;;  %2171 = vmatprep.subr.bf16.mxu1 %v2388_v1  ;;  %v2393_v6 = vld [vmem:[%s2521_s19 + $0x8] sm:$0xff]   ;;  %v2397_v10 = vld [vmem:[%s2521_s19 + $0x10] sm:$0xff]  }
  0x14   : > { %v2390_v3 = vld [vmem:[%s2521_s19 + $0x80] sm:$0xff]   ;;  %2108 = vmatpush3.bf16.msra.mxu0 %v2389_v2  ;;  %v2394_v7 = vld [vmem:[%s2521_s19 + $0x88] sm:$0xff]   ;;  %v2398_v11 = vld [vmem:[%s2521_s19 + $0x90] sm:$0xff]  }
  0x15   : > { %2172 = vmatpush3.bf16.msra.mxu1 %v2390_v3  ;;  %2109 = vmatprep.subr.bf16.mxu0 %v2391_v4  ;;  %v2399_v12 = vld [vmem:[%s2521_s19 + $0x58] sm:$0xff]   ;;  %v2403_v16 = vld [vmem:[%s2521_s19 + $0x60] sm:$0xff]   ;;  %v2407_v20 = vld [vmem:[%s2521_s19 + $0x68] sm:$0xff]  }
  0x16   : > { %2173 = vmatprep.subr.bf16.mxu1 %v2392_v5  ;;  %v2400_v13 = vld [vmem:[%s2521_s19 + $0xd8] sm:$0xff]   ;;  %v2404_v17 = vld [vmem:[%s2521_s19 + $0xe0] sm:$0xff]   ;;  %v2408_v21 = vld [vmem:[%s2521_s19 + $0xe8] sm:$0xff]  }
  0x17   : > { %v2401_v14 = vld [vmem:[%s2521_s19 + $0x18] sm:$0xff]   ;;  %v2405_v18 = vld [vmem:[%s2521_s19 + $0x20] sm:$0xff]   ;;  %v2409_v22 = vld [vmem:[%s2521_s19 + $0x28] sm:$0xff]  }
  0x18   : > { %2110 = vmatpush3.bf16.msra.mxu0 %v2393_v6  ;;  %v2402_v15 = vld [vmem:[%s2521_s19 + $0x98] sm:$0xff]   ;;  %v2406_v19 = vld [vmem:[%s2521_s19 + $0xa0] sm:$0xff]   ;;  %v2410_v23 = vld [vmem:[%s2521_s19 + $0xa8] sm:$0xff]  }
  0x19   : > { %2174 = vmatpush3.bf16.msra.mxu1 %v2394_v7  ;;  %2111 = vmatprep.subr.bf16.mxu0 %v2395_v8  ;;  %v2411_v24 = vld [vmem:[%s2521_s19 + $0x70] sm:$0xff]   ;;  %v2415_v28 = vld [vmem:[%s2521_s19 + $0x78] sm:$0xff]   ;;  %v287_v32 = vld [vmem:[%s2558_s22] sm:$0xff] }
  0x1a   : > { %2175 = vmatprep.subr.bf16.mxu1 %v2396_v9  ;;  %v2412_v25 = vld [vmem:[%s2521_s19 + $0xf0] sm:$0xff]   ;;  %v2416_v29 = vld [vmem:[%s2521_s19 + $0xf8] sm:$0xff]   ;;  %v291_v33 = vld [vmem:[%s2558_s22 + $0x20] sm:$0xff] }
  0x1b   : > { %v2413_v26 = vld [vmem:[%s2521_s19 + $0x30] sm:$0xff]   ;;  %v2417_v30 = vld [vmem:[%s2521_s19 + $0x38] sm:$0xff]   ;;  %v288_v34 = vld [vmem:[%s2558_s22 + $0x8] sm:$0xff]  ;;  %v1895_v35 = vcombine.low %v287_v32, %v291_v33  ;;  %v1896_v36 = vcombine.high %v287_v32, %v291_v33 }
  0x1c   : > { %2112 = vmatpush3.bf16.msra.mxu0 %v2397_v10  ;;  %v2414_v27 = vld [vmem:[%s2521_s19 + $0xb0] sm:$0xff]   ;;  %v2418_v31 = vld [vmem:[%s2521_s19 + $0xb8] sm:$0xff]   ;;  %v292_v37 = vld [vmem:[%s2558_s22 + $0x28] sm:$0xff] }
  0x1d   : > { %2176 = vmatpush3.bf16.msra.mxu1 %v2398_v11  ;;  %2113 = vmatprep.subr.bf16.mxu0 %v2399_v12  ;;  %v1897_v38 = vcombine.low %v288_v34, %v292_v37  ;;  %v1898_v39 = vcombine.high %v288_v34, %v292_v37  ;;  %v2419_v40 = vld [vmem:[%s2521_s19 + $0x140] sm:$0xff]   ;;  %v296_v47 = vld [vmem:[%s2558_s22 + $0x48] sm:$0xff]  ;;  %v2427_v62 = vld [vmem:[%s2521_s19 + $0x150] sm:$0xff]  }
  0x1e   : > { %2177 = vmatprep.subr.bf16.mxu1 %v2400_v13  ;;  %1215 = vmatprep.mubr.bf16.mxu0 %v1896_v36  ;;  %v2420_v41 = vld [vmem:[%s2521_s19 + $0x100] sm:$0xff]   ;;  %v300_v48 = vld [vmem:[%s2558_s22 + $0x68] sm:$0xff]  ;;  %v2428_v63 = vld [vmem:[%s2521_s19 + $0x110] sm:$0xff]  }
  0x1f   : > { %1312 = vmatprep.mubr.bf16.mxu1 %v1898_v39  ;;  %v2421_v42 = vld [vmem:[%s2521_s19 + $0x1c0] sm:$0xff]   ;;  %v1906_v49 = vcombine.high %v296_v47, %v300_v48  ;;  %v2423_v50 = vld [vmem:[%s2521_s19 + $0x148] sm:$0xff]   ;;  %v1905_v53 = vcombine.low %v296_v47, %v300_v48  ;;  %v2429_v0 = vld [vmem:[%s2521_s19 + $0x1d0] sm:$0xff]  }
  0x20   : > { %2114 = vmatpush3.bf16.msra.mxu0 %v2401_v14  ;;  %v2422_v43 = vld [vmem:[%s2521_s19 + $0x180] sm:$0xff]   ;;  %v2424_v52 = vld [vmem:[%s2521_s19 + $0x108] sm:$0xff]   ;;  %v2430_v1 = vld [vmem:[%s2521_s19 + $0x190] sm:$0xff]  }
  0x21   : > { %2178 = vmatpush3.bf16.msra.mxu1 %v2402_v15  ;;  %2115 = vmatprep.subr.bf16.mxu0 %v2403_v16  ;;  %v295_v44 = vld [vmem:[%s2558_s22 + $0x40] sm:$0xff]  ;;  %v2425_v54 = vld [vmem:[%s2521_s19 + $0x1c8] sm:$0xff]   ;;  %v2431_v10 = vld [vmem:[%s2521_s19 + $0x158] sm:$0xff]  }
  0x22   : > { %2179 = vmatprep.subr.bf16.mxu1 %v2404_v17  ;;  %v299_v45 = vld [vmem:[%s2558_s22 + $0x60] sm:$0xff]  ;;  %v2426_v55 = vld [vmem:[%s2521_s19 + $0x188] sm:$0xff]   ;;  %v2432_v11 = vld [vmem:[%s2521_s19 + $0x118] sm:$0xff]  }
  0x23   : > { %v1904_v46 = vcombine.high %v295_v44, %v299_v45  ;;  %v1903_v51 = vcombine.low %v295_v44, %v299_v45  ;;  %v303_v56 = vld [vmem:[%s2558_s22 + $0x80] sm:$0xff]  ;;  %v304_v58 = vld [vmem:[%s2558_s22 + $0x88] sm:$0xff]  ;;  %v2433_v12 = vld [vmem:[%s2521_s19 + $0x1d8] sm:$0xff]  }
  0x24   : > { %2116 = vmatpush3.bf16.msra.mxu0 %v2405_v18  ;;  %v307_v57 = vld [vmem:[%s2558_s22 + $0xa0] sm:$0xff]  ;;  %v308_v59 = vld [vmem:[%s2558_s22 + $0xa8] sm:$0xff]  ;;  %v2434_v13 = vld [vmem:[%s2521_s19 + $0x198] sm:$0xff]  }
  0x25   : > { %2180 = vmatpush3.bf16.msra.mxu1 %v2406_v19  ;;  %2117 = vmatprep.subr.bf16.mxu0 %v2407_v20  ;;  %v1912_v60 = vcombine.high %v303_v56, %v307_v57  ;;  %v1914_v61 = vcombine.high %v304_v58, %v308_v59  ;;  %v1911_v2 = vcombine.low %v303_v56, %v307_v57  ;;  %v311_v3 = vld [vmem:[%s2558_s22 + $0xc0] sm:$0xff]  ;;  %v312_v5 = vld [vmem:[%s2558_s22 + $0xc8] sm:$0xff]  ;;  %v2444_v39 = vld [vmem:[%s2521_s19 + $0x130] sm:$0xff]  }
  0x26   : > { %2181 = vmatprep.subr.bf16.mxu1 %v2408_v21  ;;  %v315_v4 = vld [vmem:[%s2558_s22 + $0xe0] sm:$0xff]  ;;  %v1913_v6 = vcombine.low %v304_v58, %v308_v59  ;;  %v316_v8 = vld [vmem:[%s2558_s22 + $0xe8] sm:$0xff]  ;;  %v2448_v48 = vld [vmem:[%s2521_s19 + $0x138] sm:$0xff]  }
  0x27   : > { %v1920_v7 = vcombine.high %v311_v3, %v315_v4  ;;  %v1922_v9 = vcombine.high %v312_v5, %v316_v8  ;;  %v319_v14 = vld [vmem:[%s2558_s22 + $0x100] sm:$0xff]  ;;  %v320_v16 = vld [vmem:[%s2558_s22 + $0x108] sm:$0xff]  ;;  %v1919_v19 = vcombine.low %v311_v3, %v315_v4  ;;  %v1921_v21 = vcombine.low %v312_v5, %v316_v8  ;;  %v298_v8 = vld [vmem:[%s2558_s22 + $0x58] sm:$0xff] }
  0x28   : > { %2118 = vmatpush3.bf16.msra.mxu0 %v2409_v22  ;;  %v323_v15 = vld [vmem:[%s2558_s22 + $0x120] sm:$0xff]  ;;  %v324_v17 = vld [vmem:[%s2558_s22 + $0x128] sm:$0xff] }
  0x29   : > { %2182 = vmatpush3.bf16.msra.mxu1 %v2410_v23  ;;  %2119 = vmatprep.subr.bf16.mxu0 %v2411_v24  ;;  %v2435_v18 = vld [vmem:[%s2521_s19 + $0x160] sm:$0xff]   ;;  %v1928_v22 = vcombine.high %v319_v14, %v323_v15  ;;  %v1930_v24 = vcombine.high %v320_v16, %v324_v17  ;;  %v2441_v32 = vld [vmem:[%s2521_s19 + $0x1e8] sm:$0xff]   ;;  %v1927_v34 = vcombine.low %v319_v14, %v323_v15  ;;  %v305_v14 = vld [vmem:[%s2558_s22 + $0x90] sm:$0xff] }
  0x2a   : > { %2183 = vmatprep.subr.bf16.mxu1 %v2412_v25  ;;  %v2436_v20 = vld [vmem:[%s2521_s19 + $0x120] sm:$0xff]   ;;  %v2442_v33 = vld [vmem:[%s2521_s19 + $0x1a8] sm:$0xff]   ;;  %v309_v15 = vld [vmem:[%s2558_s22 + $0xb0] sm:$0xff] }
  0x2b   : > { %v2437_v23 = vld [vmem:[%s2521_s19 + $0x1e0] sm:$0xff]   ;;  %v336_v44 = vld [vmem:[%s2558_s22 + $0x188] sm:$0xff] }
  0x2c   : > { %2120 = vmatpush3.bf16.msra.mxu0 %v2413_v26  ;;  %v2438_v25 = vld [vmem:[%s2521_s19 + $0x1a0] sm:$0xff]   ;;  %v340_v45 = vld [vmem:[%s2558_s22 + $0x1a8] sm:$0xff] }
  0x2d   : > { %2184 = vmatpush3.bf16.msra.mxu1 %v2414_v27  ;;  %2121 = vmatprep.subr.bf16.mxu0 %v2415_v28  ;;  %v327_v26 = vld [vmem:[%s2558_s22 + $0x140] sm:$0xff]  ;;  %v2439_v28 = vld [vmem:[%s2521_s19 + $0x168] sm:$0xff]   ;;  %v1945_v59 = vcombine.low %v336_v44, %v340_v45 }
  0x2e   : > { %2185 = vmatprep.subr.bf16.mxu1 %v2416_v29  ;;  %v331_v27 = vld [vmem:[%s2558_s22 + $0x160] sm:$0xff]  ;;  %v328_v29 = vld [vmem:[%s2558_s22 + $0x148] sm:$0xff] }
  0x2f   : > { %v1936_v36 = vcombine.high %v327_v26, %v331_v27  ;;  %v1935_v47 = vcombine.low %v327_v26, %v331_v27  ;;  %v344_v56 = vld [vmem:[%s2558_s22 + $0x1c8] sm:$0xff]  ;;  %v1915_v26 = vcombine.low %v305_v14, %v309_v15 }
  0x30   : > { %2122 = vmatpush3.bf16.msra.mxu0 %v2417_v30  ;;  %v332_v30 = vld [vmem:[%s2558_s22 + $0x168] sm:$0xff] }
  0x31   : > { %2186 = vmatpush3.bf16.msra.mxu1 %v2418_v31  ;;  %2235 = vmatprep.subr.bf16.mxu0 %v2419_v40  ;;  %v2440_v31 = vld [vmem:[%s2521_s19 + $0x128] sm:$0xff]   ;;  %v1938_v37 = vcombine.high %v328_v29, %v332_v30  ;;  %v2445_v40 = vld [vmem:[%s2521_s19 + $0x1f0] sm:$0xff]  }
  0x32   : > { %2299 = vmatprep.subr.bf16.mxu1 %v2421_v42  ;;  %v339_v42 = vld [vmem:[%s2558_s22 + $0x1a0] sm:$0xff]  ;;  %v348_v57 = vld [vmem:[%s2558_s22 + $0x1e8] sm:$0xff] }
  0x33   : > { %1216 = vmatmul.mubr.bf16.vlgmr.msra.gmra.mrb[0].mxu0 %v1895_v35  ;;  %v1929_v35 = vcombine.low %v320_v16, %v324_v17  ;;  %v1953_v3 = vcombine.low %v344_v56, %v348_v57  ;;  %v306_v16 = vld [vmem:[%s2558_s22 + $0x98] sm:$0xff] }
  0x34   : > { %1313 = vmatmul.mubr.bf16.vlgmr.msra.gmra.mrb[0].mxu1 %v1897_v38  ;;  %2236 = vmatpush3.bf16.msra.mxu0 %v2420_v41  ;;  %v2443_v38 = vld [vmem:[%s2521_s19 + $0x170] sm:$0xff]   ;;  %v335_v41 = vld [vmem:[%s2558_s22 + $0x180] sm:$0xff]  ;;  %v310_v17 = vld [vmem:[%s2558_s22 + $0xb8] sm:$0xff] }
  0x35   : > { %2300 = vmatpush3.bf16.msra.mxu1 %v2422_v43  ;;  %1223 = vmatprep.mubr.bf16.mxu0 %v1904_v46  ;;  %v2446_v43 = vld [vmem:[%s2521_s19 + $0x1b0] sm:$0xff]   ;;  %v2447_v46 = vld [vmem:[%s2521_s19 + $0x178] sm:$0xff]   ;;  %v1943_v58 = vcombine.low %v335_v41, %v339_v42  ;;  %v1917_v27 = vcombine.low %v306_v16, %v310_v17 }
  0x36   : > { %1320 = vmatprep.mubr.bf16.mxu1 %v1906_v49  ;;  %2237 = vmatprep.subr.bf16.mxu0 %v2423_v50  ;;  %v1937_v49 = vcombine.low %v328_v29, %v332_v30  ;;  %v1944_v50 = vcombine.high %v335_v41, %v339_v42  ;;  %v321_v30 = vld [vmem:[%s2558_s22 + $0x110] sm:$0xff]  ;;  %v334_v41 = vld [vmem:[%s2558_s22 + $0x178] sm:$0xff] }
  0x37   : > { %2301 = vmatprep.subr.bf16.mxu1 %v2425_v54  ;;  %v343_v54 = vld [vmem:[%s2558_s22 + $0x1c0] sm:$0xff] }
  0x38   : > { %2238 = vmatpush3.bf16.msra.mxu0 %v2424_v52  ;;  %v1946_v52 = vcombine.high %v336_v44, %v340_v45 }
  0x39   : > { %2302 = vmatpush3.bf16.msra.mxu1 %v2426_v55  ;;  %2239 = vmatprep.subr.bf16.mxu0 %v2427_v62  ;;  %v347_v55 = vld [vmem:[%s2558_s22 + $0x1e0] sm:$0xff]  ;;  %v289_v62 = vld [vmem:[%s2558_s22 + $0x10] sm:$0xff] }
  0x3a   : > { %2303 = vmatprep.subr.bf16.mxu1 %v2429_v0  ;;  %v290_v0 = vld [vmem:[%s2558_s22 + $0x18] sm:$0xff] }
  0x3b   : > { %1224 = vmatmul.mubr.bf16.gmra.mrb[4].mxu0 %v1903_v51  ;;  %v2449_v51 = vld [vmem:[%s2521_s19 + $0x1f8] sm:$0xff]  }
  0x3c   : > { %1321 = vmatmul.mubr.bf16.gmra.mrb[4].mxu1 %v1905_v53  ;;  %1231 = vmatprep.mubr.bf16.mxu0 %v1912_v60  ;;  %v2450_v53 = vld [vmem:[%s2521_s19 + $0x1b8] sm:$0xff]   ;;  %v1952_v60 = vcombine.high %v343_v54, %v347_v55 }
  0x3d   : > { %1328 = vmatprep.mubr.bf16.mxu1 %v1914_v61  ;;  %2240 = vmatpush3.bf16.msra.mxu0 %v2428_v63  ;;  %v1954_v61 = vcombine.high %v344_v56, %v348_v57  ;;  %v293_v63 = vld [vmem:[%s2558_s22 + $0x30] sm:$0xff]  ;;  %v346_v56 = vld [vmem:[%s2558_s22 + $0x1d8] sm:$0xff] }
  0x3e   : > { %2304 = vmatpush3.bf16.msra.mxu1 %v2430_v1  ;;  %2241 = vmatprep.subr.bf16.mxu0 %v2431_v10  ;;  %v294_v1 = vld [vmem:[%s2558_s22 + $0x38] sm:$0xff]  ;;  %v1900_v4 = vcombine.high %v289_v62, %v293_v63  ;;  %v1899_v10 = vcombine.low %v289_v62, %v293_v63 }
  0x3f   : > { %2305 = vmatprep.subr.bf16.mxu1 %v2433_v12  ;;  %v1902_v5 = vcombine.high %v290_v0, %v294_v1  ;;  %v350_v57 = vld [vmem:[%s2558_s22 + $0x1f8] sm:$0xff] }
  0x40   : > { %v1957_v63 = vcombine.low %v346_v56, %v350_v57 }
  0x41   : > { %2242 = vmatpush3.bf16.msra.mxu0 %v2432_v11  ;;  %v1901_v11 = vcombine.low %v290_v0, %v294_v1 }
  0x42   : > { %2306 = vmatpush3.bf16.msra.mxu1 %v2434_v13  ;;  %2243 = vmatprep.subr.bf16.mxu0 %v2435_v18 }
  0x43   : > { %1232 = vmatmul.mubr.bf16.gmra.mrb[8].mxu0 %v1911_v2  ;;  %2307 = vmatprep.subr.bf16.mxu1 %v2437_v23  ;;  %v1951_v2 = vcombine.low %v343_v54, %v347_v55  ;;  %v317_v23 = vld [vmem:[%s2558_s22 + $0xf0] sm:$0xff] }
  0x44   : > { %1329 = vmatmul.mubr.bf16.gmra.mrb[8].mxu1 %v1913_v6  ;;  %1239 = vmatprep.mubr.bf16.mxu0 %v1920_v7  ;;  %v297_v6 = vld [vmem:[%s2558_s22 + $0x50] sm:$0xff] }
  0x45   : > { %1336 = vmatprep.mubr.bf16.mxu1 %v1922_v9  ;;  %2244 = vmatpush3.bf16.msra.mxu0 %v2436_v20  ;;  %v301_v7 = vld [vmem:[%s2558_s22 + $0x70] sm:$0xff]  ;;  %v302_v9 = vld [vmem:[%s2558_s22 + $0x78] sm:$0xff]  ;;  %v1916_v20 = vcombine.high %v305_v14, %v309_v15 }
  0x46   : > { %2308 = vmatpush3.bf16.msra.mxu1 %v2438_v25  ;;  %2245 = vmatprep.subr.bf16.mxu0 %v2439_v28  ;;  %v1908_v12 = vcombine.high %v297_v6, %v301_v7  ;;  %v1910_v13 = vcombine.high %v298_v8, %v302_v9  ;;  %v1907_v18 = vcombine.low %v297_v6, %v301_v7  ;;  %v318_v25 = vld [vmem:[%s2558_s22 + $0xf8] sm:$0xff]  ;;  %v345_v54 = vld [vmem:[%s2558_s22 + $0x1d0] sm:$0xff] }
  0x47   : > { %2309 = vmatprep.subr.bf16.mxu1 %v2441_v32  ;;  %v322_v32 = vld [vmem:[%s2558_s22 + $0x118] sm:$0xff]  ;;  %v349_v55 = vld [vmem:[%s2558_s22 + $0x1f0] sm:$0xff] }
  0x48   : > { %v1955_v62 = vcombine.low %v345_v54, %v349_v55 }
  0x49   : > { %2246 = vmatpush3.bf16.msra.mxu0 %v2440_v31  ;;  %v325_v31 = vld [vmem:[%s2558_s22 + $0x130] sm:$0xff] }
  0x4a   : > { %2310 = vmatpush3.bf16.msra.mxu1 %v2442_v33  ;;  %2247 = vmatprep.subr.bf16.mxu0 %v2443_v38  ;;  %v326_v33 = vld [vmem:[%s2558_s22 + $0x138] sm:$0xff]  ;;  %v329_v38 = vld [vmem:[%s2558_s22 + $0x150] sm:$0xff]  ;;  %v1931_v42 = vcombine.low %v321_v30, %v325_v31 }
  0x4b   : > { %1240 = vmatmul.mubr.bf16.gmra.mrb[12].mxu0 %v1919_v19  ;;  %2311 = vmatprep.subr.bf16.mxu1 %v2445_v40  ;;  %v1909_v19 = vcombine.low %v298_v8, %v302_v9  ;;  %v330_v40 = vld [vmem:[%s2558_s22 + $0x158] sm:$0xff] }
  0x4c   : > { %1337 = vmatmul.mubr.bf16.gmra.mrb[12].mxu1 %v1921_v21  ;;  %1247 = vmatprep.mubr.bf16.mxu0 %v1928_v22  ;;  %v1918_v21 = vcombine.high %v306_v16, %v310_v17  ;;  %v313_v22 = vld [vmem:[%s2558_s22 + $0xd0] sm:$0xff]  ;;  %v1942_v45 = vcombine.high %v330_v40, %v334_v41 }
  0x4d   : > { %1344 = vmatprep.mubr.bf16.mxu1 %v1930_v24  ;;  %2248 = vmatpush3.bf16.msra.mxu0 %v2444_v39  ;;  %v314_v24 = vld [vmem:[%s2558_s22 + $0xd8] sm:$0xff]  ;;  %v1924_v28 = vcombine.high %v313_v22, %v317_v23  ;;  %v333_v39 = vld [vmem:[%s2558_s22 + $0x170] sm:$0xff] }
  0x4e   : > { %2312 = vmatpush3.bf16.msra.mxu1 %v2446_v43  ;;  %2249 = vmatprep.subr.bf16.mxu0 %v2447_v46  ;;  %v1926_v29 = vcombine.high %v314_v24, %v318_v25  ;;  %v1933_v43 = vcombine.low %v322_v32, %v326_v33  ;;  %v1940_v44 = vcombine.high %v329_v38, %v333_v39  ;;  %v337_v46 = vld [vmem:[%s2558_s22 + $0x190] sm:$0xff] }
  0x4f   : > { %2313 = vmatprep.subr.bf16.mxu1 %v2449_v51  ;;  %v1941_v51 = vcombine.low %v330_v40, %v334_v41 }
  0x51   : > { %2250 = vmatpush3.bf16.msra.mxu0 %v2448_v48  ;;  %v338_v48 = vld [vmem:[%s2558_s22 + $0x198] sm:$0xff] }
  0x52   : > { %2314 = vmatpush3.bf16.msra.mxu1 %v2450_v53 }
  0x53   : > { %1248 = vmatmul.mubr.bf16.gmra.mrb[16].mxu0 %v1927_v34  ;;  %v1923_v34 = vcombine.low %v313_v22, %v317_v23 }
  0x54   : > { %1345 = vmatmul.mubr.bf16.gmra.mrb[16].mxu1 %v1929_v35  ;;  %1255 = vmatprep.mubr.bf16.mxu0 %v1936_v36  ;;  %v1925_v35 = vcombine.low %v314_v24, %v318_v25  ;;  %v1932_v36 = vcombine.high %v321_v30, %v325_v31 }
  0x55   : > { %1352 = vmatprep.mubr.bf16.mxu1 %v1938_v37  ;;  %v1934_v37 = vcombine.high %v322_v32, %v326_v33 }
  0x5b   : > { %1256 = vmatmul.mubr.bf16.gmra.mrb[20].mxu0 %v1935_v47  ;;  %v341_v47 = vld [vmem:[%s2558_s22 + $0x1b0] sm:$0xff] }
  0x5c   : > { %1353 = vmatmul.mubr.bf16.gmra.mrb[20].mxu1 %v1937_v49  ;;  %1263 = vmatprep.mubr.bf16.mxu0 %v1944_v50  ;;  %v342_v49 = vld [vmem:[%s2558_s22 + $0x1b8] sm:$0xff]  ;;  %v1939_v50 = vcombine.low %v329_v38, %v333_v39 }
  0x5d   : > { %1360 = vmatprep.mubr.bf16.mxu1 %v1946_v52  ;;  %v1948_v52 = vcombine.high %v337_v46, %v341_v47  ;;  %v1950_v53 = vcombine.high %v338_v48, %v342_v49 }
  0x63   : > { %1264 = vmatmul.mubr.bf16.gmra.mrb[24].mxu0 %v1943_v58  ;;  %v1947_v58 = vcombine.low %v337_v46, %v341_v47 }
  0x64   : > { %1361 = vmatmul.mubr.bf16.gmra.mrb[24].mxu1 %v1945_v59  ;;  %1271 = vmatprep.mubr.bf16.mxu0 %v1952_v60  ;;  %v1949_v59 = vcombine.low %v338_v48, %v342_v49  ;;  %v1956_v60 = vcombine.high %v345_v54, %v349_v55 }
  0x65   : > { %1368 = vmatprep.mubr.bf16.mxu1 %v1954_v61  ;;  %v1958_v61 = vcombine.high %v346_v56, %v350_v57 }
  0x6b   : > { %1272 = vmatmul.mubr.bf16.gmra.mrb[28].mxu0 %v1951_v2 }
  0x6c   : > { %1369 = vmatmul.mubr.bf16.gmra.mrb[28].mxu1 %v1953_v3  ;;  %1409 = vmatprep.mubr.bf16.mxu0 %v1900_v4 }
  0x6d   : > { %1506 = vmatprep.mubr.bf16.mxu1 %v1902_v5 }
  0x73   : > { %1410 = vmatmul.mubr.bf16.vlgmr.msra.gmra.mrb[32].mxu0 %v1899_v10 }
  0x74   : > { %1507 = vmatmul.mubr.bf16.vlgmr.msra.gmra.mrb[32].mxu1 %v1901_v11  ;;  %1417 = vmatprep.mubr.bf16.mxu0 %v1908_v12 }
  0x75   : > { %1514 = vmatprep.mubr.bf16.mxu1 %v1910_v13 }
  0x7b   : > { %1418 = vmatmul.mubr.bf16.gmra.mrb[36].mxu0 %v1907_v18 }
  0x7c   : > { %1515 = vmatmul.mubr.bf16.gmra.mrb[36].mxu1 %v1909_v19  ;;  %1425 = vmatprep.mubr.bf16.mxu0 %v1916_v20 }
  0x7d   : > { %1522 = vmatprep.mubr.bf16.mxu1 %v1918_v21 }
  0x83   : > { %1426 = vmatmul.mubr.bf16.gmra.mrb[40].mxu0 %v1915_v26 }
  0x84   : > { %1523 = vmatmul.mubr.bf16.gmra.mrb[40].mxu1 %v1917_v27  ;;  %1433 = vmatprep.mubr.bf16.mxu0 %v1924_v28 }
  0x85   : > { %1530 = vmatprep.mubr.bf16.mxu1 %v1926_v29 }
  0x8b   : > { %1434 = vmatmul.mubr.bf16.gmra.mrb[44].mxu0 %v1923_v34 }
  0x8c   : > { %1531 = vmatmul.mubr.bf16.gmra.mrb[44].mxu1 %v1925_v35  ;;  %1441 = vmatprep.mubr.bf16.mxu0 %v1932_v36 }
  0x8d   : > { %1538 = vmatprep.mubr.bf16.mxu1 %v1934_v37 }
  0x93   : > { %1442 = vmatmul.mubr.bf16.gmra.mrb[48].mxu0 %v1931_v42 }
  0x94   : > { %1539 = vmatmul.mubr.bf16.gmra.mrb[48].mxu1 %v1933_v43  ;;  %1449 = vmatprep.mubr.bf16.mxu0 %v1940_v44 }
  0x95   : > { %1546 = vmatprep.mubr.bf16.mxu1 %v1942_v45 }
  0x9b   : > { %1450 = vmatmul.mubr.bf16.gmra.mrb[52].mxu0 %v1939_v50 }
  0x9c   : > { %1547 = vmatmul.mubr.bf16.gmra.mrb[52].mxu1 %v1941_v51  ;;  %1457 = vmatprep.mubr.bf16.mxu0 %v1948_v52 }
  0x9d   : > { %1554 = vmatprep.mubr.bf16.mxu1 %v1950_v53 }
  0xa3   : > { %1458 = vmatmul.mubr.bf16.gmra.mrb[56].mxu0 %v1947_v58 }
  0xa4   : > { %1555 = vmatmul.mubr.bf16.gmra.mrb[56].mxu1 %v1949_v59  ;;  %1465 = vmatprep.mubr.bf16.mxu0 %v1956_v60 }
  0xa5   : > { %1562 = vmatprep.mubr.bf16.mxu1 %v1958_v61 }
  0xab   : > { %1466 = vmatmul.mubr.bf16.gmra.mrb[60].mxu0 %v1955_v62 }
  0xac   : > { %1563 = vmatmul.mubr.bf16.gmra.mrb[60].mxu1 %v1957_v63 }
 0x106   : > { %v2123_v0 = vpop.f32.mrb[0].mxu0 }
 0x107   : > { %v2187_v1 = vpop.f32.mrb[0].mxu1  ;;  %v2124_v2 = vpop.f32.mrb[1].mxu0 }
 0x108   : > { %v2125_v3 = vadd.f32 %v2124_v2, %v2123_v0  ;;  %v2188_v4 = vpop.f32.mrb[1].mxu1  ;;  %v2126_v5 = vpop.f32.mrb[2].mxu0 }
 0x109   : > { %v2189_v6 = vadd.f32 %v2188_v4, %v2187_v1  ;;  %v2190_v7 = vpop.f32.mrb[2].mxu1  ;;  %v2127_v8 = vpop.f32.mrb[3].mxu0 }
 0x10a   : > { %v2128_v9 = vadd.f32 %v2127_v8, %v2126_v5  ;;  %v2191_v10 = vpop.f32.mrb[3].mxu1 }
 0x10b   : > { %v2658_v11 = vadd.f32 %v2189_v6, %v2125_v3  ;;  %v2192_v12 = vadd.f32 %v2191_v10, %v2190_v7 }
 0x10d   : > { %v2660_v13 = vadd.f32 %v2192_v12, %v2128_v9 }
 0x10e   : > { %v2129_v14 = vpop.f32.mrb[4].mxu0 }
 0x10f   : > { %v2193_v15 = vpop.f32.mrb[4].mxu1  ;;  %v2130_v16 = vpop.f32.mrb[5].mxu0 }
 0x110   : > { %v2131_v17 = vadd.f32 %v2130_v16, %v2129_v14  ;;  %v2194_v18 = vpop.f32.mrb[5].mxu1  ;;  %v2132_v19 = vpop.f32.mrb[6].mxu0 }
 0x111   : > { %v2195_v20 = vadd.f32 %v2194_v18, %v2193_v15  ;;  %v2196_v21 = vpop.f32.mrb[6].mxu1  ;;  %v2133_v22 = vpop.f32.mrb[7].mxu0 }
 0x112   : > { %v2134_v23 = vadd.f32 %v2133_v22, %v2132_v19  ;;  %v2197_v24 = vpop.f32.mrb[7].mxu1 }
 0x113   : > { %v2662_v25 = vadd.f32 %v2195_v20, %v2131_v17  ;;  %v2198_v26 = vadd.f32 %v2197_v24, %v2196_v21 }
 0x115   : > { %v2664_v27 = vadd.f32 %v2198_v26, %v2134_v23 }
 0x116   : > { %v2135_v28 = vpop.f32.mrb[8].mxu0 }
 0x117   : > { %v2199_v29 = vpop.f32.mrb[8].mxu1  ;;  %v2136_v30 = vpop.f32.mrb[9].mxu0 }
 0x118   : > { %v2137_v31 = vadd.f32 %v2136_v30, %v2135_v28  ;;  %v2200_v32 = vpop.f32.mrb[9].mxu1  ;;  %v2138_v33 = vpop.f32.mrb[10].mxu0 }
 0x119   : > { %v2201_v34 = vadd.f32 %v2200_v32, %v2199_v29  ;;  %v2202_v35 = vpop.f32.mrb[10].mxu1  ;;  %v2139_v36 = vpop.f32.mrb[11].mxu0 }
 0x11a   : > { %v2140_v37 = vadd.f32 %v2139_v36, %v2138_v33  ;;  %v2203_v38 = vpop.f32.mrb[11].mxu1 }
 0x11b   : > { %v2666_v39 = vadd.f32 %v2201_v34, %v2137_v31  ;;  %v2204_v40 = vadd.f32 %v2203_v38, %v2202_v35 }
 0x11d   : > { %v2668_v41 = vadd.f32 %v2204_v40, %v2140_v37 }
 0x11e   : > { %v2141_v42 = vpop.f32.mrb[12].mxu0 }
 0x11f   : > { %v2205_v43 = vpop.f32.mrb[12].mxu1  ;;  %v2142_v44 = vpop.f32.mrb[13].mxu0 }
 0x120   : > { %v2143_v45 = vadd.f32 %v2142_v44, %v2141_v42  ;;  %v2206_v46 = vpop.f32.mrb[13].mxu1  ;;  %v2144_v47 = vpop.f32.mrb[14].mxu0 }
 0x121   : > { %v2207_v48 = vadd.f32 %v2206_v46, %v2205_v43  ;;  %v2208_v49 = vpop.f32.mrb[14].mxu1  ;;  %v2145_v50 = vpop.f32.mrb[15].mxu0 }
 0x122   : > { %v2146_v51 = vadd.f32 %v2145_v50, %v2144_v47  ;;  %v2209_v52 = vpop.f32.mrb[15].mxu1 }
 0x123   : > { %v2670_v53 = vadd.f32 %v2207_v48, %v2143_v45  ;;  %v2210_v54 = vadd.f32 %v2209_v52, %v2208_v49 }
 0x125   : > { %v2672_v55 = vadd.f32 %v2210_v54, %v2146_v51 }
 0x126   : > { %v2147_v56 = vpop.f32.mrb[16].mxu0 }
 0x127   : > { %v2211_v57 = vpop.f32.mrb[16].mxu1  ;;  %v2148_v58 = vpop.f32.mrb[17].mxu0 }
 0x128   : > { %v2149_v59 = vadd.f32 %v2148_v58, %v2147_v56  ;;  %v2212_v60 = vpop.f32.mrb[17].mxu1  ;;  %v2150_v61 = vpop.f32.mrb[18].mxu0 }
 0x129   : > { %v2213_v62 = vadd.f32 %v2212_v60, %v2211_v57  ;;  %v2214_v63 = vpop.f32.mrb[18].mxu1  ;;  %v2151_v0 = vpop.f32.mrb[19].mxu0 }
 0x12a   : > { %v2152_v1 = vadd.f32 %v2151_v0, %v2150_v61  ;;  %v2215_v2 = vpop.f32.mrb[19].mxu1 }
 0x12b   : > { %v2674_v3 = vadd.f32 %v2213_v62, %v2149_v59  ;;  %v2216_v4 = vadd.f32 %v2215_v2, %v2214_v63 }
 0x12d   : > { %v2676_v5 = vadd.f32 %v2216_v4, %v2152_v1 }
 0x12e   : > { %v2153_v6 = vpop.f32.mrb[20].mxu0 }
 0x12f   : > { %v2217_v7 = vpop.f32.mrb[20].mxu1  ;;  %v2154_v8 = vpop.f32.mrb[21].mxu0 }
 0x130   : > { %v2155_v9 = vadd.f32 %v2154_v8, %v2153_v6  ;;  %v2218_v10 = vpop.f32.mrb[21].mxu1  ;;  %v2156_v12 = vpop.f32.mrb[22].mxu0 }
 0x131   : > { %v2219_v14 = vadd.f32 %v2218_v10, %v2217_v7  ;;  %v2220_v15 = vpop.f32.mrb[22].mxu1  ;;  %v2157_v16 = vpop.f32.mrb[23].mxu0 }
 0x132   : > { %v2158_v17 = vadd.f32 %v2157_v16, %v2156_v12  ;;  %v2221_v18 = vpop.f32.mrb[23].mxu1 }
 0x133   : > { %v2678_v19 = vadd.f32 %v2219_v14, %v2155_v9  ;;  %v2222_v20 = vadd.f32 %v2221_v18, %v2220_v15 }
 0x135   : > { %v2680_v21 = vadd.f32 %v2222_v20, %v2158_v17 }
 0x136   : > { %v2159_v22 = vpop.f32.mrb[24].mxu0 }
 0x137   : > { %v2223_v23 = vpop.f32.mrb[24].mxu1  ;;  %v2160_v24 = vpop.f32.mrb[25].mxu0 }
 0x138   : > { %v2161_v26 = vadd.f32 %v2160_v24, %v2159_v22  ;;  %v2224_v28 = vpop.f32.mrb[25].mxu1  ;;  %v2162_v29 = vpop.f32.mrb[26].mxu0 }
 0x139   : > { %v2225_v30 = vadd.f32 %v2224_v28, %v2223_v23  ;;  %v2226_v31 = vpop.f32.mrb[26].mxu1  ;;  %v2163_v32 = vpop.f32.mrb[27].mxu0 }
 0x13a   : > { %v2164_v33 = vadd.f32 %v2163_v32, %v2162_v29  ;;  %v2227_v34 = vpop.f32.mrb[27].mxu1 }
 0x13b   : > { %v2682_v35 = vadd.f32 %v2225_v30, %v2161_v26  ;;  %v2228_v36 = vadd.f32 %v2227_v34, %v2226_v31 }
 0x13d   : > { %v2684_v37 = vadd.f32 %v2228_v36, %v2164_v33 }
 0x13e   : > { %v2165_v38 = vpop.f32.mrb[28].mxu0 }
 0x13f   : > { %v2229_v40 = vpop.f32.mrb[28].mxu1  ;;  %v2166_v42 = vpop.f32.mrb[29].mxu0 }
 0x140   : > { %v2167_v43 = vadd.f32 %v2166_v42, %v2165_v38  ;;  %v2230_v44 = vpop.f32.mrb[29].mxu1  ;;  %v2168_v45 = vpop.f32.mrb[30].mxu0 }
 0x141   : > { %v2231_v46 = vadd.f32 %v2230_v44, %v2229_v40  ;;  %v2232_v47 = vpop.f32.mrb[30].mxu1  ;;  %v2169_v48 = vpop.f32.mrb[31].mxu0 }
 0x142   : > { %v2170_v49 = vadd.f32 %v2169_v48, %v2168_v45  ;;  %v2233_v50 = vpop.f32.mrb[31].mxu1 }
 0x143   : > { %v2686_v51 = vadd.f32 %v2231_v46, %v2167_v43  ;;  %v2234_v52 = vadd.f32 %v2233_v50, %v2232_v47 }
 0x145   : > { %v2688_v54 = vadd.f32 %v2234_v52, %v2170_v49 }
 0x146   : > { %v2251_v56 = vpop.f32.mrb[32].mxu0 }
 0x147   : > { %v2315_v57 = vpop.f32.mrb[32].mxu1  ;;  %v2252_v58 = vpop.f32.mrb[33].mxu0 }
 0x148   : > { %v2253_v59 = vadd.f32 %v2252_v58, %v2251_v56  ;;  %v2316_v60 = vpop.f32.mrb[33].mxu1  ;;  %v2254_v61 = vpop.f32.mrb[34].mxu0 }
 0x149   : > { %v2317_v62 = vadd.f32 %v2316_v60, %v2315_v57  ;;  %v2318_v63 = vpop.f32.mrb[34].mxu1  ;;  %v2255_v0 = vpop.f32.mrb[35].mxu0 }
 0x14a   : > { %v1412_v1 = vadd.f32 %v2253_v59, %v2658_v11  ;;  %v2256_v2 = vadd.f32 %v2255_v0, %v2254_v61  ;;  %v2319_v4 = vpop.f32.mrb[35].mxu1 }
 0x14b   : > { %v2320_v6 = vadd.f32 %v2319_v4, %v2318_v63 }
 0x14c   : > { %v1509_v7 = vadd.f32 %v2317_v62, %v1412_v1  ;;  %v1415_v8 = vadd.f32 %v2256_v2, %v2660_v13 }
 0x14e   : > { %v1512_v9 = vadd.f32 %v2320_v6, %v1415_v8  ;;  %v2257_v10 = vpop.f32.mrb[36].mxu0  ;;  %v1673_v12 = vmul.f32 %v1509_v7, %v1509_v7 }
 0x14f   : > { %v2321_v14 = vpop.f32.mrb[36].mxu1  ;;  %v2258_v15 = vpop.f32.mrb[37].mxu0 }
 0x150   : > { %v2063_v16 = vpack.c.bf16 %v1512_v9, %v1509_v7  ;;  %v1651_v11 = vadd.f32 %v1512_v9, %v1509_v7  ;;  %v1674_v17 = vmul.f32 %v1512_v9, %v1512_v9  ;;  %v2259_v18 = vadd.f32 %v2258_v15, %v2257_v10  ;;  %v2322_v20 = vpop.f32.mrb[37].mxu1  ;;  %v2260_v22 = vpop.f32.mrb[38].mxu0 }
 0x151   : > { %v2323_v23 = vadd.f32 %v2322_v20, %v2321_v14  ;;  %v2324_v13 = vpop.f32.mrb[38].mxu1  ;;  %v2261_v24 = vpop.f32.mrb[39].mxu0 }
 0x152   : > { %2064 = vst [vmem:[%s2696_s26] sm:$0xff] %v2063_v16   ;;  %v1689_v26 = vadd.f32 %v1674_v17, %v1673_v12  ;;  %v1420_v28 = vadd.f32 %v2259_v18, %v2662_v25  ;;  %v2262_v29 = vadd.f32 %v2261_v24, %v2260_v22  ;;  %v2325_v30 = vpop.f32.mrb[39].mxu1 }
 0x153   : > { %v2326_v31 = vadd.f32 %v2325_v30, %v2324_v13 }
 0x154   : > { %v1517_v32 = vadd.f32 %v2323_v23, %v1420_v28  ;;  %v1423_v33 = vadd.f32 %v2262_v29, %v2664_v27 }
 0x156   : > { %v1652_v34 = vadd.f32 %v1651_v11, %v1517_v32  ;;  %v1675_v36 = vmul.f32 %v1517_v32, %v1517_v32  ;;  %v1520_v38 = vadd.f32 %v2326_v31, %v1423_v33  ;;  %v2263_v40 = vpop.f32.mrb[40].mxu0 }
 0x157   : > { %v2327_v42 = vpop.f32.mrb[40].mxu1  ;;  %v2264_v43 = vpop.f32.mrb[41].mxu0 }
 0x158   : > { %v1690_v44 = vadd.f32 %v1689_v26, %v1675_v36  ;;  %v2068_v45 = vpack.c.bf16 %v1520_v38, %v1517_v32  ;;  %v1653_v46 = vadd.f32 %v1652_v34, %v1520_v38  ;;  %v1676_v47 = vmul.f32 %v1520_v38, %v1520_v38  ;;  %v2328_v48 = vpop.f32.mrb[41].mxu1  ;;  %v2266_v49 = vpop.f32.mrb[42].mxu0 }
 0x159   : > { %v2265_v25 = vadd.f32 %v2264_v43, %v2263_v40  ;;  %v2329_v50 = vadd.f32 %v2328_v48, %v2327_v42  ;;  %v2330_v52 = vpop.f32.mrb[42].mxu1  ;;  %v2267_v56 = vpop.f32.mrb[43].mxu0 }
 0x15a   : > { %2100 = vst [vmem:[%s2696_s26 + $0x8] sm:$0xff] %v2068_v45   ;;  %v1691_v57 = vadd.f32 %v1690_v44, %v1676_v47  ;;  %v2268_v27 = vadd.f32 %v2267_v56, %v2266_v49  ;;  %v2331_v58 = vpop.f32.mrb[43].mxu1 }
 0x15b   : > { %v1428_v59 = vadd.f32 %v2265_v25, %v2666_v39  ;;  %v2332_v60 = vadd.f32 %v2331_v58, %v2330_v52 }
 0x15c   : > { %v1431_v61 = vadd.f32 %v2268_v27, %v2668_v41 }
 0x15d   : > { %v1525_v62 = vadd.f32 %v2329_v50, %v1428_v59 }
 0x15e   : > { %v1528_v63 = vadd.f32 %v2332_v60, %v1431_v61  ;;  %v2269_v0 = vpop.f32.mrb[44].mxu0 }
 0x15f   : > { %v1654_v1 = vadd.f32 %v1653_v46, %v1525_v62  ;;  %v1677_v2 = vmul.f32 %v1525_v62, %v1525_v62  ;;  %v2333_v4 = vpop.f32.mrb[44].mxu1  ;;  %v2270_v6 = vpop.f32.mrb[45].mxu0 }
 0x160   : > { %v2073_v7 = vpack.c.bf16 %v1528_v63, %v1525_v62  ;;  %v1678_v8 = vmul.f32 %v1528_v63, %v1528_v63  ;;  %v2271_v9 = vadd.f32 %v2270_v6, %v2269_v0  ;;  %v2334_v10 = vpop.f32.mrb[45].mxu1  ;;  %v2272_v12 = vpop.f32.mrb[46].mxu0 }
 0x161   : > { %v1692_v14 = vadd.f32 %v1691_v57, %v1677_v2  ;;  %v1655_v15 = vadd.f32 %v1654_v1, %v1528_v63  ;;  %v2335_v16 = vadd.f32 %v2334_v10, %v2333_v4  ;;  %v2336_v39 = vpop.f32.mrb[46].mxu1  ;;  %v2273_v11 = vpop.f32.mrb[47].mxu0 }
 0x162   : > { %2101 = vst [vmem:[%s2696_s26 + $0x10] sm:$0xff] %v2073_v7   ;;  %v1436_v41 = vadd.f32 %v2271_v9, %v2670_v53  ;;  %v2274_v17 = vadd.f32 %v2273_v11, %v2272_v12  ;;  %v2337_v18 = vpop.f32.mrb[47].mxu1 }
 0x163   : > { %v1693_v20 = vadd.f32 %v1692_v14, %v1678_v8  ;;  %v2338_v22 = vadd.f32 %v2337_v18, %v2336_v39 }
 0x164   : > { %v1533_v23 = vadd.f32 %v2335_v16, %v1436_v41  ;;  %v1439_v13 = vadd.f32 %v2274_v17, %v2672_v55 }
 0x166   : > { %v1656_v24 = vadd.f32 %v1655_v15, %v1533_v23  ;;  %v1679_v26 = vmul.f32 %v1533_v23, %v1533_v23  ;;  %v1536_v28 = vadd.f32 %v2338_v22, %v1439_v13  ;;  %v2275_v29 = vpop.f32.mrb[48].mxu0 }
 0x167   : > { %v2339_v30 = vpop.f32.mrb[48].mxu1  ;;  %v2276_v31 = vpop.f32.mrb[49].mxu0 }
 0x168   : > { %v1694_v32 = vadd.f32 %v1693_v20, %v1679_v26  ;;  %v2078_v33 = vpack.c.bf16 %v1536_v28, %v1533_v23  ;;  %v1657_v34 = vadd.f32 %v1656_v24, %v1536_v28  ;;  %v1680_v36 = vmul.f32 %v1536_v28, %v1536_v28  ;;  %v2340_v38 = vpop.f32.mrb[49].mxu1  ;;  %v2278_v53 = vpop.f32.mrb[50].mxu0 }
 0x169   : > { %v2277_v40 = vadd.f32 %v2276_v31, %v2275_v29  ;;  %v2341_v42 = vadd.f32 %v2340_v38, %v2339_v30  ;;  %v2342_v43 = vpop.f32.mrb[50].mxu1  ;;  %v2279_v44 = vpop.f32.mrb[51].mxu0 }
 0x16a   : > { %2102 = vst [vmem:[%s2696_s26 + $0x18] sm:$0xff] %v2078_v33   ;;  %v1695_v45 = vadd.f32 %v1694_v32, %v1680_v36  ;;  %v2280_v55 = vadd.f32 %v2279_v44, %v2278_v53  ;;  %v2343_v46 = vpop.f32.mrb[51].mxu1 }
 0x16b   : > { %v1444_v47 = vadd.f32 %v2277_v40, %v2674_v3  ;;  %v2344_v48 = vadd.f32 %v2343_v46, %v2342_v43 }
 0x16c   : > { %v1447_v49 = vadd.f32 %v2280_v55, %v2676_v5 }
 0x16d   : > { %v1541_v25 = vadd.f32 %v2341_v42, %v1444_v47 }
 0x16e   : > { %v1544_v50 = vadd.f32 %v2344_v48, %v1447_v49  ;;  %v2281_v52 = vpop.f32.mrb[52].mxu0 }
 0x16f   : > { %v1658_v56 = vadd.f32 %v1657_v34, %v1541_v25  ;;  %v1681_v57 = vmul.f32 %v1541_v25, %v1541_v25  ;;  %v2345_v27 = vpop.f32.mrb[52].mxu1  ;;  %v2282_v58 = vpop.f32.mrb[53].mxu0 }
 0x170   : > { %v2083_v59 = vpack.c.bf16 %v1544_v50, %v1541_v25  ;;  %v1682_v60 = vmul.f32 %v1544_v50, %v1544_v50  ;;  %v2283_v61 = vadd.f32 %v2282_v58, %v2281_v52  ;;  %v2346_v62 = vpop.f32.mrb[53].mxu1  ;;  %v2284_v63 = vpop.f32.mrb[54].mxu0 }
 0x171   : > { %v1696_v0 = vadd.f32 %v1695_v45, %v1681_v57  ;;  %v1659_v1 = vadd.f32 %v1658_v56, %v1544_v50  ;;  %v2347_v2 = vadd.f32 %v2346_v62, %v2345_v27  ;;  %v2348_v3 = vpop.f32.mrb[54].mxu1  ;;  %v2285_v4 = vpop.f32.mrb[55].mxu0 }
 0x172   : > { %2103 = vst [vmem:[%s2696_s26 + $0x20] sm:$0xff] %v2083_v59   ;;  %v1452_v5 = vadd.f32 %v2283_v61, %v2678_v19  ;;  %v2286_v6 = vadd.f32 %v2285_v4, %v2284_v63  ;;  %v2349_v7 = vpop.f32.mrb[55].mxu1 }
 0x173   : > { %v1697_v8 = vadd.f32 %v1696_v0, %v1682_v60  ;;  %v2350_v9 = vadd.f32 %v2349_v7, %v2348_v3 }
 0x174   : > { %v1549_v10 = vadd.f32 %v2347_v2, %v1452_v5  ;;  %v1455_v12 = vadd.f32 %v2286_v6, %v2680_v21 }
 0x176   : > { %v1660_v14 = vadd.f32 %v1659_v1, %v1549_v10  ;;  %v1683_v15 = vmul.f32 %v1549_v10, %v1549_v10  ;;  %v1552_v16 = vadd.f32 %v2350_v9, %v1455_v12  ;;  %v2287_v39 = vpop.f32.mrb[56].mxu0 }
 0x177   : > { %v2351_v11 = vpop.f32.mrb[56].mxu1  ;;  %v2288_v41 = vpop.f32.mrb[57].mxu0 }
 0x178   : > { %v1698_v17 = vadd.f32 %v1697_v8, %v1683_v15  ;;  %v2088_v18 = vpack.c.bf16 %v1552_v16, %v1549_v10  ;;  %v1661_v20 = vadd.f32 %v1660_v14, %v1552_v16  ;;  %v1684_v22 = vmul.f32 %v1552_v16, %v1552_v16  ;;  %v2352_v23 = vpop.f32.mrb[57].mxu1  ;;  %v2290_v19 = vpop.f32.mrb[58].mxu0 }
 0x179   : > { %v2289_v13 = vadd.f32 %v2288_v41, %v2287_v39  ;;  %v2353_v24 = vadd.f32 %v2352_v23, %v2351_v11  ;;  %v2354_v26 = vpop.f32.mrb[58].mxu1  ;;  %v2291_v28 = vpop.f32.mrb[59].mxu0 }
 0x17a   : > { %2104 = vst [vmem:[%s2696_s26 + $0x28] sm:$0xff] %v2088_v18   ;;  %v1699_v29 = vadd.f32 %v1698_v17, %v1684_v22  ;;  %v2292_v21 = vadd.f32 %v2291_v28, %v2290_v19  ;;  %v2355_v30 = vpop.f32.mrb[59].mxu1 }
 0x17b   : > { %v1460_v31 = vadd.f32 %v2289_v13, %v2682_v35  ;;  %v2356_v32 = vadd.f32 %v2355_v30, %v2354_v26 }
 0x17c   : > { %v1463_v33 = vadd.f32 %v2292_v21, %v2684_v37 }
 0x17d   : > { %v1557_v34 = vadd.f32 %v2353_v24, %v1460_v31 }
 0x17e   : > { %v1560_v36 = vadd.f32 %v2356_v32, %v1463_v33  ;;  %v2293_v38 = vpop.f32.mrb[60].mxu0 }
 0x17f   : > { %v1662_v53 = vadd.f32 %v1661_v20, %v1557_v34  ;;  %v1685_v40 = vmul.f32 %v1557_v34, %v1557_v34  ;;  %v2357_v42 = vpop.f32.mrb[60].mxu1  ;;  %v2294_v43 = vpop.f32.mrb[61].mxu0 }
 0x180   : > { %v2093_v44 = vpack.c.bf16 %v1560_v36, %v1557_v34  ;;  %v1686_v45 = vmul.f32 %v1560_v36, %v1560_v36  ;;  %v2295_v55 = vadd.f32 %v2294_v43, %v2293_v38  ;;  %v2358_v46 = vpop.f32.mrb[61].mxu1  ;;  %v2296_v47 = vpop.f32.mrb[62].mxu0 }
 0x181   : > { %v1700_v48 = vadd.f32 %v1699_v29, %v1685_v40  ;;  %v1663_v49 = vadd.f32 %v1662_v53, %v1560_v36  ;;  %v2359_v25 = vadd.f32 %v2358_v46, %v2357_v42  ;;  %v2360_v35 = vpop.f32.mrb[62].mxu1  ;;  %v2297_v50 = vpop.f32.mrb[63].mxu0 }
 0x182   : > { %2105 = vst [vmem:[%s2696_s26 + $0x30] sm:$0xff] %v2093_v44   ;;  %v1468_v37 = vadd.f32 %v2295_v55, %v2686_v51  ;;  %v2298_v52 = vadd.f32 %v2297_v50, %v2296_v47  ;;  %v2361_v56 = vpop.f32.mrb[63].mxu1 }
 0x183   : > { %v1701_v57 = vadd.f32 %v1700_v48, %v1686_v45  ;;  %v2362_v27 = vadd.f32 %v2361_v56, %v2360_v35 }
 0x184   : > { %v1565_v58 = vadd.f32 %v2359_v25, %v1468_v37  ;;  %v1471_v59 = vadd.f32 %v2298_v52, %v2688_v54 }
 0x186   : > { %v1664_v60 = vadd.f32 %v1663_v49, %v1565_v58  ;;  %v1687_v61 = vmul.f32 %v1565_v58, %v1565_v58  ;;  %v1568_v62 = vadd.f32 %v2362_v27, %v1471_v59 }
 0x188   : > { %v1702_v63 = vadd.f32 %v1701_v57, %v1687_v61  ;;  %v2098_v0 = vpack.c.bf16 %v1568_v62, %v1565_v58  ;;  %v1665_v1 = vadd.f32 %v1664_v60, %v1568_v62  ;;  %v1688_v2 = vmul.f32 %v1568_v62, %v1568_v62 }
 0x18a   : > { %2106 = vst [vmem:[%s2696_s26 + $0x38] sm:$0xff] %v2098_v0   ;;  %v1666_v3 = vrot.slane %v1665_v1, 4  ;;  %v1703_v4 = vadd.f32 %v1702_v63, %v1688_v2 }
 0x18c   : > { %v1667_v5 = vadd.f32 %v1666_v3, %v1665_v1  ;;  %v1704_v51 = vrot.slane %v1703_v4, 4 }
 0x18e   : > { %v1668_v6 = vrot.slane %v1667_v5, 2  ;;  %v1705_v7 = vadd.f32 %v1704_v51, %v1703_v4 }
 0x190   : > { %v1669_v8 = vadd.f32 %v1668_v6, %v1667_v5  ;;  %v1706_v9 = vrot.slane %v1705_v7, 2 }
 0x192   : > { %v1670_v10 = vrot.slane %v1669_v8, 1  ;;  %v1707_v12 = vadd.f32 %v1706_v9, %v1705_v7 }
 0x194   : > { %v1671_v54 = vadd.f32 %v1670_v10, %v1669_v8  ;;  %v1708_v14 = vrot.slane %v1707_v12, 1 }
 0x196   : > { %1672 = vst [vmem:[%s285_s30] sm:$0x1] %v1671_v54  ;;  %v1709_v15 = vadd.f32 %v1708_v14, %v1707_v12 }
 0x198   : > { %1710 = vst [vmem:[%s285_s30 + $0x1] sm:$0x1] %v1709_v15 }
 0x199 PF: > { %s14_s14 = sadd.s32 1, %s2473_s14   ;;  %s2737_s12 = smov %s2469_s13 }
 0x19a   : > { %p11_p5 = scmp.ge.s32.totalorder %s14_s14, 6   ;;  %s2738_s13 = smov %s2740_s15 }
 0x19c   :  { %13 = sbr.rel (!%p11_p5) target bundleno = 2 (0x2), region = 73 }

// kernel: generator_forward.14
= control target key start
LH: loop header
LB: loop body
LE: loop exit
PB: predicated region body
PF: predicated region fallthrough
CT: control target
= control target key end

     0   :  { %v160_v4 = vlaneseq  ;;  %s1796_s1 = inlined_call_operand.vmem [shape: f32[2,128], index: 1, kind: input, shape index: {}]   ;;  %s1797_s0 = inlined_call_operand.vmem [shape: bf16[512,128], index: 0, kind: input, shape index: {}]   ;;  %s1798_s2 = inlined_call_operand.vmem [shape: f32[1,128], index: 2, kind: input, shape index: {}]   ;;  %s1799_s3 = inlined_call_operand.vmem [shape: f32[1,128], index: 3, kind: input, shape index: {}]   ;;  %s1800_s4 = inlined_call_operand.vmem [shape: bf16[512,128], index: 4, kind: output, shape index: {}]  }
   0x1   :  { %v17_v0 = vld [vmem:[%s1796_s1] sm:$0x1]  ;;  %v19_v1 = vld [vmem:[%s1796_s1 + $0x1] sm:$0x1]  ;;  %v1212_v9 = vld [vmem:[%s1797_s0 + $0x8] sm:$0xff]  }
   0x2   :  { %v1198_v2 = vmul.f32 0.001953125, %v17_v0  ;;  %v20_v3 = vmul.f32 0.001953125, %v19_v1  ;;  %v1205_v7 = vld [vmem:[%s1797_s0] sm:$0xff]   ;;  %v1207_v8 = vshrl.u32 %v160_v4, 7  ;;  %v1217_v11 = vld [vmem:[%s1797_s0 + $0x10] sm:$0xff]   ;;  %v1222_v12 = vld [vmem:[%s1797_s0 + $0x18] sm:$0xff]   ;;  %v821_v19 = vunpack.c.l.bf16 %v1212_v9 }
   0x3   :  { %v817_v13 = vunpack.c.l.bf16 %v1205_v7  ;;  %v818_v14 = vunpack.c.h.bf16 %v1205_v7  ;;  %v1229_v15 = vld [vmem:[%s1797_s0 + $0x20] sm:$0xff]   ;;  %v1234_v16 = vld [vmem:[%s1797_s0 + $0x28] sm:$0xff]   ;;  %v822_v20 = vunpack.c.h.bf16 %v1212_v9  ;;  %v1242_v21 = vld [vmem:[%s1797_s0 + $0x30] sm:$0xff]   ;;  %v825_v23 = vunpack.c.l.bf16 %v1217_v11 }
   0x4   :  { %v21_v5 = vmul.f32 %v1198_v2, %v1198_v2  ;;  %v162_v18 = vsub.s32 0, %v1207_v8  ;;  %v1247_v22 = vld [vmem:[%s1797_s0 + $0x38] sm:$0xff]   ;;  %v826_v24 = vunpack.c.h.bf16 %v1217_v11  ;;  %v829_v25 = vunpack.c.l.bf16 %v1222_v12  ;;  %v1256_v27 = vld [vmem:[%s1797_s0 + $0x40] sm:$0xff]   ;;  %v1261_v28 = vld [vmem:[%s1797_s0 + $0x48] sm:$0xff]  }
   0x5   :  { %v830_v26 = vunpack.c.h.bf16 %v1222_v12  ;;  %v833_v29 = vunpack.c.l.bf16 %v1229_v15  ;;  %v834_v30 = vunpack.c.h.bf16 %v1229_v15  ;;  %v837_v31 = vunpack.c.l.bf16 %v1234_v16  ;;  %v1269_v32 = vld [vmem:[%s1797_s0 + $0x50] sm:$0xff]   ;;  %v1274_v33 = vld [vmem:[%s1797_s0 + $0x58] sm:$0xff]   ;;  %v1283_v38 = vld [vmem:[%s1797_s0 + $0x60] sm:$0xff]  }
   0x6   :  { %v22_v6 = vsub.f32 %v20_v3, %v21_v5  ;;  %v838_v34 = vunpack.c.h.bf16 %v1234_v16  ;;  %v841_v35 = vunpack.c.l.bf16 %v1242_v21  ;;  %v842_v36 = vunpack.c.h.bf16 %v1242_v21  ;;  %v1288_v39 = vld [vmem:[%s1797_s0 + $0x68] sm:$0xff]   ;;  %v1297_v44 = vld [vmem:[%s1797_s0 + $0x70] sm:$0xff]   ;;  %v1302_v45 = vld [vmem:[%s1797_s0 + $0x78] sm:$0xff]  }
   0x7   :  { %v845_v37 = vunpack.c.l.bf16 %v1247_v22  ;;  %v846_v40 = vunpack.c.h.bf16 %v1247_v22  ;;  %v849_v41 = vunpack.c.l.bf16 %v1256_v27  ;;  %v1311_v50 = vld [vmem:[%s1797_s0 + $0x80] sm:$0xff]   ;;  %v1316_v51 = vld [vmem:[%s1797_s0 + $0x88] sm:$0xff]   ;;  %v1325_v56 = vld [vmem:[%s1797_s0 + $0x90] sm:$0xff]  }
   0x8   :  { %v23_v10 = vmax.f32 %v22_v6, 0.0  ;;  %v1330_v57 = vld [vmem:[%s1797_s0 + $0x98] sm:$0xff]   ;;  %v1339_v62 = vld [vmem:[%s1797_s0 + $0xa0] sm:$0xff]   ;;  %v1344_v63 = vld [vmem:[%s1797_s0 + $0xa8] sm:$0xff]  }
   0x9   :  { %v1353_v5 = vld [vmem:[%s1797_s0 + $0xb0] sm:$0xff]   ;;  %v1358_v6 = vld [vmem:[%s1797_s0 + $0xb8] sm:$0xff]   ;;  %v1367_v4 = vld [vmem:[%s1797_s0 + $0xc0] sm:$0xff]  }
   0xa   :  { %v25_v17 = vadd.f32 1e-05, %v23_v10  ;;  %v1372_v0 = vld [vmem:[%s1797_s0 + $0xc8] sm:$0xff]   ;;  %v24_v10 = vld [vmem:[%s1798_s2] sm:$0x1]  ;;  %v1384_v60 = vld [vmem:[%s1797_s0 + $0xd0] sm:$0xff]  }
   0xb   :  { %v1393_v1 = vld [vmem:[%s1797_s0 + $0xd8] sm:$0xff]   ;;  %v1398_v61 = vld [vmem:[%s1797_s0 + $0xe0] sm:$0xff]   ;;  %v1407_v54 = vld [vmem:[%s1797_s0 + $0xe8] sm:$0xff]  }
   0xc   :  { %1165 = vrsqrt.f32 %v25_v17  ;;  %v1415_v59 = vld [vmem:[%s1797_s0 + $0xf0] sm:$0xff]   ;;  %v1420_v55 = vld [vmem:[%s1797_s0 + $0xf8] sm:$0xff]   ;;  %v930_v52 = vunpack.c.h.bf16 %v1398_v61  ;;  %v933_v47 = vunpack.c.l.bf16 %v1407_v54 }
   0xd   :  { %v937_v43 = vunpack.c.l.bf16 %v1415_v59  ;;  %v941_v49 = vunpack.c.l.bf16 %v1420_v55 }
  0x16   :  { %v1166_v3 = vpop.eup %1165 }
  0x17   :  { %v27_v53 = vmul.f32 %v1166_v3, %v24_v10  ;;  %v28_v3 = vld [vmem:[%s1799_s3] sm:$0x1] }
  0x19   :  { %v29_v58 = vmul.f32 %v27_v53, %v1198_v2  ;;  %v1432_v17 = vrot.slane %v27_v53, %v162_v18 }
  0x1b   :  { %v30_v42 = vsub.f32 %v28_v3, %v29_v58  ;;  %v165_v2 = vmul.f32 %v817_v13, %v1432_v17  ;;  %v166_v53 = vmul.f32 %v818_v14, %v1432_v17  ;;  %v167_v46 = vmul.f32 %v821_v19, %v1432_v17 }
  0x1c   :  { %v168_v10 = vmul.f32 %v822_v20, %v1432_v17  ;;  %v169_v58 = vmul.f32 %v825_v23, %v1432_v17  ;;  %v170_v13 = vmul.f32 %v826_v24, %v1432_v17  ;;  %v171_v7 = vmul.f32 %v829_v25, %v1432_v17 }
  0x1d   :  { %v1463_v14 = vrot.slane %v30_v42, %v162_v18  ;;  %v172_v9 = vmul.f32 %v830_v26, %v1432_v17  ;;  %v173_v19 = vmul.f32 %v833_v29, %v1432_v17  ;;  %v174_v11 = vmul.f32 %v834_v30, %v1432_v17 }
  0x1e   :  { %v175_v20 = vmul.f32 %v837_v31, %v1432_v17  ;;  %v176_v8 = vmul.f32 %v838_v34, %v1432_v17  ;;  %v177_v12 = vmul.f32 %v841_v35, %v1432_v17  ;;  %v178_v18 = vmul.f32 %v842_v36, %v1432_v17 }
  0x1f   :  { %v235_v23 = vadd.f32 %v1463_v14, %v165_v2  ;;  %v236_v15 = vadd.f32 %v1463_v14, %v166_v53  ;;  %v237_v24 = vadd.f32 %v1463_v14, %v167_v46  ;;  %v238_v25 = vadd.f32 %v1463_v14, %v168_v10 }
  0x20   :  { %v239_v26 = vadd.f32 %v1463_v14, %v169_v58  ;;  %v240_v16 = vadd.f32 %v1463_v14, %v170_v13  ;;  %v241_v29 = vadd.f32 %v1463_v14, %v171_v7  ;;  %v242_v30 = vadd.f32 %v1463_v14, %v172_v9 }
  0x21   :  { %v299_v31 = vmax.f32 %v235_v23, 0.0  ;;  %v300_v34 = vmax.f32 %v236_v15, 0.0  ;;  %v301_v21 = vmax.f32 %v237_v24, 0.0  ;;  %v302_v35 = vmax.f32 %v238_v25, 0.0 }
  0x22   :  { %v303_v36 = vmax.f32 %v239_v26, 0.0  ;;  %v304_v42 = vmax.f32 %v240_v16, 0.0  ;;  %v305_v3 = vmax.f32 %v241_v29, 0.0  ;;  %v306_v2 = vmax.f32 %v242_v30, 0.0 }
  0x23   :  { %v946_v53 = vpack.c.bf16 %v300_v34, %v299_v31  ;;  %v951_v46 = vpack.c.bf16 %v302_v35, %v301_v21  ;;  %v243_v10 = vadd.f32 %v1463_v14, %v173_v19  ;;  %v244_v58 = vadd.f32 %v1463_v14, %v174_v11 }
  0x24   :  { %v956_v48 = vpack.c.bf16 %v304_v42, %v303_v36  ;;  %v961_v13 = vpack.c.bf16 %v306_v2, %v305_v3  ;;  %v245_v7 = vadd.f32 %v1463_v14, %v175_v20  ;;  %v246_v9 = vadd.f32 %v1463_v14, %v176_v8 }
  0x25   :  { %947 = vst [vmem:[%s1800_s4] sm:$0xff] %v946_v53   ;;  %1134 = vst [vmem:[%s1800_s4 + $0x8] sm:$0xff] %v951_v46   ;;  %v307_v23 = vmax.f32 %v243_v10, 0.0  ;;  %v308_v15 = vmax.f32 %v244_v58, 0.0  ;;  %v247_v19 = vadd.f32 %v1463_v14, %v177_v12  ;;  %v248_v11 = vadd.f32 %v1463_v14, %v178_v18 }
  0x26   :  { %1135 = vst [vmem:[%s1800_s4 + $0x10] sm:$0xff] %v956_v48   ;;  %1136 = vst [vmem:[%s1800_s4 + $0x18] sm:$0xff] %v961_v13   ;;  %v309_v20 = vmax.f32 %v245_v7, 0.0  ;;  %v310_v8 = vmax.f32 %v246_v9, 0.0  ;;  %v179_v24 = vmul.f32 %v845_v37, %v1432_v17  ;;  %v180_v12 = vmul.f32 %v846_v40, %v1432_v17 }
  0x27   :  { %v966_v25 = vpack.c.bf16 %v308_v15, %v307_v23  ;;  %v311_v18 = vmax.f32 %v247_v19, 0.0  ;;  %v312_v26 = vmax.f32 %v248_v11, 0.0  ;;  %v181_v48 = vmul.f32 %v849_v41, %v1432_v17 }
  0x28   :  { %v971_v16 = vpack.c.bf16 %v310_v8, %v309_v20  ;;  %v249_v29 = vadd.f32 %v1463_v14, %v179_v24  ;;  %v250_v30 = vadd.f32 %v1463_v14, %v180_v12  ;;  %v1801_v31 = vunpack.c.h.bf16 %v1256_v27 }
  0x29   :  { %1137 = vst [vmem:[%s1800_s4 + $0x20] sm:$0xff] %v966_v25   ;;  %v976_v22 = vpack.c.bf16 %v312_v26, %v311_v18  ;;  %v251_v40 = vadd.f32 %v1463_v14, %v181_v48  ;;  %v1802_v34 = vunpack.c.l.bf16 %v1261_v28  ;;  %v1803_v21 = vunpack.c.h.bf16 %v1261_v28 }
  0x2a   :  { %v182_v37 = vmul.f32 %v1801_v31, %v1432_v17  ;;  %1138 = vst [vmem:[%s1800_s4 + $0x28] sm:$0xff] %v971_v16   ;;  %v313_v27 = vmax.f32 %v249_v29, 0.0  ;;  %v314_v36 = vmax.f32 %v250_v30, 0.0  ;;  %v1804_v3 = vunpack.c.l.bf16 %v1269_v32 }
  0x2b   :  { %v183_v41 = vmul.f32 %v1802_v34, %v1432_v17  ;;  %v184_v35 = vmul.f32 %v1803_v21, %v1432_v17  ;;  %1139 = vst [vmem:[%s1800_s4 + $0x30] sm:$0xff] %v976_v22   ;;  %v315_v53 = vmax.f32 %v251_v40, 0.0  ;;  %v1805_v10 = vunpack.c.h.bf16 %v1269_v32 }
  0x2c   :  { %v252_v42 = vadd.f32 %v1463_v14, %v182_v37  ;;  %v185_v2 = vmul.f32 %v1804_v3, %v1432_v17  ;;  %v981_v13 = vpack.c.bf16 %v314_v36, %v313_v27  ;;  %v1806_v23 = vunpack.c.l.bf16 %v1274_v33 }
  0x2d   :  { %v253_v28 = vadd.f32 %v1463_v14, %v183_v41  ;;  %v254_v46 = vadd.f32 %v1463_v14, %v184_v35  ;;  %v186_v58 = vmul.f32 %v1805_v10, %v1432_v17  ;;  %v1807_v8 = vunpack.c.h.bf16 %v1274_v33 }
  0x2e   :  { %v316_v7 = vmax.f32 %v252_v42, 0.0  ;;  %v255_v9 = vadd.f32 %v1463_v14, %v185_v2  ;;  %v187_v15 = vmul.f32 %v1806_v23, %v1432_v17  ;;  %1140 = vst [vmem:[%s1800_s4 + $0x38] sm:$0xff] %v981_v13   ;;  %v1808_v18 = vunpack.c.l.bf16 %v1283_v38 }
  0x2f   :  { %v317_v19 = vmax.f32 %v253_v28, 0.0  ;;  %v318_v11 = vmax.f32 %v254_v46, 0.0  ;;  %v256_v20 = vadd.f32 %v1463_v14, %v186_v58  ;;  %v188_v24 = vmul.f32 %v1807_v8, %v1432_v17 }
  0x30   :  { %v986_v32 = vpack.c.bf16 %v316_v7, %v315_v53  ;;  %v319_v12 = vmax.f32 %v255_v9, 0.0  ;;  %v257_v25 = vadd.f32 %v1463_v14, %v187_v15  ;;  %v189_v26 = vmul.f32 %v1808_v18, %v1432_v17 }
  0x31   :  { %v991_v48 = vpack.c.bf16 %v318_v11, %v317_v19  ;;  %v320_v16 = vmax.f32 %v256_v20, 0.0  ;;  %v258_v29 = vadd.f32 %v1463_v14, %v188_v24  ;;  %v1809_v33 = vunpack.c.h.bf16 %v1283_v38 }
  0x32   :  { %1141 = vst [vmem:[%s1800_s4 + $0x40] sm:$0xff] %v986_v32   ;;  %v321_v31 = vmax.f32 %v257_v25, 0.0  ;;  %v259_v37 = vadd.f32 %v1463_v14, %v189_v26  ;;  %v1810_v22 = vunpack.c.l.bf16 %v1288_v39  ;;  %v1811_v34 = vunpack.c.h.bf16 %v1288_v39 }
  0x33   :  { %v190_v30 = vmul.f32 %v1809_v33, %v1432_v17  ;;  %1142 = vst [vmem:[%s1800_s4 + $0x48] sm:$0xff] %v991_v48   ;;  %v996_v38 = vpack.c.bf16 %v320_v16, %v319_v12  ;;  %v322_v21 = vmax.f32 %v258_v29, 0.0  ;;  %v1812_v27 = vunpack.c.l.bf16 %v1297_v44 }
  0x34   :  { %v191_v40 = vmul.f32 %v1810_v22, %v1432_v17  ;;  %v192_v41 = vmul.f32 %v1811_v34, %v1432_v17  ;;  %v323_v42 = vmax.f32 %v259_v37, 0.0  ;;  %v1813_v39 = vunpack.c.h.bf16 %v1297_v44 }
  0x35   :  { %v260_v35 = vadd.f32 %v1463_v14, %v190_v30  ;;  %v193_v36 = vmul.f32 %v1812_v27, %v1432_v17  ;;  %1143 = vst [vmem:[%s1800_s4 + $0x50] sm:$0xff] %v996_v38   ;;  %v1001_v28 = vpack.c.bf16 %v322_v21, %v321_v31  ;;  %v1814_v58 = vunpack.c.l.bf16 %v1302_v45 }
  0x36   :  { %v261_v3 = vadd.f32 %v1463_v14, %v191_v40  ;;  %v262_v2 = vadd.f32 %v1463_v14, %v192_v41  ;;  %v194_v53 = vmul.f32 %v1813_v39, %v1432_v17  ;;  %v1815_v44 = vunpack.c.h.bf16 %v1302_v45 }
  0x37   :  { %v324_v46 = vmax.f32 %v260_v35, 0.0  ;;  %v263_v10 = vadd.f32 %v1463_v14, %v193_v36  ;;  %v195_v13 = vmul.f32 %v1814_v58, %v1432_v17  ;;  %1144 = vst [vmem:[%s1800_s4 + $0x58] sm:$0xff] %v1001_v28   ;;  %v1816_v8 = vunpack.c.l.bf16 %v1311_v50 }
  0x38   :  { %v325_v7 = vmax.f32 %v261_v3, 0.0  ;;  %v326_v9 = vmax.f32 %v262_v2, 0.0  ;;  %v264_v23 = vadd.f32 %v1463_v14, %v194_v53  ;;  %v196_v15 = vmul.f32 %v1815_v44, %v1432_v17 }
  0x39   :  { %v1006_v19 = vpack.c.bf16 %v324_v46, %v323_v42  ;;  %v327_v11 = vmax.f32 %v263_v10, 0.0  ;;  %v265_v20 = vadd.f32 %v1463_v14, %v195_v13  ;;  %v197_v24 = vmul.f32 %v1816_v8, %v1432_v17 }
  0x3a   :  { %v1011_v32 = vpack.c.bf16 %v326_v9, %v325_v7  ;;  %v328_v12 = vmax.f32 %v264_v23, 0.0  ;;  %v266_v25 = vadd.f32 %v1463_v14, %v196_v15  ;;  %v1817_v45 = vunpack.c.h.bf16 %v1311_v50 }
  0x3b   :  { %1145 = vst [vmem:[%s1800_s4 + $0x60] sm:$0xff] %v1006_v19   ;;  %v329_v26 = vmax.f32 %v265_v20, 0.0  ;;  %v267_v48 = vadd.f32 %v1463_v14, %v197_v24  ;;  %v1818_v16 = vunpack.c.l.bf16 %v1316_v51  ;;  %v1819_v33 = vunpack.c.h.bf16 %v1316_v51 }
  0x3c   :  { %v198_v18 = vmul.f32 %v1817_v45, %v1432_v17  ;;  %1146 = vst [vmem:[%s1800_s4 + $0x68] sm:$0xff] %v1011_v32   ;;  %v1016_v50 = vpack.c.bf16 %v328_v12, %v327_v11  ;;  %v330_v31 = vmax.f32 %v266_v25, 0.0  ;;  %v1820_v22 = vunpack.c.l.bf16 %v1325_v56 }
  0x3d   :  { %v199_v29 = vmul.f32 %v1818_v16, %v1432_v17  ;;  %v200_v30 = vmul.f32 %v1819_v33, %v1432_v17  ;;  %v331_v34 = vmax.f32 %v267_v48, 0.0  ;;  %v1821_v51 = vunpack.c.h.bf16 %v1325_v56 }
  0x3e   :  { %v268_v37 = vadd.f32 %v1463_v14, %v198_v18  ;;  %v201_v40 = vmul.f32 %v1820_v22, %v1432_v17  ;;  %1147 = vst [vmem:[%s1800_s4 + $0x70] sm:$0xff] %v1016_v50   ;;  %v1021_v35 = vpack.c.bf16 %v330_v31, %v329_v26  ;;  %v1822_v42 = vunpack.c.l.bf16 %v1330_v57 }
  0x3f   :  { %v269_v41 = vadd.f32 %v1463_v14, %v199_v29  ;;  %v270_v38 = vadd.f32 %v1463_v14, %v200_v30  ;;  %v202_v21 = vmul.f32 %v1821_v51, %v1432_v17  ;;  %v1823_v56 = vunpack.c.h.bf16 %v1330_v57 }
  0x40   :  { %v332_v27 = vmax.f32 %v268_v37, 0.0  ;;  %v271_v36 = vadd.f32 %v1463_v14, %v201_v40  ;;  %v203_v3 = vmul.f32 %v1822_v42, %v1432_v17  ;;  %1148 = vst [vmem:[%s1800_s4 + $0x78] sm:$0xff] %v1021_v35   ;;  %v1824_v13 = vunpack.c.l.bf16 %v1339_v62 }
  0x41   :  { %v333_v2 = vmax.f32 %v269_v41, 0.0  ;;  %v334_v39 = vmax.f32 %v270_v38, 0.0  ;;  %v272_v53 = vadd.f32 %v1463_v14, %v202_v21  ;;  %v204_v28 = vmul.f32 %v1823_v56, %v1432_v17 }
  0x42   :  { %v1026_v46 = vpack.c.bf16 %v332_v27, %v331_v34  ;;  %v335_v10 = vmax.f32 %v271_v36, 0.0  ;;  %v273_v58 = vadd.f32 %v1463_v14, %v203_v3  ;;  %v205_v7 = vmul.f32 %v1824_v13, %v1432_v17 }
  0x43   :  { %v1031_v9 = vpack.c.bf16 %v334_v39, %v333_v2  ;;  %v336_v23 = vmax.f32 %v272_v53, 0.0  ;;  %v274_v44 = vadd.f32 %v1463_v14, %v204_v28  ;;  %v1825_v57 = vunpack.c.h.bf16 %v1339_v62 }
  0x44   :  { %1149 = vst [vmem:[%s1800_s4 + $0x80] sm:$0xff] %v1026_v46   ;;  %v337_v19 = vmax.f32 %v273_v58, 0.0  ;;  %v275_v11 = vadd.f32 %v1463_v14, %v205_v7  ;;  %v1826_v20 = vunpack.c.l.bf16 %v1344_v63  ;;  %v1827_v24 = vunpack.c.h.bf16 %v1344_v63 }
  0x45   :  { %v206_v15 = vmul.f32 %v1825_v57, %v1432_v17  ;;  %1150 = vst [vmem:[%s1800_s4 + $0x88] sm:$0xff] %v1031_v9   ;;  %v1036_v62 = vpack.c.bf16 %v336_v23, %v335_v10  ;;  %v338_v12 = vmax.f32 %v274_v44, 0.0  ;;  %v1828_v45 = vunpack.c.l.bf16 %v1353_v5 }
  0x46   :  { %v207_v8 = vmul.f32 %v1826_v20, %v1432_v17  ;;  %v208_v32 = vmul.f32 %v1827_v24, %v1432_v17  ;;  %v339_v26 = vmax.f32 %v275_v11, 0.0  ;;  %v1829_v63 = vunpack.c.h.bf16 %v1353_v5 }
  0x47   :  { %v276_v25 = vadd.f32 %v1463_v14, %v206_v15  ;;  %v209_v18 = vmul.f32 %v1828_v45, %v1432_v17  ;;  %1151 = vst [vmem:[%s1800_s4 + $0x90] sm:$0xff] %v1036_v62   ;;  %v1041_v33 = vpack.c.bf16 %v338_v12, %v337_v19  ;;  %v1830_v31 = vunpack.c.l.bf16 %v1358_v6 }
  0x48   :  { %v277_v48 = vadd.f32 %v1463_v14, %v207_v8  ;;  %v278_v16 = vadd.f32 %v1463_v14, %v208_v32  ;;  %v210_v29 = vmul.f32 %v1829_v63, %v1432_v17  ;;  %v1831_v5 = vunpack.c.h.bf16 %v1358_v6 }
  0x49   :  { %v340_v30 = vmax.f32 %v276_v25, 0.0  ;;  %v279_v50 = vadd.f32 %v1463_v14, %v209_v18  ;;  %v211_v37 = vmul.f32 %v1830_v31, %v1432_v17  ;;  %1152 = vst [vmem:[%s1800_s4 + $0x98] sm:$0xff] %v1041_v33   ;;  %v1832_v35 = vunpack.c.l.bf16 %v1367_v4 }
  0x4a   :  { %v341_v22 = vmax.f32 %v277_v48, 0.0  ;;  %v342_v40 = vmax.f32 %v278_v16, 0.0  ;;  %v280_v34 = vadd.f32 %v1463_v14, %v210_v29  ;;  %v212_v41 = vmul.f32 %v1831_v5, %v1432_v17 }
  0x4b   :  { %v1046_v38 = vpack.c.bf16 %v340_v30, %v339_v26  ;;  %v343_v51 = vmax.f32 %v279_v50, 0.0  ;;  %v281_v21 = vadd.f32 %v1463_v14, %v211_v37  ;;  %v213_v27 = vmul.f32 %v1832_v35, %v1432_v17 }
  0x4c   :  { %v1051_v36 = vpack.c.bf16 %v342_v40, %v341_v22  ;;  %v344_v42 = vmax.f32 %v280_v34, 0.0  ;;  %v282_v3 = vadd.f32 %v1463_v14, %v212_v41  ;;  %v1833_v6 = vunpack.c.h.bf16 %v1367_v4 }
  0x4d   :  { %1153 = vst [vmem:[%s1800_s4 + $0xa0] sm:$0xff] %v1046_v38   ;;  %v345_v39 = vmax.f32 %v281_v21, 0.0  ;;  %v283_v53 = vadd.f32 %v1463_v14, %v213_v27  ;;  %v1834_v56 = vunpack.c.l.bf16 %v1372_v0  ;;  %v1835_v46 = vunpack.c.h.bf16 %v1372_v0 }
  0x4e   :  { %v214_v2 = vmul.f32 %v1833_v6, %v1432_v17  ;;  %1154 = vst [vmem:[%s1800_s4 + $0xa8] sm:$0xff] %v1051_v36   ;;  %v1056_v4 = vpack.c.bf16 %v344_v42, %v343_v51  ;;  %v346_v58 = vmax.f32 %v282_v3, 0.0  ;;  %v1836_v7 = vunpack.c.l.bf16 %v1384_v60 }
  0x4f   :  { %v215_v28 = vmul.f32 %v1834_v56, %v1432_v17  ;;  %v216_v10 = vmul.f32 %v1835_v46, %v1432_v17  ;;  %v347_v23 = vmax.f32 %v283_v53, 0.0  ;;  %v1837_v0 = vunpack.c.h.bf16 %v1384_v60 }
  0x50   :  { %v284_v13 = vadd.f32 %v1463_v14, %v214_v2  ;;  %v217_v9 = vmul.f32 %v1836_v7, %v1432_v17  ;;  %1155 = vst [vmem:[%s1800_s4 + $0xb0] sm:$0xff] %v1056_v4   ;;  %v1061_v19 = vpack.c.bf16 %v346_v58, %v345_v39  ;;  %v1838_v8 = vunpack.c.l.bf16 %v1393_v1 }
  0x51   :  { %v285_v44 = vadd.f32 %v1463_v14, %v215_v28  ;;  %v286_v57 = vadd.f32 %v1463_v14, %v216_v10  ;;  %v218_v15 = vmul.f32 %v1837_v0, %v1432_v17  ;;  %v1839_v60 = vunpack.c.h.bf16 %v1393_v1 }
  0x52   :  { %v348_v11 = vmax.f32 %v284_v13, 0.0  ;;  %v287_v20 = vadd.f32 %v1463_v14, %v217_v9  ;;  %v219_v24 = vmul.f32 %v1838_v8, %v1432_v17  ;;  %1156 = vst [vmem:[%s1800_s4 + $0xb8] sm:$0xff] %v1061_v19   ;;  %v1840_v48 = vunpack.c.l.bf16 %v1398_v61 }
  0x53   :  { %v349_v32 = vmax.f32 %v285_v44, 0.0  ;;  %v350_v62 = vmax.f32 %v286_v57, 0.0  ;;  %v288_v12 = vadd.f32 %v1463_v14, %v218_v15  ;;  %v220_v25 = vmul.f32 %v1839_v60, %v1432_v17 }
  0x54   :  { %v1066_v45 = vpack.c.bf16 %v348_v11, %v347_v23  ;;  %v351_v18 = vmax.f32 %v287_v20, 0.0  ;;  %v289_v26 = vadd.f32 %v1463_v14, %v219_v24  ;;  %v221_v16 = vmul.f32 %v1840_v48, %v1432_v17 }
  0x55   :  { %v1071_v63 = vpack.c.bf16 %v350_v62, %v349_v32  ;;  %v352_v29 = vmax.f32 %v288_v12, 0.0  ;;  %v290_v33 = vadd.f32 %v1463_v14, %v220_v25  ;;  %v222_v1 = vmul.f32 %v930_v52, %v1432_v17 }
  0x56   :  { %1157 = vst [vmem:[%s1800_s4 + $0xc0] sm:$0xff] %v1066_v45   ;;  %v353_v30 = vmax.f32 %v289_v26, 0.0  ;;  %v291_v50 = vadd.f32 %v1463_v14, %v221_v16  ;;  %v223_v31 = vmul.f32 %v933_v47, %v1432_v17  ;;  %v1841_v37 = vunpack.c.h.bf16 %v1407_v54 }
  0x57   :  { %1158 = vst [vmem:[%s1800_s4 + $0xc8] sm:$0xff] %v1071_v63   ;;  %v1076_v52 = vpack.c.bf16 %v352_v29, %v351_v18  ;;  %v354_v61 = vmax.f32 %v290_v33, 0.0  ;;  %v292_v40 = vadd.f32 %v1463_v14, %v222_v1  ;;  %v225_v34 = vmul.f32 %v937_v43, %v1432_v17 }
  0x58   :  { %v224_v22 = vmul.f32 %v1841_v37, %v1432_v17  ;;  %v355_v5 = vmax.f32 %v291_v50, 0.0  ;;  %v293_v41 = vadd.f32 %v1463_v14, %v223_v31  ;;  %v1842_v54 = vunpack.c.h.bf16 %v1415_v59 }
  0x59   :  { %1159 = vst [vmem:[%s1800_s4 + $0xd0] sm:$0xff] %v1076_v52   ;;  %v1081_v51 = vpack.c.bf16 %v354_v61, %v353_v30  ;;  %v356_v21 = vmax.f32 %v292_v40, 0.0  ;;  %v295_v35 = vadd.f32 %v1463_v14, %v225_v34  ;;  %v227_v43 = vmul.f32 %v941_v49, %v1432_v17 }
  0x5a   :  { %v294_v47 = vadd.f32 %v1463_v14, %v224_v22  ;;  %v226_v38 = vmul.f32 %v1842_v54, %v1432_v17  ;;  %v357_v27 = vmax.f32 %v293_v41, 0.0  ;;  %v1843_v59 = vunpack.c.h.bf16 %v1420_v55 }
  0x5b   :  { %1160 = vst [vmem:[%s1800_s4 + $0xd8] sm:$0xff] %v1081_v51   ;;  %v1086_v6 = vpack.c.bf16 %v356_v21, %v355_v5  ;;  %v359_v2 = vmax.f32 %v295_v35, 0.0  ;;  %v297_v39 = vadd.f32 %v1463_v14, %v227_v43 }
  0x5c   :  { %v358_v36 = vmax.f32 %v294_v47, 0.0  ;;  %v296_v42 = vadd.f32 %v1463_v14, %v226_v38  ;;  %v228_v3 = vmul.f32 %v1843_v59, %v1432_v17 }
  0x5d   :  { %1161 = vst [vmem:[%s1800_s4 + $0xe0] sm:$0xff] %v1086_v6   ;;  %v361_v28 = vmax.f32 %v297_v39, 0.0 }
  0x5e   :  { %v1091_v53 = vpack.c.bf16 %v358_v36, %v357_v27  ;;  %v360_v56 = vmax.f32 %v296_v42, 0.0  ;;  %v298_v49 = vadd.f32 %v1463_v14, %v228_v3 }
  0x60   :  { %1162 = vst [vmem:[%s1800_s4 + $0xe8] sm:$0xff] %v1091_v53   ;;  %v1096_v55 = vpack.c.bf16 %v360_v56, %v359_v2  ;;  %v362_v17 = vmax.f32 %v298_v49, 0.0 }
  0x62   :  { %1163 = vst [vmem:[%s1800_s4 + $0xf0] sm:$0xff] %v1096_v55   ;;  %v1101_v46 = vpack.c.bf16 %v362_v17, %v361_v28 }
  0x64   :  { %1164 = vst [vmem:[%s1800_s4 + $0xf8] sm:$0xff] %v1101_v46  }

// kernel: generator_forward.15
= control target key start
LH: loop header
LB: loop body
LE: loop exit
PB: predicated region body
PF: predicated region fallthrough
CT: control target
= control target key end

     0   :  { %s3439_s12 = smov 0   ;;  %s3441_s13 = smov 0   ;;  %s3717_s0 = inlined_call_operand.vmem [shape: bf16[4,512,512], index: 0, kind: input, shape index: {}]   ;;  %s3718_s1 = inlined_call_operand.vmem [shape: bf16[4,512,128], index: 1, kind: input, shape index: {}]   ;;  %s3719_s2 = inlined_call_operand.vmem [shape: bf16[4,512,128], index: 2, kind: output, shape index: {0}]   ;;  %s3720_s3 = inlined_call_operand.vmem [shape: f32[4,1,2,128], index: 3, kind: output, shape index: {1}]  }
   0x1   :  { %s3443_s14 = smov 0  }
   0x2 LB: > { %s33_s15 = sadd.s32 1, %s3412_s13  ;;  %p2589_p0 = scmp.ge.s32.totalorder %s3416_s14, 1  ;;  %s3416_s14 = sphi %s3443_s14, %s14_s14   ;;  %s3412_s13 = sphi %s3441_s13, %s3722_s13   ;;  %s3408_s12 = sphi %s3439_s12, %s3721_s12  }
   0x3   : > { %p35_p1 = scmp.ge.s32.totalorder %s33_s15, 4  ;;  %p190_p2 = scmp.lt.s32.totalorder %s3416_s14, 5 }
   0x5   : > { %s3724_s15 = smov (%p35_p1, %s33_s15), 0  ;;  %p191_p3 = pnand %p2589_p0, %p190_p2 }
   0x6   : > { %p245_p4 = scmp.lt.s32.totalorder (!%p191_p3), %s3408_s12, 3  ;;  %v3418_v0 = vmov (!%p191_p3), 0  }
   0x7   : > { %194 = sbr.rel (%p191_p3) target bundleno = 563 (0x233), region = 28  ;;  %1311 = vmatprep.subr.bf16.mxu1 (!%p191_p3), %v3418_v0  ;;  %1600 = vmatprep.subr.bf16.mxu0 (!%p191_p3), %v3418_v0 }
   0xe   : > { %s3726_s12 = smov (!%p245_p4, %s3408_s12), 3 }
   0xf   : > { %s2824_s16 = sshll.u32 %s3726_s12, 8  ;;  %s2823_s20 = sshll.u32 %s3726_s12, 10 }
  0x10   : > { %s3467_s19 = scalar_lea.vmem %s3718_s1, %s2824_s16  ;;  %s3503_s23 = scalar_lea.vmem %s3717_s0, %s2823_s20 }
  0x11   : > { %v3170_v1 = vld [vmem:[%s3467_s19] sm:$0xff]   ;;  %v3172_v3 = vld [vmem:[%s3467_s19 + $0x8] sm:$0xff]   ;;  %v3174_v5 = vld [vmem:[%s3467_s19 + $0x10] sm:$0xff]   ;;  %s3656_s26 = scalar_lea.vmem %s3719_s2, %s2824_s16  ;;  %s2596_s27 = sshll.u32 %s3726_s12, 1 }
  0x12   : > { %v3171_v2 = vld [vmem:[%s3467_s19 + $0x80] sm:$0xff]   ;;  %1312 = vmatpush1.bf16.msra.mxu1 %v3170_v1  ;;  %v3173_v4 = vld [vmem:[%s3467_s19 + $0x88] sm:$0xff]   ;;  %v3175_v6 = vld [vmem:[%s3467_s19 + $0x90] sm:$0xff]   ;;  %s285_s30 = scalar_lea.vmem %s3720_s3, %s2596_s27 }
  0x13   : > { %1601 = vmatpush1.bf16.msra.mxu0 %v3171_v2  ;;  %1313 = vmatprep.subr.bf16.mxu1 %v3418_v0  ;;  %v3176_v7 = vld [vmem:[%s3467_s19 + $0x18] sm:$0xff]   ;;  %v3178_v9 = vld [vmem:[%s3467_s19 + $0x20] sm:$0xff]   ;;  %v3180_v11 = vld [vmem:[%s3467_s19 + $0x28] sm:$0xff]  }
  0x14   : > { %1602 = vmatprep.subr.bf16.mxu0 %v3418_v0  ;;  %v3177_v8 = vld [vmem:[%s3467_s19 + $0x98] sm:$0xff]   ;;  %v3179_v10 = vld [vmem:[%s3467_s19 + $0xa0] sm:$0xff]   ;;  %v3181_v12 = vld [vmem:[%s3467_s19 + $0xa8] sm:$0xff]  }
  0x15   : > { %v3182_v13 = vld [vmem:[%s3467_s19 + $0x30] sm:$0xff]   ;;  %v3184_v15 = vld [vmem:[%s3467_s19 + $0x38] sm:$0xff]   ;;  %v3186_v17 = vld [vmem:[%s3467_s19 + $0x40] sm:$0xff]  }
  0x16   : > { %1314 = vmatpush1.bf16.msra.mxu1 %v3172_v3  ;;  %v3183_v14 = vld [vmem:[%s3467_s19 + $0xb0] sm:$0xff]   ;;  %v3185_v16 = vld [vmem:[%s3467_s19 + $0xb8] sm:$0xff]   ;;  %v3187_v18 = vld [vmem:[%s3467_s19 + $0xc0] sm:$0xff]  }
  0x17   : > { %1603 = vmatpush1.bf16.msra.mxu0 %v3173_v4  ;;  %1315 = vmatprep.subr.bf16.mxu1 %v3418_v0  ;;  %v3204_v19 = vld [vmem:[%s3503_s23 + $0x4] ss:$16 sps:$4 sm:$0xff]   ;;  %v3188_v20 = vld [vmem:[%s3467_s19 + $0x48] sm:$0xff]   ;;  %v3192_v25 = vld [vmem:[%s3467_s19 + $0x58] sm:$0xff]  }
  0x18   : > { %1604 = vmatprep.subr.bf16.mxu0 %v3418_v0  ;;  %v3207_v21 = vld [vmem:[%s3503_s23 + $0xc] ss:$16 sps:$4 sm:$0xff]   ;;  %1343 = vmatprep.mubr.bf16.mxu1 %v3204_v19  ;;  %v3190_v23 = vld [vmem:[%s3467_s19 + $0x50] sm:$0xff]   ;;  %v3194_v27 = vld [vmem:[%s3467_s19 + $0x60] sm:$0xff]  }
  0x19   : > { %v3189_v22 = vld [vmem:[%s3467_s19 + $0xc8] sm:$0xff]   ;;  %1632 = vmatprep.mubr.bf16.mxu0 %v3207_v21  ;;  %v3191_v24 = vld [vmem:[%s3467_s19 + $0xd0] sm:$0xff]   ;;  %v3193_v26 = vld [vmem:[%s3467_s19 + $0xd8] sm:$0xff]  }
  0x1a   : > { %1316 = vmatpush1.bf16.msra.mxu1 %v3174_v5  ;;  %v3195_v28 = vld [vmem:[%s3467_s19 + $0xe0] sm:$0xff]   ;;  %v3196_v29 = vld [vmem:[%s3467_s19 + $0x68] sm:$0xff]   ;;  %v3198_v31 = vld [vmem:[%s3467_s19 + $0x70] sm:$0xff]  }
  0x1b   : > { %1605 = vmatpush1.bf16.msra.mxu0 %v3175_v6  ;;  %1317 = vmatprep.subr.bf16.mxu1 %v3418_v0  ;;  %v3197_v30 = vld [vmem:[%s3467_s19 + $0xe8] sm:$0xff]   ;;  %v3199_v32 = vld [vmem:[%s3467_s19 + $0xf0] sm:$0xff]   ;;  %v3200_v33 = vld [vmem:[%s3467_s19 + $0x78] sm:$0xff]  }
  0x1c   : > { %1606 = vmatprep.subr.bf16.mxu0 %v3418_v0  ;;  %v3201_v34 = vld [vmem:[%s3467_s19 + $0xf8] sm:$0xff]   ;;  %v3202_v35 = vld [vmem:[%s3503_s23] ss:$16 sps:$4 sm:$0xff]   ;;  %v3208_v37 = vld [vmem:[%s3503_s23 + $0x24] ss:$16 sps:$4 sm:$0xff]  }
  0x1d   : > { %v3205_v36 = vld [vmem:[%s3503_s23 + $0x8] ss:$16 sps:$4 sm:$0xff]   ;;  %v3210_v38 = vld [vmem:[%s3503_s23 + $0x2c] ss:$16 sps:$4 sm:$0xff]   ;;  %v3212_v39 = vld [vmem:[%s3503_s23 + $0x20] ss:$16 sps:$4 sm:$0xff]  }
  0x1e   : > { %1318 = vmatpush1.bf16.msra.mxu1 %v3176_v7  ;;  %v3213_v40 = vld [vmem:[%s3503_s23 + $0x28] ss:$16 sps:$4 sm:$0xff]   ;;  %v3214_v41 = vld [vmem:[%s3503_s23 + $0x44] ss:$16 sps:$4 sm:$0xff]   ;;  %v3216_v42 = vld [vmem:[%s3503_s23 + $0x4c] ss:$16 sps:$4 sm:$0xff]  }
  0x1f   : > { %1607 = vmatpush1.bf16.msra.mxu0 %v3177_v8  ;;  %1319 = vmatprep.subr.bf16.mxu1 %v3418_v0  ;;  %v3218_v43 = vld [vmem:[%s3503_s23 + $0x40] ss:$16 sps:$4 sm:$0xff]   ;;  %v3219_v44 = vld [vmem:[%s3503_s23 + $0x48] ss:$16 sps:$4 sm:$0xff]   ;;  %v3220_v45 = vld [vmem:[%s3503_s23 + $0x64] ss:$16 sps:$4 sm:$0xff]  }
  0x20   : > { %1608 = vmatprep.subr.bf16.mxu0 %v3418_v0  ;;  %v3222_v46 = vld [vmem:[%s3503_s23 + $0x6c] ss:$16 sps:$4 sm:$0xff]   ;;  %v3224_v47 = vld [vmem:[%s3503_s23 + $0x60] ss:$16 sps:$4 sm:$0xff]   ;;  %v3225_v48 = vld [vmem:[%s3503_s23 + $0x68] ss:$16 sps:$4 sm:$0xff]  }
  0x21   : > { %v3226_v49 = vld [vmem:[%s3503_s23 + $0x84] ss:$16 sps:$4 sm:$0xff]   ;;  %v3228_v50 = vld [vmem:[%s3503_s23 + $0x8c] ss:$16 sps:$4 sm:$0xff]   ;;  %v3230_v51 = vld [vmem:[%s3503_s23 + $0x80] ss:$16 sps:$4 sm:$0xff]  }
  0x22   : > { %1320 = vmatpush1.bf16.msra.mxu1 %v3178_v9  ;;  %v3231_v52 = vld [vmem:[%s3503_s23 + $0x88] ss:$16 sps:$4 sm:$0xff]   ;;  %v3232_v53 = vld [vmem:[%s3503_s23 + $0xa4] ss:$16 sps:$4 sm:$0xff]   ;;  %v3234_v54 = vld [vmem:[%s3503_s23 + $0xac] ss:$16 sps:$4 sm:$0xff]  }
  0x23   : > { %1609 = vmatpush1.bf16.msra.mxu0 %v3179_v10  ;;  %1321 = vmatprep.subr.bf16.mxu1 %v3418_v0  ;;  %v3236_v55 = vld [vmem:[%s3503_s23 + $0xa0] ss:$16 sps:$4 sm:$0xff]   ;;  %v3237_v56 = vld [vmem:[%s3503_s23 + $0xa8] ss:$16 sps:$4 sm:$0xff]   ;;  %v3238_v57 = vld [vmem:[%s3503_s23 + $0xc4] ss:$16 sps:$4 sm:$0xff]  }
  0x24   : > { %1610 = vmatprep.subr.bf16.mxu0 %v3418_v0  ;;  %v3240_v58 = vld [vmem:[%s3503_s23 + $0xcc] ss:$16 sps:$4 sm:$0xff]   ;;  %v3242_v59 = vld [vmem:[%s3503_s23 + $0xc0] ss:$16 sps:$4 sm:$0xff]   ;;  %v3243_v60 = vld [vmem:[%s3503_s23 + $0xc8] ss:$16 sps:$4 sm:$0xff]  }
  0x25   : > { %v3244_v61 = vld [vmem:[%s3503_s23 + $0xe4] ss:$16 sps:$4 sm:$0xff]   ;;  %v3246_v62 = vld [vmem:[%s3503_s23 + $0xec] ss:$16 sps:$4 sm:$0xff]   ;;  %v3248_v63 = vld [vmem:[%s3503_s23 + $0xe0] ss:$16 sps:$4 sm:$0xff]  }
  0x26   : > { %1322 = vmatpush1.bf16.msra.mxu1 %v3180_v11  ;;  %v3250_v1 = vld [vmem:[%s3503_s23 + $0x104] ss:$16 sps:$4 sm:$0xff]   ;;  %v3252_v2 = vld [vmem:[%s3503_s23 + $0x10c] ss:$16 sps:$4 sm:$0xff]   ;;  %v3254_v3 = vld [vmem:[%s3503_s23 + $0x100] ss:$16 sps:$4 sm:$0xff]  }
  0x27   : > { %1611 = vmatpush1.bf16.msra.mxu0 %v3181_v12  ;;  %1323 = vmatprep.subr.bf16.mxu1 %v3418_v0  ;;  %v3255_v4 = vld [vmem:[%s3503_s23 + $0x108] ss:$16 sps:$4 sm:$0xff]   ;;  %v3256_v5 = vld [vmem:[%s3503_s23 + $0x124] ss:$16 sps:$4 sm:$0xff]   ;;  %v3258_v6 = vld [vmem:[%s3503_s23 + $0x12c] ss:$16 sps:$4 sm:$0xff]  }
  0x28   : > { %1612 = vmatprep.subr.bf16.mxu0 %v3418_v0  ;;  %v3260_v7 = vld [vmem:[%s3503_s23 + $0x120] ss:$16 sps:$4 sm:$0xff]   ;;  %v3261_v8 = vld [vmem:[%s3503_s23 + $0x128] ss:$16 sps:$4 sm:$0xff]   ;;  %v3262_v9 = vld [vmem:[%s3503_s23 + $0x144] ss:$16 sps:$4 sm:$0xff]  }
  0x29   : > { %v3264_v10 = vld [vmem:[%s3503_s23 + $0x14c] ss:$16 sps:$4 sm:$0xff]   ;;  %v3266_v11 = vld [vmem:[%s3503_s23 + $0x140] ss:$16 sps:$4 sm:$0xff]   ;;  %v3267_v12 = vld [vmem:[%s3503_s23 + $0x148] ss:$16 sps:$4 sm:$0xff]  }
  0x2a   : > { %1324 = vmatpush1.bf16.msra.mxu1 %v3182_v13  ;;  %v3268_v13 = vld [vmem:[%s3503_s23 + $0x164] ss:$16 sps:$4 sm:$0xff]   ;;  %v3278_v19 = vld [vmem:[%s3503_s23 + $0x180] ss:$16 sps:$4 sm:$0xff]  }
  0x2b   : > { %1613 = vmatpush1.bf16.msra.mxu0 %v3183_v14  ;;  %1325 = vmatprep.subr.bf16.mxu1 %v3418_v0  ;;  %v3270_v14 = vld [vmem:[%s3503_s23 + $0x16c] ss:$16 sps:$4 sm:$0xff]   ;;  %v3280_v21 = vld [vmem:[%s3503_s23 + $0x1a4] ss:$16 sps:$4 sm:$0xff]  }
  0x2c   : > { %1614 = vmatprep.subr.bf16.mxu0 %v3418_v0 }
  0x2e   : > { %1326 = vmatpush1.bf16.msra.mxu1 %v3184_v15  ;;  %v3272_v15 = vld [vmem:[%s3503_s23 + $0x160] ss:$16 sps:$4 sm:$0xff]  }
  0x2f   : > { %1615 = vmatpush1.bf16.msra.mxu0 %v3185_v16  ;;  %1327 = vmatprep.subr.bf16.mxu1 %v3418_v0  ;;  %v3273_v16 = vld [vmem:[%s3503_s23 + $0x168] ss:$16 sps:$4 sm:$0xff]  }
  0x30   : > { %1616 = vmatprep.subr.bf16.mxu0 %v3418_v0 }
  0x32   : > { %1328 = vmatpush1.bf16.msra.mxu1 %v3186_v17  ;;  %v3274_v17 = vld [vmem:[%s3503_s23 + $0x184] ss:$16 sps:$4 sm:$0xff]  }
  0x33   : > { %1617 = vmatpush1.bf16.msra.mxu0 %v3187_v18  ;;  %1329 = vmatprep.subr.bf16.mxu1 %v3418_v0  ;;  %v3276_v18 = vld [vmem:[%s3503_s23 + $0x18c] ss:$16 sps:$4 sm:$0xff]  }
  0x34   : > { %1618 = vmatprep.subr.bf16.mxu0 %v3418_v0 }
  0x36   : > { %1330 = vmatpush1.bf16.msra.mxu1 %v3188_v20  ;;  %v3279_v20 = vld [vmem:[%s3503_s23 + $0x188] ss:$16 sps:$4 sm:$0xff]  }
  0x37   : > { %1619 = vmatpush1.bf16.msra.mxu0 %v3189_v22  ;;  %1331 = vmatprep.subr.bf16.mxu1 %v3418_v0  ;;  %v3282_v22 = vld [vmem:[%s3503_s23 + $0x1ac] ss:$16 sps:$4 sm:$0xff]  }
  0x38   : > { %1620 = vmatprep.subr.bf16.mxu0 %v3418_v0 }
  0x3a   : > { %1332 = vmatpush1.bf16.msra.mxu1 %v3190_v23  ;;  %v3284_v23 = vld [vmem:[%s3503_s23 + $0x1a0] ss:$16 sps:$4 sm:$0xff]  }
  0x3b   : > { %1621 = vmatpush1.bf16.msra.mxu0 %v3191_v24  ;;  %1333 = vmatprep.subr.bf16.mxu1 %v3418_v0  ;;  %v3285_v24 = vld [vmem:[%s3503_s23 + $0x1a8] ss:$16 sps:$4 sm:$0xff]  }
  0x3c   : > { %1622 = vmatprep.subr.bf16.mxu0 %v3418_v0 }
  0x3e   : > { %1334 = vmatpush1.bf16.msra.mxu1 %v3192_v25  ;;  %v3286_v25 = vld [vmem:[%s3503_s23 + $0x1c4] ss:$16 sps:$4 sm:$0xff]  }
  0x3f   : > { %1623 = vmatpush1.bf16.msra.mxu0 %v3193_v26  ;;  %1335 = vmatprep.subr.bf16.mxu1 %v3418_v0  ;;  %v3288_v26 = vld [vmem:[%s3503_s23 + $0x1cc] ss:$16 sps:$4 sm:$0xff]  }
  0x40   : > { %1624 = vmatprep.subr.bf16.mxu0 %v3418_v0 }
  0x42   : > { %1336 = vmatpush1.bf16.msra.mxu1 %v3194_v27  ;;  %v3290_v27 = vld [vmem:[%s3503_s23 + $0x1c0] ss:$16 sps:$4 sm:$0xff]  }
  0x43   : > { %1625 = vmatpush1.bf16.msra.mxu0 %v3195_v28  ;;  %1337 = vmatprep.subr.bf16.mxu1 %v3418_v0  ;;  %v3291_v28 = vld [vmem:[%s3503_s23 + $0x1c8] ss:$16 sps:$4 sm:$0xff]  }
  0x44   : > { %1626 = vmatprep.subr.bf16.mxu0 %v3418_v0 }
  0x46   : > { %1338 = vmatpush1.bf16.msra.mxu1 %v3196_v29  ;;  %v3292_v29 = vld [vmem:[%s3503_s23 + $0x1e4] ss:$16 sps:$4 sm:$0xff]  }
  0x47   : > { %1627 = vmatpush1.bf16.msra.mxu0 %v3197_v30  ;;  %1339 = vmatprep.subr.bf16.mxu1 %v3418_v0  ;;  %v3294_v30 = vld [vmem:[%s3503_s23 + $0x1ec] ss:$16 sps:$4 sm:$0xff]  }
  0x48   : > { %1628 = vmatprep.subr.bf16.mxu0 %v3418_v0 }
  0x4a   : > { %1340 = vmatpush1.bf16.msra.mxu1 %v3198_v31  ;;  %v3296_v31 = vld [vmem:[%s3503_s23 + $0x1e0] ss:$16 sps:$4 sm:$0xff]  }
  0x4b   : > { %1629 = vmatpush1.bf16.msra.mxu0 %v3199_v32  ;;  %1341 = vmatprep.subr.bf16.mxu1 %v3418_v0  ;;  %v3297_v32 = vld [vmem:[%s3503_s23 + $0x1e8] ss:$16 sps:$4 sm:$0xff]  }
  0x4c   : > { %1630 = vmatprep.subr.bf16.mxu0 %v3418_v0  ;;  %v3249_v0 = vld [vmem:[%s3503_s23 + $0xe8] ss:$16 sps:$4 sm:$0xff]  }
  0x4e   : > { %1342 = vmatpush1.bf16.msra.mxu1 %v3200_v33  ;;  %v3298_v33 = vld [vmem:[%s3503_s23 + $0x204] ss:$16 sps:$4 sm:$0xff]  }
  0x4f   : > { %1631 = vmatpush1.bf16.msra.mxu0 %v3201_v34  ;;  %v3300_v34 = vld [vmem:[%s3503_s23 + $0x20c] ss:$16 sps:$4 sm:$0xff]  }
  0x51   : > { %1344 = vmatmul.mubr.bf16.vlgmr.msra.gmra.mrb[0].mxu1 %v3202_v35  ;;  %v3302_v35 = vld [vmem:[%s3503_s23 + $0x200] ss:$16 sps:$4 sm:$0xff]  }
  0x52   : > { %1633 = vmatmul.mubr.bf16.vlgmr.msra.gmra.mrb[0].mxu0 %v3205_v36  ;;  %1351 = vmatprep.mubr.bf16.mxu1 %v3208_v37  ;;  %v3303_v36 = vld [vmem:[%s3503_s23 + $0x208] ss:$16 sps:$4 sm:$0xff]   ;;  %v3304_v37 = vld [vmem:[%s3503_s23 + $0x224] ss:$16 sps:$4 sm:$0xff]  }
  0x53   : > { %1640 = vmatprep.mubr.bf16.mxu0 %v3210_v38  ;;  %v3306_v38 = vld [vmem:[%s3503_s23 + $0x22c] ss:$16 sps:$4 sm:$0xff]  }
  0x59   : > { %1352 = vmatmul.mubr.bf16.gmra.mrb[4].mxu1 %v3212_v39  ;;  %v3308_v39 = vld [vmem:[%s3503_s23 + $0x220] ss:$16 sps:$4 sm:$0xff]  }
  0x5a   : > { %1641 = vmatmul.mubr.bf16.gmra.mrb[4].mxu0 %v3213_v40  ;;  %1359 = vmatprep.mubr.bf16.mxu1 %v3214_v41  ;;  %v3309_v40 = vld [vmem:[%s3503_s23 + $0x228] ss:$16 sps:$4 sm:$0xff]   ;;  %v3310_v41 = vld [vmem:[%s3503_s23 + $0x244] ss:$16 sps:$4 sm:$0xff]  }
  0x5b   : > { %1648 = vmatprep.mubr.bf16.mxu0 %v3216_v42  ;;  %v3312_v42 = vld [vmem:[%s3503_s23 + $0x24c] ss:$16 sps:$4 sm:$0xff]  }
  0x61   : > { %1360 = vmatmul.mubr.bf16.gmra.mrb[8].mxu1 %v3218_v43  ;;  %v3314_v43 = vld [vmem:[%s3503_s23 + $0x240] ss:$16 sps:$4 sm:$0xff]  }
  0x62   : > { %1649 = vmatmul.mubr.bf16.gmra.mrb[8].mxu0 %v3219_v44  ;;  %1367 = vmatprep.mubr.bf16.mxu1 %v3220_v45  ;;  %v3315_v44 = vld [vmem:[%s3503_s23 + $0x248] ss:$16 sps:$4 sm:$0xff]   ;;  %v3316_v45 = vld [vmem:[%s3503_s23 + $0x264] ss:$16 sps:$4 sm:$0xff]  }
  0x63   : > { %1656 = vmatprep.mubr.bf16.mxu0 %v3222_v46  ;;  %v3318_v46 = vld [vmem:[%s3503_s23 + $0x26c] ss:$16 sps:$4 sm:$0xff]  }
  0x69   : > { %1368 = vmatmul.mubr.bf16.gmra.mrb[12].mxu1 %v3224_v47  ;;  %v3320_v47 = vld [vmem:[%s3503_s23 + $0x260] ss:$16 sps:$4 sm:$0xff]  }
  0x6a   : > { %1657 = vmatmul.mubr.bf16.gmra.mrb[12].mxu0 %v3225_v48  ;;  %1375 = vmatprep.mubr.bf16.mxu1 %v3226_v49  ;;  %v3321_v48 = vld [vmem:[%s3503_s23 + $0x268] ss:$16 sps:$4 sm:$0xff]   ;;  %v3322_v49 = vld [vmem:[%s3503_s23 + $0x284] ss:$16 sps:$4 sm:$0xff]  }
  0x6b   : > { %1664 = vmatprep.mubr.bf16.mxu0 %v3228_v50  ;;  %v3324_v50 = vld [vmem:[%s3503_s23 + $0x28c] ss:$16 sps:$4 sm:$0xff]  }
  0x71   : > { %1376 = vmatmul.mubr.bf16.gmra.mrb[16].mxu1 %v3230_v51  ;;  %v3326_v51 = vld [vmem:[%s3503_s23 + $0x280] ss:$16 sps:$4 sm:$0xff]  }
  0x72   : > { %1665 = vmatmul.mubr.bf16.gmra.mrb[16].mxu0 %v3231_v52  ;;  %1383 = vmatprep.mubr.bf16.mxu1 %v3232_v53  ;;  %v3327_v52 = vld [vmem:[%s3503_s23 + $0x288] ss:$16 sps:$4 sm:$0xff]   ;;  %v3328_v53 = vld [vmem:[%s3503_s23 + $0x2a4] ss:$16 sps:$4 sm:$0xff]  }
  0x73   : > { %1672 = vmatprep.mubr.bf16.mxu0 %v3234_v54  ;;  %v3330_v54 = vld [vmem:[%s3503_s23 + $0x2ac] ss:$16 sps:$4 sm:$0xff]  }
  0x79   : > { %1384 = vmatmul.mubr.bf16.gmra.mrb[20].mxu1 %v3236_v55  ;;  %v3332_v55 = vld [vmem:[%s3503_s23 + $0x2a0] ss:$16 sps:$4 sm:$0xff]  }
  0x7a   : > { %1673 = vmatmul.mubr.bf16.gmra.mrb[20].mxu0 %v3237_v56  ;;  %1391 = vmatprep.mubr.bf16.mxu1 %v3238_v57  ;;  %v3333_v56 = vld [vmem:[%s3503_s23 + $0x2a8] ss:$16 sps:$4 sm:$0xff]   ;;  %v3334_v57 = vld [vmem:[%s3503_s23 + $0x2c4] ss:$16 sps:$4 sm:$0xff]  }
  0x7b   : > { %1680 = vmatprep.mubr.bf16.mxu0 %v3240_v58  ;;  %v3336_v58 = vld [vmem:[%s3503_s23 + $0x2cc] ss:$16 sps:$4 sm:$0xff]  }
  0x81   : > { %1392 = vmatmul.mubr.bf16.gmra.mrb[24].mxu1 %v3242_v59  ;;  %v3338_v59 = vld [vmem:[%s3503_s23 + $0x2c0] ss:$16 sps:$4 sm:$0xff]  }
  0x82   : > { %1681 = vmatmul.mubr.bf16.gmra.mrb[24].mxu0 %v3243_v60  ;;  %1399 = vmatprep.mubr.bf16.mxu1 %v3244_v61  ;;  %v3339_v60 = vld [vmem:[%s3503_s23 + $0x2c8] ss:$16 sps:$4 sm:$0xff]   ;;  %v3340_v61 = vld [vmem:[%s3503_s23 + $0x2e4] ss:$16 sps:$4 sm:$0xff]  }
  0x83   : > { %1688 = vmatprep.mubr.bf16.mxu0 %v3246_v62  ;;  %v3342_v62 = vld [vmem:[%s3503_s23 + $0x2ec] ss:$16 sps:$4 sm:$0xff]  }
  0x89   : > { %1400 = vmatmul.mubr.bf16.gmra.mrb[28].mxu1 %v3248_v63  ;;  %v3344_v63 = vld [vmem:[%s3503_s23 + $0x2e0] ss:$16 sps:$4 sm:$0xff]  }
  0x8a   : > { %1689 = vmatmul.mubr.bf16.gmra.mrb[28].mxu0 %v3249_v0  ;;  %1407 = vmatprep.mubr.bf16.mxu1 %v3250_v1  ;;  %v3345_v0 = vld [vmem:[%s3503_s23 + $0x2e8] ss:$16 sps:$4 sm:$0xff]   ;;  %v3346_v1 = vld [vmem:[%s3503_s23 + $0x304] ss:$16 sps:$4 sm:$0xff]  }
  0x8b   : > { %1696 = vmatprep.mubr.bf16.mxu0 %v3252_v2  ;;  %v3348_v2 = vld [vmem:[%s3503_s23 + $0x30c] ss:$16 sps:$4 sm:$0xff]  }
  0x91   : > { %1408 = vmatmul.mubr.bf16.gmra.mrb[32].mxu1 %v3254_v3  ;;  %v3350_v3 = vld [vmem:[%s3503_s23 + $0x300] ss:$16 sps:$4 sm:$0xff]  }
  0x92   : > { %1697 = vmatmul.mubr.bf16.gmra.mrb[32].mxu0 %v3255_v4  ;;  %1415 = vmatprep.mubr.bf16.mxu1 %v3256_v5  ;;  %v3351_v4 = vld [vmem:[%s3503_s23 + $0x308] ss:$16 sps:$4 sm:$0xff]   ;;  %v3352_v5 = vld [vmem:[%s3503_s23 + $0x324] ss:$16 sps:$4 sm:$0xff]  }
  0x93   : > { %1704 = vmatprep.mubr.bf16.mxu0 %v3258_v6  ;;  %v3354_v6 = vld [vmem:[%s3503_s23 + $0x32c] ss:$16 sps:$4 sm:$0xff]  }
  0x99   : > { %1416 = vmatmul.mubr.bf16.gmra.mrb[36].mxu1 %v3260_v7  ;;  %v3356_v7 = vld [vmem:[%s3503_s23 + $0x320] ss:$16 sps:$4 sm:$0xff]  }
  0x9a   : > { %1705 = vmatmul.mubr.bf16.gmra.mrb[36].mxu0 %v3261_v8  ;;  %1423 = vmatprep.mubr.bf16.mxu1 %v3262_v9  ;;  %v3357_v8 = vld [vmem:[%s3503_s23 + $0x328] ss:$16 sps:$4 sm:$0xff]   ;;  %v3358_v9 = vld [vmem:[%s3503_s23 + $0x344] ss:$16 sps:$4 sm:$0xff]  }
  0x9b   : > { %1712 = vmatprep.mubr.bf16.mxu0 %v3264_v10  ;;  %v3360_v10 = vld [vmem:[%s3503_s23 + $0x34c] ss:$16 sps:$4 sm:$0xff]  }
  0xa1   : > { %1424 = vmatmul.mubr.bf16.gmra.mrb[40].mxu1 %v3266_v11  ;;  %v3362_v11 = vld [vmem:[%s3503_s23 + $0x340] ss:$16 sps:$4 sm:$0xff]  }
  0xa2   : > { %1713 = vmatmul.mubr.bf16.gmra.mrb[40].mxu0 %v3267_v12  ;;  %1431 = vmatprep.mubr.bf16.mxu1 %v3268_v13  ;;  %v3363_v12 = vld [vmem:[%s3503_s23 + $0x348] ss:$16 sps:$4 sm:$0xff]   ;;  %v3364_v13 = vld [vmem:[%s3503_s23 + $0x364] ss:$16 sps:$4 sm:$0xff]  }
  0xa3   : > { %1720 = vmatprep.mubr.bf16.mxu0 %v3270_v14  ;;  %v3366_v14 = vld [vmem:[%s3503_s23 + $0x36c] ss:$16 sps:$4 sm:$0xff]  }
  0xa9   : > { %1432 = vmatmul.mubr.bf16.gmra.mrb[44].mxu1 %v3272_v15 }
  0xaa   : > { %1721 = vmatmul.mubr.bf16.gmra.mrb[44].mxu0 %v3273_v16  ;;  %1439 = vmatprep.mubr.bf16.mxu1 %v3274_v17 }
  0xab   : > { %1728 = vmatprep.mubr.bf16.mxu0 %v3276_v18  ;;  %v3368_v18 = vld [vmem:[%s3503_s23 + $0x360] ss:$16 sps:$4 sm:$0xff]  }
  0xb1   : > { %1440 = vmatmul.mubr.bf16.gmra.mrb[48].mxu1 %v3278_v19 }
  0xb2   : > { %1729 = vmatmul.mubr.bf16.gmra.mrb[48].mxu0 %v3279_v20  ;;  %1447 = vmatprep.mubr.bf16.mxu1 %v3280_v21 }
  0xb3   : > { %1736 = vmatprep.mubr.bf16.mxu0 %v3282_v22  ;;  %v3369_v22 = vld [vmem:[%s3503_s23 + $0x368] ss:$16 sps:$4 sm:$0xff]  }
  0xb9   : > { %1448 = vmatmul.mubr.bf16.gmra.mrb[52].mxu1 %v3284_v23  ;;  %v3370_v23 = vld [vmem:[%s3503_s23 + $0x384] ss:$16 sps:$4 sm:$0xff]  }
  0xba   : > { %1737 = vmatmul.mubr.bf16.gmra.mrb[52].mxu0 %v3285_v24  ;;  %1455 = vmatprep.mubr.bf16.mxu1 %v3286_v25 }
  0xbb   : > { %1744 = vmatprep.mubr.bf16.mxu0 %v3288_v26  ;;  %v3372_v26 = vld [vmem:[%s3503_s23 + $0x38c] ss:$16 sps:$4 sm:$0xff]  }
  0xc1   : > { %1456 = vmatmul.mubr.bf16.gmra.mrb[56].mxu1 %v3290_v27 }
  0xc2   : > { %1745 = vmatmul.mubr.bf16.gmra.mrb[56].mxu0 %v3291_v28  ;;  %1463 = vmatprep.mubr.bf16.mxu1 %v3292_v29 }
  0xc3   : > { %1752 = vmatprep.mubr.bf16.mxu0 %v3294_v30 }
  0xc9   : > { %1464 = vmatmul.mubr.bf16.gmra.mrb[60].mxu1 %v3296_v31 }
  0xca   : > { %1753 = vmatmul.mubr.bf16.gmra.mrb[60].mxu0 %v3297_v32  ;;  %1471 = vmatprep.mubr.bf16.mxu1 %v3298_v33 }
  0xcb   : > { %1760 = vmatprep.mubr.bf16.mxu0 %v3300_v34 }
  0xd1   : > { %1472 = vmatmul.mubr.bf16.gmra.mrb[64].mxu1 %v3302_v35 }
  0xd2   : > { %1761 = vmatmul.mubr.bf16.gmra.mrb[64].mxu0 %v3303_v36  ;;  %1479 = vmatprep.mubr.bf16.mxu1 %v3304_v37  ;;  %v3374_v37 = vld [vmem:[%s3503_s23 + $0x380] ss:$16 sps:$4 sm:$0xff]  }
  0xd3   : > { %1768 = vmatprep.mubr.bf16.mxu0 %v3306_v38 }
  0xd9   : > { %1480 = vmatmul.mubr.bf16.gmra.mrb[68].mxu1 %v3308_v39 }
  0xda   : > { %1769 = vmatmul.mubr.bf16.gmra.mrb[68].mxu0 %v3309_v40  ;;  %1487 = vmatprep.mubr.bf16.mxu1 %v3310_v41  ;;  %v3375_v41 = vld [vmem:[%s3503_s23 + $0x388] ss:$16 sps:$4 sm:$0xff]  }
  0xdb   : > { %1776 = vmatprep.mubr.bf16.mxu0 %v3312_v42 }
  0xe1   : > { %1488 = vmatmul.mubr.bf16.gmra.mrb[72].mxu1 %v3314_v43 }
  0xe2   : > { %1777 = vmatmul.mubr.bf16.gmra.mrb[72].mxu0 %v3315_v44  ;;  %1495 = vmatprep.mubr.bf16.mxu1 %v3316_v45  ;;  %v3376_v44 = vld [vmem:[%s3503_s23 + $0x3a4] ss:$16 sps:$4 sm:$0xff]   ;;  %v3378_v45 = vld [vmem:[%s3503_s23 + $0x3ac] ss:$16 sps:$4 sm:$0xff]  }
  0xe3   : > { %1784 = vmatprep.mubr.bf16.mxu0 %v3318_v46 }
  0xe9   : > { %1496 = vmatmul.mubr.bf16.gmra.mrb[76].mxu1 %v3320_v47 }
  0xea   : > { %1785 = vmatmul.mubr.bf16.gmra.mrb[76].mxu0 %v3321_v48  ;;  %1503 = vmatprep.mubr.bf16.mxu1 %v3322_v49 }
  0xeb   : > { %1792 = vmatprep.mubr.bf16.mxu0 %v3324_v50 }
  0xf1   : > { %1504 = vmatmul.mubr.bf16.gmra.mrb[80].mxu1 %v3326_v51 }
  0xf2   : > { %1793 = vmatmul.mubr.bf16.gmra.mrb[80].mxu0 %v3327_v52  ;;  %1511 = vmatprep.mubr.bf16.mxu1 %v3328_v53 }
  0xf3   : > { %1800 = vmatprep.mubr.bf16.mxu0 %v3330_v54 }
  0xf9   : > { %1512 = vmatmul.mubr.bf16.gmra.mrb[84].mxu1 %v3332_v55 }
  0xfa   : > { %1801 = vmatmul.mubr.bf16.gmra.mrb[84].mxu0 %v3333_v56  ;;  %1519 = vmatprep.mubr.bf16.mxu1 %v3334_v57 }
  0xfb   : > { %1808 = vmatprep.mubr.bf16.mxu0 %v3336_v58  ;;  %v3380_v58 = vld [vmem:[%s3503_s23 + $0x3a0] ss:$16 sps:$4 sm:$0xff]  }
 0x101   : > { %1520 = vmatmul.mubr.bf16.gmra.mrb[88].mxu1 %v3338_v59 }
 0x102   : > { %1809 = vmatmul.mubr.bf16.gmra.mrb[88].mxu0 %v3339_v60  ;;  %1527 = vmatprep.mubr.bf16.mxu1 %v3340_v61 }
 0x103   : > { %1816 = vmatprep.mubr.bf16.mxu0 %v3342_v62  ;;  %v3381_v62 = vld [vmem:[%s3503_s23 + $0x3a8] ss:$16 sps:$4 sm:$0xff]  }
 0x109   : > { %1528 = vmatmul.mubr.bf16.gmra.mrb[92].mxu1 %v3344_v63 }
 0x10a   : > { %1817 = vmatmul.mubr.bf16.gmra.mrb[92].mxu0 %v3345_v0  ;;  %1535 = vmatprep.mubr.bf16.mxu1 %v3346_v1  ;;  %v3382_v1 = vld [vmem:[%s3503_s23 + $0x3c4] ss:$16 sps:$4 sm:$0xff]  }
 0x10b   : > { %1824 = vmatprep.mubr.bf16.mxu0 %v3348_v2  ;;  %v3384_v2 = vld [vmem:[%s3503_s23 + $0x3cc] ss:$16 sps:$4 sm:$0xff]  }
 0x111   : > { %1536 = vmatmul.mubr.bf16.gmra.mrb[96].mxu1 %v3350_v3 }
 0x112   : > { %1825 = vmatmul.mubr.bf16.gmra.mrb[96].mxu0 %v3351_v4  ;;  %1543 = vmatprep.mubr.bf16.mxu1 %v3352_v5 }
 0x113   : > { %1832 = vmatprep.mubr.bf16.mxu0 %v3354_v6 }
 0x119   : > { %1544 = vmatmul.mubr.bf16.gmra.mrb[100].mxu1 %v3356_v7 }
 0x11a   : > { %1833 = vmatmul.mubr.bf16.gmra.mrb[100].mxu0 %v3357_v8  ;;  %1551 = vmatprep.mubr.bf16.mxu1 %v3358_v9 }
 0x11b   : > { %1840 = vmatprep.mubr.bf16.mxu0 %v3360_v10 }
 0x121   : > { %1552 = vmatmul.mubr.bf16.gmra.mrb[104].mxu1 %v3362_v11 }
 0x122   : > { %1841 = vmatmul.mubr.bf16.gmra.mrb[104].mxu0 %v3363_v12  ;;  %1559 = vmatprep.mubr.bf16.mxu1 %v3364_v13 }
 0x123   : > { %1848 = vmatprep.mubr.bf16.mxu0 %v3366_v14 }
 0x124   : > { %v1345_v15 = vpop.f32.mrb[0].mxu1 }
 0x125   : > { %v1634_v16 = vpop.f32.mrb[0].mxu0  ;;  %v1347_v17 = vpop.f32.mrb[1].mxu1 }
 0x126   : > { %v1635_v19 = vadd.f32 %v1634_v16, %v1345_v15  ;;  %v1636_v20 = vpop.f32.mrb[1].mxu0  ;;  %v1348_v21 = vpop.f32.mrb[2].mxu1  ;;  %v3386_v15 = vld [vmem:[%s3503_s23 + $0x3c0] ss:$16 sps:$4 sm:$0xff]  }
 0x127   : > { %v1637_v24 = vpop.f32.mrb[2].mxu0  ;;  %v1350_v25 = vpop.f32.mrb[3].mxu1 }
 0x128   : > { %v1638_v27 = vadd.f32 %v1637_v24, %v1348_v21  ;;  %v1639_v28 = vpop.f32.mrb[3].mxu0  ;;  %v2279_v29 = vmul.f32 %v1635_v19, %v1635_v19 }
 0x129   : > { %1560 = vmatmul.mubr.bf16.gmra.mrb[108].mxu1 %v3368_v18 }
 0x12a   : > { %v2893_v30 = vpack.c.bf16 %v1638_v27, %v1635_v19  ;;  %v2209_v31 = vadd.f32 %v1638_v27, %v1635_v19  ;;  %v2280_v32 = vmul.f32 %v1638_v27, %v1638_v27  ;;  %1849 = vmatmul.mubr.bf16.gmra.mrb[108].mxu0 %v3369_v22  ;;  %1567 = vmatprep.mubr.bf16.mxu1 %v3370_v23  ;;  %v3387_v19 = vld [vmem:[%s3503_s23 + $0x3c8] ss:$16 sps:$4 sm:$0xff]   ;;  %v3388_v22 = vld [vmem:[%s3503_s23 + $0x3e4] ss:$16 sps:$4 sm:$0xff]   ;;  %v3390_v23 = vld [vmem:[%s3503_s23 + $0x3ec] ss:$16 sps:$4 sm:$0xff]  }
 0x12b   : > { %1856 = vmatprep.mubr.bf16.mxu0 %v3372_v26 }
 0x12c   : > { %2894 = vst [vmem:[%s3656_s26] sm:$0xff] %v2893_v30   ;;  %v2343_v33 = vadd.f32 %v2280_v32, %v2279_v29  ;;  %v1353_v34 = vpop.f32.mrb[4].mxu1 }
 0x12d   : > { %v1642_v35 = vpop.f32.mrb[4].mxu0  ;;  %v1355_v36 = vpop.f32.mrb[5].mxu1 }
 0x12e   : > { %v1643_v38 = vadd.f32 %v1642_v35, %v1353_v34  ;;  %v1644_v39 = vpop.f32.mrb[5].mxu0  ;;  %v1356_v40 = vpop.f32.mrb[6].mxu1  ;;  %v3392_v36 = vld [vmem:[%s3503_s23 + $0x3e0] ss:$16 sps:$4 sm:$0xff]  }
 0x12f   : > { %v1645_v42 = vpop.f32.mrb[6].mxu0  ;;  %v1358_v43 = vpop.f32.mrb[7].mxu1 }
 0x130   : > { %v2210_v46 = vadd.f32 %v2209_v31, %v1643_v38  ;;  %v2281_v47 = vmul.f32 %v1643_v38, %v1643_v38  ;;  %v1646_v48 = vadd.f32 %v1645_v42, %v1356_v40  ;;  %v1647_v49 = vpop.f32.mrb[7].mxu0  ;;  %v3393_v40 = vld [vmem:[%s3503_s23 + $0x3e8] ss:$16 sps:$4 sm:$0xff]  }
 0x131   : > { %1568 = vmatmul.mubr.bf16.gmra.mrb[112].mxu1 %v3374_v37 }
 0x132   : > { %v2344_v50 = vadd.f32 %v2343_v33, %v2281_v47  ;;  %v2898_v51 = vpack.c.bf16 %v1646_v48, %v1643_v38  ;;  %v2211_v52 = vadd.f32 %v2210_v46, %v1646_v48  ;;  %v2282_v53 = vmul.f32 %v1646_v48, %v1646_v48  ;;  %1857 = vmatmul.mubr.bf16.gmra.mrb[112].mxu0 %v3375_v41 }
 0x133   : > { %1575 = vmatprep.mubr.bf16.mxu1 %v3376_v44  ;;  %1864 = vmatprep.mubr.bf16.mxu0 %v3378_v45 }
 0x134   : > { %3050 = vst [vmem:[%s3656_s26 + $0x8] sm:$0xff] %v2898_v51   ;;  %v2345_v54 = vadd.f32 %v2344_v50, %v2282_v53  ;;  %v1361_v55 = vpop.f32.mrb[8].mxu1 }
 0x135   : > { %v1650_v56 = vpop.f32.mrb[8].mxu0  ;;  %v1363_v57 = vpop.f32.mrb[9].mxu1 }
 0x136   : > { %v1651_v59 = vadd.f32 %v1650_v56, %v1361_v55  ;;  %v1652_v60 = vpop.f32.mrb[9].mxu0  ;;  %v1364_v61 = vpop.f32.mrb[10].mxu1 }
 0x137   : > { %v1653_v63 = vpop.f32.mrb[10].mxu0  ;;  %v1366_v0 = vpop.f32.mrb[11].mxu1 }
 0x138   : > { %v2212_v3 = vadd.f32 %v2211_v52, %v1651_v59  ;;  %v2283_v4 = vmul.f32 %v1651_v59, %v1651_v59  ;;  %v1654_v5 = vadd.f32 %v1653_v63, %v1364_v61  ;;  %v1655_v6 = vpop.f32.mrb[11].mxu0 }
 0x139   : > { %1576 = vmatmul.mubr.bf16.gmra.mrb[116].mxu1 %v3380_v58 }
 0x13a   : > { %v2346_v7 = vadd.f32 %v2345_v54, %v2283_v4  ;;  %v2903_v8 = vpack.c.bf16 %v1654_v5, %v1651_v59  ;;  %v2213_v9 = vadd.f32 %v2212_v3, %v1654_v5  ;;  %v2284_v10 = vmul.f32 %v1654_v5, %v1654_v5  ;;  %1865 = vmatmul.mubr.bf16.gmra.mrb[116].mxu0 %v3381_v62 }
 0x13b   : > { %1583 = vmatprep.mubr.bf16.mxu1 %v3382_v1  ;;  %1872 = vmatprep.mubr.bf16.mxu0 %v3384_v2 }
 0x13c   : > { %3051 = vst [vmem:[%s3656_s26 + $0x10] sm:$0xff] %v2903_v8   ;;  %v2347_v11 = vadd.f32 %v2346_v7, %v2284_v10  ;;  %v1369_v12 = vpop.f32.mrb[12].mxu1 }
 0x13d   : > { %v1658_v13 = vpop.f32.mrb[12].mxu0  ;;  %v1371_v14 = vpop.f32.mrb[13].mxu1 }
 0x13e   : > { %v1659_v16 = vadd.f32 %v1658_v13, %v1369_v12  ;;  %v1660_v17 = vpop.f32.mrb[13].mxu0  ;;  %v1372_v18 = vpop.f32.mrb[14].mxu1 }
 0x13f   : > { %v1661_v20 = vpop.f32.mrb[14].mxu0  ;;  %v1374_v21 = vpop.f32.mrb[15].mxu1 }
 0x140   : > { %v2214_v24 = vadd.f32 %v2213_v9, %v1659_v16  ;;  %v2285_v25 = vmul.f32 %v1659_v16, %v1659_v16  ;;  %v1662_v26 = vadd.f32 %v1661_v20, %v1372_v18  ;;  %v1663_v27 = vpop.f32.mrb[15].mxu0 }
 0x141   : > { %1584 = vmatmul.mubr.bf16.gmra.mrb[120].mxu1 %v3386_v15 }
 0x142   : > { %v2348_v28 = vadd.f32 %v2347_v11, %v2285_v25  ;;  %v2908_v29 = vpack.c.bf16 %v1662_v26, %v1659_v16  ;;  %v2215_v30 = vadd.f32 %v2214_v24, %v1662_v26  ;;  %v2286_v31 = vmul.f32 %v1662_v26, %v1662_v26  ;;  %1873 = vmatmul.mubr.bf16.gmra.mrb[120].mxu0 %v3387_v19 }
 0x143   : > { %1591 = vmatprep.mubr.bf16.mxu1 %v3388_v22  ;;  %1880 = vmatprep.mubr.bf16.mxu0 %v3390_v23 }
 0x144   : > { %3052 = vst [vmem:[%s3656_s26 + $0x18] sm:$0xff] %v2908_v29   ;;  %v2349_v32 = vadd.f32 %v2348_v28, %v2286_v31  ;;  %v1377_v33 = vpop.f32.mrb[16].mxu1 }
 0x145   : > { %v1666_v34 = vpop.f32.mrb[16].mxu0  ;;  %v1379_v35 = vpop.f32.mrb[17].mxu1 }
 0x146   : > { %v1667_v37 = vadd.f32 %v1666_v34, %v1377_v33  ;;  %v1668_v38 = vpop.f32.mrb[17].mxu0  ;;  %v1380_v39 = vpop.f32.mrb[18].mxu1 }
 0x147   : > { %v1669_v41 = vpop.f32.mrb[18].mxu0  ;;  %v1382_v42 = vpop.f32.mrb[19].mxu1 }
 0x148   : > { %v2216_v43 = vadd.f32 %v2215_v30, %v1667_v37  ;;  %v2287_v44 = vmul.f32 %v1667_v37, %v1667_v37  ;;  %v1670_v45 = vadd.f32 %v1669_v41, %v1380_v39  ;;  %v1671_v46 = vpop.f32.mrb[19].mxu0 }
 0x149   : > { %1592 = vmatmul.mubr.bf16.gmra.mrb[124].mxu1 %v3392_v36 }
 0x14a   : > { %v2350_v47 = vadd.f32 %v2349_v32, %v2287_v44  ;;  %v2913_v48 = vpack.c.bf16 %v1670_v45, %v1667_v37  ;;  %v2217_v49 = vadd.f32 %v2216_v43, %v1670_v45  ;;  %v2288_v50 = vmul.f32 %v1670_v45, %v1670_v45  ;;  %1881 = vmatmul.mubr.bf16.gmra.mrb[124].mxu0 %v3393_v40 }
 0x14c   : > { %3053 = vst [vmem:[%s3656_s26 + $0x20] sm:$0xff] %v2913_v48   ;;  %v2351_v51 = vadd.f32 %v2350_v47, %v2288_v50  ;;  %v1385_v52 = vpop.f32.mrb[20].mxu1 }
 0x14d   : > { %v1674_v53 = vpop.f32.mrb[20].mxu0  ;;  %v1387_v54 = vpop.f32.mrb[21].mxu1 }
 0x14e   : > { %v1675_v55 = vadd.f32 %v1674_v53, %v1385_v52  ;;  %v1676_v56 = vpop.f32.mrb[21].mxu0  ;;  %v1388_v57 = vpop.f32.mrb[22].mxu1 }
 0x14f   : > { %v1677_v58 = vpop.f32.mrb[22].mxu0  ;;  %v1390_v59 = vpop.f32.mrb[23].mxu1 }
 0x150   : > { %v2218_v60 = vadd.f32 %v2217_v49, %v1675_v55  ;;  %v2289_v61 = vmul.f32 %v1675_v55, %v1675_v55  ;;  %v1678_v62 = vadd.f32 %v1677_v58, %v1388_v57  ;;  %v1679_v63 = vpop.f32.mrb[23].mxu0 }
 0x152   : > { %v2352_v0 = vadd.f32 %v2351_v51, %v2289_v61  ;;  %v2918_v1 = vpack.c.bf16 %v1678_v62, %v1675_v55  ;;  %v2219_v2 = vadd.f32 %v2218_v60, %v1678_v62  ;;  %v2290_v3 = vmul.f32 %v1678_v62, %v1678_v62 }
 0x154   : > { %3054 = vst [vmem:[%s3656_s26 + $0x28] sm:$0xff] %v2918_v1   ;;  %v2353_v4 = vadd.f32 %v2352_v0, %v2290_v3  ;;  %v1393_v5 = vpop.f32.mrb[24].mxu1 }
 0x155   : > { %v1682_v6 = vpop.f32.mrb[24].mxu0  ;;  %v1395_v7 = vpop.f32.mrb[25].mxu1 }
 0x156   : > { %v1683_v8 = vadd.f32 %v1682_v6, %v1393_v5  ;;  %v1684_v9 = vpop.f32.mrb[25].mxu0  ;;  %v1396_v10 = vpop.f32.mrb[26].mxu1 }
 0x157   : > { %v1685_v11 = vpop.f32.mrb[26].mxu0  ;;  %v1398_v12 = vpop.f32.mrb[27].mxu1 }
 0x158   : > { %v2220_v13 = vadd.f32 %v2219_v2, %v1683_v8  ;;  %v2291_v14 = vmul.f32 %v1683_v8, %v1683_v8  ;;  %v1686_v15 = vadd.f32 %v1685_v11, %v1396_v10  ;;  %v1687_v16 = vpop.f32.mrb[27].mxu0 }
 0x15a   : > { %v2354_v17 = vadd.f32 %v2353_v4, %v2291_v14  ;;  %v2923_v18 = vpack.c.bf16 %v1686_v15, %v1683_v8  ;;  %v2221_v19 = vadd.f32 %v2220_v13, %v1686_v15  ;;  %v2292_v20 = vmul.f32 %v1686_v15, %v1686_v15 }
 0x15c   : > { %3055 = vst [vmem:[%s3656_s26 + $0x30] sm:$0xff] %v2923_v18   ;;  %v2355_v21 = vadd.f32 %v2354_v17, %v2292_v20  ;;  %v1401_v22 = vpop.f32.mrb[28].mxu1 }
 0x15d   : > { %v1690_v23 = vpop.f32.mrb[28].mxu0  ;;  %v1403_v24 = vpop.f32.mrb[29].mxu1 }
 0x15e   : > { %v1691_v25 = vadd.f32 %v1690_v23, %v1401_v22  ;;  %v1692_v26 = vpop.f32.mrb[29].mxu0  ;;  %v1404_v27 = vpop.f32.mrb[30].mxu1 }
 0x15f   : > { %v1693_v28 = vpop.f32.mrb[30].mxu0  ;;  %v1406_v29 = vpop.f32.mrb[31].mxu1 }
 0x160   : > { %v2222_v30 = vadd.f32 %v2221_v19, %v1691_v25  ;;  %v2293_v31 = vmul.f32 %v1691_v25, %v1691_v25  ;;  %v1694_v32 = vadd.f32 %v1693_v28, %v1404_v27  ;;  %v1695_v33 = vpop.f32.mrb[31].mxu0 }
 0x162   : > { %v2356_v34 = vadd.f32 %v2355_v21, %v2293_v31  ;;  %v2928_v35 = vpack.c.bf16 %v1694_v32, %v1691_v25  ;;  %v2223_v36 = vadd.f32 %v2222_v30, %v1694_v32  ;;  %v2294_v37 = vmul.f32 %v1694_v32, %v1694_v32 }
 0x164   : > { %3056 = vst [vmem:[%s3656_s26 + $0x38] sm:$0xff] %v2928_v35   ;;  %v2357_v38 = vadd.f32 %v2356_v34, %v2294_v37  ;;  %v1409_v39 = vpop.f32.mrb[32].mxu1 }
 0x165   : > { %v1698_v40 = vpop.f32.mrb[32].mxu0  ;;  %v1411_v41 = vpop.f32.mrb[33].mxu1 }
 0x166   : > { %v1699_v42 = vadd.f32 %v1698_v40, %v1409_v39  ;;  %v1700_v43 = vpop.f32.mrb[33].mxu0  ;;  %v1412_v44 = vpop.f32.mrb[34].mxu1 }
 0x167   : > { %v1701_v45 = vpop.f32.mrb[34].mxu0  ;;  %v1414_v46 = vpop.f32.mrb[35].mxu1 }
 0x168   : > { %v2224_v47 = vadd.f32 %v2223_v36, %v1699_v42  ;;  %v2295_v48 = vmul.f32 %v1699_v42, %v1699_v42  ;;  %v1702_v49 = vadd.f32 %v1701_v45, %v1412_v44  ;;  %v1703_v50 = vpop.f32.mrb[35].mxu0 }
 0x16a   : > { %v2358_v51 = vadd.f32 %v2357_v38, %v2295_v48  ;;  %v2933_v52 = vpack.c.bf16 %v1702_v49, %v1699_v42  ;;  %v2225_v53 = vadd.f32 %v2224_v47, %v1702_v49  ;;  %v2296_v54 = vmul.f32 %v1702_v49, %v1702_v49 }
 0x16c   : > { %3057 = vst [vmem:[%s3656_s26 + $0x40] sm:$0xff] %v2933_v52   ;;  %v2359_v55 = vadd.f32 %v2358_v51, %v2296_v54  ;;  %v1417_v56 = vpop.f32.mrb[36].mxu1 }
 0x16d   : > { %v1706_v57 = vpop.f32.mrb[36].mxu0  ;;  %v1419_v58 = vpop.f32.mrb[37].mxu1 }
 0x16e   : > { %v1707_v59 = vadd.f32 %v1706_v57, %v1417_v56  ;;  %v1708_v60 = vpop.f32.mrb[37].mxu0  ;;  %v1420_v61 = vpop.f32.mrb[38].mxu1 }
 0x16f   : > { %v1709_v62 = vpop.f32.mrb[38].mxu0  ;;  %v1422_v63 = vpop.f32.mrb[39].mxu1 }
 0x170   : > { %v2226_v0 = vadd.f32 %v2225_v53, %v1707_v59  ;;  %v2297_v1 = vmul.f32 %v1707_v59, %v1707_v59  ;;  %v1710_v2 = vadd.f32 %v1709_v62, %v1420_v61  ;;  %v1711_v3 = vpop.f32.mrb[39].mxu0 }
 0x172   : > { %v2360_v4 = vadd.f32 %v2359_v55, %v2297_v1  ;;  %v2938_v5 = vpack.c.bf16 %v1710_v2, %v1707_v59  ;;  %v2227_v6 = vadd.f32 %v2226_v0, %v1710_v2  ;;  %v2298_v7 = vmul.f32 %v1710_v2, %v1710_v2 }
 0x174   : > { %3058 = vst [vmem:[%s3656_s26 + $0x48] sm:$0xff] %v2938_v5   ;;  %v2361_v8 = vadd.f32 %v2360_v4, %v2298_v7  ;;  %v1425_v9 = vpop.f32.mrb[40].mxu1 }
 0x175   : > { %v1714_v10 = vpop.f32.mrb[40].mxu0  ;;  %v1427_v11 = vpop.f32.mrb[41].mxu1 }
 0x176   : > { %v1715_v12 = vadd.f32 %v1714_v10, %v1425_v9  ;;  %v1716_v13 = vpop.f32.mrb[41].mxu0  ;;  %v1428_v14 = vpop.f32.mrb[42].mxu1 }
 0x177   : > { %v1717_v15 = vpop.f32.mrb[42].mxu0  ;;  %v1430_v16 = vpop.f32.mrb[43].mxu1 }
 0x178   : > { %v2228_v17 = vadd.f32 %v2227_v6, %v1715_v12  ;;  %v2299_v18 = vmul.f32 %v1715_v12, %v1715_v12  ;;  %v1718_v19 = vadd.f32 %v1717_v15, %v1428_v14  ;;  %v1719_v20 = vpop.f32.mrb[43].mxu0 }
 0x17a   : > { %v2362_v21 = vadd.f32 %v2361_v8, %v2299_v18  ;;  %v2943_v22 = vpack.c.bf16 %v1718_v19, %v1715_v12  ;;  %v2229_v23 = vadd.f32 %v2228_v17, %v1718_v19  ;;  %v2300_v24 = vmul.f32 %v1718_v19, %v1718_v19 }
 0x17c   : > { %3059 = vst [vmem:[%s3656_s26 + $0x50] sm:$0xff] %v2943_v22   ;;  %v2363_v25 = vadd.f32 %v2362_v21, %v2300_v24  ;;  %v1433_v26 = vpop.f32.mrb[44].mxu1 }
 0x17d   : > { %v1722_v27 = vpop.f32.mrb[44].mxu0  ;;  %v1435_v28 = vpop.f32.mrb[45].mxu1 }
 0x17e   : > { %v1723_v29 = vadd.f32 %v1722_v27, %v1433_v26  ;;  %v1724_v30 = vpop.f32.mrb[45].mxu0  ;;  %v1436_v31 = vpop.f32.mrb[46].mxu1 }
 0x17f   : > { %v1725_v32 = vpop.f32.mrb[46].mxu0  ;;  %v1438_v33 = vpop.f32.mrb[47].mxu1 }
 0x180   : > { %v2230_v34 = vadd.f32 %v2229_v23, %v1723_v29  ;;  %v2301_v35 = vmul.f32 %v1723_v29, %v1723_v29  ;;  %v1726_v36 = vadd.f32 %v1725_v32, %v1436_v31  ;;  %v1727_v37 = vpop.f32.mrb[47].mxu0 }
 0x182   : > { %v2364_v38 = vadd.f32 %v2363_v25, %v2301_v35  ;;  %v2948_v39 = vpack.c.bf16 %v1726_v36, %v1723_v29  ;;  %v2231_v40 = vadd.f32 %v2230_v34, %v1726_v36  ;;  %v2302_v41 = vmul.f32 %v1726_v36, %v1726_v36 }
 0x184   : > { %3060 = vst [vmem:[%s3656_s26 + $0x58] sm:$0xff] %v2948_v39   ;;  %v2365_v42 = vadd.f32 %v2364_v38, %v2302_v41  ;;  %v1441_v43 = vpop.f32.mrb[48].mxu1 }
 0x185   : > { %v1730_v44 = vpop.f32.mrb[48].mxu0  ;;  %v1443_v45 = vpop.f32.mrb[49].mxu1 }
 0x186   : > { %v1731_v46 = vadd.f32 %v1730_v44, %v1441_v43  ;;  %v1732_v47 = vpop.f32.mrb[49].mxu0  ;;  %v1444_v48 = vpop.f32.mrb[50].mxu1 }
 0x187   : > { %v1733_v49 = vpop.f32.mrb[50].mxu0  ;;  %v1446_v50 = vpop.f32.mrb[51].mxu1 }
 0x188   : > { %v2232_v51 = vadd.f32 %v2231_v40, %v1731_v46  ;;  %v2303_v52 = vmul.f32 %v1731_v46, %v1731_v46  ;;  %v1734_v53 = vadd.f32 %v1733_v49, %v1444_v48  ;;  %v1735_v54 = vpop.f32.mrb[51].mxu0 }
 0x18a   : > { %v2366_v55 = vadd.f32 %v2365_v42, %v2303_v52  ;;  %v2953_v56 = vpack.c.bf16 %v1734_v53, %v1731_v46  ;;  %v2233_v57 = vadd.f32 %v2232_v51, %v1734_v53  ;;  %v2304_v58 = vmul.f32 %v1734_v53, %v1734_v53 }
 0x18c   : > { %3061 = vst [vmem:[%s3656_s26 + $0x60] sm:$0xff] %v2953_v56   ;;  %v2367_v59 = vadd.f32 %v2366_v55, %v2304_v58  ;;  %v1449_v60 = vpop.f32.mrb[52].mxu1 }
 0x18d   : > { %v1738_v61 = vpop.f32.mrb[52].mxu0  ;;  %v1451_v62 = vpop.f32.mrb[53].mxu1 }
 0x18e   : > { %v1739_v63 = vadd.f32 %v1738_v61, %v1449_v60  ;;  %v1740_v0 = vpop.f32.mrb[53].mxu0  ;;  %v1452_v1 = vpop.f32.mrb[54].mxu1 }
 0x18f   : > { %v1741_v2 = vpop.f32.mrb[54].mxu0  ;;  %v1454_v3 = vpop.f32.mrb[55].mxu1 }
 0x190   : > { %v2234_v4 = vadd.f32 %v2233_v57, %v1739_v63  ;;  %v2305_v5 = vmul.f32 %v1739_v63, %v1739_v63  ;;  %v1742_v6 = vadd.f32 %v1741_v2, %v1452_v1  ;;  %v1743_v7 = vpop.f32.mrb[55].mxu0 }
 0x192   : > { %v2368_v8 = vadd.f32 %v2367_v59, %v2305_v5  ;;  %v2958_v9 = vpack.c.bf16 %v1742_v6, %v1739_v63  ;;  %v2235_v10 = vadd.f32 %v2234_v4, %v1742_v6  ;;  %v2306_v11 = vmul.f32 %v1742_v6, %v1742_v6 }
 0x194   : > { %3062 = vst [vmem:[%s3656_s26 + $0x68] sm:$0xff] %v2958_v9   ;;  %v2369_v12 = vadd.f32 %v2368_v8, %v2306_v11  ;;  %v1457_v13 = vpop.f32.mrb[56].mxu1 }
 0x195   : > { %v1746_v14 = vpop.f32.mrb[56].mxu0  ;;  %v1459_v15 = vpop.f32.mrb[57].mxu1 }
 0x196   : > { %v1747_v16 = vadd.f32 %v1746_v14, %v1457_v13  ;;  %v1748_v17 = vpop.f32.mrb[57].mxu0  ;;  %v1460_v18 = vpop.f32.mrb[58].mxu1 }
 0x197   : > { %v1749_v19 = vpop.f32.mrb[58].mxu0  ;;  %v1462_v20 = vpop.f32.mrb[59].mxu1 }
 0x198   : > { %v2236_v21 = vadd.f32 %v2235_v10, %v1747_v16  ;;  %v2307_v22 = vmul.f32 %v1747_v16, %v1747_v16  ;;  %v1750_v23 = vadd.f32 %v1749_v19, %v1460_v18  ;;  %v1751_v24 = vpop.f32.mrb[59].mxu0 }
 0x19a   : > { %v2370_v25 = vadd.f32 %v2369_v12, %v2307_v22  ;;  %v2963_v26 = vpack.c.bf16 %v1750_v23, %v1747_v16  ;;  %v2237_v27 = vadd.f32 %v2236_v21, %v1750_v23  ;;  %v2308_v28 = vmul.f32 %v1750_v23, %v1750_v23 }
 0x19c   : > { %3063 = vst [vmem:[%s3656_s26 + $0x70] sm:$0xff] %v2963_v26   ;;  %v2371_v29 = vadd.f32 %v2370_v25, %v2308_v28  ;;  %v1465_v30 = vpop.f32.mrb[60].mxu1 }
 0x19d   : > { %v1754_v31 = vpop.f32.mrb[60].mxu0  ;;  %v1467_v32 = vpop.f32.mrb[61].mxu1 }
 0x19e   : > { %v1755_v33 = vadd.f32 %v1754_v31, %v1465_v30  ;;  %v1756_v34 = vpop.f32.mrb[61].mxu0  ;;  %v1468_v35 = vpop.f32.mrb[62].mxu1 }
 0x19f   : > { %v1757_v36 = vpop.f32.mrb[62].mxu0  ;;  %v1470_v37 = vpop.f32.mrb[63].mxu1 }
 0x1a0   : > { %v2238_v38 = vadd.f32 %v2237_v27, %v1755_v33  ;;  %v2309_v39 = vmul.f32 %v1755_v33, %v1755_v33  ;;  %v1758_v40 = vadd.f32 %v1757_v36, %v1468_v35  ;;  %v1759_v41 = vpop.f32.mrb[63].mxu0 }
 0x1a2   : > { %v2372_v42 = vadd.f32 %v2371_v29, %v2309_v39  ;;  %v2968_v43 = vpack.c.bf16 %v1758_v40, %v1755_v33  ;;  %v2239_v44 = vadd.f32 %v2238_v38, %v1758_v40  ;;  %v2310_v45 = vmul.f32 %v1758_v40, %v1758_v40 }
 0x1a4   : > { %3064 = vst [vmem:[%s3656_s26 + $0x78] sm:$0xff] %v2968_v43   ;;  %v2373_v46 = vadd.f32 %v2372_v42, %v2310_v45  ;;  %v1473_v47 = vpop.f32.mrb[64].mxu1 }
 0x1a5   : > { %v1762_v48 = vpop.f32.mrb[64].mxu0  ;;  %v1475_v49 = vpop.f32.mrb[65].mxu1 }
 0x1a6   : > { %v1763_v50 = vadd.f32 %v1762_v48, %v1473_v47  ;;  %v1764_v51 = vpop.f32.mrb[65].mxu0  ;;  %v1476_v52 = vpop.f32.mrb[66].mxu1 }
 0x1a7   : > { %v1765_v53 = vpop.f32.mrb[66].mxu0  ;;  %v1478_v54 = vpop.f32.mrb[67].mxu1 }
 0x1a8   : > { %v2240_v55 = vadd.f32 %v2239_v44, %v1763_v50  ;;  %v2311_v56 = vmul.f32 %v1763_v50, %v1763_v50  ;;  %v1766_v57 = vadd.f32 %v1765_v53, %v1476_v52  ;;  %v1767_v58 = vpop.f32.mrb[67].mxu0 }
 0x1aa   : > { %v2374_v59 = vadd.f32 %v2373_v46, %v2311_v56  ;;  %v2973_v60 = vpack.c.bf16 %v1766_v57, %v1763_v50  ;;  %v2241_v61 = vadd.f32 %v2240_v55, %v1766_v57  ;;  %v2312_v62 = vmul.f32 %v1766_v57, %v1766_v57 }
 0x1ac   : > { %3065 = vst [vmem:[%s3656_s26 + $0x80] sm:$0xff] %v2973_v60   ;;  %v2375_v63 = vadd.f32 %v2374_v59, %v2312_v62  ;;  %v1481_v0 = vpop.f32.mrb[68].mxu1 }
 0x1ad   : > { %v1770_v1 = vpop.f32.mrb[68].mxu0  ;;  %v1483_v2 = vpop.f32.mrb[69].mxu1 }
 0x1ae   : > { %v1771_v3 = vadd.f32 %v1770_v1, %v1481_v0  ;;  %v1772_v4 = vpop.f32.mrb[69].mxu0  ;;  %v1484_v5 = vpop.f32.mrb[70].mxu1 }
 0x1af   : > { %v1773_v6 = vpop.f32.mrb[70].mxu0  ;;  %v1486_v7 = vpop.f32.mrb[71].mxu1 }
 0x1b0   : > { %v2242_v8 = vadd.f32 %v2241_v61, %v1771_v3  ;;  %v2313_v9 = vmul.f32 %v1771_v3, %v1771_v3  ;;  %v1774_v10 = vadd.f32 %v1773_v6, %v1484_v5  ;;  %v1775_v11 = vpop.f32.mrb[71].mxu0 }
 0x1b2   : > { %v2376_v12 = vadd.f32 %v2375_v63, %v2313_v9  ;;  %v2978_v13 = vpack.c.bf16 %v1774_v10, %v1771_v3  ;;  %v2243_v14 = vadd.f32 %v2242_v8, %v1774_v10  ;;  %v2314_v15 = vmul.f32 %v1774_v10, %v1774_v10 }
 0x1b4   : > { %3066 = vst [vmem:[%s3656_s26 + $0x88] sm:$0xff] %v2978_v13   ;;  %v2377_v16 = vadd.f32 %v2376_v12, %v2314_v15  ;;  %v1489_v17 = vpop.f32.mrb[72].mxu1 }
 0x1b5   : > { %v1778_v18 = vpop.f32.mrb[72].mxu0  ;;  %v1491_v19 = vpop.f32.mrb[73].mxu1 }
 0x1b6   : > { %v1779_v20 = vadd.f32 %v1778_v18, %v1489_v17  ;;  %v1780_v21 = vpop.f32.mrb[73].mxu0  ;;  %v1492_v22 = vpop.f32.mrb[74].mxu1 }
 0x1b7   : > { %v1781_v23 = vpop.f32.mrb[74].mxu0  ;;  %v1494_v24 = vpop.f32.mrb[75].mxu1 }
 0x1b8   : > { %v2244_v25 = vadd.f32 %v2243_v14, %v1779_v20  ;;  %v2315_v26 = vmul.f32 %v1779_v20, %v1779_v20  ;;  %v1782_v27 = vadd.f32 %v1781_v23, %v1492_v22  ;;  %v1783_v28 = vpop.f32.mrb[75].mxu0 }
 0x1ba   : > { %v2378_v29 = vadd.f32 %v2377_v16, %v2315_v26  ;;  %v2983_v30 = vpack.c.bf16 %v1782_v27, %v1779_v20  ;;  %v2245_v31 = vadd.f32 %v2244_v25, %v1782_v27  ;;  %v2316_v32 = vmul.f32 %v1782_v27, %v1782_v27 }
 0x1bc   : > { %3067 = vst [vmem:[%s3656_s26 + $0x90] sm:$0xff] %v2983_v30   ;;  %v2379_v33 = vadd.f32 %v2378_v29, %v2316_v32  ;;  %v1497_v34 = vpop.f32.mrb[76].mxu1 }
 0x1bd   : > { %v1786_v35 = vpop.f32.mrb[76].mxu0  ;;  %v1499_v36 = vpop.f32.mrb[77].mxu1 }
 0x1be   : > { %v1787_v37 = vadd.f32 %v1786_v35, %v1497_v34  ;;  %v1788_v38 = vpop.f32.mrb[77].mxu0  ;;  %v1500_v39 = vpop.f32.mrb[78].mxu1 }
 0x1bf   : > { %v1789_v40 = vpop.f32.mrb[78].mxu0  ;;  %v1502_v41 = vpop.f32.mrb[79].mxu1 }
 0x1c0   : > { %v2246_v42 = vadd.f32 %v2245_v31, %v1787_v37  ;;  %v2317_v43 = vmul.f32 %v1787_v37, %v1787_v37  ;;  %v1790_v44 = vadd.f32 %v1789_v40, %v1500_v39  ;;  %v1791_v45 = vpop.f32.mrb[79].mxu0 }
 0x1c2   : > { %v2380_v46 = vadd.f32 %v2379_v33, %v2317_v43  ;;  %v2988_v47 = vpack.c.bf16 %v1790_v44, %v1787_v37  ;;  %v2247_v48 = vadd.f32 %v2246_v42, %v1790_v44  ;;  %v2318_v49 = vmul.f32 %v1790_v44, %v1790_v44 }
 0x1c4   : > { %3068 = vst [vmem:[%s3656_s26 + $0x98] sm:$0xff] %v2988_v47   ;;  %v2381_v50 = vadd.f32 %v2380_v46, %v2318_v49  ;;  %v1505_v51 = vpop.f32.mrb[80].mxu1 }
 0x1c5   : > { %v1794_v52 = vpop.f32.mrb[80].mxu0  ;;  %v1507_v53 = vpop.f32.mrb[81].mxu1 }
 0x1c6   : > { %v1795_v54 = vadd.f32 %v1794_v52, %v1505_v51  ;;  %v1796_v55 = vpop.f32.mrb[81].mxu0  ;;  %v1508_v56 = vpop.f32.mrb[82].mxu1 }
 0x1c7   : > { %v1797_v57 = vpop.f32.mrb[82].mxu0  ;;  %v1510_v58 = vpop.f32.mrb[83].mxu1 }
 0x1c8   : > { %v2248_v59 = vadd.f32 %v2247_v48, %v1795_v54  ;;  %v2319_v60 = vmul.f32 %v1795_v54, %v1795_v54  ;;  %v1798_v61 = vadd.f32 %v1797_v57, %v1508_v56  ;;  %v1799_v62 = vpop.f32.mrb[83].mxu0 }
 0x1ca   : > { %v2382_v63 = vadd.f32 %v2381_v50, %v2319_v60  ;;  %v2993_v0 = vpack.c.bf16 %v1798_v61, %v1795_v54  ;;  %v2249_v1 = vadd.f32 %v2248_v59, %v1798_v61  ;;  %v2320_v2 = vmul.f32 %v1798_v61, %v1798_v61 }
 0x1cc   : > { %3069 = vst [vmem:[%s3656_s26 + $0xa0] sm:$0xff] %v2993_v0   ;;  %v2383_v3 = vadd.f32 %v2382_v63, %v2320_v2  ;;  %v1513_v4 = vpop.f32.mrb[84].mxu1 }
 0x1cd   : > { %v1802_v5 = vpop.f32.mrb[84].mxu0  ;;  %v1515_v6 = vpop.f32.mrb[85].mxu1 }
 0x1ce   : > { %v1803_v7 = vadd.f32 %v1802_v5, %v1513_v4  ;;  %v1804_v8 = vpop.f32.mrb[85].mxu0  ;;  %v1516_v9 = vpop.f32.mrb[86].mxu1 }
 0x1cf   : > { %v1805_v10 = vpop.f32.mrb[86].mxu0  ;;  %v1518_v11 = vpop.f32.mrb[87].mxu1 }
 0x1d0   : > { %v2250_v12 = vadd.f32 %v2249_v1, %v1803_v7  ;;  %v2321_v13 = vmul.f32 %v1803_v7, %v1803_v7  ;;  %v1806_v14 = vadd.f32 %v1805_v10, %v1516_v9  ;;  %v1807_v15 = vpop.f32.mrb[87].mxu0 }
 0x1d2   : > { %v2384_v16 = vadd.f32 %v2383_v3, %v2321_v13  ;;  %v2998_v17 = vpack.c.bf16 %v1806_v14, %v1803_v7  ;;  %v2251_v18 = vadd.f32 %v2250_v12, %v1806_v14  ;;  %v2322_v19 = vmul.f32 %v1806_v14, %v1806_v14 }
 0x1d4   : > { %3070 = vst [vmem:[%s3656_s26 + $0xa8] sm:$0xff] %v2998_v17   ;;  %v2385_v20 = vadd.f32 %v2384_v16, %v2322_v19  ;;  %v1521_v21 = vpop.f32.mrb[88].mxu1 }
 0x1d5   : > { %v1810_v22 = vpop.f32.mrb[88].mxu0  ;;  %v1523_v23 = vpop.f32.mrb[89].mxu1 }
 0x1d6   : > { %v1811_v24 = vadd.f32 %v1810_v22, %v1521_v21  ;;  %v1812_v25 = vpop.f32.mrb[89].mxu0  ;;  %v1524_v26 = vpop.f32.mrb[90].mxu1 }
 0x1d7   : > { %v1813_v27 = vpop.f32.mrb[90].mxu0  ;;  %v1526_v28 = vpop.f32.mrb[91].mxu1 }
 0x1d8   : > { %v2252_v29 = vadd.f32 %v2251_v18, %v1811_v24  ;;  %v2323_v30 = vmul.f32 %v1811_v24, %v1811_v24  ;;  %v1814_v31 = vadd.f32 %v1813_v27, %v1524_v26  ;;  %v1815_v32 = vpop.f32.mrb[91].mxu0 }
 0x1da   : > { %v2386_v33 = vadd.f32 %v2385_v20, %v2323_v30  ;;  %v3003_v34 = vpack.c.bf16 %v1814_v31, %v1811_v24  ;;  %v2253_v35 = vadd.f32 %v2252_v29, %v1814_v31  ;;  %v2324_v36 = vmul.f32 %v1814_v31, %v1814_v31 }
 0x1dc   : > { %3071 = vst [vmem:[%s3656_s26 + $0xb0] sm:$0xff] %v3003_v34   ;;  %v2387_v37 = vadd.f32 %v2386_v33, %v2324_v36  ;;  %v1529_v38 = vpop.f32.mrb[92].mxu1 }
 0x1dd   : > { %v1818_v39 = vpop.f32.mrb[92].mxu0  ;;  %v1531_v40 = vpop.f32.mrb[93].mxu1 }
 0x1de   : > { %v1819_v41 = vadd.f32 %v1818_v39, %v1529_v38  ;;  %v1820_v42 = vpop.f32.mrb[93].mxu0  ;;  %v1532_v43 = vpop.f32.mrb[94].mxu1 }
 0x1df   : > { %v1821_v44 = vpop.f32.mrb[94].mxu0  ;;  %v1534_v45 = vpop.f32.mrb[95].mxu1 }
 0x1e0   : > { %v2254_v46 = vadd.f32 %v2253_v35, %v1819_v41  ;;  %v2325_v47 = vmul.f32 %v1819_v41, %v1819_v41  ;;  %v1822_v48 = vadd.f32 %v1821_v44, %v1532_v43  ;;  %v1823_v49 = vpop.f32.mrb[95].mxu0 }
 0x1e2   : > { %v2388_v50 = vadd.f32 %v2387_v37, %v2325_v47  ;;  %v3008_v51 = vpack.c.bf16 %v1822_v48, %v1819_v41  ;;  %v2255_v52 = vadd.f32 %v2254_v46, %v1822_v48  ;;  %v2326_v53 = vmul.f32 %v1822_v48, %v1822_v48 }
 0x1e4   : > { %3072 = vst [vmem:[%s3656_s26 + $0xb8] sm:$0xff] %v3008_v51   ;;  %v2389_v54 = vadd.f32 %v2388_v50, %v2326_v53  ;;  %v1537_v55 = vpop.f32.mrb[96].mxu1 }
 0x1e5   : > { %v1826_v56 = vpop.f32.mrb[96].mxu0  ;;  %v1539_v57 = vpop.f32.mrb[97].mxu1 }
 0x1e6   : > { %v1827_v58 = vadd.f32 %v1826_v56, %v1537_v55  ;;  %v1828_v59 = vpop.f32.mrb[97].mxu0  ;;  %v1540_v60 = vpop.f32.mrb[98].mxu1 }
 0x1e7   : > { %v1829_v61 = vpop.f32.mrb[98].mxu0  ;;  %v1542_v62 = vpop.f32.mrb[99].mxu1 }
 0x1e8   : > { %v2256_v63 = vadd.f32 %v2255_v52, %v1827_v58  ;;  %v2327_v0 = vmul.f32 %v1827_v58, %v1827_v58  ;;  %v1830_v1 = vadd.f32 %v1829_v61, %v1540_v60  ;;  %v1831_v2 = vpop.f32.mrb[99].mxu0 }
 0x1ea   : > { %v2390_v3 = vadd.f32 %v2389_v54, %v2327_v0  ;;  %v3013_v4 = vpack.c.bf16 %v1830_v1, %v1827_v58  ;;  %v2257_v5 = vadd.f32 %v2256_v63, %v1830_v1  ;;  %v2328_v6 = vmul.f32 %v1830_v1, %v1830_v1 }
 0x1ec   : > { %3073 = vst [vmem:[%s3656_s26 + $0xc0] sm:$0xff] %v3013_v4   ;;  %v2391_v7 = vadd.f32 %v2390_v3, %v2328_v6  ;;  %v1545_v8 = vpop.f32.mrb[100].mxu1 }
 0x1ed   : > { %v1834_v9 = vpop.f32.mrb[100].mxu0  ;;  %v1547_v10 = vpop.f32.mrb[101].mxu1 }
 0x1ee   : > { %v1835_v11 = vadd.f32 %v1834_v9, %v1545_v8  ;;  %v1836_v12 = vpop.f32.mrb[101].mxu0  ;;  %v1548_v13 = vpop.f32.mrb[102].mxu1 }
 0x1ef   : > { %v1837_v14 = vpop.f32.mrb[102].mxu0  ;;  %v1550_v15 = vpop.f32.mrb[103].mxu1 }
 0x1f0   : > { %v2258_v16 = vadd.f32 %v2257_v5, %v1835_v11  ;;  %v2329_v17 = vmul.f32 %v1835_v11, %v1835_v11  ;;  %v1838_v18 = vadd.f32 %v1837_v14, %v1548_v13  ;;  %v1839_v19 = vpop.f32.mrb[103].mxu0 }
 0x1f2   : > { %v2392_v20 = vadd.f32 %v2391_v7, %v2329_v17  ;;  %v3018_v21 = vpack.c.bf16 %v1838_v18, %v1835_v11  ;;  %v2259_v22 = vadd.f32 %v2258_v16, %v1838_v18  ;;  %v2330_v23 = vmul.f32 %v1838_v18, %v1838_v18 }
 0x1f4   : > { %3074 = vst [vmem:[%s3656_s26 + $0xc8] sm:$0xff] %v3018_v21   ;;  %v2393_v24 = vadd.f32 %v2392_v20, %v2330_v23  ;;  %v1553_v25 = vpop.f32.mrb[104].mxu1 }
 0x1f5   : > { %v1842_v26 = vpop.f32.mrb[104].mxu0  ;;  %v1555_v27 = vpop.f32.mrb[105].mxu1 }
 0x1f6   : > { %v1843_v28 = vadd.f32 %v1842_v26, %v1553_v25  ;;  %v1844_v29 = vpop.f32.mrb[105].mxu0  ;;  %v1556_v30 = vpop.f32.mrb[106].mxu1 }
 0x1f7   : > { %v1845_v31 = vpop.f32.mrb[106].mxu0  ;;  %v1558_v32 = vpop.f32.mrb[107].mxu1 }
 0x1f8   : > { %v2260_v33 = vadd.f32 %v2259_v22, %v1843_v28  ;;  %v2331_v34 = vmul.f32 %v1843_v28, %v1843_v28  ;;  %v1846_v35 = vadd.f32 %v1845_v31, %v1556_v30  ;;  %v1847_v36 = vpop.f32.mrb[107].mxu0 }
 0x1fa   : > { %v2394_v37 = vadd.f32 %v2393_v24, %v2331_v34  ;;  %v3023_v38 = vpack.c.bf16 %v1846_v35, %v1843_v28  ;;  %v2261_v39 = vadd.f32 %v2260_v33, %v1846_v35  ;;  %v2332_v40 = vmul.f32 %v1846_v35, %v1846_v35 }
 0x1fc   : > { %3075 = vst [vmem:[%s3656_s26 + $0xd0] sm:$0xff] %v3023_v38   ;;  %v2395_v41 = vadd.f32 %v2394_v37, %v2332_v40  ;;  %v1561_v42 = vpop.f32.mrb[108].mxu1 }
 0x1fd   : > { %v1850_v43 = vpop.f32.mrb[108].mxu0  ;;  %v1563_v44 = vpop.f32.mrb[109].mxu1 }
 0x1fe   : > { %v1851_v45 = vadd.f32 %v1850_v43, %v1561_v42  ;;  %v1852_v46 = vpop.f32.mrb[109].mxu0  ;;  %v1564_v47 = vpop.f32.mrb[110].mxu1 }
 0x1ff   : > { %v1853_v48 = vpop.f32.mrb[110].mxu0  ;;  %v1566_v49 = vpop.f32.mrb[111].mxu1 }
 0x200   : > { %v2262_v50 = vadd.f32 %v2261_v39, %v1851_v45  ;;  %v2333_v51 = vmul.f32 %v1851_v45, %v1851_v45  ;;  %v1854_v52 = vadd.f32 %v1853_v48, %v1564_v47  ;;  %v1855_v53 = vpop.f32.mrb[111].mxu0 }
 0x202   : > { %v2396_v54 = vadd.f32 %v2395_v41, %v2333_v51  ;;  %v3028_v55 = vpack.c.bf16 %v1854_v52, %v1851_v45  ;;  %v2263_v56 = vadd.f32 %v2262_v50, %v1854_v52  ;;  %v2334_v57 = vmul.f32 %v1854_v52, %v1854_v52 }
 0x204   : > { %3076 = vst [vmem:[%s3656_s26 + $0xd8] sm:$0xff] %v3028_v55   ;;  %v2397_v58 = vadd.f32 %v2396_v54, %v2334_v57  ;;  %v1569_v59 = vpop.f32.mrb[112].mxu1 }
 0x205   : > { %v1858_v60 = vpop.f32.mrb[112].mxu0  ;;  %v1571_v61 = vpop.f32.mrb[113].mxu1 }
 0x206   : > { %v1859_v62 = vadd.f32 %v1858_v60, %v1569_v59  ;;  %v1860_v63 = vpop.f32.mrb[113].mxu0  ;;  %v1572_v0 = vpop.f32.mrb[114].mxu1 }
 0x207   : > { %v1861_v1 = vpop.f32.mrb[114].mxu0  ;;  %v1574_v2 = vpop.f32.mrb[115].mxu1 }
 0x208   : > { %v2264_v3 = vadd.f32 %v2263_v56, %v1859_v62  ;;  %v2335_v4 = vmul.f32 %v1859_v62, %v1859_v62  ;;  %v1862_v5 = vadd.f32 %v1861_v1, %v1572_v0  ;;  %v1863_v6 = vpop.f32.mrb[115].mxu0 }
 0x20a   : > { %v2398_v7 = vadd.f32 %v2397_v58, %v2335_v4  ;;  %v3033_v8 = vpack.c.bf16 %v1862_v5, %v1859_v62  ;;  %v2265_v9 = vadd.f32 %v2264_v3, %v1862_v5  ;;  %v2336_v10 = vmul.f32 %v1862_v5, %v1862_v5 }
 0x20c   : > { %3077 = vst [vmem:[%s3656_s26 + $0xe0] sm:$0xff] %v3033_v8   ;;  %v2399_v11 = vadd.f32 %v2398_v7, %v2336_v10  ;;  %v1577_v12 = vpop.f32.mrb[116].mxu1 }
 0x20d   : > { %v1866_v13 = vpop.f32.mrb[116].mxu0  ;;  %v1579_v14 = vpop.f32.mrb[117].mxu1 }
 0x20e   : > { %v1867_v15 = vadd.f32 %v1866_v13, %v1577_v12  ;;  %v1868_v16 = vpop.f32.mrb[117].mxu0  ;;  %v1580_v17 = vpop.f32.mrb[118].mxu1 }
 0x20f   : > { %v1869_v18 = vpop.f32.mrb[118].mxu0  ;;  %v1582_v19 = vpop.f32.mrb[119].mxu1 }
 0x210   : > { %v2266_v20 = vadd.f32 %v2265_v9, %v1867_v15  ;;  %v2337_v21 = vmul.f32 %v1867_v15, %v1867_v15  ;;  %v1870_v22 = vadd.f32 %v1869_v18, %v1580_v17  ;;  %v1871_v23 = vpop.f32.mrb[119].mxu0 }
 0x212   : > { %v2400_v24 = vadd.f32 %v2399_v11, %v2337_v21  ;;  %v3038_v25 = vpack.c.bf16 %v1870_v22, %v1867_v15  ;;  %v2267_v26 = vadd.f32 %v2266_v20, %v1870_v22  ;;  %v2338_v27 = vmul.f32 %v1870_v22, %v1870_v22 }
 0x214   : > { %3078 = vst [vmem:[%s3656_s26 + $0xe8] sm:$0xff] %v3038_v25   ;;  %v2401_v28 = vadd.f32 %v2400_v24, %v2338_v27  ;;  %v1585_v29 = vpop.f32.mrb[120].mxu1 }
 0x215   : > { %v1874_v30 = vpop.f32.mrb[120].mxu0  ;;  %v1587_v31 = vpop.f32.mrb[121].mxu1 }
 0x216   : > { %v1875_v32 = vadd.f32 %v1874_v30, %v1585_v29  ;;  %v1876_v33 = vpop.f32.mrb[121].mxu0  ;;  %v1588_v34 = vpop.f32.mrb[122].mxu1 }
 0x217   : > { %v1877_v35 = vpop.f32.mrb[122].mxu0  ;;  %v1590_v36 = vpop.f32.mrb[123].mxu1 }
 0x218   : > { %v2268_v37 = vadd.f32 %v2267_v26, %v1875_v32  ;;  %v2339_v38 = vmul.f32 %v1875_v32, %v1875_v32  ;;  %v1878_v39 = vadd.f32 %v1877_v35, %v1588_v34  ;;  %v1879_v40 = vpop.f32.mrb[123].mxu0 }
 0x21a   : > { %v2402_v41 = vadd.f32 %v2401_v28, %v2339_v38  ;;  %v3043_v42 = vpack.c.bf16 %v1878_v39, %v1875_v32  ;;  %v2269_v43 = vadd.f32 %v2268_v37, %v1878_v39  ;;  %v2340_v44 = vmul.f32 %v1878_v39, %v1878_v39 }
 0x21c   : > { %3079 = vst [vmem:[%s3656_s26 + $0xf0] sm:$0xff] %v3043_v42   ;;  %v2403_v45 = vadd.f32 %v2402_v41, %v2340_v44  ;;  %v1593_v46 = vpop.f32.mrb[124].mxu1 }
 0x21d   : > { %v1882_v47 = vpop.f32.mrb[124].mxu0  ;;  %v1595_v48 = vpop.f32.mrb[125].mxu1 }
 0x21e   : > { %v1883_v49 = vadd.f32 %v1882_v47, %v1593_v46  ;;  %v1884_v50 = vpop.f32.mrb[125].mxu0  ;;  %v1596_v51 = vpop.f32.mrb[126].mxu1 }
 0x21f   : > { %v1885_v52 = vpop.f32.mrb[126].mxu0  ;;  %v1598_v53 = vpop.f32.mrb[127].mxu1 }
 0x220   : > { %v2270_v54 = vadd.f32 %v2269_v43, %v1883_v49  ;;  %v2341_v55 = vmul.f32 %v1883_v49, %v1883_v49  ;;  %v1886_v56 = vadd.f32 %v1885_v52, %v1596_v51  ;;  %v1887_v57 = vpop.f32.mrb[127].mxu0 }
 0x222   : > { %v2404_v58 = vadd.f32 %v2403_v45, %v2341_v55  ;;  %v3048_v59 = vpack.c.bf16 %v1886_v56, %v1883_v49  ;;  %v2271_v60 = vadd.f32 %v2270_v54, %v1886_v56  ;;  %v2342_v61 = vmul.f32 %v1886_v56, %v1886_v56 }
 0x224   : > { %3080 = vst [vmem:[%s3656_s26 + $0xf8] sm:$0xff] %v3048_v59   ;;  %v2272_v62 = vrot.slane %v2271_v60, 4  ;;  %v2405_v63 = vadd.f32 %v2404_v58, %v2342_v61 }
 0x226   : > { %v2273_v0 = vadd.f32 %v2272_v62, %v2271_v60  ;;  %v2406_v1 = vrot.slane %v2405_v63, 4 }
 0x228   : > { %v2274_v2 = vrot.slane %v2273_v0, 2  ;;  %v2407_v3 = vadd.f32 %v2406_v1, %v2405_v63 }
 0x22a   : > { %v2275_v4 = vadd.f32 %v2274_v2, %v2273_v0  ;;  %v2408_v5 = vrot.slane %v2407_v3, 2 }
 0x22c   : > { %v2276_v6 = vrot.slane %v2275_v4, 1  ;;  %v2409_v7 = vadd.f32 %v2408_v5, %v2407_v3 }
 0x22e   : > { %v2277_v8 = vadd.f32 %v2276_v6, %v2275_v4  ;;  %v2410_v9 = vrot.slane %v2409_v7, 1 }
 0x230   : > { %2278 = vst [vmem:[%s285_s30] sm:$0x1] %v2277_v8  ;;  %v2411_v10 = vadd.f32 %v2410_v9, %v2409_v7 }
 0x232   : > { %2412 = vst [vmem:[%s285_s30 + $0x1] sm:$0x1] %v2411_v10 }
 0x233 PF: > { %s14_s14 = sadd.s32 1, %s3416_s14   ;;  %s3721_s12 = smov %s3412_s13 }
 0x234   : > { %p11_p5 = scmp.ge.s32.totalorder %s14_s14, 6   ;;  %s3722_s13 = smov %s3724_s15 }
 0x236   :  { %13 = sbr.rel (!%p11_p5) target bundleno = 2 (0x2), region = 73 }

// kernel: generator_forward.16
= control target key start
LH: loop header
LB: loop body
LE: loop exit
PB: predicated region body
PF: predicated region fallthrough
CT: control target
= control target key end

     0   :  { %s2575_s15 = smov 0   ;;  %s3285_s0 = inlined_call_operand.vmem [shape: bf16[2048,128], index: 0, kind: input, shape index: {}]   ;;  %s3286_s1 = inlined_call_operand.vmem [shape: f32[2,128], index: 1, kind: input, shape index: {}]   ;;  %s3287_s2 = inlined_call_operand.vmem [shape: f32[1,128], index: 2, kind: input, shape index: {}]   ;;  %s3288_s3 = inlined_call_operand.vmem [shape: f32[1,128], index: 3, kind: input, shape index: {}]   ;;  %s3289_s4 = inlined_call_operand.vmem [shape: bf16[2048,128], index: 4, kind: output, shape index: {}]  }
   0x1 LB: > { %s1563_s16 = sadd.s32 4294967295, %s2548_s15   ;;  %p1567_p0 = scmp.ge.s32.totalorder %s2548_s15, 1  ;;  %s2548_s15 = sphi %s2575_s15, %s14_s15  }
   0x2   : > { %p163_p1 = scmp.lt.s32.totalorder %s2548_s15, 3 }
   0x4   : > { %p164_p2 = pnand %p1567_p0, %p163_p1 }
   0x5   : > { %s1568_s17 = sshll.u32 (!%p164_p2), %s1563_s16, 7  ;;  %v201_v0 = vld [vmem:[%s3286_s1] sm:$0x1] (!%p164_p2)  ;;  %v203_v1 = vld [vmem:[%s3286_s1 + $0x1] sm:$0x1] (!%p164_p2)  ;;  %v472_v2 = vlaneseq (!%p164_p2) }
   0x6   : > { %167 = sbr.rel (%p164_p2) target bundleno = 177 (0xb1), region = 36  ;;  %p190_p3 = scmp.lt.s32.totalorder (!%p164_p2), %s1568_s17, 255  ;;  %v2589_v3 = vmul.f32 (!%p164_p2), 0.00048828125, %v201_v0  ;;  %v204_v4 = vmul.f32 (!%p164_p2), 0.00048828125, %v203_v1  ;;  %v212_v50 = vld [vmem:[%s3288_s3] sm:$0x1] (!%p164_p2) }
   0x7   : > { %v2595_v6 = vshrl.u32 (!%p164_p2), %v472_v2, 7 }
   0x8   : > { %v205_v5 = vmul.f32 (!%p164_p2), %v2589_v3, %v2589_v3 }
   0x9   : > { %v474_v10 = vsub.s32 (!%p164_p2), 0, %v2595_v6 }
   0xa   : > { %v206_v7 = vsub.f32 (!%p164_p2), %v204_v4, %v205_v5 }
   0xc   : > { %v207_v8 = vmax.f32 (!%p164_p2), %v206_v7, 0.0 }
   0xd   : > { %s3338_s17 = smov (!%p190_p3, %s1568_s17), 255 }
   0xe   : > { %s1569_s22 = sshll.u32 %s3338_s17, 2  ;;  %v209_v20 = vadd.f32 1e-05, %v207_v8 }
   0xf   : > { %s2603_s25 = scalar_lea.vmem %s3285_s0, %s1569_s22  ;;  %s2845_s6 = scalar_lea.vmem %s3289_s4, %s1569_s22 }
  0x10   : > { %v2606_v9 = vld [vmem:[%s2603_s25] sm:$0xff]   ;;  %v2610_v11 = vld [vmem:[%s2603_s25 + $0x8] sm:$0xff]   ;;  %v2613_v12 = vld [vmem:[%s2603_s25 + $0x10] sm:$0xff]   ;;  %2540 = vrsqrt.f32 %v209_v20 }
  0x11   : > { %v1832_v13 = vunpack.c.l.bf16 %v2606_v9  ;;  %v1833_v14 = vunpack.c.h.bf16 %v2606_v9  ;;  %v1836_v15 = vunpack.c.l.bf16 %v2610_v11  ;;  %v1837_v16 = vunpack.c.h.bf16 %v2610_v11  ;;  %v2620_v17 = vld [vmem:[%s2603_s25 + $0x18] sm:$0xff]   ;;  %v2623_v18 = vld [vmem:[%s2603_s25 + $0x20] sm:$0xff]   ;;  %v2626_v19 = vld [vmem:[%s2603_s25 + $0x28] sm:$0xff]  }
  0x12   : > { %v1840_v21 = vunpack.c.l.bf16 %v2613_v12  ;;  %v1841_v22 = vunpack.c.h.bf16 %v2613_v12  ;;  %v1844_v23 = vunpack.c.l.bf16 %v2620_v17  ;;  %v2632_v24 = vld [vmem:[%s2603_s25 + $0x30] sm:$0xff]   ;;  %v2635_v25 = vld [vmem:[%s2603_s25 + $0x38] sm:$0xff]   ;;  %v2638_v26 = vld [vmem:[%s2603_s25 + $0x40] sm:$0xff]   ;;  %v1845_v27 = vunpack.c.h.bf16 %v2620_v17 }
  0x13   : > { %v1848_v28 = vunpack.c.l.bf16 %v2623_v18  ;;  %v1849_v29 = vunpack.c.h.bf16 %v2623_v18  ;;  %v1852_v30 = vunpack.c.l.bf16 %v2626_v19  ;;  %v2645_v31 = vld [vmem:[%s2603_s25 + $0x48] sm:$0xff]   ;;  %v2648_v32 = vld [vmem:[%s2603_s25 + $0x50] sm:$0xff]   ;;  %v1853_v33 = vunpack.c.h.bf16 %v2626_v19  ;;  %v2654_v36 = vld [vmem:[%s2603_s25 + $0x58] sm:$0xff]  }
  0x14   : > { %v1856_v34 = vunpack.c.l.bf16 %v2632_v24  ;;  %v1857_v35 = vunpack.c.h.bf16 %v2632_v24  ;;  %v2657_v37 = vld [vmem:[%s2603_s25 + $0x60] sm:$0xff]   ;;  %v1860_v38 = vunpack.c.l.bf16 %v2635_v25  ;;  %v2664_v42 = vld [vmem:[%s2603_s25 + $0x68] sm:$0xff]   ;;  %v2667_v43 = vld [vmem:[%s2603_s25 + $0x70] sm:$0xff]  }
  0x15   : > { %v2674_v48 = vld [vmem:[%s2603_s25 + $0x78] sm:$0xff]   ;;  %v2677_v49 = vld [vmem:[%s2603_s25 + $0x80] sm:$0xff]   ;;  %v2684_v54 = vld [vmem:[%s2603_s25 + $0x88] sm:$0xff]  }
  0x16   : > { %v2687_v55 = vld [vmem:[%s2603_s25 + $0x90] sm:$0xff]   ;;  %v2694_v60 = vld [vmem:[%s2603_s25 + $0x98] sm:$0xff]   ;;  %v2697_v61 = vld [vmem:[%s2603_s25 + $0xa0] sm:$0xff]  }
  0x17   : > { %v2704_v2 = vld [vmem:[%s2603_s25 + $0xa8] sm:$0xff]   ;;  %v2707_v4 = vld [vmem:[%s2603_s25 + $0xb0] sm:$0xff]   ;;  %v2714_v63 = vld [vmem:[%s2603_s25 + $0xb8] sm:$0xff]  }
  0x18   : > { %v2717_v62 = vld [vmem:[%s2603_s25 + $0xc0] sm:$0xff]   ;;  %v2724_v5 = vld [vmem:[%s2603_s25 + $0xc8] sm:$0xff]   ;;  %v2727_v8 = vld [vmem:[%s2603_s25 + $0xd0] sm:$0xff]  }
  0x19   : > { %v208_v20 = vld [vmem:[%s3287_s2] sm:$0x1]  ;;  %v2737_v57 = vld [vmem:[%s2603_s25 + $0xd8] sm:$0xff]   ;;  %v2747_v1 = vld [vmem:[%s2603_s25 + $0xe8] sm:$0xff]  }
  0x1a   : > { %v2740_v7 = vld [vmem:[%s2603_s25 + $0xe0] sm:$0xff]   ;;  %v2750_v51 = vld [vmem:[%s2603_s25 + $0xf0] sm:$0xff]   ;;  %v2541_v0 = vpop.eup %2540  ;;  %v2757_v46 = vld [vmem:[%s2603_s25 + $0xf8] sm:$0xff]  }
  0x1b   : > { %v211_v53 = vmul.f32 %v2541_v0, %v208_v20  ;;  %v2763_v44 = vld [vmem:[%s2603_s25 + $0x100] sm:$0xff]   ;;  %v2766_v41 = vld [vmem:[%s2603_s25 + $0x108] sm:$0xff]   ;;  %v1952_v20 = vunpack.c.l.bf16 %v2750_v51  ;;  %v1953_v52 = vunpack.c.h.bf16 %v2750_v51  ;;  %v1957_v40 = vunpack.c.h.bf16 %v2757_v46 }
  0x1c   : > { %v1961_v56 = vunpack.c.h.bf16 %v2763_v44  ;;  %v1964_v0 = vunpack.c.l.bf16 %v2766_v41 }
  0x1d   : > { %v213_v58 = vmul.f32 %v211_v53, %v2589_v3  ;;  %v2778_v45 = vrot.slane %v211_v53, %v474_v10 }
  0x1f   : > { %v214_v39 = vsub.f32 %v212_v50, %v213_v58  ;;  %v477_v3 = vmul.f32 %v1832_v13, %v2778_v45  ;;  %v478_v53 = vmul.f32 %v1833_v14, %v2778_v45  ;;  %v479_v59 = vmul.f32 %v1836_v15, %v2778_v45 }
  0x20   : > { %v480_v47 = vmul.f32 %v1837_v16, %v2778_v45  ;;  %v481_v50 = vmul.f32 %v1840_v21, %v2778_v45  ;;  %v482_v13 = vmul.f32 %v1841_v22, %v2778_v45  ;;  %v483_v9 = vmul.f32 %v1844_v23, %v2778_v45 }
  0x21   : > { %v2809_v14 = vrot.slane %v214_v39, %v474_v10  ;;  %v484_v11 = vmul.f32 %v1845_v27, %v2778_v45  ;;  %v485_v15 = vmul.f32 %v1848_v28, %v2778_v45  ;;  %v486_v12 = vmul.f32 %v1849_v29, %v2778_v45 }
  0x22   : > { %v487_v16 = vmul.f32 %v1852_v30, %v2778_v45  ;;  %v488_v6 = vmul.f32 %v1853_v33, %v2778_v45  ;;  %v489_v10 = vmul.f32 %v1856_v34, %v2778_v45  ;;  %v490_v17 = vmul.f32 %v1857_v35, %v2778_v45 }
  0x23   : > { %v611_v18 = vadd.f32 %v2809_v14, %v477_v3  ;;  %v612_v21 = vadd.f32 %v2809_v14, %v478_v53  ;;  %v613_v22 = vadd.f32 %v2809_v14, %v479_v59  ;;  %v614_v23 = vadd.f32 %v2809_v14, %v480_v47 }
  0x24   : > { %v615_v19 = vadd.f32 %v2809_v14, %v481_v50  ;;  %v616_v27 = vadd.f32 %v2809_v14, %v482_v13  ;;  %v617_v28 = vadd.f32 %v2809_v14, %v483_v9  ;;  %v618_v29 = vadd.f32 %v2809_v14, %v484_v11 }
  0x25   : > { %v739_v30 = vmax.f32 %v611_v18, 0.0  ;;  %v740_v33 = vmax.f32 %v612_v21, 0.0  ;;  %v741_v24 = vmax.f32 %v613_v22, 0.0  ;;  %v742_v34 = vmax.f32 %v614_v23, 0.0 }
  0x26   : > { %v743_v35 = vmax.f32 %v615_v19, 0.0  ;;  %v744_v39 = vmax.f32 %v616_v27, 0.0  ;;  %v745_v47 = vmax.f32 %v617_v28, 0.0  ;;  %v746_v58 = vmax.f32 %v618_v29, 0.0 }
  0x27   : > { %v2089_v59 = vpack.c.bf16 %v740_v33, %v739_v30  ;;  %v2094_v3 = vpack.c.bf16 %v742_v34, %v741_v24  ;;  %v619_v53 = vadd.f32 %v2809_v14, %v485_v15  ;;  %v620_v50 = vadd.f32 %v2809_v14, %v486_v12 }
  0x28   : > { %v2099_v13 = vpack.c.bf16 %v744_v39, %v743_v35  ;;  %v2104_v9 = vpack.c.bf16 %v746_v58, %v745_v47  ;;  %v621_v11 = vadd.f32 %v2809_v14, %v487_v16  ;;  %v622_v18 = vadd.f32 %v2809_v14, %v488_v6 }
  0x29   : > { %2090 = vst [vmem:[%s2845_s6] sm:$0xff] %v2089_v59   ;;  %2469 = vst [vmem:[%s2845_s6 + $0x8] sm:$0xff] %v2094_v3   ;;  %v747_v21 = vmax.f32 %v619_v53, 0.0  ;;  %v748_v22 = vmax.f32 %v620_v50, 0.0  ;;  %v623_v23 = vadd.f32 %v2809_v14, %v489_v10  ;;  %v624_v19 = vadd.f32 %v2809_v14, %v490_v17 }
  0x2a   : > { %2470 = vst [vmem:[%s2845_s6 + $0x10] sm:$0xff] %v2099_v13   ;;  %2471 = vst [vmem:[%s2845_s6 + $0x18] sm:$0xff] %v2104_v9   ;;  %v749_v15 = vmax.f32 %v621_v11, 0.0  ;;  %v750_v27 = vmax.f32 %v622_v18, 0.0  ;;  %v491_v12 = vmul.f32 %v1860_v38, %v2778_v45  ;;  %v3290_v16 = vunpack.c.h.bf16 %v2635_v25 }
  0x2b   : > { %v2109_v28 = vpack.c.bf16 %v748_v22, %v747_v21  ;;  %v751_v29 = vmax.f32 %v623_v23, 0.0  ;;  %v752_v30 = vmax.f32 %v624_v19, 0.0  ;;  %v3291_v10 = vunpack.c.l.bf16 %v2638_v26 }
  0x2c   : > { %v492_v6 = vmul.f32 %v3290_v16, %v2778_v45  ;;  %v2114_v33 = vpack.c.bf16 %v750_v27, %v749_v15  ;;  %v625_v24 = vadd.f32 %v2809_v14, %v491_v12  ;;  %v3292_v38 = vunpack.c.h.bf16 %v2638_v26 }
  0x2d   : > { %v493_v17 = vmul.f32 %v3291_v10, %v2778_v45  ;;  %2472 = vst [vmem:[%s2845_s6 + $0x20] sm:$0xff] %v2109_v28   ;;  %v2119_v25 = vpack.c.bf16 %v752_v30, %v751_v29  ;;  %v3293_v47 = vunpack.c.l.bf16 %v2645_v31  ;;  %v3294_v59 = vunpack.c.h.bf16 %v2645_v31 }
  0x2e   : > { %v626_v34 = vadd.f32 %v2809_v14, %v492_v6  ;;  %v494_v35 = vmul.f32 %v3292_v38, %v2778_v45  ;;  %2473 = vst [vmem:[%s2845_s6 + $0x28] sm:$0xff] %v2114_v33   ;;  %v753_v53 = vmax.f32 %v625_v24, 0.0  ;;  %v3295_v26 = vunpack.c.l.bf16 %v2648_v32 }
  0x2f   : > { %v627_v39 = vadd.f32 %v2809_v14, %v493_v17  ;;  %v495_v58 = vmul.f32 %v3293_v47, %v2778_v45  ;;  %v496_v3 = vmul.f32 %v3294_v59, %v2778_v45  ;;  %2474 = vst [vmem:[%s2845_s6 + $0x30] sm:$0xff] %v2119_v25   ;;  %v3296_v31 = vunpack.c.h.bf16 %v2648_v32 }
  0x30   : > { %v754_v50 = vmax.f32 %v626_v34, 0.0  ;;  %v628_v13 = vadd.f32 %v2809_v14, %v494_v35  ;;  %v497_v9 = vmul.f32 %v3295_v26, %v2778_v45  ;;  %v3297_v27 = vunpack.c.l.bf16 %v2654_v36 }
  0x31   : > { %v755_v11 = vmax.f32 %v627_v39, 0.0  ;;  %v629_v18 = vadd.f32 %v2809_v14, %v495_v58  ;;  %v630_v21 = vadd.f32 %v2809_v14, %v496_v3  ;;  %v498_v22 = vmul.f32 %v3296_v31, %v2778_v45 }
  0x32   : > { %v2124_v23 = vpack.c.bf16 %v754_v50, %v753_v53  ;;  %v756_v19 = vmax.f32 %v628_v13, 0.0  ;;  %v631_v15 = vadd.f32 %v2809_v14, %v497_v9  ;;  %v499_v12 = vmul.f32 %v3297_v27, %v2778_v45 }
  0x33   : > { %v757_v16 = vmax.f32 %v629_v18, 0.0  ;;  %v758_v6 = vmax.f32 %v630_v21, 0.0  ;;  %v632_v28 = vadd.f32 %v2809_v14, %v498_v22  ;;  %v3298_v29 = vunpack.c.h.bf16 %v2654_v36 }
  0x34   : > { %2475 = vst [vmem:[%s2845_s6 + $0x38] sm:$0xff] %v2124_v23   ;;  %v2129_v32 = vpack.c.bf16 %v756_v19, %v755_v11  ;;  %v759_v10 = vmax.f32 %v631_v15, 0.0  ;;  %v633_v17 = vadd.f32 %v2809_v14, %v499_v12  ;;  %v3299_v33 = vunpack.c.l.bf16 %v2657_v37 }
  0x35   : > { %v500_v30 = vmul.f32 %v3298_v29, %v2778_v45  ;;  %v2134_v34 = vpack.c.bf16 %v758_v6, %v757_v16  ;;  %v760_v38 = vmax.f32 %v632_v28, 0.0  ;;  %v3300_v25 = vunpack.c.h.bf16 %v2657_v37 }
  0x36   : > { %v501_v24 = vmul.f32 %v3299_v33, %v2778_v45  ;;  %2476 = vst [vmem:[%s2845_s6 + $0x40] sm:$0xff] %v2129_v32   ;;  %v761_v39 = vmax.f32 %v633_v17, 0.0  ;;  %v3301_v58 = vunpack.c.l.bf16 %v2664_v42  ;;  %v3302_v3 = vunpack.c.h.bf16 %v2664_v42 }
  0x37   : > { %v634_v35 = vadd.f32 %v2809_v14, %v500_v30  ;;  %v502_v36 = vmul.f32 %v3300_v25, %v2778_v45  ;;  %2477 = vst [vmem:[%s2845_s6 + $0x48] sm:$0xff] %v2134_v34   ;;  %v2139_v50 = vpack.c.bf16 %v760_v38, %v759_v10  ;;  %v3303_v26 = vunpack.c.l.bf16 %v2667_v43 }
  0x38   : > { %v635_v47 = vadd.f32 %v2809_v14, %v501_v24  ;;  %v503_v59 = vmul.f32 %v3301_v58, %v2778_v45  ;;  %v504_v53 = vmul.f32 %v3302_v3, %v2778_v45  ;;  %v3304_v31 = vunpack.c.h.bf16 %v2667_v43 }
  0x39   : > { %v762_v13 = vmax.f32 %v634_v35, 0.0  ;;  %v636_v37 = vadd.f32 %v2809_v14, %v502_v36  ;;  %v505_v9 = vmul.f32 %v3303_v26, %v2778_v45  ;;  %2478 = vst [vmem:[%s2845_s6 + $0x50] sm:$0xff] %v2139_v50   ;;  %v3305_v15 = vunpack.c.l.bf16 %v2674_v48 }
  0x3a   : > { %v763_v11 = vmax.f32 %v635_v47, 0.0  ;;  %v637_v18 = vadd.f32 %v2809_v14, %v503_v59  ;;  %v638_v21 = vadd.f32 %v2809_v14, %v504_v53  ;;  %v506_v42 = vmul.f32 %v3304_v31, %v2778_v45 }
  0x3b   : > { %v2144_v22 = vpack.c.bf16 %v762_v13, %v761_v39  ;;  %v764_v23 = vmax.f32 %v636_v37, 0.0  ;;  %v639_v19 = vadd.f32 %v2809_v14, %v505_v9  ;;  %v507_v27 = vmul.f32 %v3305_v15, %v2778_v45 }
  0x3c   : > { %v765_v12 = vmax.f32 %v637_v18, 0.0  ;;  %v766_v16 = vmax.f32 %v638_v21, 0.0  ;;  %v640_v6 = vadd.f32 %v2809_v14, %v506_v42  ;;  %v3306_v28 = vunpack.c.h.bf16 %v2674_v48 }
  0x3d   : > { %2479 = vst [vmem:[%s2845_s6 + $0x58] sm:$0xff] %v2144_v22   ;;  %v2149_v29 = vpack.c.bf16 %v764_v23, %v763_v11  ;;  %v767_v30 = vmax.f32 %v639_v19, 0.0  ;;  %v641_v32 = vadd.f32 %v2809_v14, %v507_v27  ;;  %v3307_v10 = vunpack.c.l.bf16 %v2677_v49 }
  0x3e   : > { %v508_v43 = vmul.f32 %v3306_v28, %v2778_v45  ;;  %v2154_v33 = vpack.c.bf16 %v766_v16, %v765_v12  ;;  %v768_v24 = vmax.f32 %v640_v6, 0.0  ;;  %v3308_v38 = vunpack.c.h.bf16 %v2677_v49 }
  0x3f   : > { %v509_v17 = vmul.f32 %v3307_v10, %v2778_v45  ;;  %2480 = vst [vmem:[%s2845_s6 + $0x60] sm:$0xff] %v2149_v29   ;;  %v769_v35 = vmax.f32 %v641_v32, 0.0  ;;  %v3309_v36 = vunpack.c.l.bf16 %v2684_v54  ;;  %v3310_v47 = vunpack.c.h.bf16 %v2684_v54 }
  0x40   : > { %v642_v34 = vadd.f32 %v2809_v14, %v508_v43  ;;  %v510_v48 = vmul.f32 %v3308_v38, %v2778_v45  ;;  %2481 = vst [vmem:[%s2845_s6 + $0x68] sm:$0xff] %v2154_v33   ;;  %v2159_v59 = vpack.c.bf16 %v768_v24, %v767_v30  ;;  %v3311_v53 = vunpack.c.l.bf16 %v2687_v55 }
  0x41   : > { %v643_v25 = vadd.f32 %v2809_v14, %v509_v17  ;;  %v511_v39 = vmul.f32 %v3309_v36, %v2778_v45  ;;  %v512_v58 = vmul.f32 %v3310_v47, %v2778_v45  ;;  %v3312_v9 = vunpack.c.h.bf16 %v2687_v55 }
  0x42   : > { %v770_v3 = vmax.f32 %v642_v34, 0.0  ;;  %v644_v49 = vadd.f32 %v2809_v14, %v510_v48  ;;  %v513_v50 = vmul.f32 %v3311_v53, %v2778_v45  ;;  %2482 = vst [vmem:[%s2845_s6 + $0x70] sm:$0xff] %v2159_v59   ;;  %v3313_v31 = vunpack.c.l.bf16 %v2694_v60 }
  0x43   : > { %v771_v13 = vmax.f32 %v643_v25, 0.0  ;;  %v645_v37 = vadd.f32 %v2809_v14, %v511_v39  ;;  %v646_v26 = vadd.f32 %v2809_v14, %v512_v58  ;;  %v514_v54 = vmul.f32 %v3312_v9, %v2778_v45 }
  0x44   : > { %v2164_v11 = vpack.c.bf16 %v770_v3, %v769_v35  ;;  %v772_v18 = vmax.f32 %v644_v49, 0.0  ;;  %v647_v21 = vadd.f32 %v2809_v14, %v513_v50  ;;  %v515_v42 = vmul.f32 %v3313_v31, %v2778_v45 }
  0x45   : > { %v773_v22 = vmax.f32 %v645_v37, 0.0  ;;  %v774_v23 = vmax.f32 %v646_v26, 0.0  ;;  %v648_v19 = vadd.f32 %v2809_v14, %v514_v54  ;;  %v3314_v15 = vunpack.c.h.bf16 %v2694_v60 }
  0x46   : > { %2483 = vst [vmem:[%s2845_s6 + $0x78] sm:$0xff] %v2164_v11   ;;  %v2169_v27 = vpack.c.bf16 %v772_v18, %v771_v13  ;;  %v775_v12 = vmax.f32 %v647_v21, 0.0  ;;  %v649_v16 = vadd.f32 %v2809_v14, %v515_v42  ;;  %v3315_v6 = vunpack.c.l.bf16 %v2697_v61 }
  0x47   : > { %v516_v55 = vmul.f32 %v3314_v15, %v2778_v45  ;;  %v2174_v43 = vpack.c.bf16 %v774_v23, %v773_v22  ;;  %v776_v29 = vmax.f32 %v648_v19, 0.0  ;;  %v3316_v32 = vunpack.c.h.bf16 %v2697_v61 }
  0x48   : > { %v517_v28 = vmul.f32 %v3315_v6, %v2778_v45  ;;  %2484 = vst [vmem:[%s2845_s6 + $0x80] sm:$0xff] %v2169_v27   ;;  %v777_v10 = vmax.f32 %v649_v16, 0.0  ;;  %v3317_v33 = vunpack.c.l.bf16 %v2704_v2  ;;  %v3318_v34 = vunpack.c.h.bf16 %v2704_v2 }
  0x49   : > { %v650_v30 = vadd.f32 %v2809_v14, %v516_v55  ;;  %v518_v60 = vmul.f32 %v3316_v32, %v2778_v45  ;;  %2485 = vst [vmem:[%s2845_s6 + $0x88] sm:$0xff] %v2174_v43   ;;  %v2179_v48 = vpack.c.bf16 %v776_v29, %v775_v12  ;;  %v3319_v25 = vunpack.c.l.bf16 %v2707_v4 }
  0x4a   : > { %v651_v17 = vadd.f32 %v2809_v14, %v517_v28  ;;  %v519_v24 = vmul.f32 %v3317_v33, %v2778_v45  ;;  %v520_v38 = vmul.f32 %v3318_v34, %v2778_v45  ;;  %v3320_v59 = vunpack.c.h.bf16 %v2707_v4 }
  0x4b   : > { %v778_v35 = vmax.f32 %v650_v30, 0.0  ;;  %v652_v61 = vadd.f32 %v2809_v14, %v518_v60  ;;  %v521_v36 = vmul.f32 %v3319_v25, %v2778_v45  ;;  %2486 = vst [vmem:[%s2845_s6 + $0x90] sm:$0xff] %v2179_v48   ;;  %v3321_v50 = vunpack.c.l.bf16 %v2714_v63 }
  0x4c   : > { %v779_v39 = vmax.f32 %v651_v17, 0.0  ;;  %v653_v47 = vadd.f32 %v2809_v14, %v519_v24  ;;  %v654_v58 = vadd.f32 %v2809_v14, %v520_v38  ;;  %v522_v2 = vmul.f32 %v3320_v59, %v2778_v45 }
  0x4d   : > { %v2184_v3 = vpack.c.bf16 %v778_v35, %v777_v10  ;;  %v780_v49 = vmax.f32 %v652_v61, 0.0  ;;  %v655_v53 = vadd.f32 %v2809_v14, %v521_v36  ;;  %v523_v13 = vmul.f32 %v3321_v50, %v2778_v45 }
  0x4e   : > { %v781_v37 = vmax.f32 %v653_v47, 0.0  ;;  %v782_v26 = vmax.f32 %v654_v58, 0.0  ;;  %v656_v9 = vadd.f32 %v2809_v14, %v522_v2  ;;  %v3322_v54 = vunpack.c.h.bf16 %v2714_v63 }
  0x4f   : > { %2487 = vst [vmem:[%s2845_s6 + $0x98] sm:$0xff] %v2184_v3   ;;  %v2189_v11 = vpack.c.bf16 %v780_v49, %v779_v39  ;;  %v783_v18 = vmax.f32 %v655_v53, 0.0  ;;  %v657_v21 = vadd.f32 %v2809_v14, %v523_v13  ;;  %v3323_v31 = vunpack.c.l.bf16 %v2717_v62 }
  0x50   : > { %v524_v4 = vmul.f32 %v3322_v54, %v2778_v45  ;;  %v2194_v22 = vpack.c.bf16 %v782_v26, %v781_v37  ;;  %v784_v23 = vmax.f32 %v656_v9, 0.0  ;;  %v3324_v15 = vunpack.c.h.bf16 %v2717_v62 }
  0x51   : > { %v525_v42 = vmul.f32 %v3323_v31, %v2778_v45  ;;  %2488 = vst [vmem:[%s2845_s6 + $0xa0] sm:$0xff] %v2189_v11   ;;  %v785_v55 = vmax.f32 %v657_v21, 0.0  ;;  %v3325_v12 = vunpack.c.l.bf16 %v2724_v5  ;;  %v3326_v6 = vunpack.c.h.bf16 %v2724_v5 }
  0x52   : > { %v658_v19 = vadd.f32 %v2809_v14, %v524_v4  ;;  %v526_v63 = vmul.f32 %v3324_v15, %v2778_v45  ;;  %2489 = vst [vmem:[%s2845_s6 + $0xa8] sm:$0xff] %v2194_v22   ;;  %v2199_v43 = vpack.c.bf16 %v784_v23, %v783_v18  ;;  %v3327_v30 = vunpack.c.l.bf16 %v2727_v8 }
  0x53   : > { %v659_v27 = vadd.f32 %v2809_v14, %v525_v42  ;;  %v527_v16 = vmul.f32 %v3325_v12, %v2778_v45  ;;  %v528_v28 = vmul.f32 %v3326_v6, %v2778_v45  ;;  %v3328_v33 = vunpack.c.h.bf16 %v2727_v8 }
  0x54   : > { %v786_v29 = vmax.f32 %v658_v19, 0.0  ;;  %v660_v62 = vadd.f32 %v2809_v14, %v526_v63  ;;  %v529_v32 = vmul.f32 %v3327_v30, %v2778_v45  ;;  %2490 = vst [vmem:[%s2845_s6 + $0xb0] sm:$0xff] %v2199_v43   ;;  %v3329_v48 = vunpack.c.l.bf16 %v2737_v57 }
  0x55   : > { %v787_v60 = vmax.f32 %v659_v27, 0.0  ;;  %v661_v10 = vadd.f32 %v2809_v14, %v527_v16  ;;  %v662_v17 = vadd.f32 %v2809_v14, %v528_v28  ;;  %v530_v5 = vmul.f32 %v3328_v33, %v2778_v45 }
  0x56   : > { %v2204_v24 = vpack.c.bf16 %v786_v29, %v785_v55  ;;  %v788_v34 = vmax.f32 %v660_v62, 0.0  ;;  %v663_v38 = vadd.f32 %v2809_v14, %v529_v32  ;;  %v531_v35 = vmul.f32 %v3329_v48, %v2778_v45  ;;  %v2439_v62 = vld [vmem:[%s2603_s25 + $0x110] sm:$0xff]  }
  0x57   : > { %v789_v61 = vmax.f32 %v661_v10, 0.0  ;;  %v790_v25 = vmax.f32 %v662_v17, 0.0  ;;  %v664_v36 = vadd.f32 %v2809_v14, %v530_v5  ;;  %v3330_v39 = vunpack.c.h.bf16 %v2737_v57  ;;  %v2440_v5 = vld [vmem:[%s2603_s25 + $0x118] sm:$0xff]  }
  0x58   : > { %2491 = vst [vmem:[%s2845_s6 + $0xb8] sm:$0xff] %v2204_v24   ;;  %v2209_v47 = vpack.c.bf16 %v788_v34, %v787_v60  ;;  %v791_v58 = vmax.f32 %v663_v38, 0.0  ;;  %v665_v59 = vadd.f32 %v2809_v14, %v531_v35  ;;  %v3331_v2 = vunpack.c.l.bf16 %v2740_v7 }
  0x59   : > { %v532_v8 = vmul.f32 %v3330_v39, %v2778_v45  ;;  %v2214_v49 = vpack.c.bf16 %v790_v25, %v789_v61  ;;  %v792_v53 = vmax.f32 %v664_v36, 0.0  ;;  %v3332_v13 = vunpack.c.h.bf16 %v2740_v7  ;;  %v2441_v25 = vld [vmem:[%s2603_s25 + $0x120] sm:$0xff]  }
  0x5a   : > { %v533_v3 = vmul.f32 %v3331_v2, %v2778_v45  ;;  %2492 = vst [vmem:[%s2845_s6 + $0xc0] sm:$0xff] %v2209_v47   ;;  %v793_v37 = vmax.f32 %v665_v59, 0.0  ;;  %v3333_v9 = vunpack.c.l.bf16 %v2747_v1  ;;  %v3334_v4 = vunpack.c.h.bf16 %v2747_v1  ;;  %v2442_v2 = vld [vmem:[%s2603_s25 + $0x128] sm:$0xff]  }
  0x5b   : > { %v666_v50 = vadd.f32 %v2809_v14, %v532_v8  ;;  %v534_v57 = vmul.f32 %v3332_v13, %v2778_v45  ;;  %2493 = vst [vmem:[%s2845_s6 + $0xc8] sm:$0xff] %v2214_v49   ;;  %v2219_v18 = vpack.c.bf16 %v792_v53, %v791_v58  ;;  %v537_v31 = vmul.f32 %v1952_v20, %v2778_v45 }
  0x5c   : > { %v667_v26 = vadd.f32 %v2809_v14, %v533_v3  ;;  %v535_v54 = vmul.f32 %v3333_v9, %v2778_v45  ;;  %v536_v11 = vmul.f32 %v3334_v4, %v2778_v45  ;;  %v538_v1 = vmul.f32 %v1953_v52, %v2778_v45 }
  0x5d   : > { %v794_v21 = vmax.f32 %v666_v50, 0.0  ;;  %v668_v7 = vadd.f32 %v2809_v14, %v534_v57  ;;  %2494 = vst [vmem:[%s2845_s6 + $0xd0] sm:$0xff] %v2219_v18   ;;  %v671_v63 = vadd.f32 %v2809_v14, %v537_v31  ;;  %v3335_v55 = vunpack.c.l.bf16 %v2757_v46  ;;  %v2443_v18 = vld [vmem:[%s2603_s25 + $0x130] sm:$0xff]  }
  0x5e   : > { %v795_v42 = vmax.f32 %v667_v26, 0.0  ;;  %v669_v22 = vadd.f32 %v2809_v14, %v535_v54  ;;  %v670_v23 = vadd.f32 %v2809_v14, %v536_v11  ;;  %v672_v16 = vadd.f32 %v2809_v14, %v538_v1 }
  0x5f   : > { %v2224_v19 = vpack.c.bf16 %v794_v21, %v793_v37  ;;  %v796_v15 = vmax.f32 %v668_v7, 0.0  ;;  %v539_v20 = vmul.f32 %v3335_v55, %v2778_v45  ;;  %v540_v51 = vmul.f32 %v1957_v40, %v2778_v45 }
  0x60   : > { %v797_v27 = vmax.f32 %v669_v22, 0.0  ;;  %v798_v12 = vmax.f32 %v670_v23, 0.0  ;;  %v799_v6 = vmax.f32 %v671_v63, 0.0  ;;  %v3336_v43 = vunpack.c.l.bf16 %v2763_v44 }
  0x61   : > { %2495 = vst [vmem:[%s2845_s6 + $0xd8] sm:$0xff] %v2224_v19   ;;  %v2229_v52 = vpack.c.bf16 %v796_v15, %v795_v42  ;;  %v673_v28 = vadd.f32 %v2809_v14, %v539_v20  ;;  %v800_v32 = vmax.f32 %v672_v16, 0.0  ;;  %v674_v60 = vadd.f32 %v2809_v14, %v540_v51  ;;  %v2444_v15 = vld [vmem:[%s2603_s25 + $0x138] sm:$0xff]  }
  0x62   : > { %v541_v29 = vmul.f32 %v3336_v43, %v2778_v45  ;;  %v2234_v30 = vpack.c.bf16 %v798_v12, %v797_v27  ;;  %v542_v40 = vmul.f32 %v1961_v56, %v2778_v45  ;;  %v1965_v17 = vunpack.c.h.bf16 %v2766_v41 }
  0x63   : > { %2496 = vst [vmem:[%s2845_s6 + $0xe0] sm:$0xff] %v2229_v52   ;;  %v801_v46 = vmax.f32 %v673_v28, 0.0  ;;  %v543_v33 = vmul.f32 %v1964_v0, %v2778_v45  ;;  %v2239_v24 = vpack.c.bf16 %v800_v32, %v799_v6  ;;  %v802_v34 = vmax.f32 %v674_v60, 0.0  ;;  %v2445_v6 = vld [vmem:[%s2603_s25 + $0x140] sm:$0xff]  }
  0x64   : > { %v675_v10 = vadd.f32 %v2809_v14, %v541_v29  ;;  %2497 = vst [vmem:[%s2845_s6 + $0xe8] sm:$0xff] %v2234_v30   ;;  %v676_v38 = vadd.f32 %v2809_v14, %v542_v40  ;;  %v1968_v44 = vunpack.c.l.bf16 %v2439_v62  ;;  %v544_v48 = vmul.f32 %v1965_v17, %v2778_v45 }
  0x65   : > { %v677_v35 = vadd.f32 %v2809_v14, %v543_v33  ;;  %v1969_v61 = vunpack.c.h.bf16 %v2439_v62  ;;  %2498 = vst [vmem:[%s2845_s6 + $0xf0] sm:$0xff] %v2239_v24   ;;  %v2244_v36 = vpack.c.bf16 %v802_v34, %v801_v46  ;;  %v1972_v39 = vunpack.c.l.bf16 %v2440_v5  ;;  %v2446_v46 = vld [vmem:[%s2603_s25 + $0x148] sm:$0xff]  }
  0x66   : > { %v803_v56 = vmax.f32 %v675_v10, 0.0  ;;  %v804_v41 = vmax.f32 %v676_v38, 0.0  ;;  %v545_v0 = vmul.f32 %v1968_v44, %v2778_v45  ;;  %v678_v8 = vadd.f32 %v2809_v14, %v544_v48 }
  0x67   : > { %v805_v47 = vmax.f32 %v677_v35, 0.0  ;;  %v546_v58 = vmul.f32 %v1969_v61, %v2778_v45  ;;  %v1973_v59 = vunpack.c.h.bf16 %v2440_v5  ;;  %2499 = vst [vmem:[%s2845_s6 + $0xf8] sm:$0xff] %v2244_v36   ;;  %v547_v53 = vmul.f32 %v1972_v39, %v2778_v45 }
  0x68   : > { %v2249_v3 = vpack.c.bf16 %v804_v41, %v803_v56  ;;  %v679_v49 = vadd.f32 %v2809_v14, %v545_v0  ;;  %v1976_v50 = vunpack.c.l.bf16 %v2441_v25  ;;  %v806_v13 = vmax.f32 %v678_v8, 0.0 }
  0x69   : > { %v680_v57 = vadd.f32 %v2809_v14, %v546_v58  ;;  %v548_v37 = vmul.f32 %v1973_v59, %v2778_v45  ;;  %v1977_v26 = vunpack.c.h.bf16 %v2441_v25  ;;  %v681_v54 = vadd.f32 %v2809_v14, %v547_v53  ;;  %v2447_v25 = vld [vmem:[%s2603_s25 + $0x150] sm:$0xff]  }
  0x6a   : > { %2500 = vst [vmem:[%s2845_s6 + $0x100] sm:$0xff] %v2249_v3   ;;  %v807_v9 = vmax.f32 %v679_v49, 0.0  ;;  %v549_v4 = vmul.f32 %v1976_v50, %v2778_v45  ;;  %v1980_v11 = vunpack.c.l.bf16 %v2442_v2  ;;  %v2254_v21 = vpack.c.bf16 %v806_v13, %v805_v47 }
  0x6b   : > { %v808_v7 = vmax.f32 %v680_v57, 0.0  ;;  %v682_v31 = vadd.f32 %v2809_v14, %v548_v37  ;;  %v550_v42 = vmul.f32 %v1977_v26, %v2778_v45  ;;  %v809_v22 = vmax.f32 %v681_v54, 0.0 }
  0x6c   : > { %v683_v23 = vadd.f32 %v2809_v14, %v549_v4  ;;  %v1981_v1 = vunpack.c.h.bf16 %v2442_v2  ;;  %v551_v19 = vmul.f32 %v1980_v11, %v2778_v45  ;;  %2501 = vst [vmem:[%s2845_s6 + $0x108] sm:$0xff] %v2254_v21   ;;  %v1984_v27 = vunpack.c.l.bf16 %v2443_v18  ;;  %v2448_v2 = vld [vmem:[%s2603_s25 + $0x158] sm:$0xff]  }
  0x6d   : > { %v2259_v63 = vpack.c.bf16 %v808_v7, %v807_v9  ;;  %v810_v55 = vmax.f32 %v682_v31, 0.0  ;;  %v684_v20 = vadd.f32 %v2809_v14, %v550_v42  ;;  %v1985_v52 = vunpack.c.h.bf16 %v2443_v18  ;;  %v2449_v9 = vld [vmem:[%s2603_s25 + $0x160] sm:$0xff]  }
  0x6e   : > { %v811_v12 = vmax.f32 %v683_v23, 0.0  ;;  %v552_v16 = vmul.f32 %v1981_v1, %v2778_v45  ;;  %v685_v51 = vadd.f32 %v2809_v14, %v551_v19  ;;  %v553_v29 = vmul.f32 %v1984_v27, %v2778_v45 }
  0x6f   : > { %2502 = vst [vmem:[%s2845_s6 + $0x110] sm:$0xff] %v2259_v63   ;;  %v2264_v28 = vpack.c.bf16 %v810_v55, %v809_v22  ;;  %v812_v43 = vmax.f32 %v684_v20, 0.0  ;;  %v1988_v62 = vunpack.c.l.bf16 %v2444_v15  ;;  %v554_v60 = vmul.f32 %v1985_v52, %v2778_v45  ;;  %v2450_v22 = vld [vmem:[%s2603_s25 + $0x168] sm:$0xff]  }
  0x70   : > { %v686_v30 = vadd.f32 %v2809_v14, %v552_v16  ;;  %v813_v32 = vmax.f32 %v685_v51, 0.0  ;;  %v1989_v40 = vunpack.c.h.bf16 %v2444_v15  ;;  %v687_v17 = vadd.f32 %v2809_v14, %v553_v29 }
  0x71   : > { %2503 = vst [vmem:[%s2845_s6 + $0x118] sm:$0xff] %v2264_v28   ;;  %v2269_v10 = vpack.c.bf16 %v812_v43, %v811_v12  ;;  %v555_v33 = vmul.f32 %v1988_v62, %v2778_v45  ;;  %v1992_v5 = vunpack.c.l.bf16 %v2445_v6  ;;  %v688_v34 = vadd.f32 %v2809_v14, %v554_v60 }
  0x72   : > { %v814_v24 = vmax.f32 %v686_v30, 0.0  ;;  %v556_v38 = vmul.f32 %v1989_v40, %v2778_v45  ;;  %v1993_v44 = vunpack.c.h.bf16 %v2445_v6  ;;  %v815_v56 = vmax.f32 %v687_v17, 0.0  ;;  %v2451_v6 = vld [vmem:[%s2603_s25 + $0x170] sm:$0xff]  }
  0x73   : > { %2504 = vst [vmem:[%s2845_s6 + $0x120] sm:$0xff] %v2269_v10   ;;  %v689_v48 = vadd.f32 %v2809_v14, %v555_v33  ;;  %v557_v35 = vmul.f32 %v1992_v5, %v2778_v45  ;;  %v1996_v61 = vunpack.c.l.bf16 %v2446_v46  ;;  %v816_v41 = vmax.f32 %v688_v34, 0.0 }
  0x74   : > { %v2274_v36 = vpack.c.bf16 %v814_v24, %v813_v32  ;;  %v690_v0 = vadd.f32 %v2809_v14, %v556_v38  ;;  %v558_v39 = vmul.f32 %v1993_v44, %v2778_v45  ;;  %v1997_v58 = vunpack.c.h.bf16 %v2446_v46  ;;  %v2452_v46 = vld [vmem:[%s2603_s25 + $0x178] sm:$0xff]  }
  0x75   : > { %v817_v8 = vmax.f32 %v689_v48, 0.0  ;;  %v691_v47 = vadd.f32 %v2809_v14, %v557_v35  ;;  %v559_v59 = vmul.f32 %v1996_v61, %v2778_v45  ;;  %v2279_v3 = vpack.c.bf16 %v816_v41, %v815_v56  ;;  %v2453_v56 = vld [vmem:[%s2603_s25 + $0x180] sm:$0xff]  }
  0x76   : > { %2505 = vst [vmem:[%s2845_s6 + $0x128] sm:$0xff] %v2274_v36   ;;  %v818_v49 = vmax.f32 %v690_v0, 0.0  ;;  %v692_v53 = vadd.f32 %v2809_v14, %v558_v39  ;;  %v2000_v50 = vunpack.c.l.bf16 %v2447_v25  ;;  %v560_v57 = vmul.f32 %v1997_v58, %v2778_v45 }
  0x77   : > { %v819_v13 = vmax.f32 %v691_v47, 0.0  ;;  %v693_v37 = vadd.f32 %v2809_v14, %v559_v59  ;;  %v2001_v26 = vunpack.c.h.bf16 %v2447_v25  ;;  %2506 = vst [vmem:[%s2845_s6 + $0x130] sm:$0xff] %v2279_v3   ;;  %v2004_v18 = vunpack.c.l.bf16 %v2448_v2 }
  0x78   : > { %v2284_v54 = vpack.c.bf16 %v818_v49, %v817_v8  ;;  %v820_v4 = vmax.f32 %v692_v53, 0.0  ;;  %v561_v11 = vmul.f32 %v2000_v50, %v2778_v45  ;;  %v694_v21 = vadd.f32 %v2809_v14, %v560_v57  ;;  %v2454_v8 = vld [vmem:[%s2603_s25 + $0x188] sm:$0xff]  }
  0x79   : > { %v821_v7 = vmax.f32 %v693_v37, 0.0  ;;  %v562_v31 = vmul.f32 %v2001_v26, %v2778_v45  ;;  %v2005_v42 = vunpack.c.h.bf16 %v2448_v2  ;;  %v563_v19 = vmul.f32 %v2004_v18, %v2778_v45 }
  0x7a   : > { %2507 = vst [vmem:[%s2845_s6 + $0x138] sm:$0xff] %v2284_v54   ;;  %v2289_v23 = vpack.c.bf16 %v820_v4, %v819_v13  ;;  %v695_v1 = vadd.f32 %v2809_v14, %v561_v11  ;;  %v2008_v15 = vunpack.c.l.bf16 %v2449_v9  ;;  %v822_v63 = vmax.f32 %v694_v21, 0.0 }
  0x7b   : > { %v696_v55 = vadd.f32 %v2809_v14, %v562_v31  ;;  %v564_v20 = vmul.f32 %v2005_v42, %v2778_v45  ;;  %v2009_v27 = vunpack.c.h.bf16 %v2449_v9  ;;  %v697_v16 = vadd.f32 %v2809_v14, %v563_v19  ;;  %v2455_v9 = vld [vmem:[%s2603_s25 + $0x190] sm:$0xff]  }
  0x7c   : > { %2508 = vst [vmem:[%s2845_s6 + $0x140] sm:$0xff] %v2289_v23   ;;  %v823_v12 = vmax.f32 %v695_v1, 0.0  ;;  %v565_v51 = vmul.f32 %v2008_v15, %v2778_v45  ;;  %v2012_v52 = vunpack.c.l.bf16 %v2450_v22  ;;  %v2294_v28 = vpack.c.bf16 %v822_v63, %v821_v7 }
  0x7d   : > { %v824_v43 = vmax.f32 %v696_v55, 0.0  ;;  %v698_v29 = vadd.f32 %v2809_v14, %v564_v20  ;;  %v566_v62 = vmul.f32 %v2009_v27, %v2778_v45  ;;  %v825_v30 = vmax.f32 %v697_v16, 0.0 }
  0x7e   : > { %v699_v32 = vadd.f32 %v2809_v14, %v565_v51  ;;  %v2013_v60 = vunpack.c.h.bf16 %v2450_v22  ;;  %v567_v40 = vmul.f32 %v2012_v52, %v2778_v45  ;;  %2509 = vst [vmem:[%s2845_s6 + $0x148] sm:$0xff] %v2294_v28   ;;  %v2016_v5 = vunpack.c.l.bf16 %v2451_v6  ;;  %v2456_v22 = vld [vmem:[%s2603_s25 + $0x198] sm:$0xff]  }
  0x7f   : > { %v2299_v10 = vpack.c.bf16 %v824_v43, %v823_v12  ;;  %v826_v17 = vmax.f32 %v698_v29, 0.0  ;;  %v700_v33 = vadd.f32 %v2809_v14, %v566_v62  ;;  %v2017_v44 = vunpack.c.h.bf16 %v2451_v6  ;;  %v2457_v12 = vld [vmem:[%s2603_s25 + $0x1a0] sm:$0xff]  }
  0x80   : > { %v827_v24 = vmax.f32 %v699_v32, 0.0  ;;  %v568_v34 = vmul.f32 %v2013_v60, %v2778_v45  ;;  %v701_v38 = vadd.f32 %v2809_v14, %v567_v40  ;;  %v569_v61 = vmul.f32 %v2016_v5, %v2778_v45 }
  0x81   : > { %2510 = vst [vmem:[%s2845_s6 + $0x150] sm:$0xff] %v2299_v10   ;;  %v2304_v48 = vpack.c.bf16 %v826_v17, %v825_v30  ;;  %v828_v35 = vmax.f32 %v700_v33, 0.0  ;;  %v2020_v25 = vunpack.c.l.bf16 %v2452_v46  ;;  %v570_v0 = vmul.f32 %v2017_v44, %v2778_v45  ;;  %v2458_v30 = vld [vmem:[%s2603_s25 + $0x1a8] sm:$0xff]  }
  0x82   : > { %v702_v36 = vadd.f32 %v2809_v14, %v568_v34  ;;  %v829_v41 = vmax.f32 %v701_v38, 0.0  ;;  %v2021_v39 = vunpack.c.h.bf16 %v2452_v46  ;;  %v703_v58 = vadd.f32 %v2809_v14, %v569_v61 }
  0x83   : > { %2511 = vst [vmem:[%s2845_s6 + $0x158] sm:$0xff] %v2304_v48   ;;  %v2309_v47 = vpack.c.bf16 %v828_v35, %v827_v24  ;;  %v571_v59 = vmul.f32 %v2020_v25, %v2778_v45  ;;  %v2024_v2 = vunpack.c.l.bf16 %v2453_v56  ;;  %v704_v49 = vadd.f32 %v2809_v14, %v570_v0 }
  0x84   : > { %v830_v3 = vmax.f32 %v702_v36, 0.0  ;;  %v572_v53 = vmul.f32 %v2021_v39, %v2778_v45  ;;  %v2025_v50 = vunpack.c.h.bf16 %v2453_v56  ;;  %v831_v13 = vmax.f32 %v703_v58, 0.0  ;;  %v2459_v56 = vld [vmem:[%s2603_s25 + $0x1b0] sm:$0xff]  }
  0x85   : > { %2512 = vst [vmem:[%s2845_s6 + $0x160] sm:$0xff] %v2309_v47   ;;  %v705_v57 = vadd.f32 %v2809_v14, %v571_v59  ;;  %v573_v37 = vmul.f32 %v2024_v2, %v2778_v45  ;;  %v2028_v26 = vunpack.c.l.bf16 %v2454_v8  ;;  %v832_v4 = vmax.f32 %v704_v49, 0.0 }
  0x86   : > { %v2314_v54 = vpack.c.bf16 %v830_v3, %v829_v41  ;;  %v706_v11 = vadd.f32 %v2809_v14, %v572_v53  ;;  %v574_v18 = vmul.f32 %v2025_v50, %v2778_v45  ;;  %v2029_v31 = vunpack.c.h.bf16 %v2454_v8  ;;  %v2460_v8 = vld [vmem:[%s2603_s25 + $0x1b8] sm:$0xff]  }
  0x87   : > { %v833_v21 = vmax.f32 %v705_v57, 0.0  ;;  %v707_v7 = vadd.f32 %v2809_v14, %v573_v37  ;;  %v575_v42 = vmul.f32 %v2028_v26, %v2778_v45  ;;  %v2319_v23 = vpack.c.bf16 %v832_v4, %v831_v13  ;;  %v2461_v13 = vld [vmem:[%s2603_s25 + $0x1c0] sm:$0xff]  }
  0x88   : > { %2513 = vst [vmem:[%s2845_s6 + $0x168] sm:$0xff] %v2314_v54   ;;  %v834_v1 = vmax.f32 %v706_v11, 0.0  ;;  %v708_v19 = vadd.f32 %v2809_v14, %v574_v18  ;;  %v2032_v15 = vunpack.c.l.bf16 %v2455_v9  ;;  %v576_v55 = vmul.f32 %v2029_v31, %v2778_v45 }
  0x89   : > { %v835_v63 = vmax.f32 %v707_v7, 0.0  ;;  %v709_v20 = vadd.f32 %v2809_v14, %v575_v42  ;;  %v2033_v27 = vunpack.c.h.bf16 %v2455_v9  ;;  %2514 = vst [vmem:[%s2845_s6 + $0x170] sm:$0xff] %v2319_v23   ;;  %v2036_v6 = vunpack.c.l.bf16 %v2456_v22 }
  0x8a   : > { %v2324_v16 = vpack.c.bf16 %v834_v1, %v833_v21  ;;  %v836_v51 = vmax.f32 %v708_v19, 0.0  ;;  %v577_v52 = vmul.f32 %v2032_v15, %v2778_v45  ;;  %v710_v28 = vadd.f32 %v2809_v14, %v576_v55  ;;  %v2462_v21 = vld [vmem:[%s2603_s25 + $0x1c8] sm:$0xff]  }
  0x8b   : > { %v837_v43 = vmax.f32 %v709_v20, 0.0  ;;  %v578_v29 = vmul.f32 %v2033_v27, %v2778_v45  ;;  %v2037_v62 = vunpack.c.h.bf16 %v2456_v22  ;;  %v579_v40 = vmul.f32 %v2036_v6, %v2778_v45 }
  0x8c   : > { %2515 = vst [vmem:[%s2845_s6 + $0x178] sm:$0xff] %v2324_v16   ;;  %v2329_v32 = vpack.c.bf16 %v836_v51, %v835_v63  ;;  %v711_v60 = vadd.f32 %v2809_v14, %v577_v52  ;;  %v2040_v46 = vunpack.c.l.bf16 %v2457_v12  ;;  %v838_v10 = vmax.f32 %v710_v28, 0.0 }
  0x8d   : > { %v712_v17 = vadd.f32 %v2809_v14, %v578_v29  ;;  %v580_v33 = vmul.f32 %v2037_v62, %v2778_v45  ;;  %v2041_v5 = vunpack.c.h.bf16 %v2457_v12  ;;  %v713_v34 = vadd.f32 %v2809_v14, %v579_v40  ;;  %v2463_v12 = vld [vmem:[%s2603_s25 + $0x1d0] sm:$0xff]  }
  0x8e   : > { %2516 = vst [vmem:[%s2845_s6 + $0x180] sm:$0xff] %v2329_v32   ;;  %v839_v24 = vmax.f32 %v711_v60, 0.0  ;;  %v581_v38 = vmul.f32 %v2040_v46, %v2778_v45  ;;  %v2044_v44 = vunpack.c.l.bf16 %v2458_v30  ;;  %v2334_v48 = vpack.c.bf16 %v838_v10, %v837_v43 }
  0x8f   : > { %v840_v35 = vmax.f32 %v712_v17, 0.0  ;;  %v714_v61 = vadd.f32 %v2809_v14, %v580_v33  ;;  %v582_v25 = vmul.f32 %v2041_v5, %v2778_v45  ;;  %v841_v36 = vmax.f32 %v713_v34, 0.0 }
  0x90   : > { %v715_v41 = vadd.f32 %v2809_v14, %v581_v38  ;;  %v2045_v0 = vunpack.c.h.bf16 %v2458_v30  ;;  %v583_v39 = vmul.f32 %v2044_v44, %v2778_v45  ;;  %2517 = vst [vmem:[%s2845_s6 + $0x188] sm:$0xff] %v2334_v48   ;;  %v2048_v2 = vunpack.c.l.bf16 %v2459_v56  ;;  %v2464_v30 = vld [vmem:[%s2603_s25 + $0x1d8] sm:$0xff]  }
  0x91   : > { %v2339_v47 = vpack.c.bf16 %v840_v35, %v839_v24  ;;  %v842_v58 = vmax.f32 %v714_v61, 0.0  ;;  %v716_v59 = vadd.f32 %v2809_v14, %v582_v25  ;;  %v2049_v50 = vunpack.c.h.bf16 %v2459_v56  ;;  %v2465_v24 = vld [vmem:[%s2603_s25 + $0x1e0] sm:$0xff]  }
  0x92   : > { %v843_v3 = vmax.f32 %v715_v41, 0.0  ;;  %v584_v49 = vmul.f32 %v2045_v0, %v2778_v45  ;;  %v717_v53 = vadd.f32 %v2809_v14, %v583_v39  ;;  %v585_v26 = vmul.f32 %v2048_v2, %v2778_v45 }
  0x93   : > { %2518 = vst [vmem:[%s2845_s6 + $0x190] sm:$0xff] %v2339_v47   ;;  %v2344_v57 = vpack.c.bf16 %v842_v58, %v841_v36  ;;  %v844_v37 = vmax.f32 %v716_v59, 0.0  ;;  %v2052_v9 = vunpack.c.l.bf16 %v2460_v8  ;;  %v586_v11 = vmul.f32 %v2049_v50, %v2778_v45  ;;  %v2466_v36 = vld [vmem:[%s2603_s25 + $0x1e8] sm:$0xff]  }
  0x94   : > { %v718_v54 = vadd.f32 %v2809_v14, %v584_v49  ;;  %v845_v4 = vmax.f32 %v717_v53, 0.0  ;;  %v2053_v18 = vunpack.c.h.bf16 %v2460_v8  ;;  %v719_v31 = vadd.f32 %v2809_v14, %v585_v26 }
  0x95   : > { %2519 = vst [vmem:[%s2845_s6 + $0x198] sm:$0xff] %v2344_v57   ;;  %v2349_v7 = vpack.c.bf16 %v844_v37, %v843_v3  ;;  %v587_v42 = vmul.f32 %v2052_v9, %v2778_v45  ;;  %v2056_v22 = vunpack.c.l.bf16 %v2461_v13  ;;  %v720_v1 = vadd.f32 %v2809_v14, %v586_v11 }
  0x96   : > { %v846_v23 = vmax.f32 %v718_v54, 0.0  ;;  %v588_v19 = vmul.f32 %v2053_v18, %v2778_v45  ;;  %v2057_v15 = vunpack.c.h.bf16 %v2461_v13  ;;  %v847_v63 = vmax.f32 %v719_v31, 0.0  ;;  %v2467_v13 = vld [vmem:[%s2603_s25 + $0x1f0] sm:$0xff]  }
  0x97   : > { %2520 = vst [vmem:[%s2845_s6 + $0x1a0] sm:$0xff] %v2349_v7   ;;  %v721_v55 = vadd.f32 %v2809_v14, %v587_v42  ;;  %v589_v20 = vmul.f32 %v2056_v22, %v2778_v45  ;;  %v2060_v27 = vunpack.c.l.bf16 %v2462_v21  ;;  %v848_v51 = vmax.f32 %v720_v1, 0.0 }
  0x98   : > { %v2354_v16 = vpack.c.bf16 %v846_v23, %v845_v4  ;;  %v722_v52 = vadd.f32 %v2809_v14, %v588_v19  ;;  %v590_v6 = vmul.f32 %v2057_v15, %v2778_v45  ;;  %v2061_v29 = vunpack.c.h.bf16 %v2462_v21  ;;  %v2468_v21 = vld [vmem:[%s2603_s25 + $0x1f8] sm:$0xff]  }
  0x99   : > { %v849_v28 = vmax.f32 %v721_v55, 0.0  ;;  %v723_v43 = vadd.f32 %v2809_v14, %v589_v20  ;;  %v591_v62 = vmul.f32 %v2060_v27, %v2778_v45  ;;  %v2359_v32 = vpack.c.bf16 %v848_v51, %v847_v63 }
  0x9a   : > { %2521 = vst [vmem:[%s2845_s6 + $0x1a8] sm:$0xff] %v2354_v16   ;;  %v850_v60 = vmax.f32 %v722_v52, 0.0  ;;  %v724_v40 = vadd.f32 %v2809_v14, %v590_v6  ;;  %v2064_v46 = vunpack.c.l.bf16 %v2463_v12  ;;  %v592_v17 = vmul.f32 %v2061_v29, %v2778_v45 }
  0x9b   : > { %v851_v10 = vmax.f32 %v723_v43, 0.0  ;;  %v725_v33 = vadd.f32 %v2809_v14, %v591_v62  ;;  %v2065_v5 = vunpack.c.h.bf16 %v2463_v12  ;;  %2522 = vst [vmem:[%s2845_s6 + $0x1b0] sm:$0xff] %v2359_v32   ;;  %v2068_v56 = vunpack.c.l.bf16 %v2464_v30 }
  0x9c   : > { %v2364_v34 = vpack.c.bf16 %v850_v60, %v849_v28  ;;  %v852_v38 = vmax.f32 %v724_v40, 0.0  ;;  %v593_v44 = vmul.f32 %v2064_v46, %v2778_v45  ;;  %v726_v48 = vadd.f32 %v2809_v14, %v592_v17 }
  0x9d   : > { %v853_v35 = vmax.f32 %v725_v33, 0.0  ;;  %v594_v61 = vmul.f32 %v2065_v5, %v2778_v45  ;;  %v2069_v25 = vunpack.c.h.bf16 %v2464_v30  ;;  %v595_v39 = vmul.f32 %v2068_v56, %v2778_v45 }
  0x9e   : > { %2523 = vst [vmem:[%s2845_s6 + $0x1b8] sm:$0xff] %v2364_v34   ;;  %v2369_v41 = vpack.c.bf16 %v852_v38, %v851_v10  ;;  %v727_v0 = vadd.f32 %v2809_v14, %v593_v44  ;;  %v2072_v8 = vunpack.c.l.bf16 %v2465_v24  ;;  %v854_v47 = vmax.f32 %v726_v48, 0.0 }
  0x9f   : > { %v728_v58 = vadd.f32 %v2809_v14, %v594_v61  ;;  %v596_v59 = vmul.f32 %v2069_v25, %v2778_v45  ;;  %v2073_v2 = vunpack.c.h.bf16 %v2465_v24  ;;  %v729_v49 = vadd.f32 %v2809_v14, %v595_v39 }
  0xa0   : > { %2524 = vst [vmem:[%s2845_s6 + $0x1c0] sm:$0xff] %v2369_v41   ;;  %v855_v3 = vmax.f32 %v727_v0, 0.0  ;;  %v597_v53 = vmul.f32 %v2072_v8, %v2778_v45  ;;  %v2076_v50 = vunpack.c.l.bf16 %v2466_v36  ;;  %v2374_v57 = vpack.c.bf16 %v854_v47, %v853_v35 }
  0xa1   : > { %v856_v37 = vmax.f32 %v728_v58, 0.0  ;;  %v730_v26 = vadd.f32 %v2809_v14, %v596_v59  ;;  %v598_v9 = vmul.f32 %v2073_v2, %v2778_v45  ;;  %v857_v54 = vmax.f32 %v729_v49, 0.0 }
  0xa2   : > { %v731_v4 = vadd.f32 %v2809_v14, %v597_v53  ;;  %v2077_v11 = vunpack.c.h.bf16 %v2466_v36  ;;  %v599_v18 = vmul.f32 %v2076_v50, %v2778_v45  ;;  %2525 = vst [vmem:[%s2845_s6 + $0x1c8] sm:$0xff] %v2374_v57   ;;  %v2080_v22 = vunpack.c.l.bf16 %v2467_v13 }
  0xa3   : > { %v2379_v7 = vpack.c.bf16 %v856_v37, %v855_v3  ;;  %v858_v31 = vmax.f32 %v730_v26, 0.0  ;;  %v732_v42 = vadd.f32 %v2809_v14, %v598_v9  ;;  %v2081_v15 = vunpack.c.h.bf16 %v2467_v13 }
  0xa4   : > { %v859_v23 = vmax.f32 %v731_v4, 0.0  ;;  %v600_v1 = vmul.f32 %v2077_v11, %v2778_v45  ;;  %v733_v19 = vadd.f32 %v2809_v14, %v599_v18  ;;  %v601_v20 = vmul.f32 %v2080_v22, %v2778_v45 }
  0xa5   : > { %2526 = vst [vmem:[%s2845_s6 + $0x1d0] sm:$0xff] %v2379_v7   ;;  %v2384_v63 = vpack.c.bf16 %v858_v31, %v857_v54  ;;  %v860_v55 = vmax.f32 %v732_v42, 0.0  ;;  %v2084_v27 = vunpack.c.l.bf16 %v2468_v21  ;;  %v602_v51 = vmul.f32 %v2081_v15, %v2778_v45 }
  0xa6   : > { %v734_v12 = vadd.f32 %v2809_v14, %v600_v1  ;;  %v861_v16 = vmax.f32 %v733_v19, 0.0  ;;  %v2085_v52 = vunpack.c.h.bf16 %v2468_v21  ;;  %v735_v28 = vadd.f32 %v2809_v14, %v601_v20 }
  0xa7   : > { %2527 = vst [vmem:[%s2845_s6 + $0x1d8] sm:$0xff] %v2384_v63   ;;  %v2389_v6 = vpack.c.bf16 %v860_v55, %v859_v23  ;;  %v603_v43 = vmul.f32 %v2084_v27, %v2778_v45  ;;  %v736_v62 = vadd.f32 %v2809_v14, %v602_v51 }
  0xa8   : > { %v862_v29 = vmax.f32 %v734_v12, 0.0  ;;  %v604_v30 = vmul.f32 %v2085_v52, %v2778_v45  ;;  %v863_v32 = vmax.f32 %v735_v28, 0.0 }
  0xa9   : > { %2528 = vst [vmem:[%s2845_s6 + $0x1e0] sm:$0xff] %v2389_v6   ;;  %v737_v60 = vadd.f32 %v2809_v14, %v603_v43  ;;  %v864_v46 = vmax.f32 %v736_v62, 0.0 }
  0xaa   : > { %v2394_v40 = vpack.c.bf16 %v862_v29, %v861_v16  ;;  %v738_v10 = vadd.f32 %v2809_v14, %v604_v30 }
  0xab   : > { %v865_v17 = vmax.f32 %v737_v60, 0.0  ;;  %v2399_v33 = vpack.c.bf16 %v864_v46, %v863_v32 }
  0xac   : > { %2529 = vst [vmem:[%s2845_s6 + $0x1e8] sm:$0xff] %v2394_v40   ;;  %v866_v5 = vmax.f32 %v738_v10, 0.0 }
  0xad   : > { %2530 = vst [vmem:[%s2845_s6 + $0x1f0] sm:$0xff] %v2399_v33  }
  0xae   : > { %v2404_v24 = vpack.c.bf16 %v866_v5, %v865_v17 }
  0xb0   : > { %2531 = vst [vmem:[%s2845_s6 + $0x1f8] sm:$0xff] %v2404_v24  }
  0xb1 PF: > { %s14_s15 = sadd.s32 1, %s2548_s15  }
  0xb2   : > { %p11_p4 = scmp.ge.s32.totalorder %s14_s15, 4  }
  0xb4   :  { %13 = sbr.rel (!%p11_p4) target bundleno = 1 (0x1), region = 66 }

// kernel: generator_forward.17
= control target key start
LH: loop header
LB: loop body
LE: loop exit
PB: predicated region body
PF: predicated region fallthrough
CT: control target
= control target key end

     0   :  { %s2636_s9 = smov 0   ;;  %s2638_s10 = smov 0   ;;  %s2979_s0 = inlined_call_operand.vmem [shape: bf16[4,8,256], index: 0, kind: input, shape index: {}]   ;;  %s2980_s1 = inlined_call_operand.vmem [shape: bf16[4,256,2048], index: 1, kind: input, shape index: {}]   ;;  %s2981_s2 = inlined_call_operand.vmem [shape: f32[4,8,2048], index: 2, kind: output, shape index: {}]  }
   0x1   :  { %s2640_s11 = smov 0  }
   0x2 LB: > { %s31_s12 = sadd.s32 1, %s2615_s10  ;;  %p2269_p0 = scmp.ge.s32.totalorder %s2619_s11, 1  ;;  %s2619_s11 = sphi %s2640_s11, %s12_s11   ;;  %s2615_s10 = sphi %s2638_s10, %s2983_s10   ;;  %s2611_s9 = sphi %s2636_s9, %s2982_s9  }
   0x3   : > { %p33_p1 = scmp.ge.s32.totalorder %s31_s12, 4  ;;  %p158_p2 = scmp.lt.s32.totalorder %s2619_s11, 5 }
   0x5   : > { %s2985_s12 = smov (%p33_p1, %s31_s12), 0  ;;  %p159_p3 = pnand %p2269_p0, %p158_p2 }
   0x6   : > { %p201_p4 = scmp.lt.s32.totalorder (!%p159_p3), %s2611_s9, 3 }
   0x7   : > { %162 = sbr.rel (%p159_p3) target bundleno = 504 (0x1f8), region = 28 }
   0xe   : > { %s2987_s9 = smov (!%p201_p4, %s2611_s9), 3 }
   0xf   : > { %s2537_s13 = sshll.u32 %s2987_s9, 11  ;;  %s2536_s17 = sshll.u32 %s2987_s9, 3 }
  0x10   : > { %s2660_s16 = scalar_lea.vmem %s2980_s1, %s2537_s13  ;;  %s209_s20 = scalar_lea.vmem %s2979_s0, %s2536_s17 }
  0x11   : > { %v235_v0 = vld [vmem:[%s2660_s16] sm:$0xff]  ;;  %v236_v2 = vld [vmem:[%s2660_s16 + $0x8] sm:$0xff]  ;;  %s2538_s21 = sshll.u32 %s2987_s9, 7 }
  0x12   : > { %v243_v1 = vld [vmem:[%s2660_s16 + $0x40] sm:$0xff]  ;;  %v244_v4 = vld [vmem:[%s2660_s16 + $0x48] sm:$0xff]  ;;  %s2952_s24 = scalar_lea.vmem %s2981_s2, %s2538_s21 }
  0x13   : > { %v2279_v3 = vcombine.high %v235_v0, %v243_v1  ;;  %v2278_v5 = vcombine.low %v235_v0, %v243_v1  ;;  %v251_v6 = vld [vmem:[%s2660_s16 + $0x80] sm:$0xff]  ;;  %v2281_v8 = vcombine.high %v236_v2, %v244_v4  ;;  %v2280_v9 = vcombine.low %v236_v2, %v244_v4  ;;  %v252_v11 = vld [vmem:[%s2660_s16 + $0x88] sm:$0xff] }
  0x14   : > { %v259_v7 = vld [vmem:[%s2660_s16 + $0xc0] sm:$0xff]  ;;  %v260_v12 = vld [vmem:[%s2660_s16 + $0xc8] sm:$0xff] }
  0x15   : > { %v2295_v10 = vcombine.high %v251_v6, %v259_v7  ;;  %v267_v13 = vld [vmem:[%s2660_s16 + $0x100] sm:$0xff]  ;;  %1778 = vmatprep.subr.bf16.mxu0 %v2279_v3  ;;  %v2297_v14 = vcombine.high %v252_v11, %v260_v12  ;;  %v268_v16 = vld [vmem:[%s2660_s16 + $0x108] sm:$0xff]  ;;  %1819 = vmatprep.subr.bf16.mxu1 %v2281_v8  ;;  %v2294_v18 = vcombine.low %v251_v6, %v259_v7 }
  0x16   : > { %v275_v15 = vld [vmem:[%s2660_s16 + $0x140] sm:$0xff]  ;;  %v276_v17 = vld [vmem:[%s2660_s16 + $0x148] sm:$0xff]  ;;  %1779 = vmatpush1.bf16.msra.mxu0 %v2278_v5  ;;  %1820 = vmatpush1.bf16.msra.mxu1 %v2280_v9  ;;  %v2296_v19 = vcombine.low %v252_v11, %v260_v12 }
  0x17   : > { %1780 = vmatprep.subr.bf16.mxu0 %v2295_v10  ;;  %v2311_v20 = vcombine.high %v267_v13, %v275_v15  ;;  %1821 = vmatprep.subr.bf16.mxu1 %v2297_v14  ;;  %v2313_v21 = vcombine.high %v268_v16, %v276_v17  ;;  %v283_v22 = vld [vmem:[%s2660_s16 + $0x180] sm:$0xff]  ;;  %v284_v24 = vld [vmem:[%s2660_s16 + $0x188] sm:$0xff]  ;;  %v2310_v26 = vcombine.low %v267_v13, %v275_v15 }
  0x18   : > { %v291_v23 = vld [vmem:[%s2660_s16 + $0x1c0] sm:$0xff]  ;;  %v292_v25 = vld [vmem:[%s2660_s16 + $0x1c8] sm:$0xff]  ;;  %v2312_v27 = vcombine.low %v268_v16, %v276_v17 }
  0x19   : > { %v2327_v28 = vcombine.high %v283_v22, %v291_v23  ;;  %v2329_v29 = vcombine.high %v284_v24, %v292_v25  ;;  %v299_v30 = vld [vmem:[%s2660_s16 + $0x200] sm:$0xff]  ;;  %v300_v32 = vld [vmem:[%s2660_s16 + $0x208] sm:$0xff]  ;;  %v2326_v34 = vcombine.low %v283_v22, %v291_v23  ;;  %v2328_v35 = vcombine.low %v284_v24, %v292_v25 }
  0x1a   : > { %1781 = vmatpush1.bf16.msra.mxu0 %v2294_v18  ;;  %1822 = vmatpush1.bf16.msra.mxu1 %v2296_v19  ;;  %v307_v31 = vld [vmem:[%s2660_s16 + $0x240] sm:$0xff]  ;;  %v308_v33 = vld [vmem:[%s2660_s16 + $0x248] sm:$0xff] }
  0x1b   : > { %1782 = vmatprep.subr.bf16.mxu0 %v2311_v20  ;;  %1823 = vmatprep.subr.bf16.mxu1 %v2313_v21  ;;  %v2343_v36 = vcombine.high %v299_v30, %v307_v31  ;;  %v2345_v37 = vcombine.high %v300_v32, %v308_v33  ;;  %v315_v38 = vld [vmem:[%s2660_s16 + $0x280] sm:$0xff]  ;;  %v316_v40 = vld [vmem:[%s2660_s16 + $0x288] sm:$0xff]  ;;  %v2342_v42 = vcombine.low %v299_v30, %v307_v31 }
  0x1c   : > { %v323_v39 = vld [vmem:[%s2660_s16 + $0x2c0] sm:$0xff]  ;;  %v324_v41 = vld [vmem:[%s2660_s16 + $0x2c8] sm:$0xff]  ;;  %v2344_v43 = vcombine.low %v300_v32, %v308_v33 }
  0x1d   : > { %v2359_v44 = vcombine.high %v315_v38, %v323_v39  ;;  %v2361_v45 = vcombine.high %v316_v40, %v324_v41  ;;  %v331_v46 = vld [vmem:[%s2660_s16 + $0x300] sm:$0xff]  ;;  %v332_v48 = vld [vmem:[%s2660_s16 + $0x308] sm:$0xff]  ;;  %v2358_v50 = vcombine.low %v315_v38, %v323_v39  ;;  %v2360_v51 = vcombine.low %v316_v40, %v324_v41 }
  0x1e   : > { %1783 = vmatpush1.bf16.msra.mxu0 %v2310_v26  ;;  %1824 = vmatpush1.bf16.msra.mxu1 %v2312_v27  ;;  %v339_v47 = vld [vmem:[%s2660_s16 + $0x340] sm:$0xff]  ;;  %v340_v49 = vld [vmem:[%s2660_s16 + $0x348] sm:$0xff] }
  0x1f   : > { %1784 = vmatprep.subr.bf16.mxu0 %v2327_v28  ;;  %1825 = vmatprep.subr.bf16.mxu1 %v2329_v29  ;;  %v2375_v52 = vcombine.high %v331_v46, %v339_v47  ;;  %v2694_v53 = vld [vmem:[%s209_s20] sm:$0xff]  ;;  %v2377_v54 = vcombine.high %v332_v48, %v340_v49  ;;  %v348_v58 = vld [vmem:[%s2660_s16 + $0x388] sm:$0xff]  ;;  %v2374_v60 = vcombine.low %v331_v46, %v339_v47 }
  0x20   : > { %v347_v55 = vld [vmem:[%s2660_s16 + $0x380] sm:$0xff]  ;;  %v2700_v57 = vcombine.high %v2694_v53, %v2694_v53  ;;  %v356_v59 = vld [vmem:[%s2660_s16 + $0x3c8] sm:$0xff]  ;;  %v2376_v61 = vcombine.low %v332_v48, %v340_v49 }
  0x21   : > { %v355_v56 = vld [vmem:[%s2660_s16 + $0x3c0] sm:$0xff]  ;;  %v2393_v63 = vcombine.high %v348_v58, %v356_v59  ;;  %v364_v2 = vld [vmem:[%s2660_s16 + $0x408] sm:$0xff]  ;;  %v2392_v5 = vcombine.low %v348_v58, %v356_v59 }
  0x22   : > { %1785 = vmatpush1.bf16.msra.mxu0 %v2326_v34  ;;  %1826 = vmatpush1.bf16.msra.mxu1 %v2328_v35  ;;  %v2391_v62 = vcombine.high %v347_v55, %v355_v56  ;;  %v363_v0 = vld [vmem:[%s2660_s16 + $0x400] sm:$0xff]  ;;  %v372_v3 = vld [vmem:[%s2660_s16 + $0x448] sm:$0xff]  ;;  %v2390_v4 = vcombine.low %v347_v55, %v355_v56 }
  0x23   : > { %1786 = vmatprep.subr.bf16.mxu0 %v2343_v36  ;;  %1827 = vmatprep.subr.bf16.mxu1 %v2345_v37  ;;  %v371_v1 = vld [vmem:[%s2660_s16 + $0x440] sm:$0xff]  ;;  %v2409_v7 = vcombine.high %v364_v2, %v372_v3  ;;  %v380_v10 = vld [vmem:[%s2660_s16 + $0x488] sm:$0xff]  ;;  %v2408_v13 = vcombine.low %v364_v2, %v372_v3  ;;  %v237_v2 = vld [vmem:[%s2660_s16 + $0x10] sm:$0xff] }
  0x24   : > { %1810 = vmatprep.mubr.bf16.mxu0 %v2700_v57  ;;  %1851 = vmatprep.mubr.bf16.mxu1 %v2700_v57  ;;  %v2407_v6 = vcombine.high %v363_v0, %v371_v1  ;;  %v379_v8 = vld [vmem:[%s2660_s16 + $0x480] sm:$0xff]  ;;  %v388_v11 = vld [vmem:[%s2660_s16 + $0x4c8] sm:$0xff]  ;;  %v2406_v12 = vcombine.low %v363_v0, %v371_v1  ;;  %v245_v3 = vld [vmem:[%s2660_s16 + $0x50] sm:$0xff] }
  0x25   : > { %v387_v9 = vld [vmem:[%s2660_s16 + $0x4c0] sm:$0xff]  ;;  %v2425_v15 = vcombine.high %v380_v10, %v388_v11  ;;  %v396_v18 = vld [vmem:[%s2660_s16 + $0x508] sm:$0xff]  ;;  %v2424_v21 = vcombine.low %v380_v10, %v388_v11  ;;  %v253_v10 = vld [vmem:[%s2660_s16 + $0x90] sm:$0xff] }
  0x26   : > { %1787 = vmatpush1.bf16.msra.mxu0 %v2342_v42  ;;  %1828 = vmatpush1.bf16.msra.mxu1 %v2344_v43  ;;  %v2423_v14 = vcombine.high %v379_v8, %v387_v9  ;;  %v395_v16 = vld [vmem:[%s2660_s16 + $0x500] sm:$0xff]  ;;  %v404_v19 = vld [vmem:[%s2660_s16 + $0x548] sm:$0xff]  ;;  %v2422_v20 = vcombine.low %v379_v8, %v387_v9  ;;  %v2283_v8 = vcombine.high %v237_v2, %v245_v3  ;;  %v261_v11 = vld [vmem:[%s2660_s16 + $0xd0] sm:$0xff] }
  0x27   : > { %1788 = vmatprep.subr.bf16.mxu0 %v2359_v44  ;;  %1829 = vmatprep.subr.bf16.mxu1 %v2361_v45  ;;  %v403_v17 = vld [vmem:[%s2660_s16 + $0x540] sm:$0xff]  ;;  %v2441_v23 = vcombine.high %v396_v18, %v404_v19  ;;  %v412_v26 = vld [vmem:[%s2660_s16 + $0x588] sm:$0xff]  ;;  %v2440_v29 = vcombine.low %v396_v18, %v404_v19  ;;  %v269_v19 = vld [vmem:[%s2660_s16 + $0x110] sm:$0xff] }
  0x28   : > { %v2439_v22 = vcombine.high %v395_v16, %v403_v17  ;;  %v411_v24 = vld [vmem:[%s2660_s16 + $0x580] sm:$0xff]  ;;  %v420_v27 = vld [vmem:[%s2660_s16 + $0x5c8] sm:$0xff]  ;;  %v2438_v28 = vcombine.low %v395_v16, %v403_v17  ;;  %v2299_v17 = vcombine.high %v253_v10, %v261_v11 }
  0x29   : > { %v419_v25 = vld [vmem:[%s2660_s16 + $0x5c0] sm:$0xff]  ;;  %v2457_v31 = vcombine.high %v412_v26, %v420_v27  ;;  %v428_v34 = vld [vmem:[%s2660_s16 + $0x608] sm:$0xff]  ;;  %v2456_v37 = vcombine.low %v412_v26, %v420_v27  ;;  %v285_v26 = vld [vmem:[%s2660_s16 + $0x190] sm:$0xff] }
  0x2a   : > { %1789 = vmatpush1.bf16.msra.mxu0 %v2358_v50  ;;  %1830 = vmatpush1.bf16.msra.mxu1 %v2360_v51  ;;  %v2455_v30 = vcombine.high %v411_v24, %v419_v25  ;;  %v427_v32 = vld [vmem:[%s2660_s16 + $0x600] sm:$0xff]  ;;  %v436_v35 = vld [vmem:[%s2660_s16 + $0x648] sm:$0xff]  ;;  %v2454_v36 = vcombine.low %v411_v24, %v419_v25  ;;  %v293_v27 = vld [vmem:[%s2660_s16 + $0x1d0] sm:$0xff] }
  0x2b   : > { %1790 = vmatprep.subr.bf16.mxu0 %v2375_v52  ;;  %1831 = vmatprep.subr.bf16.mxu1 %v2377_v54  ;;  %v435_v33 = vld [vmem:[%s2660_s16 + $0x640] sm:$0xff]  ;;  %v2473_v39 = vcombine.high %v428_v34, %v436_v35  ;;  %v444_v42 = vld [vmem:[%s2660_s16 + $0x688] sm:$0xff]  ;;  %v2472_v45 = vcombine.low %v428_v34, %v436_v35  ;;  %v301_v34 = vld [vmem:[%s2660_s16 + $0x210] sm:$0xff] }
  0x2c   : > { %v2471_v38 = vcombine.high %v427_v32, %v435_v33  ;;  %v443_v40 = vld [vmem:[%s2660_s16 + $0x680] sm:$0xff]  ;;  %v452_v43 = vld [vmem:[%s2660_s16 + $0x6c8] sm:$0xff]  ;;  %v2470_v44 = vcombine.low %v427_v32, %v435_v33  ;;  %v2331_v32 = vcombine.high %v285_v26, %v293_v27  ;;  %v309_v35 = vld [vmem:[%s2660_s16 + $0x250] sm:$0xff] }
  0x2d   : > { %v451_v41 = vld [vmem:[%s2660_s16 + $0x6c0] sm:$0xff]  ;;  %v2489_v47 = vcombine.high %v444_v42, %v452_v43  ;;  %v460_v50 = vld [vmem:[%s2660_s16 + $0x708] sm:$0xff]  ;;  %v2488_v54 = vcombine.low %v444_v42, %v452_v43  ;;  %v317_v42 = vld [vmem:[%s2660_s16 + $0x290] sm:$0xff] }
  0x2e   : > { %1791 = vmatpush1.bf16.msra.mxu0 %v2374_v60  ;;  %1832 = vmatpush1.bf16.msra.mxu1 %v2376_v61  ;;  %v2487_v46 = vcombine.high %v443_v40, %v451_v41  ;;  %v459_v48 = vld [vmem:[%s2660_s16 + $0x700] sm:$0xff]  ;;  %v468_v51 = vld [vmem:[%s2660_s16 + $0x748] sm:$0xff]  ;;  %v2486_v52 = vcombine.low %v443_v40, %v451_v41  ;;  %v2347_v40 = vcombine.high %v301_v34, %v309_v35  ;;  %v325_v43 = vld [vmem:[%s2660_s16 + $0x2d0] sm:$0xff] }
  0x2f   : > { %1792 = vmatprep.subr.bf16.mxu0 %v2391_v62  ;;  %1833 = vmatprep.subr.bf16.mxu1 %v2393_v63  ;;  %v467_v49 = vld [vmem:[%s2660_s16 + $0x740] sm:$0xff]  ;;  %v2505_v56 = vcombine.high %v460_v50, %v468_v51  ;;  %v476_v60 = vld [vmem:[%s2660_s16 + $0x788] sm:$0xff]  ;;  %v2504_v63 = vcombine.low %v460_v50, %v468_v51  ;;  %v333_v50 = vld [vmem:[%s2660_s16 + $0x310] sm:$0xff] }
  0x30   : > { %v2503_v55 = vcombine.high %v459_v48, %v467_v49  ;;  %v475_v58 = vld [vmem:[%s2660_s16 + $0x780] sm:$0xff]  ;;  %v484_v61 = vld [vmem:[%s2660_s16 + $0x7c8] sm:$0xff]  ;;  %v2502_v62 = vcombine.low %v459_v48, %v467_v49  ;;  %v2363_v48 = vcombine.high %v317_v42, %v325_v43  ;;  %v341_v51 = vld [vmem:[%s2660_s16 + $0x350] sm:$0xff] }
  0x31   : > { %v483_v59 = vld [vmem:[%s2660_s16 + $0x7c0] sm:$0xff]  ;;  %v2521_v1 = vcombine.high %v476_v60, %v484_v61 }
  0x32   : > { %1793 = vmatpush1.bf16.msra.mxu0 %v2390_v4  ;;  %1834 = vmatpush1.bf16.msra.mxu1 %v2392_v5  ;;  %v2519_v0 = vcombine.high %v475_v58, %v483_v59  ;;  %v238_v4 = vld [vmem:[%s2660_s16 + $0x18] sm:$0xff] }
  0x33   : > { %1794 = vmatprep.subr.bf16.mxu0 %v2407_v6  ;;  %1835 = vmatprep.subr.bf16.mxu1 %v2409_v7  ;;  %v246_v5 = vld [vmem:[%s2660_s16 + $0x58] sm:$0xff]  ;;  %v2518_v6 = vcombine.low %v475_v58, %v483_v59  ;;  %v2520_v7 = vcombine.low %v476_v60, %v484_v61  ;;  %v2379_v58 = vcombine.high %v333_v50, %v341_v51  ;;  %v349_v60 = vld [vmem:[%s2660_s16 + $0x390] sm:$0xff] }
  0x34   : > { %v2285_v9 = vcombine.high %v238_v4, %v246_v5  ;;  %v2284_v16 = vcombine.low %v238_v4, %v246_v5  ;;  %v357_v61 = vld [vmem:[%s2660_s16 + $0x3d0] sm:$0xff] }
  0x35   : > { %v365_v4 = vld [vmem:[%s2660_s16 + $0x410] sm:$0xff] }
  0x36   : > { %1795 = vmatpush1.bf16.msra.mxu0 %v2406_v12  ;;  %1836 = vmatpush1.bf16.msra.mxu1 %v2408_v13  ;;  %v2746_v12 = vcombine.low %v2694_v53, %v2694_v53  ;;  %v254_v13 = vld [vmem:[%s2660_s16 + $0x98] sm:$0xff]  ;;  %v373_v5 = vld [vmem:[%s2660_s16 + $0x450] sm:$0xff] }
  0x37   : > { %1796 = vmatprep.subr.bf16.mxu0 %v2423_v14  ;;  %1837 = vmatprep.subr.bf16.mxu1 %v2425_v15  ;;  %v262_v14 = vld [vmem:[%s2660_s16 + $0xd8] sm:$0xff]  ;;  %v2282_v15 = vcombine.low %v237_v2, %v245_v3  ;;  %v2395_v2 = vcombine.high %v349_v60, %v357_v61 }
  0x38   : > { %v2301_v18 = vcombine.high %v254_v13, %v262_v14  ;;  %v270_v53 = vld [vmem:[%s2660_s16 + $0x118] sm:$0xff] }
  0x3a   : > { %1797 = vmatpush1.bf16.msra.mxu0 %v2422_v20  ;;  %1838 = vmatpush1.bf16.msra.mxu1 %v2424_v21  ;;  %v277_v20 = vld [vmem:[%s2660_s16 + $0x150] sm:$0xff]  ;;  %v278_v21 = vld [vmem:[%s2660_s16 + $0x158] sm:$0xff] }
  0x3b   : > { %1798 = vmatprep.subr.bf16.mxu0 %v2439_v22  ;;  %1839 = vmatprep.subr.bf16.mxu1 %v2441_v23  ;;  %v2298_v22 = vcombine.low %v253_v10, %v261_v11  ;;  %v2300_v23 = vcombine.low %v254_v13, %v262_v14  ;;  %v2315_v24 = vcombine.high %v269_v19, %v277_v20  ;;  %v381_v13 = vld [vmem:[%s2660_s16 + $0x490] sm:$0xff] }
  0x3c   : > { %v2317_v25 = vcombine.high %v270_v53, %v278_v21  ;;  %v2411_v10 = vcombine.high %v365_v4, %v373_v5  ;;  %v389_v14 = vld [vmem:[%s2660_s16 + $0x4d0] sm:$0xff] }
  0x3e   : > { %1799 = vmatpush1.bf16.msra.mxu0 %v2438_v28  ;;  %1840 = vmatpush1.bf16.msra.mxu1 %v2440_v29  ;;  %v286_v28 = vld [vmem:[%s2660_s16 + $0x198] sm:$0xff] }
  0x3f   : > { %1800 = vmatprep.subr.bf16.mxu0 %v2455_v30  ;;  %1841 = vmatprep.subr.bf16.mxu1 %v2457_v31  ;;  %v294_v29 = vld [vmem:[%s2660_s16 + $0x1d8] sm:$0xff]  ;;  %v2314_v30 = vcombine.low %v269_v19, %v277_v20  ;;  %v2316_v31 = vcombine.low %v270_v53, %v278_v21  ;;  %v2427_v19 = vcombine.high %v381_v13, %v389_v14  ;;  %v397_v53 = vld [vmem:[%s2660_s16 + $0x510] sm:$0xff] }
  0x40   : > { %v2333_v33 = vcombine.high %v286_v28, %v294_v29  ;;  %v405_v21 = vld [vmem:[%s2660_s16 + $0x550] sm:$0xff] }
  0x42   : > { %1801 = vmatpush1.bf16.msra.mxu0 %v2454_v36  ;;  %1842 = vmatpush1.bf16.msra.mxu1 %v2456_v37  ;;  %v302_v36 = vld [vmem:[%s2660_s16 + $0x218] sm:$0xff] }
  0x43   : > { %1802 = vmatprep.subr.bf16.mxu0 %v2471_v38  ;;  %1843 = vmatprep.subr.bf16.mxu1 %v2473_v39  ;;  %v310_v37 = vld [vmem:[%s2660_s16 + $0x258] sm:$0xff]  ;;  %v2330_v38 = vcombine.low %v285_v26, %v293_v27  ;;  %v2332_v39 = vcombine.low %v286_v28, %v294_v29  ;;  %v2443_v26 = vcombine.high %v397_v53, %v405_v21  ;;  %v413_v28 = vld [vmem:[%s2660_s16 + $0x590] sm:$0xff] }
  0x44   : > { %v2349_v41 = vcombine.high %v302_v36, %v310_v37  ;;  %v421_v29 = vld [vmem:[%s2660_s16 + $0x5d0] sm:$0xff] }
  0x46   : > { %1803 = vmatpush1.bf16.msra.mxu0 %v2470_v44  ;;  %1844 = vmatpush1.bf16.msra.mxu1 %v2472_v45  ;;  %v318_v44 = vld [vmem:[%s2660_s16 + $0x298] sm:$0xff] }
  0x47   : > { %1804 = vmatprep.subr.bf16.mxu0 %v2487_v46  ;;  %1845 = vmatprep.subr.bf16.mxu1 %v2489_v47  ;;  %v326_v45 = vld [vmem:[%s2660_s16 + $0x2d8] sm:$0xff]  ;;  %v2346_v46 = vcombine.low %v301_v34, %v309_v35  ;;  %v2348_v47 = vcombine.low %v302_v36, %v310_v37  ;;  %v2459_v34 = vcombine.high %v413_v28, %v421_v29  ;;  %v429_v36 = vld [vmem:[%s2660_s16 + $0x610] sm:$0xff] }
  0x48   : > { %v2365_v49 = vcombine.high %v318_v44, %v326_v45  ;;  %v437_v37 = vld [vmem:[%s2660_s16 + $0x650] sm:$0xff] }
  0x4a   : > { %1805 = vmatpush1.bf16.msra.mxu0 %v2486_v52  ;;  %1846 = vmatpush1.bf16.msra.mxu1 %v2488_v54  ;;  %v334_v52 = vld [vmem:[%s2660_s16 + $0x318] sm:$0xff] }
  0x4b   : > { %1806 = vmatprep.subr.bf16.mxu0 %v2503_v55  ;;  %1847 = vmatprep.subr.bf16.mxu1 %v2505_v56  ;;  %v342_v54 = vld [vmem:[%s2660_s16 + $0x358] sm:$0xff]  ;;  %v2362_v55 = vcombine.low %v317_v42, %v325_v43  ;;  %v2364_v56 = vcombine.low %v318_v44, %v326_v45  ;;  %v2475_v42 = vcombine.high %v429_v36, %v437_v37  ;;  %v445_v44 = vld [vmem:[%s2660_s16 + $0x690] sm:$0xff] }
  0x4c   : > { %v2381_v59 = vcombine.high %v334_v52, %v342_v54  ;;  %v453_v45 = vld [vmem:[%s2660_s16 + $0x6d0] sm:$0xff] }
  0x4e   : > { %1807 = vmatpush1.bf16.msra.mxu0 %v2502_v62  ;;  %1848 = vmatpush1.bf16.msra.mxu1 %v2504_v63  ;;  %v350_v62 = vld [vmem:[%s2660_s16 + $0x398] sm:$0xff] }
  0x4f   : > { %1808 = vmatprep.subr.bf16.mxu0 %v2519_v0  ;;  %1849 = vmatprep.subr.bf16.mxu1 %v2521_v1  ;;  %v358_v63 = vld [vmem:[%s2660_s16 + $0x3d8] sm:$0xff]  ;;  %v2378_v0 = vcombine.low %v333_v50, %v341_v51  ;;  %v2380_v1 = vcombine.low %v334_v52, %v342_v54  ;;  %v2491_v50 = vcombine.high %v445_v44, %v453_v45  ;;  %v461_v52 = vld [vmem:[%s2660_s16 + $0x710] sm:$0xff] }
  0x50   : > { %v2397_v3 = vcombine.high %v350_v62, %v358_v63  ;;  %v469_v54 = vld [vmem:[%s2660_s16 + $0x750] sm:$0xff] }
  0x52   : > { %1809 = vmatpush1.bf16.msra.mxu0 %v2518_v6  ;;  %1850 = vmatpush1.bf16.msra.mxu1 %v2520_v7  ;;  %v366_v6 = vld [vmem:[%s2660_s16 + $0x418] sm:$0xff] }
  0x53   : > { %1860 = vmatprep.subr.bf16.mxu0 %v2283_v8  ;;  %1901 = vmatprep.subr.bf16.mxu1 %v2285_v9  ;;  %v374_v7 = vld [vmem:[%s2660_s16 + $0x458] sm:$0xff]  ;;  %v2394_v8 = vcombine.low %v349_v60, %v357_v61  ;;  %v2396_v9 = vcombine.low %v350_v62, %v358_v63  ;;  %v2507_v60 = vcombine.high %v461_v52, %v469_v54  ;;  %v477_v62 = vld [vmem:[%s2660_s16 + $0x790] sm:$0xff] }
  0x54   : > { %v2413_v11 = vcombine.high %v366_v6, %v374_v7  ;;  %v485_v63 = vld [vmem:[%s2660_s16 + $0x7d0] sm:$0xff] }
  0x55   : > { %1811 = vmatmul.mubr.bf16.vlgmr.msra.gmra.mrb[0].mxu0 %v2746_v12  ;;  %1852 = vmatmul.mubr.bf16.vlgmr.msra.gmra.mrb[0].mxu1 %v2746_v12 }
  0x56   : > { %1861 = vmatpush1.bf16.msra.mxu0 %v2282_v15  ;;  %1902 = vmatpush1.bf16.msra.mxu1 %v2284_v16  ;;  %v382_v15 = vld [vmem:[%s2660_s16 + $0x498] sm:$0xff] }
  0x57   : > { %1862 = vmatprep.subr.bf16.mxu0 %v2299_v17  ;;  %1903 = vmatprep.subr.bf16.mxu1 %v2301_v18  ;;  %v390_v16 = vld [vmem:[%s2660_s16 + $0x4d8] sm:$0xff]  ;;  %v2410_v17 = vcombine.low %v365_v4, %v373_v5  ;;  %v2412_v18 = vcombine.low %v366_v6, %v374_v7  ;;  %v2523_v4 = vcombine.high %v477_v62, %v485_v63  ;;  %v239_v6 = vld [vmem:[%s2660_s16 + $0x20] sm:$0xff] }
  0x58   : > { %1892 = vmatprep.mubr.bf16.mxu0 %v2700_v57  ;;  %1933 = vmatprep.mubr.bf16.mxu1 %v2700_v57  ;;  %v2429_v20 = vcombine.high %v382_v15, %v390_v16  ;;  %v247_v7 = vld [vmem:[%s2660_s16 + $0x60] sm:$0xff] }
  0x5a   : > { %1863 = vmatpush1.bf16.msra.mxu0 %v2298_v22  ;;  %1904 = vmatpush1.bf16.msra.mxu1 %v2300_v23  ;;  %v398_v22 = vld [vmem:[%s2660_s16 + $0x518] sm:$0xff] }
  0x5b   : > { %1864 = vmatprep.subr.bf16.mxu0 %v2315_v24  ;;  %1905 = vmatprep.subr.bf16.mxu1 %v2317_v25  ;;  %v406_v23 = vld [vmem:[%s2660_s16 + $0x558] sm:$0xff]  ;;  %v2426_v24 = vcombine.low %v381_v13, %v389_v14  ;;  %v2428_v25 = vcombine.low %v382_v15, %v390_v16  ;;  %v2287_v13 = vcombine.high %v239_v6, %v247_v7  ;;  %v255_v15 = vld [vmem:[%s2660_s16 + $0xa0] sm:$0xff] }
  0x5c   : > { %v2445_v27 = vcombine.high %v398_v22, %v406_v23  ;;  %v263_v16 = vld [vmem:[%s2660_s16 + $0xe0] sm:$0xff] }
  0x5e   : > { %1865 = vmatpush1.bf16.msra.mxu0 %v2314_v30  ;;  %1906 = vmatpush1.bf16.msra.mxu1 %v2316_v31  ;;  %v414_v30 = vld [vmem:[%s2660_s16 + $0x598] sm:$0xff] }
  0x5f   : > { %1866 = vmatprep.subr.bf16.mxu0 %v2331_v32  ;;  %1907 = vmatprep.subr.bf16.mxu1 %v2333_v33  ;;  %v422_v31 = vld [vmem:[%s2660_s16 + $0x5d8] sm:$0xff]  ;;  %v2442_v32 = vcombine.low %v397_v53, %v405_v21  ;;  %v2444_v33 = vcombine.low %v398_v22, %v406_v23  ;;  %v2303_v53 = vcombine.high %v255_v15, %v263_v16  ;;  %v271_v22 = vld [vmem:[%s2660_s16 + $0x120] sm:$0xff] }
  0x60   : > { %v2461_v35 = vcombine.high %v414_v30, %v422_v31  ;;  %v279_v23 = vld [vmem:[%s2660_s16 + $0x160] sm:$0xff] }
  0x62   : > { %1867 = vmatpush1.bf16.msra.mxu0 %v2330_v38  ;;  %1908 = vmatpush1.bf16.msra.mxu1 %v2332_v39  ;;  %v430_v38 = vld [vmem:[%s2660_s16 + $0x618] sm:$0xff] }
  0x63   : > { %1868 = vmatprep.subr.bf16.mxu0 %v2347_v40  ;;  %1909 = vmatprep.subr.bf16.mxu1 %v2349_v41  ;;  %v438_v39 = vld [vmem:[%s2660_s16 + $0x658] sm:$0xff]  ;;  %v2458_v40 = vcombine.low %v413_v28, %v421_v29  ;;  %v2460_v41 = vcombine.low %v414_v30, %v422_v31  ;;  %v2319_v28 = vcombine.high %v271_v22, %v279_v23  ;;  %v287_v30 = vld [vmem:[%s2660_s16 + $0x1a0] sm:$0xff] }
  0x64   : > { %v2477_v43 = vcombine.high %v430_v38, %v438_v39  ;;  %v295_v31 = vld [vmem:[%s2660_s16 + $0x1e0] sm:$0xff] }
  0x66   : > { %1869 = vmatpush1.bf16.msra.mxu0 %v2346_v46  ;;  %1910 = vmatpush1.bf16.msra.mxu1 %v2348_v47  ;;  %v446_v46 = vld [vmem:[%s2660_s16 + $0x698] sm:$0xff] }
  0x67   : > { %1870 = vmatprep.subr.bf16.mxu0 %v2363_v48  ;;  %1911 = vmatprep.subr.bf16.mxu1 %v2365_v49  ;;  %v454_v47 = vld [vmem:[%s2660_s16 + $0x6d8] sm:$0xff]  ;;  %v2474_v48 = vcombine.low %v429_v36, %v437_v37  ;;  %v2476_v49 = vcombine.low %v430_v38, %v438_v39  ;;  %v2335_v36 = vcombine.high %v287_v30, %v295_v31  ;;  %v303_v38 = vld [vmem:[%s2660_s16 + $0x220] sm:$0xff] }
  0x68   : > { %v2493_v51 = vcombine.high %v446_v46, %v454_v47  ;;  %v311_v39 = vld [vmem:[%s2660_s16 + $0x260] sm:$0xff] }
  0x6a   : > { %1871 = vmatpush1.bf16.msra.mxu0 %v2362_v55  ;;  %1912 = vmatpush1.bf16.msra.mxu1 %v2364_v56  ;;  %v462_v55 = vld [vmem:[%s2660_s16 + $0x718] sm:$0xff] }
  0x6b   : > { %1872 = vmatprep.subr.bf16.mxu0 %v2379_v58  ;;  %1913 = vmatprep.subr.bf16.mxu1 %v2381_v59  ;;  %v470_v56 = vld [vmem:[%s2660_s16 + $0x758] sm:$0xff]  ;;  %v2490_v58 = vcombine.low %v445_v44, %v453_v45  ;;  %v2492_v59 = vcombine.low %v446_v46, %v454_v47  ;;  %v2351_v44 = vcombine.high %v303_v38, %v311_v39  ;;  %v319_v46 = vld [vmem:[%s2660_s16 + $0x2a0] sm:$0xff] }
  0x6c   : > { %v2509_v61 = vcombine.high %v462_v55, %v470_v56  ;;  %v327_v47 = vld [vmem:[%s2660_s16 + $0x2e0] sm:$0xff] }
  0x6e   : > { %1873 = vmatpush1.bf16.msra.mxu0 %v2378_v0  ;;  %1914 = vmatpush1.bf16.msra.mxu1 %v2380_v1  ;;  %v478_v0 = vld [vmem:[%s2660_s16 + $0x798] sm:$0xff] }
  0x6f   : > { %1874 = vmatprep.subr.bf16.mxu0 %v2395_v2  ;;  %1915 = vmatprep.subr.bf16.mxu1 %v2397_v3  ;;  %v486_v1 = vld [vmem:[%s2660_s16 + $0x7d8] sm:$0xff]  ;;  %v2506_v2 = vcombine.low %v461_v52, %v469_v54  ;;  %v2508_v3 = vcombine.low %v462_v55, %v470_v56  ;;  %v2367_v52 = vcombine.high %v319_v46, %v327_v47  ;;  %v335_v55 = vld [vmem:[%s2660_s16 + $0x320] sm:$0xff] }
  0x70   : > { %v2525_v5 = vcombine.high %v478_v0, %v486_v1  ;;  %v343_v56 = vld [vmem:[%s2660_s16 + $0x360] sm:$0xff] }
  0x72   : > { %1875 = vmatpush1.bf16.msra.mxu0 %v2394_v8  ;;  %1916 = vmatpush1.bf16.msra.mxu1 %v2396_v9  ;;  %v240_v8 = vld [vmem:[%s2660_s16 + $0x28] sm:$0xff] }
  0x73   : > { %1876 = vmatprep.subr.bf16.mxu0 %v2411_v10  ;;  %1917 = vmatprep.subr.bf16.mxu1 %v2413_v11  ;;  %v248_v9 = vld [vmem:[%s2660_s16 + $0x68] sm:$0xff]  ;;  %v2522_v10 = vcombine.low %v477_v62, %v485_v63  ;;  %v2524_v11 = vcombine.low %v478_v0, %v486_v1  ;;  %v2383_v62 = vcombine.high %v335_v55, %v343_v56  ;;  %v351_v0 = vld [vmem:[%s2660_s16 + $0x3a0] sm:$0xff] }
  0x74   : > { %v2289_v14 = vcombine.high %v240_v8, %v248_v9  ;;  %v359_v1 = vld [vmem:[%s2660_s16 + $0x3e0] sm:$0xff] }
  0x76   : > { %1877 = vmatpush1.bf16.msra.mxu0 %v2410_v17  ;;  %1918 = vmatpush1.bf16.msra.mxu1 %v2412_v18  ;;  %v256_v17 = vld [vmem:[%s2660_s16 + $0xa8] sm:$0xff] }
  0x77   : > { %1878 = vmatprep.subr.bf16.mxu0 %v2427_v19  ;;  %1919 = vmatprep.subr.bf16.mxu1 %v2429_v20  ;;  %v264_v18 = vld [vmem:[%s2660_s16 + $0xe8] sm:$0xff]  ;;  %v2286_v19 = vcombine.low %v239_v6, %v247_v7  ;;  %v2288_v20 = vcombine.low %v240_v8, %v248_v9  ;;  %v2399_v6 = vcombine.high %v351_v0, %v359_v1  ;;  %v367_v8 = vld [vmem:[%s2660_s16 + $0x420] sm:$0xff] }
  0x78   : > { %v2305_v21 = vcombine.high %v256_v17, %v264_v18  ;;  %v375_v9 = vld [vmem:[%s2660_s16 + $0x460] sm:$0xff] }
  0x7a   : > { %1879 = vmatpush1.bf16.msra.mxu0 %v2426_v24  ;;  %1920 = vmatpush1.bf16.msra.mxu1 %v2428_v25  ;;  %v272_v24 = vld [vmem:[%s2660_s16 + $0x128] sm:$0xff] }
  0x7b   : > { %1880 = vmatprep.subr.bf16.mxu0 %v2443_v26  ;;  %1921 = vmatprep.subr.bf16.mxu1 %v2445_v27  ;;  %v280_v25 = vld [vmem:[%s2660_s16 + $0x168] sm:$0xff]  ;;  %v2302_v26 = vcombine.low %v255_v15, %v263_v16  ;;  %v2304_v27 = vcombine.low %v256_v17, %v264_v18  ;;  %v2415_v15 = vcombine.high %v367_v8, %v375_v9  ;;  %v383_v17 = vld [vmem:[%s2660_s16 + $0x4a0] sm:$0xff] }
  0x7c   : > { %v2321_v29 = vcombine.high %v272_v24, %v280_v25  ;;  %v391_v18 = vld [vmem:[%s2660_s16 + $0x4e0] sm:$0xff] }
  0x7e   : > { %1881 = vmatpush1.bf16.msra.mxu0 %v2442_v32  ;;  %1922 = vmatpush1.bf16.msra.mxu1 %v2444_v33  ;;  %v288_v32 = vld [vmem:[%s2660_s16 + $0x1a8] sm:$0xff] }
  0x7f   : > { %1882 = vmatprep.subr.bf16.mxu0 %v2459_v34  ;;  %1923 = vmatprep.subr.bf16.mxu1 %v2461_v35  ;;  %v296_v33 = vld [vmem:[%s2660_s16 + $0x1e8] sm:$0xff]  ;;  %v2318_v34 = vcombine.low %v271_v22, %v279_v23  ;;  %v2320_v35 = vcombine.low %v272_v24, %v280_v25  ;;  %v2431_v22 = vcombine.high %v383_v17, %v391_v18  ;;  %v399_v24 = vld [vmem:[%s2660_s16 + $0x520] sm:$0xff] }
  0x80   : > { %v2337_v37 = vcombine.high %v288_v32, %v296_v33  ;;  %v407_v25 = vld [vmem:[%s2660_s16 + $0x560] sm:$0xff] }
  0x82   : > { %1883 = vmatpush1.bf16.msra.mxu0 %v2458_v40  ;;  %1924 = vmatpush1.bf16.msra.mxu1 %v2460_v41  ;;  %v304_v40 = vld [vmem:[%s2660_s16 + $0x228] sm:$0xff] }
  0x83   : > { %1884 = vmatprep.subr.bf16.mxu0 %v2475_v42  ;;  %1925 = vmatprep.subr.bf16.mxu1 %v2477_v43  ;;  %v312_v41 = vld [vmem:[%s2660_s16 + $0x268] sm:$0xff]  ;;  %v2334_v42 = vcombine.low %v287_v30, %v295_v31  ;;  %v2336_v43 = vcombine.low %v288_v32, %v296_v33  ;;  %v2447_v30 = vcombine.high %v399_v24, %v407_v25  ;;  %v415_v32 = vld [vmem:[%s2660_s16 + $0x5a0] sm:$0xff] }
  0x84   : > { %v2353_v45 = vcombine.high %v304_v40, %v312_v41  ;;  %v423_v33 = vld [vmem:[%s2660_s16 + $0x5e0] sm:$0xff] }
  0x86   : > { %1885 = vmatpush1.bf16.msra.mxu0 %v2474_v48  ;;  %1926 = vmatpush1.bf16.msra.mxu1 %v2476_v49  ;;  %v320_v48 = vld [vmem:[%s2660_s16 + $0x2a8] sm:$0xff] }
  0x87   : > { %1886 = vmatprep.subr.bf16.mxu0 %v2491_v50  ;;  %1927 = vmatprep.subr.bf16.mxu1 %v2493_v51  ;;  %v328_v49 = vld [vmem:[%s2660_s16 + $0x2e8] sm:$0xff]  ;;  %v2350_v50 = vcombine.low %v303_v38, %v311_v39  ;;  %v2352_v51 = vcombine.low %v304_v40, %v312_v41  ;;  %v2463_v38 = vcombine.high %v415_v32, %v423_v33  ;;  %v431_v40 = vld [vmem:[%s2660_s16 + $0x620] sm:$0xff] }
  0x88   : > { %v2369_v54 = vcombine.high %v320_v48, %v328_v49  ;;  %v439_v41 = vld [vmem:[%s2660_s16 + $0x660] sm:$0xff] }
  0x8a   : > { %1887 = vmatpush1.bf16.msra.mxu0 %v2490_v58  ;;  %1928 = vmatpush1.bf16.msra.mxu1 %v2492_v59  ;;  %v336_v58 = vld [vmem:[%s2660_s16 + $0x328] sm:$0xff] }
  0x8b   : > { %1888 = vmatprep.subr.bf16.mxu0 %v2507_v60  ;;  %1929 = vmatprep.subr.bf16.mxu1 %v2509_v61  ;;  %v344_v59 = vld [vmem:[%s2660_s16 + $0x368] sm:$0xff]  ;;  %v2366_v60 = vcombine.low %v319_v46, %v327_v47  ;;  %v2368_v61 = vcombine.low %v320_v48, %v328_v49  ;;  %v2479_v46 = vcombine.high %v431_v40, %v439_v41  ;;  %v447_v48 = vld [vmem:[%s2660_s16 + $0x6a0] sm:$0xff] }
  0x8c   : > { %v2385_v63 = vcombine.high %v336_v58, %v344_v59  ;;  %v455_v49 = vld [vmem:[%s2660_s16 + $0x6e0] sm:$0xff] }
  0x8e   : > { %1889 = vmatpush1.bf16.msra.mxu0 %v2506_v2  ;;  %1930 = vmatpush1.bf16.msra.mxu1 %v2508_v3  ;;  %v352_v2 = vld [vmem:[%s2660_s16 + $0x3a8] sm:$0xff] }
  0x8f   : > { %1890 = vmatprep.subr.bf16.mxu0 %v2523_v4  ;;  %1931 = vmatprep.subr.bf16.mxu1 %v2525_v5  ;;  %v360_v3 = vld [vmem:[%s2660_s16 + $0x3e8] sm:$0xff]  ;;  %v2382_v4 = vcombine.low %v335_v55, %v343_v56  ;;  %v2384_v5 = vcombine.low %v336_v58, %v344_v59  ;;  %v2495_v55 = vcombine.high %v447_v48, %v455_v49  ;;  %v463_v58 = vld [vmem:[%s2660_s16 + $0x720] sm:$0xff] }
  0x90   : > { %v2401_v7 = vcombine.high %v352_v2, %v360_v3  ;;  %v471_v59 = vld [vmem:[%s2660_s16 + $0x760] sm:$0xff] }
  0x92   : > { %1891 = vmatpush1.bf16.msra.mxu0 %v2522_v10  ;;  %1932 = vmatpush1.bf16.msra.mxu1 %v2524_v11  ;;  %v368_v10 = vld [vmem:[%s2660_s16 + $0x428] sm:$0xff] }
  0x93   : > { %1942 = vmatprep.subr.bf16.mxu0 %v2287_v13  ;;  %1983 = vmatprep.subr.bf16.mxu1 %v2289_v14  ;;  %v376_v11 = vld [vmem:[%s2660_s16 + $0x468] sm:$0xff]  ;;  %v2398_v13 = vcombine.low %v351_v0, %v359_v1  ;;  %v2400_v14 = vcombine.low %v352_v2, %v360_v3  ;;  %v2511_v0 = vcombine.high %v463_v58, %v471_v59  ;;  %v479_v2 = vld [vmem:[%s2660_s16 + $0x7a0] sm:$0xff] }
  0x94   : > { %v2417_v16 = vcombine.high %v368_v10, %v376_v11  ;;  %v487_v3 = vld [vmem:[%s2660_s16 + $0x7e0] sm:$0xff] }
  0x95   : > { %1893 = vmatmul.mubr.bf16.vlgmr.msra.gmra.mrb[4].mxu0 %v2746_v12  ;;  %1934 = vmatmul.mubr.bf16.vlgmr.msra.gmra.mrb[4].mxu1 %v2746_v12 }
  0x96   : > { %1943 = vmatpush1.bf16.msra.mxu0 %v2286_v19  ;;  %1984 = vmatpush1.bf16.msra.mxu1 %v2288_v20  ;;  %v384_v19 = vld [vmem:[%s2660_s16 + $0x4a8] sm:$0xff] }
  0x97   : > { %1944 = vmatprep.subr.bf16.mxu0 %v2303_v53  ;;  %1985 = vmatprep.subr.bf16.mxu1 %v2305_v21  ;;  %v392_v20 = vld [vmem:[%s2660_s16 + $0x4e8] sm:$0xff]  ;;  %v2414_v53 = vcombine.low %v367_v8, %v375_v9  ;;  %v2416_v21 = vcombine.low %v368_v10, %v376_v11  ;;  %v2527_v8 = vcombine.high %v479_v2, %v487_v3  ;;  %v241_v10 = vld [vmem:[%s2660_s16 + $0x30] sm:$0xff] }
  0x98   : > { %1974 = vmatprep.mubr.bf16.mxu0 %v2700_v57  ;;  %2015 = vmatprep.mubr.bf16.mxu1 %v2700_v57  ;;  %v2433_v23 = vcombine.high %v384_v19, %v392_v20  ;;  %v249_v11 = vld [vmem:[%s2660_s16 + $0x70] sm:$0xff] }
  0x9a   : > { %1945 = vmatpush1.bf16.msra.mxu0 %v2302_v26  ;;  %1986 = vmatpush1.bf16.msra.mxu1 %v2304_v27  ;;  %v400_v26 = vld [vmem:[%s2660_s16 + $0x528] sm:$0xff] }
  0x9b   : > { %1946 = vmatprep.subr.bf16.mxu0 %v2319_v28  ;;  %1987 = vmatprep.subr.bf16.mxu1 %v2321_v29  ;;  %v408_v27 = vld [vmem:[%s2660_s16 + $0x568] sm:$0xff]  ;;  %v2430_v28 = vcombine.low %v383_v17, %v391_v18  ;;  %v2432_v29 = vcombine.low %v384_v19, %v392_v20  ;;  %v2291_v17 = vcombine.high %v241_v10, %v249_v11  ;;  %v257_v19 = vld [vmem:[%s2660_s16 + $0xb0] sm:$0xff] }
  0x9c   : > { %v2449_v31 = vcombine.high %v400_v26, %v408_v27  ;;  %v265_v20 = vld [vmem:[%s2660_s16 + $0xf0] sm:$0xff] }
  0x9e   : > { %1947 = vmatpush1.bf16.msra.mxu0 %v2318_v34  ;;  %1988 = vmatpush1.bf16.msra.mxu1 %v2320_v35  ;;  %v416_v34 = vld [vmem:[%s2660_s16 + $0x5a8] sm:$0xff] }
  0x9f   : > { %1948 = vmatprep.subr.bf16.mxu0 %v2335_v36  ;;  %1989 = vmatprep.subr.bf16.mxu1 %v2337_v37  ;;  %v424_v35 = vld [vmem:[%s2660_s16 + $0x5e8] sm:$0xff]  ;;  %v2446_v36 = vcombine.low %v399_v24, %v407_v25  ;;  %v2448_v37 = vcombine.low %v400_v26, %v408_v27  ;;  %v2307_v24 = vcombine.high %v257_v19, %v265_v20  ;;  %v273_v26 = vld [vmem:[%s2660_s16 + $0x130] sm:$0xff] }
  0xa0   : > { %v2465_v39 = vcombine.high %v416_v34, %v424_v35  ;;  %v281_v27 = vld [vmem:[%s2660_s16 + $0x170] sm:$0xff] }
  0xa2   : > { %1949 = vmatpush1.bf16.msra.mxu0 %v2334_v42  ;;  %1990 = vmatpush1.bf16.msra.mxu1 %v2336_v43  ;;  %v432_v42 = vld [vmem:[%s2660_s16 + $0x628] sm:$0xff] }
  0xa3   : > { %1950 = vmatprep.subr.bf16.mxu0 %v2351_v44  ;;  %1991 = vmatprep.subr.bf16.mxu1 %v2353_v45  ;;  %v440_v43 = vld [vmem:[%s2660_s16 + $0x668] sm:$0xff]  ;;  %v2462_v44 = vcombine.low %v415_v32, %v423_v33  ;;  %v2464_v45 = vcombine.low %v416_v34, %v424_v35  ;;  %v2323_v32 = vcombine.high %v273_v26, %v281_v27  ;;  %v289_v34 = vld [vmem:[%s2660_s16 + $0x1b0] sm:$0xff] }
  0xa4   : > { %v2481_v47 = vcombine.high %v432_v42, %v440_v43  ;;  %v297_v35 = vld [vmem:[%s2660_s16 + $0x1f0] sm:$0xff] }
  0xa6   : > { %1951 = vmatpush1.bf16.msra.mxu0 %v2350_v50  ;;  %1992 = vmatpush1.bf16.msra.mxu1 %v2352_v51  ;;  %v448_v50 = vld [vmem:[%s2660_s16 + $0x6a8] sm:$0xff] }
  0xa7   : > { %1952 = vmatprep.subr.bf16.mxu0 %v2367_v52  ;;  %1993 = vmatprep.subr.bf16.mxu1 %v2369_v54  ;;  %v456_v51 = vld [vmem:[%s2660_s16 + $0x6e8] sm:$0xff]  ;;  %v2478_v52 = vcombine.low %v431_v40, %v439_v41  ;;  %v2480_v54 = vcombine.low %v432_v42, %v440_v43  ;;  %v2339_v40 = vcombine.high %v289_v34, %v297_v35  ;;  %v305_v42 = vld [vmem:[%s2660_s16 + $0x230] sm:$0xff] }
  0xa8   : > { %v2497_v56 = vcombine.high %v448_v50, %v456_v51  ;;  %v313_v43 = vld [vmem:[%s2660_s16 + $0x270] sm:$0xff] }
  0xaa   : > { %1953 = vmatpush1.bf16.msra.mxu0 %v2366_v60  ;;  %1994 = vmatpush1.bf16.msra.mxu1 %v2368_v61  ;;  %v464_v60 = vld [vmem:[%s2660_s16 + $0x728] sm:$0xff] }
  0xab   : > { %1954 = vmatprep.subr.bf16.mxu0 %v2383_v62  ;;  %1995 = vmatprep.subr.bf16.mxu1 %v2385_v63  ;;  %v472_v61 = vld [vmem:[%s2660_s16 + $0x768] sm:$0xff]  ;;  %v2494_v62 = vcombine.low %v447_v48, %v455_v49  ;;  %v2496_v63 = vcombine.low %v448_v50, %v456_v51  ;;  %v321_v49 = vld [vmem:[%s2660_s16 + $0x2b0] sm:$0xff]  ;;  %v322_v51 = vld [vmem:[%s2660_s16 + $0x2b8] sm:$0xff] }
  0xac   : > { %v2513_v1 = vcombine.high %v464_v60, %v472_v61  ;;  %v329_v50 = vld [vmem:[%s2660_s16 + $0x2f0] sm:$0xff] }
  0xae   : > { %1955 = vmatpush1.bf16.msra.mxu0 %v2382_v4  ;;  %1996 = vmatpush1.bf16.msra.mxu1 %v2384_v5  ;;  %v480_v4 = vld [vmem:[%s2660_s16 + $0x7a8] sm:$0xff] }
  0xaf   : > { %1956 = vmatprep.subr.bf16.mxu0 %v2399_v6  ;;  %1997 = vmatprep.subr.bf16.mxu1 %v2401_v7  ;;  %v488_v5 = vld [vmem:[%s2660_s16 + $0x7e8] sm:$0xff]  ;;  %v2510_v6 = vcombine.low %v463_v58, %v471_v59  ;;  %v2512_v7 = vcombine.low %v464_v60, %v472_v61  ;;  %v337_v59 = vld [vmem:[%s2660_s16 + $0x330] sm:$0xff]  ;;  %v338_v61 = vld [vmem:[%s2660_s16 + $0x338] sm:$0xff] }
  0xb0   : > { %v2529_v9 = vcombine.high %v480_v4, %v488_v5  ;;  %v345_v60 = vld [vmem:[%s2660_s16 + $0x370] sm:$0xff] }
  0xb2   : > { %1957 = vmatpush1.bf16.msra.mxu0 %v2398_v13  ;;  %1998 = vmatpush1.bf16.msra.mxu1 %v2400_v14  ;;  %v242_v13 = vld [vmem:[%s2660_s16 + $0x38] sm:$0xff] }
  0xb3   : > { %1958 = vmatprep.subr.bf16.mxu0 %v2415_v15  ;;  %1999 = vmatprep.subr.bf16.mxu1 %v2417_v16  ;;  %v250_v14 = vld [vmem:[%s2660_s16 + $0x78] sm:$0xff]  ;;  %v2526_v15 = vcombine.low %v479_v2, %v487_v3  ;;  %v2528_v16 = vcombine.low %v480_v4, %v488_v5  ;;  %v353_v3 = vld [vmem:[%s2660_s16 + $0x3b0] sm:$0xff] }
  0xb4   : > { %v2293_v18 = vcombine.high %v242_v13, %v250_v14  ;;  %v361_v4 = vld [vmem:[%s2660_s16 + $0x3f0] sm:$0xff]  ;;  %v354_v5 = vld [vmem:[%s2660_s16 + $0x3b8] sm:$0xff] }
  0xb6   : > { %1959 = vmatpush1.bf16.msra.mxu0 %v2414_v53  ;;  %2000 = vmatpush1.bf16.msra.mxu1 %v2416_v21  ;;  %v258_v53 = vld [vmem:[%s2660_s16 + $0xb8] sm:$0xff] }
  0xb7   : > { %1960 = vmatprep.subr.bf16.mxu0 %v2431_v22  ;;  %2001 = vmatprep.subr.bf16.mxu1 %v2433_v23  ;;  %v266_v21 = vld [vmem:[%s2660_s16 + $0xf8] sm:$0xff]  ;;  %v2290_v22 = vcombine.low %v241_v10, %v249_v11  ;;  %v2292_v23 = vcombine.low %v242_v13, %v250_v14  ;;  %v369_v11 = vld [vmem:[%s2660_s16 + $0x430] sm:$0xff] }
  0xb8   : > { %v2309_v25 = vcombine.high %v258_v53, %v266_v21  ;;  %v377_v13 = vld [vmem:[%s2660_s16 + $0x470] sm:$0xff]  ;;  %v370_v14 = vld [vmem:[%s2660_s16 + $0x438] sm:$0xff] }
  0xba   : > { %1961 = vmatpush1.bf16.msra.mxu0 %v2430_v28  ;;  %2002 = vmatpush1.bf16.msra.mxu1 %v2432_v29  ;;  %v274_v28 = vld [vmem:[%s2660_s16 + $0x138] sm:$0xff] }
  0xbb   : > { %1962 = vmatprep.subr.bf16.mxu0 %v2447_v30  ;;  %2003 = vmatprep.subr.bf16.mxu1 %v2449_v31  ;;  %v282_v29 = vld [vmem:[%s2660_s16 + $0x178] sm:$0xff]  ;;  %v2306_v30 = vcombine.low %v257_v19, %v265_v20  ;;  %v2308_v31 = vcombine.low %v258_v53, %v266_v21  ;;  %v385_v20 = vld [vmem:[%s2660_s16 + $0x4b0] sm:$0xff] }
  0xbc   : > { %v2325_v33 = vcombine.high %v274_v28, %v282_v29  ;;  %v393_v53 = vld [vmem:[%s2660_s16 + $0x4f0] sm:$0xff]  ;;  %v386_v21 = vld [vmem:[%s2660_s16 + $0x4b8] sm:$0xff] }
  0xbe   : > { %1963 = vmatpush1.bf16.msra.mxu0 %v2446_v36  ;;  %2004 = vmatpush1.bf16.msra.mxu1 %v2448_v37  ;;  %v290_v36 = vld [vmem:[%s2660_s16 + $0x1b8] sm:$0xff] }
  0xbf   : > { %1964 = vmatprep.subr.bf16.mxu0 %v2463_v38  ;;  %2005 = vmatprep.subr.bf16.mxu1 %v2465_v39  ;;  %v298_v37 = vld [vmem:[%s2660_s16 + $0x1f8] sm:$0xff]  ;;  %v2322_v38 = vcombine.low %v273_v26, %v281_v27  ;;  %v2324_v39 = vcombine.low %v274_v28, %v282_v29  ;;  %v401_v27 = vld [vmem:[%s2660_s16 + $0x530] sm:$0xff] }
  0xc0   : > { %v2341_v41 = vcombine.high %v290_v36, %v298_v37  ;;  %v409_v28 = vld [vmem:[%s2660_s16 + $0x570] sm:$0xff]  ;;  %v402_v29 = vld [vmem:[%s2660_s16 + $0x538] sm:$0xff] }
  0xc2   : > { %1965 = vmatpush1.bf16.msra.mxu0 %v2462_v44  ;;  %2006 = vmatpush1.bf16.msra.mxu1 %v2464_v45  ;;  %v306_v44 = vld [vmem:[%s2660_s16 + $0x238] sm:$0xff] }
  0xc3   : > { %1966 = vmatprep.subr.bf16.mxu0 %v2479_v46  ;;  %2007 = vmatprep.subr.bf16.mxu1 %v2481_v47  ;;  %v314_v45 = vld [vmem:[%s2660_s16 + $0x278] sm:$0xff]  ;;  %v2338_v46 = vcombine.low %v289_v34, %v297_v35  ;;  %v2355_v47 = vcombine.high %v305_v42, %v313_v43  ;;  %v417_v35 = vld [vmem:[%s2660_s16 + $0x5b0] sm:$0xff] }
  0xc4   : > { %v2357_v48 = vcombine.high %v306_v44, %v314_v45 }
  0xc6   : > { %1967 = vmatpush1.bf16.msra.mxu0 %v2478_v52  ;;  %2008 = vmatpush1.bf16.msra.mxu1 %v2480_v54  ;;  %v330_v52 = vld [vmem:[%s2660_s16 + $0x2f8] sm:$0xff]  ;;  %v2354_v54 = vcombine.low %v305_v42, %v313_v43  ;;  %v433_v43 = vld [vmem:[%s2660_s16 + $0x630] sm:$0xff] }
  0xc7   : > { %1968 = vmatprep.subr.bf16.mxu0 %v2495_v55  ;;  %2009 = vmatprep.subr.bf16.mxu1 %v2497_v56  ;;  %v2356_v55 = vcombine.low %v306_v44, %v314_v45  ;;  %v2371_v56 = vcombine.high %v321_v49, %v329_v50  ;;  %v2373_v58 = vcombine.high %v322_v51, %v330_v52  ;;  %v441_v44 = vld [vmem:[%s2660_s16 + $0x670] sm:$0xff]  ;;  %v434_v45 = vld [vmem:[%s2660_s16 + $0x638] sm:$0xff] }
  0xca   : > { %1969 = vmatpush1.bf16.msra.mxu0 %v2494_v62  ;;  %2010 = vmatpush1.bf16.msra.mxu1 %v2496_v63  ;;  %v346_v62 = vld [vmem:[%s2660_s16 + $0x378] sm:$0xff]  ;;  %v2370_v63 = vcombine.low %v321_v49, %v329_v50  ;;  %v449_v50 = vld [vmem:[%s2660_s16 + $0x6b0] sm:$0xff] }
  0xcb   : > { %1970 = vmatprep.subr.bf16.mxu0 %v2511_v0  ;;  %2011 = vmatprep.subr.bf16.mxu1 %v2513_v1  ;;  %v2372_v0 = vcombine.low %v322_v51, %v330_v52  ;;  %v2387_v1 = vcombine.high %v337_v59, %v345_v60  ;;  %v2389_v2 = vcombine.high %v338_v61, %v346_v62  ;;  %v457_v51 = vld [vmem:[%s2660_s16 + $0x6f0] sm:$0xff]  ;;  %v450_v52 = vld [vmem:[%s2660_s16 + $0x6b8] sm:$0xff] }
  0xce   : > { %1971 = vmatpush1.bf16.msra.mxu0 %v2510_v6  ;;  %2012 = vmatpush1.bf16.msra.mxu1 %v2512_v7  ;;  %v362_v6 = vld [vmem:[%s2660_s16 + $0x3f8] sm:$0xff]  ;;  %v2386_v7 = vcombine.low %v337_v59, %v345_v60  ;;  %v465_v60 = vld [vmem:[%s2660_s16 + $0x730] sm:$0xff] }
  0xcf   : > { %1972 = vmatprep.subr.bf16.mxu0 %v2527_v8  ;;  %2013 = vmatprep.subr.bf16.mxu1 %v2529_v9  ;;  %v2388_v8 = vcombine.low %v338_v61, %v346_v62  ;;  %v2403_v9 = vcombine.high %v353_v3, %v361_v4  ;;  %v2405_v10 = vcombine.high %v354_v5, %v362_v6  ;;  %v473_v61 = vld [vmem:[%s2660_s16 + $0x770] sm:$0xff]  ;;  %v466_v62 = vld [vmem:[%s2660_s16 + $0x738] sm:$0xff] }
  0xd2   : > { %1973 = vmatpush1.bf16.msra.mxu0 %v2526_v15  ;;  %2014 = vmatpush1.bf16.msra.mxu1 %v2528_v16  ;;  %v378_v15 = vld [vmem:[%s2660_s16 + $0x478] sm:$0xff]  ;;  %v2402_v16 = vcombine.low %v353_v3, %v361_v4  ;;  %v481_v4 = vld [vmem:[%s2660_s16 + $0x7b0] sm:$0xff] }
  0xd3   : > { %2024 = vmatprep.subr.bf16.mxu0 %v2291_v17  ;;  %2065 = vmatprep.subr.bf16.mxu1 %v2293_v18  ;;  %v2404_v17 = vcombine.low %v354_v5, %v362_v6  ;;  %v2419_v18 = vcombine.high %v369_v11, %v377_v13  ;;  %v2421_v19 = vcombine.high %v370_v14, %v378_v15  ;;  %v489_v5 = vld [vmem:[%s2660_s16 + $0x7f0] sm:$0xff]  ;;  %v482_v6 = vld [vmem:[%s2660_s16 + $0x7b8] sm:$0xff] }
  0xd5   : > { %1975 = vmatmul.mubr.bf16.vlgmr.msra.gmra.mrb[8].mxu0 %v2746_v12  ;;  %2016 = vmatmul.mubr.bf16.vlgmr.msra.gmra.mrb[8].mxu1 %v2746_v12 }
  0xd6   : > { %2025 = vmatpush1.bf16.msra.mxu0 %v2290_v22  ;;  %2066 = vmatpush1.bf16.msra.mxu1 %v2292_v23  ;;  %v394_v22 = vld [vmem:[%s2660_s16 + $0x4f8] sm:$0xff]  ;;  %v2418_v23 = vcombine.low %v369_v11, %v377_v13  ;;  %v2530_v13 = vcombine.low %v481_v4, %v489_v5 }
  0xd7   : > { %2026 = vmatprep.subr.bf16.mxu0 %v2307_v24  ;;  %2067 = vmatprep.subr.bf16.mxu1 %v2309_v25  ;;  %v2420_v24 = vcombine.low %v370_v14, %v378_v15  ;;  %v2435_v25 = vcombine.high %v385_v20, %v393_v53  ;;  %v2437_v26 = vcombine.high %v386_v21, %v394_v22 }
  0xd8   : > { %2056 = vmatprep.mubr.bf16.mxu0 %v2700_v57  ;;  %2097 = vmatprep.mubr.bf16.mxu1 %v2700_v57  ;;  %v2340_v57 = vcombine.low %v290_v36, %v298_v37  ;;  %v425_v36 = vld [vmem:[%s2660_s16 + $0x5f0] sm:$0xff]  ;;  %v418_v37 = vld [vmem:[%s2660_s16 + $0x5b8] sm:$0xff] }
  0xda   : > { %2027 = vmatpush1.bf16.msra.mxu0 %v2306_v30  ;;  %2068 = vmatpush1.bf16.msra.mxu1 %v2308_v31  ;;  %v410_v30 = vld [vmem:[%s2660_s16 + $0x578] sm:$0xff]  ;;  %v2434_v31 = vcombine.low %v385_v20, %v393_v53 }
  0xdb   : > { %2028 = vmatprep.subr.bf16.mxu0 %v2323_v32  ;;  %2069 = vmatprep.subr.bf16.mxu1 %v2325_v33  ;;  %v2436_v32 = vcombine.low %v386_v21, %v394_v22  ;;  %v2451_v33 = vcombine.high %v401_v27, %v409_v28  ;;  %v2453_v34 = vcombine.high %v402_v29, %v410_v30 }
  0xde   : > { %2029 = vmatpush1.bf16.msra.mxu0 %v2322_v38  ;;  %2070 = vmatpush1.bf16.msra.mxu1 %v2324_v39  ;;  %v426_v38 = vld [vmem:[%s2660_s16 + $0x5f8] sm:$0xff]  ;;  %v2450_v39 = vcombine.low %v401_v27, %v409_v28 }
  0xdf   : > { %2030 = vmatprep.subr.bf16.mxu0 %v2339_v40  ;;  %2071 = vmatprep.subr.bf16.mxu1 %v2341_v41  ;;  %v2452_v40 = vcombine.low %v402_v29, %v410_v30  ;;  %v2467_v41 = vcombine.high %v417_v35, %v425_v36  ;;  %v2469_v42 = vcombine.high %v418_v37, %v426_v38 }
  0xe2   : > { %2031 = vmatpush1.bf16.msra.mxu0 %v2338_v46  ;;  %2072 = vmatpush1.bf16.msra.mxu1 %v2340_v57  ;;  %v442_v46 = vld [vmem:[%s2660_s16 + $0x678] sm:$0xff]  ;;  %v2466_v57 = vcombine.low %v417_v35, %v425_v36 }
  0xe3   : > { %2032 = vmatprep.subr.bf16.mxu0 %v2355_v47  ;;  %2073 = vmatprep.subr.bf16.mxu1 %v2357_v48  ;;  %v2468_v47 = vcombine.low %v418_v37, %v426_v38  ;;  %v2483_v48 = vcombine.high %v433_v43, %v441_v44  ;;  %v2485_v49 = vcombine.high %v434_v45, %v442_v46 }
  0xe6   : > { %2033 = vmatpush1.bf16.msra.mxu0 %v2354_v54  ;;  %2074 = vmatpush1.bf16.msra.mxu1 %v2356_v55  ;;  %v458_v54 = vld [vmem:[%s2660_s16 + $0x6f8] sm:$0xff]  ;;  %v2482_v55 = vcombine.low %v433_v43, %v441_v44 }
  0xe7   : > { %2034 = vmatprep.subr.bf16.mxu0 %v2371_v56  ;;  %2075 = vmatprep.subr.bf16.mxu1 %v2373_v58  ;;  %v2484_v56 = vcombine.low %v434_v45, %v442_v46  ;;  %v2499_v58 = vcombine.high %v449_v50, %v457_v51  ;;  %v2501_v59 = vcombine.high %v450_v52, %v458_v54 }
  0xea   : > { %2035 = vmatpush1.bf16.msra.mxu0 %v2370_v63  ;;  %2076 = vmatpush1.bf16.msra.mxu1 %v2372_v0  ;;  %v474_v63 = vld [vmem:[%s2660_s16 + $0x778] sm:$0xff]  ;;  %v2498_v0 = vcombine.low %v449_v50, %v457_v51 }
  0xeb   : > { %2036 = vmatprep.subr.bf16.mxu0 %v2387_v1  ;;  %2077 = vmatprep.subr.bf16.mxu1 %v2389_v2  ;;  %v2500_v1 = vcombine.low %v450_v52, %v458_v54  ;;  %v2515_v2 = vcombine.high %v465_v60, %v473_v61  ;;  %v2517_v3 = vcombine.high %v466_v62, %v474_v63 }
  0xee   : > { %2037 = vmatpush1.bf16.msra.mxu0 %v2386_v7  ;;  %2078 = vmatpush1.bf16.msra.mxu1 %v2388_v8  ;;  %v490_v7 = vld [vmem:[%s2660_s16 + $0x7f8] sm:$0xff]  ;;  %v2514_v8 = vcombine.low %v465_v60, %v473_v61 }
  0xef   : > { %2038 = vmatprep.subr.bf16.mxu0 %v2403_v9  ;;  %2079 = vmatprep.subr.bf16.mxu1 %v2405_v10  ;;  %v2516_v9 = vcombine.low %v466_v62, %v474_v63  ;;  %v2531_v10 = vcombine.high %v481_v4, %v489_v5  ;;  %v2533_v11 = vcombine.high %v482_v6, %v490_v7 }
  0xf0   : > { %v2532_v14 = vcombine.low %v482_v6, %v490_v7 }
  0xf2   : > { %2039 = vmatpush1.bf16.msra.mxu0 %v2402_v16  ;;  %2080 = vmatpush1.bf16.msra.mxu1 %v2404_v17 }
  0xf3   : > { %2040 = vmatprep.subr.bf16.mxu0 %v2419_v18  ;;  %2081 = vmatprep.subr.bf16.mxu1 %v2421_v19 }
  0xf6   : > { %2041 = vmatpush1.bf16.msra.mxu0 %v2418_v23  ;;  %2082 = vmatpush1.bf16.msra.mxu1 %v2420_v24 }
  0xf7   : > { %2042 = vmatprep.subr.bf16.mxu0 %v2435_v25  ;;  %2083 = vmatprep.subr.bf16.mxu1 %v2437_v26 }
  0xfa   : > { %2043 = vmatpush1.bf16.msra.mxu0 %v2434_v31  ;;  %2084 = vmatpush1.bf16.msra.mxu1 %v2436_v32 }
  0xfb   : > { %2044 = vmatprep.subr.bf16.mxu0 %v2451_v33  ;;  %2085 = vmatprep.subr.bf16.mxu1 %v2453_v34 }
  0xfe   : > { %2045 = vmatpush1.bf16.msra.mxu0 %v2450_v39  ;;  %2086 = vmatpush1.bf16.msra.mxu1 %v2452_v40 }
  0xff   : > { %2046 = vmatprep.subr.bf16.mxu0 %v2467_v41  ;;  %2087 = vmatprep.subr.bf16.mxu1 %v2469_v42 }
 0x102   : > { %2047 = vmatpush1.bf16.msra.mxu0 %v2466_v57  ;;  %2088 = vmatpush1.bf16.msra.mxu1 %v2468_v47 }
 0x103   : > { %2048 = vmatprep.subr.bf16.mxu0 %v2483_v48  ;;  %2089 = vmatprep.subr.bf16.mxu1 %v2485_v49 }
 0x106   : > { %2049 = vmatpush1.bf16.msra.mxu0 %v2482_v55  ;;  %2090 = vmatpush1.bf16.msra.mxu1 %v2484_v56 }
 0x107   : > { %2050 = vmatprep.subr.bf16.mxu0 %v2499_v58  ;;  %2091 = vmatprep.subr.bf16.mxu1 %v2501_v59 }
 0x10a   : > { %2051 = vmatpush1.bf16.msra.mxu0 %v2498_v0  ;;  %2092 = vmatpush1.bf16.msra.mxu1 %v2500_v1 }
 0x10b   : > { %2052 = vmatprep.subr.bf16.mxu0 %v2515_v2  ;;  %2093 = vmatprep.subr.bf16.mxu1 %v2517_v3 }
 0x10e   : > { %2053 = vmatpush1.bf16.msra.mxu0 %v2514_v8  ;;  %2094 = vmatpush1.bf16.msra.mxu1 %v2516_v9 }
 0x10f   : > { %2054 = vmatprep.subr.bf16.mxu0 %v2531_v10  ;;  %2095 = vmatprep.subr.bf16.mxu1 %v2533_v11 }
 0x112   : > { %2055 = vmatpush1.bf16.msra.mxu0 %v2530_v13  ;;  %2096 = vmatpush1.bf16.msra.mxu1 %v2532_v14 }
 0x115   : > { %2057 = vmatmul.mubr.bf16.vlgmr.msra.gmra.mrb[12].mxu0 %v2746_v12  ;;  %2098 = vmatmul.mubr.bf16.vlgmr.msra.gmra.mrb[12].mxu1 %v2746_v12 }
 0x128   : > { %v1812_v15 = vpop.f32.mrb[0].mxu0  ;;  %v1853_v16 = vpop.f32.mrb[0].mxu1 }
 0x129   : > { %2565 = vtanh.f32 %v1812_v15  ;;  %v1814_v17 = vpop.f32.mrb[1].mxu0  ;;  %v1855_v18 = vpop.f32.mrb[1].mxu1 }
 0x12a   : > { %2567 = vtanh.f32 %v1853_v16  ;;  %v1816_v19 = vpop.f32.mrb[2].mxu0  ;;  %v1857_v20 = vpop.f32.mrb[2].mxu1 }
 0x12b   : > { %2569 = vtanh.f32 %v1814_v17  ;;  %v1817_v53 = vpop.f32.mrb[3].mxu0  ;;  %v1858_v21 = vpop.f32.mrb[3].mxu1 }
 0x12c   : > { %2571 = vtanh.f32 %v1855_v18 }
 0x133   : > { %v2566_v12 = vpop.eup %2565 }
 0x134   : > { %v2568_v22 = vpop.eup %2567  ;;  %2122 = vst [vmem:[%s2952_s24] sm:$0xff] %v2566_v12 }
 0x135   : > { %v2570_v23 = vpop.eup %2569  ;;  %2124 = vst [vmem:[%s2952_s24 + $0x10] sm:$0xff] %v2568_v22 }
 0x136   : > { %v2572_v24 = vpop.eup %2571  ;;  %2123 = vst [vmem:[%s2952_s24 + $0x8] sm:$0xff] %v2570_v23 }
 0x137   : > { %2125 = vst [vmem:[%s2952_s24 + $0x18] sm:$0xff] %v2572_v24 }
 0x168   : > { %v1894_v25 = vpop.f32.mrb[4].mxu0  ;;  %v1935_v26 = vpop.f32.mrb[4].mxu1 }
 0x169   : > { %2573 = vtanh.f32 %v1894_v25  ;;  %v1896_v27 = vpop.f32.mrb[5].mxu0  ;;  %v1937_v28 = vpop.f32.mrb[5].mxu1 }
 0x16a   : > { %2575 = vtanh.f32 %v1935_v26  ;;  %v1898_v29 = vpop.f32.mrb[6].mxu0  ;;  %v1939_v30 = vpop.f32.mrb[6].mxu1 }
 0x16b   : > { %2577 = vtanh.f32 %v1896_v27  ;;  %v1899_v31 = vpop.f32.mrb[7].mxu0  ;;  %v1940_v32 = vpop.f32.mrb[7].mxu1 }
 0x16c   : > { %2579 = vtanh.f32 %v1937_v28 }
 0x173   : > { %v2574_v33 = vpop.eup %2573 }
 0x174   : > { %v2576_v34 = vpop.eup %2575  ;;  %2126 = vst [vmem:[%s2952_s24 + $0x20] sm:$0xff] %v2574_v33 }
 0x175   : > { %v2578_v35 = vpop.eup %2577  ;;  %2128 = vst [vmem:[%s2952_s24 + $0x30] sm:$0xff] %v2576_v34 }
 0x176   : > { %v2580_v36 = vpop.eup %2579  ;;  %2127 = vst [vmem:[%s2952_s24 + $0x28] sm:$0xff] %v2578_v35 }
 0x177   : > { %2129 = vst [vmem:[%s2952_s24 + $0x38] sm:$0xff] %v2580_v36 }
 0x1a8   : > { %v1976_v37 = vpop.f32.mrb[8].mxu0  ;;  %v2017_v38 = vpop.f32.mrb[8].mxu1 }
 0x1a9   : > { %2581 = vtanh.f32 %v1976_v37  ;;  %v1978_v39 = vpop.f32.mrb[9].mxu0  ;;  %v2019_v40 = vpop.f32.mrb[9].mxu1 }
 0x1aa   : > { %2583 = vtanh.f32 %v2017_v38  ;;  %v1980_v41 = vpop.f32.mrb[10].mxu0  ;;  %v2021_v42 = vpop.f32.mrb[10].mxu1 }
 0x1ab   : > { %2585 = vtanh.f32 %v1978_v39  ;;  %v1981_v43 = vpop.f32.mrb[11].mxu0  ;;  %v2022_v44 = vpop.f32.mrb[11].mxu1 }
 0x1ac   : > { %2587 = vtanh.f32 %v2019_v40 }
 0x1b3   : > { %v2582_v45 = vpop.eup %2581 }
 0x1b4   : > { %v2584_v46 = vpop.eup %2583  ;;  %2130 = vst [vmem:[%s2952_s24 + $0x40] sm:$0xff] %v2582_v45 }
 0x1b5   : > { %v2586_v57 = vpop.eup %2585  ;;  %2132 = vst [vmem:[%s2952_s24 + $0x50] sm:$0xff] %v2584_v46 }
 0x1b6   : > { %v2588_v47 = vpop.eup %2587  ;;  %2131 = vst [vmem:[%s2952_s24 + $0x48] sm:$0xff] %v2586_v57 }
 0x1b7   : > { %2133 = vst [vmem:[%s2952_s24 + $0x58] sm:$0xff] %v2588_v47 }
 0x1e8   : > { %v2058_v48 = vpop.f32.mrb[12].mxu0  ;;  %v2099_v49 = vpop.f32.mrb[12].mxu1 }
 0x1e9   : > { %2589 = vtanh.f32 %v2058_v48  ;;  %v2060_v50 = vpop.f32.mrb[13].mxu0  ;;  %v2101_v51 = vpop.f32.mrb[13].mxu1 }
 0x1ea   : > { %2591 = vtanh.f32 %v2099_v49  ;;  %v2062_v52 = vpop.f32.mrb[14].mxu0  ;;  %v2103_v54 = vpop.f32.mrb[14].mxu1 }
 0x1eb   : > { %2593 = vtanh.f32 %v2060_v50  ;;  %v2063_v55 = vpop.f32.mrb[15].mxu0  ;;  %v2104_v56 = vpop.f32.mrb[15].mxu1 }
 0x1ec   : > { %2595 = vtanh.f32 %v2101_v51 }
 0x1f3   : > { %v2590_v58 = vpop.eup %2589 }
 0x1f4   : > { %v2592_v59 = vpop.eup %2591  ;;  %2134 = vst [vmem:[%s2952_s24 + $0x60] sm:$0xff] %v2590_v58 }
 0x1f5   : > { %v2594_v60 = vpop.eup %2593  ;;  %2136 = vst [vmem:[%s2952_s24 + $0x70] sm:$0xff] %v2592_v59 }
 0x1f6   : > { %v2596_v61 = vpop.eup %2595  ;;  %2135 = vst [vmem:[%s2952_s24 + $0x68] sm:$0xff] %v2594_v60 }
 0x1f7   : > { %2137 = vst [vmem:[%s2952_s24 + $0x78] sm:$0xff] %v2596_v61 }
 0x1f8 PF: > { %s12_s11 = sadd.s32 1, %s2619_s11   ;;  %s2982_s9 = smov %s2615_s10 }
 0x1f9   : > { %p9_p5 = scmp.ge.s32.totalorder %s12_s11, 6   ;;  %s2983_s10 = smov %s2985_s12 }
 0x1fb   :  { %11 = sbr.rel (!%p9_p5) target bundleno = 2 (0x2), region = 61 }

</bundles_post_ra>
